<compile_context>
chip_gen: v6e
topology: v6e:2x2x1
jax: 0.10.0
libtpu: 0.0.40
codegen_flags: <defaults>
</compile_context>

<pallas_src>
import jax
import jax.numpy as jnp
from jax import lax
from jax.experimental import pallas as pl
from jax.experimental.pallas import tpu as pltpu

_NEG_BIG = -1e30  # pad-lane logit bias: exp() underflows to 0, finite so 0*x stays 0


def seq2seq_kernel(xproj_ref, din0_ref, wcat_ref, b_ref, wp_ref, bp_ref,
                   emb_ref, dec_ref):
    """Encoder LSTM recurrence + autoregressive decoder rollout.

    xproj_ref : (S, B, 4H)   precomputed x_t @ W_ih^T + b_ih + b_hh (time-major)
    din0_ref  : (B, FP)      X[:, 0, :] zero-padded to FP lanes (decoder seed)
    wcat_ref  : (FP+H, 4H)   fused recurrent weight: rows [0:F) = W_ih^T
                             (zero-padded to FP rows), rows [FP:FP+H) = W_hh^T
    b_ref     : (1, 4H)      b_ih + b_hh (decoder per-step bias)
    wp_ref    : (H, FP)      projection weight^T, zero columns on padded lanes
    bp_ref    : (1, FP)      projection bias, -1e30 on padded lanes
    emb_ref   : (B, H)       out: final encoder hidden state (embeddings)
    dec_ref   : (S, B, FP)   out: decoder log-softmax outputs (padded lanes junk)
    """
    S, B, G4 = xproj_ref.shape
    H = emb_ref.shape[1]
    FP = dec_ref.shape[2]

    # ---- hoist loop-invariant loads / broadcasts off the serial loops ----
    wcat = wcat_ref[...]                         # (FP+H, 4H)
    whh = wcat[FP:FP + H, :]                     # (H, 4H), sublane-aligned slice
    wp = wp_ref[...]                             # (H, FP)
    b_bc = jnp.broadcast_to(b_ref[...], (B, G4))
    bp_bc = jnp.broadcast_to(bp_ref[...], (B, FP))

    def sig(x):
        # sigmoid via tanh: work goes to the EUP, no f32 divide on the chain
        return 0.5 * (jnp.tanh(0.5 * x) + 1.0)

    def gates_to_state(gates, c):
        i = sig(gates[:, 0:H])
        f = sig(gates[:, H:2 * H])
        g = jnp.tanh(gates[:, 2 * H:3 * H])
        o = sig(gates[:, 3 * H:4 * H])
        c_new = f * c + i * g
        h_new = o * jnp.tanh(c_new)
        return h_new, c_new

    # ---- encoder: only h @ W_hh^T is on the serial chain ----
    def enc_body(t, carry):
        h, c = carry
        gates = xproj_ref[t] + jnp.dot(h, whh, preferred_element_type=jnp.float32)
        return gates_to_state(gates, c)

    h0 = jnp.zeros((B, H), jnp.float32)
    c0 = jnp.zeros((B, H), jnp.float32)
    h, c = lax.fori_loop(0, S, enc_body, (h0, c0), unroll=True)

    emb_ref[...] = h

    # ---- decoder: one fused K = FP+H matmul per step, state in registers ----
    def dec_body(t, carry):
        h, c, din = carry
        lhs = jnp.concatenate([din, h], axis=-1)                    # (B, FP+H)
        gates = jnp.dot(lhs, wcat, preferred_element_type=jnp.float32) + b_bc
        h_new, c_new = gates_to_state(gates, c)
        logits = jnp.dot(h_new, wp, preferred_element_type=jnp.float32) + bp_bc
        m = jnp.max(logits, axis=-1, keepdims=True)
        lse = jnp.log(jnp.sum(jnp.exp(logits - m), axis=-1, keepdims=True)) + m
        logsm = logits - lse                                        # pad lanes ~ -1e30
        dec_ref[t] = logsm                                          # lane-dense store
        return h_new, c_new, logsm

    lax.fori_loop(0, S, dec_body, (h, c, din0_ref[...]), unroll=True)


@jax.jit
def model_forward(X, w_ih, w_hh, b_ih, b_hh, w_p, b_p):
    """Equivalent of Model.forward in training mode (share_weights=True)."""
    B, S, F = X.shape
    H = w_hh.shape[1]
    FP = ((F + 127) // 128) * 128            # pad feature lanes to 128 multiple

    Xf = X.astype(jnp.float32)
    wih = w_ih.astype(jnp.float32)           # (4H, F)
    whh = w_hh.astype(jnp.float32)           # (4H, H)
    bias = (b_ih + b_hh).astype(jnp.float32)  # (4H,)

    # Encoder input projection hoisted off the serial chain (one good-shaped
    # XLA matmul), bias folded in.  Time-major (S, B, 4H).
    xproj = jnp.einsum('bsf,gf->sbg', Xf, wih) + bias

    # Decoder seed: X[:, 0, :] padded to FP lanes.
    din0 = jnp.zeros((B, FP), jnp.float32).at[:, :F].set(Xf[:, 0, :])

    # Fused recurrent weight for the decoder: gates = [din_pad | h] @ wcat + b.
    wcat = jnp.zeros((FP + H, 4 * H), jnp.float32)
    wcat = wcat.at[:F, :].set(wih.T)
    wcat = wcat.at[FP:FP + H, :].set(whh.T)

    b2 = bias.reshape(1, 4 * H)

    # Projection padded to FP output lanes; -1e30 bias on pad lanes makes the
    # 128-lane log-softmax equal the F-lane one on real lanes, and the zero
    # wcat rows make the huge pad values inert on the next decoder step.
    wp_pad = jnp.zeros((H, FP), jnp.float32).at[:, :F].set(w_p.astype(jnp.float32).T)
    bp_pad = jnp.full((1, FP), _NEG_BIG, jnp.float32).at[0, :F].set(b_p.astype(jnp.float32))

    vspec = pl.BlockSpec(memory_space=pltpu.MemorySpace.VMEM)

    emb, dec = pl.pallas_call(
        seq2seq_kernel,
        out_shape=(jax.ShapeDtypeStruct((B, H), jnp.float32),
                   jax.ShapeDtypeStruct((S, B, FP), jnp.float32)),
        in_specs=[vspec] * 6,
        out_specs=(vspec, vspec),
    )(xproj, din0, wcat, b2, wp_pad, bp_pad)

    decoder_outputs = jnp.transpose(dec, (1, 0, 2))[:, :, :F]       # (B, S, F)
    return emb, decoder_outputs


def reference_forward(X, w_ih, w_hh, b_ih, b_hh, w_p, b_p):
    """Pure-JAX reference mirroring torch.nn.LSTM + Linear + LogSoftmax."""
    B, S, F = X.shape
    H = w_hh.shape[1]
    h = jnp.zeros((B, H), jnp.float32)
    c = jnp.zeros((B, H), jnp.float32)

    def step(x_t, h, c):
        g = x_t @ w_ih.T + h @ w_hh.T + b_ih + b_hh
        i = jax.nn.sigmoid(g[:, :H])
        f = jax.nn.sigmoid(g[:, H:2 * H])
        gg = jnp.tanh(g[:, 2 * H:3 * H])
        o = jax.nn.sigmoid(g[:, 3 * H:])
        c = f * c + i * gg
        h = o * jnp.tanh(c)
        return h, c

    for t in range(S):
        h, c = step(X[:, t], h, c)
    emb = h

    din = X[:, 0]
    outs = []
    for _ in range(S):
        h, c = step(din, h, c)
        logits = h @ w_p.T + b_p
        logsm = logits - jax.scipy.special.logsumexp(logits, axis=1, keepdims=True)
        outs.append(logsm)
        din = logsm
    return emb, jnp.stack(outs, axis=1)


if __name__ == "__main__":
    # Model defaults: input_size=13, embedding_size=128, 1 layer, shared weights.
    B, S, F, H = 2, 8, 13, 128

    key = jax.random.PRNGKey(0)
    k = 1.0 / jnp.sqrt(jnp.float32(H))
    keys = jax.random.split(key, 8)

    # LSTM parameters (gate order i, f, g, o — like torch.nn.LSTM)
    w_ih = jax.random.uniform(keys[0], (4 * H, F), jnp.float32, -k, k)
    w_hh = jax.random.uniform(keys[1], (4 * H, H), jnp.float32, -k, k)
    b_ih = jax.random.uniform(keys[2], (4 * H,), jnp.float32, -k, k)
    b_hh = jax.random.uniform(keys[3], (4 * H,), jnp.float32, -k, k)
    # Projection Linear(embedding_size -> input_size)
    w_p = jax.random.uniform(keys[4], (F, H), jnp.float32, -k, k)
    b_p = jax.random.uniform(keys[5], (F,), jnp.float32, -k, k)

    X = jax.random.normal(keys[6], (B, S, F), jnp.float32)

    emb, dec_out = model_forward(X, w_ih, w_hh, b_ih, b_hh, w_p, b_p)
    emb = jax.block_until_ready(emb)
    dec_out = jax.block_until_ready(dec_out)

    emb_ref, dec_ref = reference_forward(X, w_ih, w_hh, b_ih, b_hh, w_p, b_p)

    assert emb.shape == (B, H) and dec_out.shape == (B, S, F)
    assert jnp.allclose(emb, emb_ref, atol=1e-4, rtol=1e-4)
    assert jnp.allclose(dec_out, dec_ref, atol=1e-4, rtol=1e-4)

    print("KERNEL_OK")
</pallas_src>

<mosaic_0001>
module attributes {stable_mosaic.version = 11 : i64} {
  func.func @seq2seq_kernel(%arg0: memref<8x2x512xf32, #tpu.memory_space<vmem>>, %arg1: memref<2x128xf32, #tpu.memory_space<vmem>>, %arg2: memref<256x512xf32, #tpu.memory_space<vmem>>, %arg3: memref<1x512xf32, #tpu.memory_space<vmem>>, %arg4: memref<128x128xf32, #tpu.memory_space<vmem>>, %arg5: memref<1x128xf32, #tpu.memory_space<vmem>>, %arg6: memref<2x128xf32, #tpu.memory_space<vmem>>, %arg7: memref<8x2x128xf32, #tpu.memory_space<vmem>>) attributes {dimension_semantics = [], scalar_prefetch = 0 : i64, scratch_operands = 0 : i64, tpu.core_type = #tpu.core_type<tc>} {
    %c0 = arith.constant 0 : index
    %c0_0 = arith.constant 0 : index
    %0 = vector.load %arg2[%c0, %c0_0] : memref<256x512xf32, #tpu.memory_space<vmem>>, vector<256x512xf32>
    %1 = vector.extract_strided_slice %0 {offsets = [128, 0], sizes = [128, 512], strides = [1, 1]} : vector<256x512xf32> to vector<128x512xf32>
    %c0_1 = arith.constant 0 : index
    %c0_2 = arith.constant 0 : index
    %2 = vector.load %arg4[%c0_1, %c0_2] : memref<128x128xf32, #tpu.memory_space<vmem>>, vector<128x128xf32>
    %c0_3 = arith.constant 0 : index
    %c0_4 = arith.constant 0 : index
    %3 = vector.load %arg3[%c0_3, %c0_4] : memref<1x512xf32, #tpu.memory_space<vmem>>, vector<1x512xf32>
    %4 = vector.shape_cast %3 : vector<1x512xf32> to vector<1x512xf32>
    %5 = vector.broadcast %4 : vector<1x512xf32> to vector<2x512xf32>
    %c0_5 = arith.constant 0 : index
    %c0_6 = arith.constant 0 : index
    %6 = vector.load %arg5[%c0_5, %c0_6] : memref<1x128xf32, #tpu.memory_space<vmem>>, vector<1x128xf32>
    %7 = vector.shape_cast %6 : vector<1x128xf32> to vector<1x128xf32>
    %8 = vector.broadcast %7 : vector<1x128xf32> to vector<2x128xf32>
    %cst = arith.constant 0.000000e+00 : f32
    %9 = vector.broadcast %cst : f32 to vector<2x128xf32>
    %cst_7 = arith.constant 0.000000e+00 : f32
    %10 = vector.broadcast %cst_7 : f32 to vector<2x128xf32>
    %c0_i32 = arith.constant 0 : i32
    %11 = arith.index_cast %c0_i32 : i32 to index
    %c0_8 = arith.constant 0 : index
    %c0_9 = arith.constant 0 : index
    %12 = vector.load %arg0[%11, %c0_8, %c0_9] : memref<8x2x512xf32, #tpu.memory_space<vmem>>, vector<1x2x512xf32>
    %13 = vector.shape_cast %12 : vector<1x2x512xf32> to vector<2x512xf32>
    %cst_10 = arith.constant dense<0.000000e+00> : vector<2x512xf32>
    %14 = tpu.matmul %9, %1, %cst_10 {dimension_numbers = #tpu.dot_dimension_numbers<[1], [0], [0], [1], [0, 0, 1, 1], [], []>} : vector<2x128xf32>, vector<128x512xf32>, vector<2x512xf32> -> vector<2x512xf32>
    %15 = arith.addf %13, %14 : vector<2x512xf32>
    %16 = vector.extract_strided_slice %15 {offsets = [0, 0], sizes = [2, 128], strides = [1, 1]} : vector<2x512xf32> to vector<2x128xf32>
    %cst_11 = arith.constant 5.000000e-01 : f32
    %17 = vector.broadcast %cst_11 : f32 to vector<2x128xf32>
    %18 = arith.mulf %17, %16 : vector<2x128xf32>
    %19 = math.tanh %18 : vector<2x128xf32>
    %cst_12 = arith.constant 1.000000e+00 : f32
    %20 = vector.broadcast %cst_12 : f32 to vector<2x128xf32>
    %21 = arith.addf %19, %20 : vector<2x128xf32>
    %cst_13 = arith.constant 5.000000e-01 : f32
    %22 = vector.broadcast %cst_13 : f32 to vector<2x128xf32>
    %23 = arith.mulf %22, %21 : vector<2x128xf32>
    %24 = vector.extract_strided_slice %15 {offsets = [0, 128], sizes = [2, 128], strides = [1, 1]} : vector<2x512xf32> to vector<2x128xf32>
    %cst_14 = arith.constant 5.000000e-01 : f32
    %25 = vector.broadcast %cst_14 : f32 to vector<2x128xf32>
    %26 = arith.mulf %25, %24 : vector<2x128xf32>
    %27 = math.tanh %26 : vector<2x128xf32>
    %cst_15 = arith.constant 1.000000e+00 : f32
    %28 = vector.broadcast %cst_15 : f32 to vector<2x128xf32>
    %29 = arith.addf %27, %28 : vector<2x128xf32>
    %cst_16 = arith.constant 5.000000e-01 : f32
    %30 = vector.broadcast %cst_16 : f32 to vector<2x128xf32>
    %31 = arith.mulf %30, %29 : vector<2x128xf32>
    %32 = vector.extract_strided_slice %15 {offsets = [0, 256], sizes = [2, 128], strides = [1, 1]} : vector<2x512xf32> to vector<2x128xf32>
    %33 = math.tanh %32 : vector<2x128xf32>
    %34 = vector.extract_strided_slice %15 {offsets = [0, 384], sizes = [2, 128], strides = [1, 1]} : vector<2x512xf32> to vector<2x128xf32>
    %cst_17 = arith.constant 5.000000e-01 : f32
    %35 = vector.broadcast %cst_17 : f32 to vector<2x128xf32>
    %36 = arith.mulf %35, %34 : vector<2x128xf32>
    %37 = math.tanh %36 : vector<2x128xf32>
    %cst_18 = arith.constant 1.000000e+00 : f32
    %38 = vector.broadcast %cst_18 : f32 to vector<2x128xf32>
    %39 = arith.addf %37, %38 : vector<2x128xf32>
    %cst_19 = arith.constant 5.000000e-01 : f32
    %40 = vector.broadcast %cst_19 : f32 to vector<2x128xf32>
    %41 = arith.mulf %40, %39 : vector<2x128xf32>
    %42 = arith.mulf %31, %10 : vector<2x128xf32>
    %43 = arith.mulf %23, %33 : vector<2x128xf32>
    %44 = arith.addf %42, %43 : vector<2x128xf32>
    %45 = math.tanh %44 : vector<2x128xf32>
    %46 = arith.mulf %41, %45 : vector<2x128xf32>
    %c1_i32 = arith.constant 1 : i32
    %47 = arith.index_cast %c1_i32 : i32 to index
    %c0_20 = arith.constant 0 : index
    %c0_21 = arith.constant 0 : index
    %48 = vector.load %arg0[%47, %c0_20, %c0_21] : memref<8x2x512xf32, #tpu.memory_space<vmem>>, vector<1x2x512xf32>
    %49 = vector.shape_cast %48 : vector<1x2x512xf32> to vector<2x512xf32>
    %cst_22 = arith.constant dense<0.000000e+00> : vector<2x512xf32>
    %50 = tpu.matmul %46, %1, %cst_22 {dimension_numbers = #tpu.dot_dimension_numbers<[1], [0], [0], [1], [0, 0, 1, 1], [], []>} : vector<2x128xf32>, vector<128x512xf32>, vector<2x512xf32> -> vector<2x512xf32>
    %51 = arith.addf %49, %50 : vector<2x512xf32>
    %52 = vector.extract_strided_slice %51 {offsets = [0, 0], sizes = [2, 128], strides = [1, 1]} : vector<2x512xf32> to vector<2x128xf32>
    %cst_23 = arith.constant 5.000000e-01 : f32
    %53 = vector.broadcast %cst_23 : f32 to vector<2x128xf32>
    %54 = arith.mulf %53, %52 : vector<2x128xf32>
    %55 = math.tanh %54 : vector<2x128xf32>
    %cst_24 = arith.constant 1.000000e+00 : f32
    %56 = vector.broadcast %cst_24 : f32 to vector<2x128xf32>
    %57 = arith.addf %55, %56 : vector<2x128xf32>
    %cst_25 = arith.constant 5.000000e-01 : f32
    %58 = vector.broadcast %cst_25 : f32 to vector<2x128xf32>
    %59 = arith.mulf %58, %57 : vector<2x128xf32>
    %60 = vector.extract_strided_slice %51 {offsets = [0, 128], sizes = [2, 128], strides = [1, 1]} : vector<2x512xf32> to vector<2x128xf32>
    %cst_26 = arith.constant 5.000000e-01 : f32
    %61 = vector.broadcast %cst_26 : f32 to vector<2x128xf32>
    %62 = arith.mulf %61, %60 : vector<2x128xf32>
    %63 = math.tanh %62 : vector<2x128xf32>
    %cst_27 = arith.constant 1.000000e+00 : f32
    %64 = vector.broadcast %cst_27 : f32 to vector<2x128xf32>
    %65 = arith.addf %63, %64 : vector<2x128xf32>
    %cst_28 = arith.constant 5.000000e-01 : f32
    %66 = vector.broadcast %cst_28 : f32 to vector<2x128xf32>
    %67 = arith.mulf %66, %65 : vector<2x128xf32>
    %68 = vector.extract_strided_slice %51 {offsets = [0, 256], sizes = [2, 128], strides = [1, 1]} : vector<2x512xf32> to vector<2x128xf32>
    %69 = math.tanh %68 : vector<2x128xf32>
    %70 = vector.extract_strided_slice %51 {offsets = [0, 384], sizes = [2, 128], strides = [1, 1]} : vector<2x512xf32> to vector<2x128xf32>
    %cst_29 = arith.constant 5.000000e-01 : f32
    %71 = vector.broadcast %cst_29 : f32 to vector<2x128xf32>
    %72 = arith.mulf %71, %70 : vector<2x128xf32>
    %73 = math.tanh %72 : vector<2x128xf32>
    %cst_30 = arith.constant 1.000000e+00 : f32
    %74 = vector.broadcast %cst_30 : f32 to vector<2x128xf32>
    %75 = arith.addf %73, %74 : vector<2x128xf32>
    %cst_31 = arith.constant 5.000000e-01 : f32
    %76 = vector.broadcast %cst_31 : f32 to vector<2x128xf32>
    %77 = arith.mulf %76, %75 : vector<2x128xf32>
    %78 = arith.mulf %67, %44 : vector<2x128xf32>
    %79 = arith.mulf %59, %69 : vector<2x128xf32>
    %80 = arith.addf %78, %79 : vector<2x128xf32>
    %81 = math.tanh %80 : vector<2x128xf32>
    %82 = arith.mulf %77, %81 : vector<2x128xf32>
    %c2_i32 = arith.constant 2 : i32
    %83 = arith.index_cast %c2_i32 : i32 to index
    %c0_32 = arith.constant 0 : index
    %c0_33 = arith.constant 0 : index
    %84 = vector.load %arg0[%83, %c0_32, %c0_33] : memref<8x2x512xf32, #tpu.memory_space<vmem>>, vector<1x2x512xf32>
    %85 = vector.shape_cast %84 : vector<1x2x512xf32> to vector<2x512xf32>
    %cst_34 = arith.constant dense<0.000000e+00> : vector<2x512xf32>
    %86 = tpu.matmul %82, %1, %cst_34 {dimension_numbers = #tpu.dot_dimension_numbers<[1], [0], [0], [1], [0, 0, 1, 1], [], []>} : vector<2x128xf32>, vector<128x512xf32>, vector<2x512xf32> -> vector<2x512xf32>
    %87 = arith.addf %85, %86 : vector<2x512xf32>
    %88 = vector.extract_strided_slice %87 {offsets = [0, 0], sizes = [2, 128], strides = [1, 1]} : vector<2x512xf32> to vector<2x128xf32>
    %cst_35 = arith.constant 5.000000e-01 : f32
    %89 = vector.broadcast %cst_35 : f32 to vector<2x128xf32>
    %90 = arith.mulf %89, %88 : vector<2x128xf32>
    %91 = math.tanh %90 : vector<2x128xf32>
    %cst_36 = arith.constant 1.000000e+00 : f32
    %92 = vector.broadcast %cst_36 : f32 to vector<2x128xf32>
    %93 = arith.addf %91, %92 : vector<2x128xf32>
    %cst_37 = arith.constant 5.000000e-01 : f32
    %94 = vector.broadcast %cst_37 : f32 to vector<2x128xf32>
    %95 = arith.mulf %94, %93 : vector<2x128xf32>
    %96 = vector.extract_strided_slice %87 {offsets = [0, 128], sizes = [2, 128], strides = [1, 1]} : vector<2x512xf32> to vector<2x128xf32>
    %cst_38 = arith.constant 5.000000e-01 : f32
    %97 = vector.broadcast %cst_38 : f32 to vector<2x128xf32>
    %98 = arith.mulf %97, %96 : vector<2x128xf32>
    %99 = math.tanh %98 : vector<2x128xf32>
    %cst_39 = arith.constant 1.000000e+00 : f32
    %100 = vector.broadcast %cst_39 : f32 to vector<2x128xf32>
    %101 = arith.addf %99, %100 : vector<2x128xf32>
    %cst_40 = arith.constant 5.000000e-01 : f32
    %102 = vector.broadcast %cst_40 : f32 to vector<2x128xf32>
    %103 = arith.mulf %102, %101 : vector<2x128xf32>
    %104 = vector.extract_strided_slice %87 {offsets = [0, 256], sizes = [2, 128], strides = [1, 1]} : vector<2x512xf32> to vector<2x128xf32>
    %105 = math.tanh %104 : vector<2x128xf32>
    %106 = vector.extract_strided_slice %87 {offsets = [0, 384], sizes = [2, 128], strides = [1, 1]} : vector<2x512xf32> to vector<2x128xf32>
    %cst_41 = arith.constant 5.000000e-01 : f32
    %107 = vector.broadcast %cst_41 : f32 to vector<2x128xf32>
    %108 = arith.mulf %107, %106 : vector<2x128xf32>
    %109 = math.tanh %108 : vector<2x128xf32>
    %cst_42 = arith.constant 1.000000e+00 : f32
    %110 = vector.broadcast %cst_42 : f32 to vector<2x128xf32>
    %111 = arith.addf %109, %110 : vector<2x128xf32>
    %cst_43 = arith.constant 5.000000e-01 : f32
    %112 = vector.broadcast %cst_43 : f32 to vector<2x128xf32>
    %113 = arith.mulf %112, %111 : vector<2x128xf32>
    %114 = arith.mulf %103, %80 : vector<2x128xf32>
    %115 = arith.mulf %95, %105 : vector<2x128xf32>
    %116 = arith.addf %114, %115 : vector<2x128xf32>
    %117 = math.tanh %116 : vector<2x128xf32>
    %118 = arith.mulf %113, %117 : vector<2x128xf32>
    %c3_i32 = arith.constant 3 : i32
    %119 = arith.index_cast %c3_i32 : i32 to index
    %c0_44 = arith.constant 0 : index
    %c0_45 = arith.constant 0 : index
    %120 = vector.load %arg0[%119, %c0_44, %c0_45] : memref<8x2x512xf32, #tpu.memory_space<vmem>>, vector<1x2x512xf32>
    %121 = vector.shape_cast %120 : vector<1x2x512xf32> to vector<2x512xf32>
    %cst_46 = arith.constant dense<0.000000e+00> : vector<2x512xf32>
    %122 = tpu.matmul %118, %1, %cst_46 {dimension_numbers = #tpu.dot_dimension_numbers<[1], [0], [0], [1], [0, 0, 1, 1], [], []>} : vector<2x128xf32>, vector<128x512xf32>, vector<2x512xf32> -> vector<2x512xf32>
    %123 = arith.addf %121, %122 : vector<2x512xf32>
    %124 = vector.extract_strided_slice %123 {offsets = [0, 0], sizes = [2, 128], strides = [1, 1]} : vector<2x512xf32> to vector<2x128xf32>
    %cst_47 = arith.constant 5.000000e-01 : f32
    %125 = vector.broadcast %cst_47 : f32 to vector<2x128xf32>
    %126 = arith.mulf %125, %124 : vector<2x128xf32>
    %127 = math.tanh %126 : vector<2x128xf32>
    %cst_48 = arith.constant 1.000000e+00 : f32
    %128 = vector.broadcast %cst_48 : f32 to vector<2x128xf32>
    %129 = arith.addf %127, %128 : vector<2x128xf32>
    %cst_49 = arith.constant 5.000000e-01 : f32
    %130 = vector.broadcast %cst_49 : f32 to vector<2x128xf32>
    %131 = arith.mulf %130, %129 : vector<2x128xf32>
    %132 = vector.extract_strided_slice %123 {offsets = [0, 128], sizes = [2, 128], strides = [1, 1]} : vector<2x512xf32> to vector<2x128xf32>
    %cst_50 = arith.constant 5.000000e-01 : f32
    %133 = vector.broadcast %cst_50 : f32 to vector<2x128xf32>
    %134 = arith.mulf %133, %132 : vector<2x128xf32>
    %135 = math.tanh %134 : vector<2x128xf32>
    %cst_51 = arith.constant 1.000000e+00 : f32
    %136 = vector.broadcast %cst_51 : f32 to vector<2x128xf32>
    %137 = arith.addf %135, %136 : vector<2x128xf32>
    %cst_52 = arith.constant 5.000000e-01 : f32
    %138 = vector.broadcast %cst_52 : f32 to vector<2x128xf32>
    %139 = arith.mulf %138, %137 : vector<2x128xf32>
    %140 = vector.extract_strided_slice %123 {offsets = [0, 256], sizes = [2, 128], strides = [1, 1]} : vector<2x512xf32> to vector<2x128xf32>
    %141 = math.tanh %140 : vector<2x128xf32>
    %142 = vector.extract_strided_slice %123 {offsets = [0, 384], sizes = [2, 128], strides = [1, 1]} : vector<2x512xf32> to vector<2x128xf32>
    %cst_53 = arith.constant 5.000000e-01 : f32
    %143 = vector.broadcast %cst_53 : f32 to vector<2x128xf32>
    %144 = arith.mulf %143, %142 : vector<2x128xf32>
    %145 = math.tanh %144 : vector<2x128xf32>
    %cst_54 = arith.constant 1.000000e+00 : f32
    %146 = vector.broadcast %cst_54 : f32 to vector<2x128xf32>
    %147 = arith.addf %145, %146 : vector<2x128xf32>
    %cst_55 = arith.constant 5.000000e-01 : f32
    %148 = vector.broadcast %cst_55 : f32 to vector<2x128xf32>
    %149 = arith.mulf %148, %147 : vector<2x128xf32>
    %150 = arith.mulf %139, %116 : vector<2x128xf32>
    %151 = arith.mulf %131, %141 : vector<2x128xf32>
    %152 = arith.addf %150, %151 : vector<2x128xf32>
    %153 = math.tanh %152 : vector<2x128xf32>
    %154 = arith.mulf %149, %153 : vector<2x128xf32>
    %c4_i32 = arith.constant 4 : i32
    %155 = arith.index_cast %c4_i32 : i32 to index
    %c0_56 = arith.constant 0 : index
    %c0_57 = arith.constant 0 : index
    %156 = vector.load %arg0[%155, %c0_56, %c0_57] : memref<8x2x512xf32, #tpu.memory_space<vmem>>, vector<1x2x512xf32>
    %157 = vector.shape_cast %156 : vector<1x2x512xf32> to vector<2x512xf32>
    %cst_58 = arith.constant dense<0.000000e+00> : vector<2x512xf32>
    %158 = tpu.matmul %154, %1, %cst_58 {dimension_numbers = #tpu.dot_dimension_numbers<[1], [0], [0], [1], [0, 0, 1, 1], [], []>} : vector<2x128xf32>, vector<128x512xf32>, vector<2x512xf32> -> vector<2x512xf32>
    %159 = arith.addf %157, %158 : vector<2x512xf32>
    %160 = vector.extract_strided_slice %159 {offsets = [0, 0], sizes = [2, 128], strides = [1, 1]} : vector<2x512xf32> to vector<2x128xf32>
    %cst_59 = arith.constant 5.000000e-01 : f32
    %161 = vector.broadcast %cst_59 : f32 to vector<2x128xf32>
    %162 = arith.mulf %161, %160 : vector<2x128xf32>
    %163 = math.tanh %162 : vector<2x128xf32>
    %cst_60 = arith.constant 1.000000e+00 : f32
    %164 = vector.broadcast %cst_60 : f32 to vector<2x128xf32>
    %165 = arith.addf %163, %164 : vector<2x128xf32>
    %cst_61 = arith.constant 5.000000e-01 : f32
    %166 = vector.broadcast %cst_61 : f32 to vector<2x128xf32>
    %167 = arith.mulf %166, %165 : vector<2x128xf32>
    %168 = vector.extract_strided_slice %159 {offsets = [0, 128], sizes = [2, 128], strides = [1, 1]} : vector<2x512xf32> to vector<2x128xf32>
    %cst_62 = arith.constant 5.000000e-01 : f32
    %169 = vector.broadcast %cst_62 : f32 to vector<2x128xf32>
    %170 = arith.mulf %169, %168 : vector<2x128xf32>
    %171 = math.tanh %170 : vector<2x128xf32>
    %cst_63 = arith.constant 1.000000e+00 : f32
    %172 = vector.broadcast %cst_63 : f32 to vector<2x128xf32>
    %173 = arith.addf %171, %172 : vector<2x128xf32>
    %cst_64 = arith.constant 5.000000e-01 : f32
    %174 = vector.broadcast %cst_64 : f32 to vector<2x128xf32>
    %175 = arith.mulf %174, %173 : vector<2x128xf32>
    %176 = vector.extract_strided_slice %159 {offsets = [0, 256], sizes = [2, 128], strides = [1, 1]} : vector<2x512xf32> to vector<2x128xf32>
    %177 = math.tanh %176 : vector<2x128xf32>
    %178 = vector.extract_strided_slice %159 {offsets = [0, 384], sizes = [2, 128], strides = [1, 1]} : vector<2x512xf32> to vector<2x128xf32>
    %cst_65 = arith.constant 5.000000e-01 : f32
    %179 = vector.broadcast %cst_65 : f32 to vector<2x128xf32>
    %180 = arith.mulf %179, %178 : vector<2x128xf32>
    %181 = math.tanh %180 : vector<2x128xf32>
    %cst_66 = arith.constant 1.000000e+00 : f32
    %182 = vector.broadcast %cst_66 : f32 to vector<2x128xf32>
    %183 = arith.addf %181, %182 : vector<2x128xf32>
    %cst_67 = arith.constant 5.000000e-01 : f32
    %184 = vector.broadcast %cst_67 : f32 to vector<2x128xf32>
    %185 = arith.mulf %184, %183 : vector<2x128xf32>
    %186 = arith.mulf %175, %152 : vector<2x128xf32>
    %187 = arith.mulf %167, %177 : vector<2x128xf32>
    %188 = arith.addf %186, %187 : vector<2x128xf32>
    %189 = math.tanh %188 : vector<2x128xf32>
    %190 = arith.mulf %185, %189 : vector<2x128xf32>
    %c5_i32 = arith.constant 5 : i32
    %191 = arith.index_cast %c5_i32 : i32 to index
    %c0_68 = arith.constant 0 : index
    %c0_69 = arith.constant 0 : index
    %192 = vector.load %arg0[%191, %c0_68, %c0_69] : memref<8x2x512xf32, #tpu.memory_space<vmem>>, vector<1x2x512xf32>
    %193 = vector.shape_cast %192 : vector<1x2x512xf32> to vector<2x512xf32>
    %cst_70 = arith.constant dense<0.000000e+00> : vector<2x512xf32>
    %194 = tpu.matmul %190, %1, %cst_70 {dimension_numbers = #tpu.dot_dimension_numbers<[1], [0], [0], [1], [0, 0, 1, 1], [], []>} : vector<2x128xf32>, vector<128x512xf32>, vector<2x512xf32> -> vector<2x512xf32>
    %195 = arith.addf %193, %194 : vector<2x512xf32>
    %196 = vector.extract_strided_slice %195 {offsets = [0, 0], sizes = [2, 128], strides = [1, 1]} : vector<2x512xf32> to vector<2x128xf32>
    %cst_71 = arith.constant 5.000000e-01 : f32
    %197 = vector.broadcast %cst_71 : f32 to vector<2x128xf32>
    %198 = arith.mulf %197, %196 : vector<2x128xf32>
    %199 = math.tanh %198 : vector<2x128xf32>
    %cst_72 = arith.constant 1.000000e+00 : f32
    %200 = vector.broadcast %cst_72 : f32 to vector<2x128xf32>
    %201 = arith.addf %199, %200 : vector<2x128xf32>
    %cst_73 = arith.constant 5.000000e-01 : f32
    %202 = vector.broadcast %cst_73 : f32 to vector<2x128xf32>
    %203 = arith.mulf %202, %201 : vector<2x128xf32>
    %204 = vector.extract_strided_slice %195 {offsets = [0, 128], sizes = [2, 128], strides = [1, 1]} : vector<2x512xf32> to vector<2x128xf32>
    %cst_74 = arith.constant 5.000000e-01 : f32
    %205 = vector.broadcast %cst_74 : f32 to vector<2x128xf32>
    %206 = arith.mulf %205, %204 : vector<2x128xf32>
    %207 = math.tanh %206 : vector<2x128xf32>
    %cst_75 = arith.constant 1.000000e+00 : f32
    %208 = vector.broadcast %cst_75 : f32 to vector<2x128xf32>
    %209 = arith.addf %207, %208 : vector<2x128xf32>
    %cst_76 = arith.constant 5.000000e-01 : f32
    %210 = vector.broadcast %cst_76 : f32 to vector<2x128xf32>
    %211 = arith.mulf %210, %209 : vector<2x128xf32>
    %212 = vector.extract_strided_slice %195 {offsets = [0, 256], sizes = [2, 128], strides = [1, 1]} : vector<2x512xf32> to vector<2x128xf32>
    %213 = math.tanh %212 : vector<2x128xf32>
    %214 = vector.extract_strided_slice %195 {offsets = [0, 384], sizes = [2, 128], strides = [1, 1]} : vector<2x512xf32> to vector<2x128xf32>
    %cst_77 = arith.constant 5.000000e-01 : f32
    %215 = vector.broadcast %cst_77 : f32 to vector<2x128xf32>
    %216 = arith.mulf %215, %214 : vector<2x128xf32>
    %217 = math.tanh %216 : vector<2x128xf32>
    %cst_78 = arith.constant 1.000000e+00 : f32
    %218 = vector.broadcast %cst_78 : f32 to vector<2x128xf32>
    %219 = arith.addf %217, %218 : vector<2x128xf32>
    %cst_79 = arith.constant 5.000000e-01 : f32
    %220 = vector.broadcast %cst_79 : f32 to vector<2x128xf32>
    %221 = arith.mulf %220, %219 : vector<2x128xf32>
    %222 = arith.mulf %211, %188 : vector<2x128xf32>
    %223 = arith.mulf %203, %213 : vector<2x128xf32>
    %224 = arith.addf %222, %223 : vector<2x128xf32>
    %225 = math.tanh %224 : vector<2x128xf32>
    %226 = arith.mulf %221, %225 : vector<2x128xf32>
    %c6_i32 = arith.constant 6 : i32
    %227 = arith.index_cast %c6_i32 : i32 to index
    %c0_80 = arith.constant 0 : index
    %c0_81 = arith.constant 0 : index
    %228 = vector.load %arg0[%227, %c0_80, %c0_81] : memref<8x2x512xf32, #tpu.memory_space<vmem>>, vector<1x2x512xf32>
    %229 = vector.shape_cast %228 : vector<1x2x512xf32> to vector<2x512xf32>
    %cst_82 = arith.constant dense<0.000000e+00> : vector<2x512xf32>
    %230 = tpu.matmul %226, %1, %cst_82 {dimension_numbers = #tpu.dot_dimension_numbers<[1], [0], [0], [1], [0, 0, 1, 1], [], []>} : vector<2x128xf32>, vector<128x512xf32>, vector<2x512xf32> -> vector<2x512xf32>
    %231 = arith.addf %229, %230 : vector<2x512xf32>
    %232 = vector.extract_strided_slice %231 {offsets = [0, 0], sizes = [2, 128], strides = [1, 1]} : vector<2x512xf32> to vector<2x128xf32>
    %cst_83 = arith.constant 5.000000e-01 : f32
    %233 = vector.broadcast %cst_83 : f32 to vector<2x128xf32>
    %234 = arith.mulf %233, %232 : vector<2x128xf32>
    %235 = math.tanh %234 : vector<2x128xf32>
    %cst_84 = arith.constant 1.000000e+00 : f32
    %236 = vector.broadcast %cst_84 : f32 to vector<2x128xf32>
    %237 = arith.addf %235, %236 : vector<2x128xf32>
    %cst_85 = arith.constant 5.000000e-01 : f32
    %238 = vector.broadcast %cst_85 : f32 to vector<2x128xf32>
    %239 = arith.mulf %238, %237 : vector<2x128xf32>
    %240 = vector.extract_strided_slice %231 {offsets = [0, 128], sizes = [2, 128], strides = [1, 1]} : vector<2x512xf32> to vector<2x128xf32>
    %cst_86 = arith.constant 5.000000e-01 : f32
    %241 = vector.broadcast %cst_86 : f32 to vector<2x128xf32>
    %242 = arith.mulf %241, %240 : vector<2x128xf32>
    %243 = math.tanh %242 : vector<2x128xf32>
    %cst_87 = arith.constant 1.000000e+00 : f32
    %244 = vector.broadcast %cst_87 : f32 to vector<2x128xf32>
    %245 = arith.addf %243, %244 : vector<2x128xf32>
    %cst_88 = arith.constant 5.000000e-01 : f32
    %246 = vector.broadcast %cst_88 : f32 to vector<2x128xf32>
    %247 = arith.mulf %246, %245 : vector<2x128xf32>
    %248 = vector.extract_strided_slice %231 {offsets = [0, 256], sizes = [2, 128], strides = [1, 1]} : vector<2x512xf32> to vector<2x128xf32>
    %249 = math.tanh %248 : vector<2x128xf32>
    %250 = vector.extract_strided_slice %231 {offsets = [0, 384], sizes = [2, 128], strides = [1, 1]} : vector<2x512xf32> to vector<2x128xf32>
    %cst_89 = arith.constant 5.000000e-01 : f32
    %251 = vector.broadcast %cst_89 : f32 to vector<2x128xf32>
    %252 = arith.mulf %251, %250 : vector<2x128xf32>
    %253 = math.tanh %252 : vector<2x128xf32>
    %cst_90 = arith.constant 1.000000e+00 : f32
    %254 = vector.broadcast %cst_90 : f32 to vector<2x128xf32>
    %255 = arith.addf %253, %254 : vector<2x128xf32>
    %cst_91 = arith.constant 5.000000e-01 : f32
    %256 = vector.broadcast %cst_91 : f32 to vector<2x128xf32>
    %257 = arith.mulf %256, %255 : vector<2x128xf32>
    %258 = arith.mulf %247, %224 : vector<2x128xf32>
    %259 = arith.mulf %239, %249 : vector<2x128xf32>
    %260 = arith.addf %258, %259 : vector<2x128xf32>
    %261 = math.tanh %260 : vector<2x128xf32>
    %262 = arith.mulf %257, %261 : vector<2x128xf32>
    %c7_i32 = arith.constant 7 : i32
    %263 = arith.index_cast %c7_i32 : i32 to index
    %c0_92 = arith.constant 0 : index
    %c0_93 = arith.constant 0 : index
    %264 = vector.load %arg0[%263, %c0_92, %c0_93] : memref<8x2x512xf32, #tpu.memory_space<vmem>>, vector<1x2x512xf32>
    %265 = vector.shape_cast %264 : vector<1x2x512xf32> to vector<2x512xf32>
    %cst_94 = arith.constant dense<0.000000e+00> : vector<2x512xf32>
    %266 = tpu.matmul %262, %1, %cst_94 {dimension_numbers = #tpu.dot_dimension_numbers<[1], [0], [0], [1], [0, 0, 1, 1], [], []>} : vector<2x128xf32>, vector<128x512xf32>, vector<2x512xf32> -> vector<2x512xf32>
    %267 = arith.addf %265, %266 : vector<2x512xf32>
    %268 = vector.extract_strided_slice %267 {offsets = [0, 0], sizes = [2, 128], strides = [1, 1]} : vector<2x512xf32> to vector<2x128xf32>
    %cst_95 = arith.constant 5.000000e-01 : f32
    %269 = vector.broadcast %cst_95 : f32 to vector<2x128xf32>
    %270 = arith.mulf %269, %268 : vector<2x128xf32>
    %271 = math.tanh %270 : vector<2x128xf32>
    %cst_96 = arith.constant 1.000000e+00 : f32
    %272 = vector.broadcast %cst_96 : f32 to vector<2x128xf32>
    %273 = arith.addf %271, %272 : vector<2x128xf32>
    %cst_97 = arith.constant 5.000000e-01 : f32
    %274 = vector.broadcast %cst_97 : f32 to vector<2x128xf32>
    %275 = arith.mulf %274, %273 : vector<2x128xf32>
    %276 = vector.extract_strided_slice %267 {offsets = [0, 128], sizes = [2, 128], strides = [1, 1]} : vector<2x512xf32> to vector<2x128xf32>
    %cst_98 = arith.constant 5.000000e-01 : f32
    %277 = vector.broadcast %cst_98 : f32 to vector<2x128xf32>
    %278 = arith.mulf %277, %276 : vector<2x128xf32>
    %279 = math.tanh %278 : vector<2x128xf32>
    %cst_99 = arith.constant 1.000000e+00 : f32
    %280 = vector.broadcast %cst_99 : f32 to vector<2x128xf32>
    %281 = arith.addf %279, %280 : vector<2x128xf32>
    %cst_100 = arith.constant 5.000000e-01 : f32
    %282 = vector.broadcast %cst_100 : f32 to vector<2x128xf32>
    %283 = arith.mulf %282, %281 : vector<2x128xf32>
    %284 = vector.extract_strided_slice %267 {offsets = [0, 256], sizes = [2, 128], strides = [1, 1]} : vector<2x512xf32> to vector<2x128xf32>
    %285 = math.tanh %284 : vector<2x128xf32>
    %286 = vector.extract_strided_slice %267 {offsets = [0, 384], sizes = [2, 128], strides = [1, 1]} : vector<2x512xf32> to vector<2x128xf32>
    %cst_101 = arith.constant 5.000000e-01 : f32
    %287 = vector.broadcast %cst_101 : f32 to vector<2x128xf32>
    %288 = arith.mulf %287, %286 : vector<2x128xf32>
    %289 = math.tanh %288 : vector<2x128xf32>
    %cst_102 = arith.constant 1.000000e+00 : f32
    %290 = vector.broadcast %cst_102 : f32 to vector<2x128xf32>
    %291 = arith.addf %289, %290 : vector<2x128xf32>
    %cst_103 = arith.constant 5.000000e-01 : f32
    %292 = vector.broadcast %cst_103 : f32 to vector<2x128xf32>
    %293 = arith.mulf %292, %291 : vector<2x128xf32>
    %294 = arith.mulf %283, %260 : vector<2x128xf32>
    %295 = arith.mulf %275, %285 : vector<2x128xf32>
    %296 = arith.addf %294, %295 : vector<2x128xf32>
    %297 = math.tanh %296 : vector<2x128xf32>
    %298 = arith.mulf %293, %297 : vector<2x128xf32>
    %c8_i32 = arith.constant 8 : i32
    %c0_104 = arith.constant 0 : index
    %c0_105 = arith.constant 0 : index
    %299 = vector.load %arg6[%c0_104, %c0_105] : memref<2x128xf32, #tpu.memory_space<vmem>>, vector<2x128xf32>
    tpu.vector_store %arg6[%c0_104, %c0_105], %298 {strides = array<i32>} : memref<2x128xf32, #tpu.memory_space<vmem>>, vector<2x128xf32>,
    %c0_106 = arith.constant 0 : index
    %c0_107 = arith.constant 0 : index
    %300 = vector.load %arg1[%c0_106, %c0_107] : memref<2x128xf32, #tpu.memory_space<vmem>>, vector<2x128xf32>
    %c0_i32_108 = arith.constant 0 : i32
    %301 = tpu.concatenate %300, %298 in 1 : vector<2x128xf32>, vector<2x128xf32> -> vector<2x256xf32>
    %cst_109 = arith.constant dense<0.000000e+00> : vector<2x512xf32>
    %302 = tpu.matmul %301, %0, %cst_109 {dimension_numbers = #tpu.dot_dimension_numbers<[1], [0], [0], [1], [0, 0, 1, 1], [], []>} : vector<2x256xf32>, vector<256x512xf32>, vector<2x512xf32> -> vector<2x512xf32>
    %303 = arith.addf %302, %5 : vector<2x512xf32>
    %304 = vector.extract_strided_slice %303 {offsets = [0, 0], sizes = [2, 128], strides = [1, 1]} : vector<2x512xf32> to vector<2x128xf32>
    %cst_110 = arith.constant 5.000000e-01 : f32
    %305 = vector.broadcast %cst_110 : f32 to vector<2x128xf32>
    %306 = arith.mulf %305, %304 : vector<2x128xf32>
    %307 = math.tanh %306 : vector<2x128xf32>
    %cst_111 = arith.constant 1.000000e+00 : f32
    %308 = vector.broadcast %cst_111 : f32 to vector<2x128xf32>
    %309 = arith.addf %307, %308 : vector<2x128xf32>
    %cst_112 = arith.constant 5.000000e-01 : f32
    %310 = vector.broadcast %cst_112 : f32 to vector<2x128xf32>
    %311 = arith.mulf %310, %309 : vector<2x128xf32>
    %312 = vector.extract_strided_slice %303 {offsets = [0, 128], sizes = [2, 128], strides = [1, 1]} : vector<2x512xf32> to vector<2x128xf32>
    %cst_113 = arith.constant 5.000000e-01 : f32
    %313 = vector.broadcast %cst_113 : f32 to vector<2x128xf32>
    %314 = arith.mulf %313, %312 : vector<2x128xf32>
    %315 = math.tanh %314 : vector<2x128xf32>
    %cst_114 = arith.constant 1.000000e+00 : f32
    %316 = vector.broadcast %cst_114 : f32 to vector<2x128xf32>
    %317 = arith.addf %315, %316 : vector<2x128xf32>
    %cst_115 = arith.constant 5.000000e-01 : f32
    %318 = vector.broadcast %cst_115 : f32 to vector<2x128xf32>
    %319 = arith.mulf %318, %317 : vector<2x128xf32>
    %320 = vector.extract_strided_slice %303 {offsets = [0, 256], sizes = [2, 128], strides = [1, 1]} : vector<2x512xf32> to vector<2x128xf32>
    %321 = math.tanh %320 : vector<2x128xf32>
    %322 = vector.extract_strided_slice %303 {offsets = [0, 384], sizes = [2, 128], strides = [1, 1]} : vector<2x512xf32> to vector<2x128xf32>
    %cst_116 = arith.constant 5.000000e-01 : f32
    %323 = vector.broadcast %cst_116 : f32 to vector<2x128xf32>
    %324 = arith.mulf %323, %322 : vector<2x128xf32>
    %325 = math.tanh %324 : vector<2x128xf32>
    %cst_117 = arith.constant 1.000000e+00 : f32
    %326 = vector.broadcast %cst_117 : f32 to vector<2x128xf32>
    %327 = arith.addf %325, %326 : vector<2x128xf32>
    %cst_118 = arith.constant 5.000000e-01 : f32
    %328 = vector.broadcast %cst_118 : f32 to vector<2x128xf32>
    %329 = arith.mulf %328, %327 : vector<2x128xf32>
    %330 = arith.mulf %319, %296 : vector<2x128xf32>
    %331 = arith.mulf %311, %321 : vector<2x128xf32>
    %332 = arith.addf %330, %331 : vector<2x128xf32>
    %333 = math.tanh %332 : vector<2x128xf32>
    %334 = arith.mulf %329, %333 : vector<2x128xf32>
    %cst_119 = arith.constant dense<0.000000e+00> : vector<2x128xf32>
    %335 = tpu.matmul %334, %2, %cst_119 {dimension_numbers = #tpu.dot_dimension_numbers<[1], [0], [0], [1], [0, 0, 1, 1], [], []>} : vector<2x128xf32>, vector<128x128xf32>, vector<2x128xf32> -> vector<2x128xf32>
    %336 = arith.addf %335, %8 : vector<2x128xf32>
    %cst_120 = arith.constant dense<0xFF800000> : vector<2xf32>
    %337 = vector.multi_reduction <maximumf>, %336, %cst_120 [1] : vector<2x128xf32> to vector<2xf32>
    %338 = vector.shape_cast %337 : vector<2xf32> to vector<2x1xf32>
    %339 = vector.broadcast %338 : vector<2x1xf32> to vector<2x128xf32>
    %340 = arith.subf %336, %339 : vector<2x128xf32>
    %341 = math.exp %340 : vector<2x128xf32>
    %cst_121 = arith.constant dense<0.000000e+00> : vector<2xf32>
    %342 = vector.multi_reduction <add>, %341, %cst_121 [1] : vector<2x128xf32> to vector<2xf32>
    %343 = vector.shape_cast %342 : vector<2xf32> to vector<2x1xf32>
    %344 = math.log %343 : vector<2x1xf32>
    %345 = arith.addf %344, %338 : vector<2x1xf32>
    %346 = vector.broadcast %345 : vector<2x1xf32> to vector<2x128xf32>
    %347 = arith.subf %336, %346 : vector<2x128xf32>
    %348 = arith.index_cast %c0_i32_108 : i32 to index
    %c0_122 = arith.constant 0 : index
    %c0_123 = arith.constant 0 : index
    %349 = vector.load %arg7[%348, %c0_122, %c0_123] : memref<8x2x128xf32, #tpu.memory_space<vmem>>, vector<1x2x128xf32>
    %350 = vector.shape_cast %349 : vector<1x2x128xf32> to vector<2x128xf32>
    %351 = vector.shape_cast %347 : vector<2x128xf32> to vector<1x2x128xf32>
    tpu.vector_store %arg7[%348, %c0_122, %c0_123], %351 {strides = array<i32>} : memref<8x2x128xf32, #tpu.memory_space<vmem>>, vector<1x2x128xf32>,
    %c1_i32_124 = arith.constant 1 : i32
    %352 = tpu.concatenate %347, %334 in 1 : vector<2x128xf32>, vector<2x128xf32> -> vector<2x256xf32>
    %cst_125 = arith.constant dense<0.000000e+00> : vector<2x512xf32>
    %353 = tpu.matmul %352, %0, %cst_125 {dimension_numbers = #tpu.dot_dimension_numbers<[1], [0], [0], [1], [0, 0, 1, 1], [], []>} : vector<2x256xf32>, vector<256x512xf32>, vector<2x512xf32> -> vector<2x512xf32>
    %354 = arith.addf %353, %5 : vector<2x512xf32>
    %355 = vector.extract_strided_slice %354 {offsets = [0, 0], sizes = [2, 128], strides = [1, 1]} : vector<2x512xf32> to vector<2x128xf32>
    %cst_126 = arith.constant 5.000000e-01 : f32
    %356 = vector.broadcast %cst_126 : f32 to vector<2x128xf32>
    %357 = arith.mulf %356, %355 : vector<2x128xf32>
    %358 = math.tanh %357 : vector<2x128xf32>
    %cst_127 = arith.constant 1.000000e+00 : f32
    %359 = vector.broadcast %cst_127 : f32 to vector<2x128xf32>
    %360 = arith.addf %358, %359 : vector<2x128xf32>
    %cst_128 = arith.constant 5.000000e-01 : f32
    %361 = vector.broadcast %cst_128 : f32 to vector<2x128xf32>
    %362 = arith.mulf %361, %360 : vector<2x128xf32>
    %363 = vector.extract_strided_slice %354 {offsets = [0, 128], sizes = [2, 128], strides = [1, 1]} : vector<2x512xf32> to vector<2x128xf32>
    %cst_129 = arith.constant 5.000000e-01 : f32
    %364 = vector.broadcast %cst_129 : f32 to vector<2x128xf32>
    %365 = arith.mulf %364, %363 : vector<2x128xf32>
    %366 = math.tanh %365 : vector<2x128xf32>
    %cst_130 = arith.constant 1.000000e+00 : f32
    %367 = vector.broadcast %cst_130 : f32 to vector<2x128xf32>
    %368 = arith.addf %366, %367 : vector<2x128xf32>
    %cst_131 = arith.constant 5.000000e-01 : f32
    %369 = vector.broadcast %cst_131 : f32 to vector<2x128xf32>
    %370 = arith.mulf %369, %368 : vector<2x128xf32>
    %371 = vector.extract_strided_slice %354 {offsets = [0, 256], sizes = [2, 128], strides = [1, 1]} : vector<2x512xf32> to vector<2x128xf32>
    %372 = math.tanh %371 : vector<2x128xf32>
    %373 = vector.extract_strided_slice %354 {offsets = [0, 384], sizes = [2, 128], strides = [1, 1]} : vector<2x512xf32> to vector<2x128xf32>
    %cst_132 = arith.constant 5.000000e-01 : f32
    %374 = vector.broadcast %cst_132 : f32 to vector<2x128xf32>
    %375 = arith.mulf %374, %373 : vector<2x128xf32>
    %376 = math.tanh %375 : vector<2x128xf32>
    %cst_133 = arith.constant 1.000000e+00 : f32
    %377 = vector.broadcast %cst_133 : f32 to vector<2x128xf32>
    %378 = arith.addf %376, %377 : vector<2x128xf32>
    %cst_134 = arith.constant 5.000000e-01 : f32
    %379 = vector.broadcast %cst_134 : f32 to vector<2x128xf32>
    %380 = arith.mulf %379, %378 : vector<2x128xf32>
    %381 = arith.mulf %370, %332 : vector<2x128xf32>
    %382 = arith.mulf %362, %372 : vector<2x128xf32>
    %383 = arith.addf %381, %382 : vector<2x128xf32>
    %384 = math.tanh %383 : vector<2x128xf32>
    %385 = arith.mulf %380, %384 : vector<2x128xf32>
    %cst_135 = arith.constant dense<0.000000e+00> : vector<2x128xf32>
    %386 = tpu.matmul %385, %2, %cst_135 {dimension_numbers = #tpu.dot_dimension_numbers<[1], [0], [0], [1], [0, 0, 1, 1], [], []>} : vector<2x128xf32>, vector<128x128xf32>, vector<2x128xf32> -> vector<2x128xf32>
    %387 = arith.addf %386, %8 : vector<2x128xf32>
    %cst_136 = arith.constant dense<0xFF800000> : vector<2xf32>
    %388 = vector.multi_reduction <maximumf>, %387, %cst_136 [1] : vector<2x128xf32> to vector<2xf32>
    %389 = vector.shape_cast %388 : vector<2xf32> to vector<2x1xf32>
    %390 = vector.broadcast %389 : vector<2x1xf32> to vector<2x128xf32>
    %391 = arith.subf %387, %390 : vector<2x128xf32>
    %392 = math.exp %391 : vector<2x128xf32>
    %cst_137 = arith.constant dense<0.000000e+00> : vector<2xf32>
    %393 = vector.multi_reduction <add>, %392, %cst_137 [1] : vector<2x128xf32> to vector<2xf32>
    %394 = vector.shape_cast %393 : vector<2xf32> to vector<2x1xf32>
    %395 = math.log %394 : vector<2x1xf32>
    %396 = arith.addf %395, %389 : vector<2x1xf32>
    %397 = vector.broadcast %396 : vector<2x1xf32> to vector<2x128xf32>
    %398 = arith.subf %387, %397 : vector<2x128xf32>
    %399 = arith.index_cast %c1_i32_124 : i32 to index
    %c0_138 = arith.constant 0 : index
    %c0_139 = arith.constant 0 : index
    %400 = vector.load %arg7[%399, %c0_138, %c0_139] : memref<8x2x128xf32, #tpu.memory_space<vmem>>, vector<1x2x128xf32>
    %401 = vector.shape_cast %400 : vector<1x2x128xf32> to vector<2x128xf32>
    %402 = vector.shape_cast %398 : vector<2x128xf32> to vector<1x2x128xf32>
    tpu.vector_store %arg7[%399, %c0_138, %c0_139], %402 {strides = array<i32>} : memref<8x2x128xf32, #tpu.memory_space<vmem>>, vector<1x2x128xf32>,
    %c2_i32_140 = arith.constant 2 : i32
    %403 = tpu.concatenate %398, %385 in 1 : vector<2x128xf32>, vector<2x128xf32> -> vector<2x256xf32>
    %cst_141 = arith.constant dense<0.000000e+00> : vector<2x512xf32>
    %404 = tpu.matmul %403, %0, %cst_141 {dimension_numbers = #tpu.dot_dimension_numbers<[1], [0], [0], [1], [0, 0, 1, 1], [], []>} : vector<2x256xf32>, vector<256x512xf32>, vector<2x512xf32> -> vector<2x512xf32>
    %405 = arith.addf %404, %5 : vector<2x512xf32>
    %406 = vector.extract_strided_slice %405 {offsets = [0, 0], sizes = [2, 128], strides = [1, 1]} : vector<2x512xf32> to vector<2x128xf32>
    %cst_142 = arith.constant 5.000000e-01 : f32
    %407 = vector.broadcast %cst_142 : f32 to vector<2x128xf32>
    %408 = arith.mulf %407, %406 : vector<2x128xf32>
    %409 = math.tanh %408 : vector<2x128xf32>
    %cst_143 = arith.constant 1.000000e+00 : f32
    %410 = vector.broadcast %cst_143 : f32 to vector<2x128xf32>
    %411 = arith.addf %409, %410 : vector<2x128xf32>
    %cst_144 = arith.constant 5.000000e-01 : f32
    %412 = vector.broadcast %cst_144 : f32 to vector<2x128xf32>
    %413 = arith.mulf %412, %411 : vector<2x128xf32>
    %414 = vector.extract_strided_slice %405 {offsets = [0, 128], sizes = [2, 128], strides = [1, 1]} : vector<2x512xf32> to vector<2x128xf32>
    %cst_145 = arith.constant 5.000000e-01 : f32
    %415 = vector.broadcast %cst_145 : f32 to vector<2x128xf32>
    %416 = arith.mulf %415, %414 : vector<2x128xf32>
    %417 = math.tanh %416 : vector<2x128xf32>
    %cst_146 = arith.constant 1.000000e+00 : f32
    %418 = vector.broadcast %cst_146 : f32 to vector<2x128xf32>
    %419 = arith.addf %417, %418 : vector<2x128xf32>
    %cst_147 = arith.constant 5.000000e-01 : f32
    %420 = vector.broadcast %cst_147 : f32 to vector<2x128xf32>
    %421 = arith.mulf %420, %419 : vector<2x128xf32>
    %422 = vector.extract_strided_slice %405 {offsets = [0, 256], sizes = [2, 128], strides = [1, 1]} : vector<2x512xf32> to vector<2x128xf32>
    %423 = math.tanh %422 : vector<2x128xf32>
    %424 = vector.extract_strided_slice %405 {offsets = [0, 384], sizes = [2, 128], strides = [1, 1]} : vector<2x512xf32> to vector<2x128xf32>
    %cst_148 = arith.constant 5.000000e-01 : f32
    %425 = vector.broadcast %cst_148 : f32 to vector<2x128xf32>
    %426 = arith.mulf %425, %424 : vector<2x128xf32>
    %427 = math.tanh %426 : vector<2x128xf32>
    %cst_149 = arith.constant 1.000000e+00 : f32
    %428 = vector.broadcast %cst_149 : f32 to vector<2x128xf32>
    %429 = arith.addf %427, %428 : vector<2x128xf32>
    %cst_150 = arith.constant 5.000000e-01 : f32
    %430 = vector.broadcast %cst_150 : f32 to vector<2x128xf32>
    %431 = arith.mulf %430, %429 : vector<2x128xf32>
    %432 = arith.mulf %421, %383 : vector<2x128xf32>
    %433 = arith.mulf %413, %423 : vector<2x128xf32>
    %434 = arith.addf %432, %433 : vector<2x128xf32>
    %435 = math.tanh %434 : vector<2x128xf32>
    %436 = arith.mulf %431, %435 : vector<2x128xf32>
    %cst_151 = arith.constant dense<0.000000e+00> : vector<2x128xf32>
    %437 = tpu.matmul %436, %2, %cst_151 {dimension_numbers = #tpu.dot_dimension_numbers<[1], [0], [0], [1], [0, 0, 1, 1], [], []>} : vector<2x128xf32>, vector<128x128xf32>, vector<2x128xf32> -> vector<2x128xf32>
    %438 = arith.addf %437, %8 : vector<2x128xf32>
    %cst_152 = arith.constant dense<0xFF800000> : vector<2xf32>
    %439 = vector.multi_reduction <maximumf>, %438, %cst_152 [1] : vector<2x128xf32> to vector<2xf32>
    %440 = vector.shape_cast %439 : vector<2xf32> to vector<2x1xf32>
    %441 = vector.broadcast %440 : vector<2x1xf32> to vector<2x128xf32>
    %442 = arith.subf %438, %441 : vector<2x128xf32>
    %443 = math.exp %442 : vector<2x128xf32>
    %cst_153 = arith.constant dense<0.000000e+00> : vector<2xf32>
    %444 = vector.multi_reduction <add>, %443, %cst_153 [1] : vector<2x128xf32> to vector<2xf32>
    %445 = vector.shape_cast %444 : vector<2xf32> to vector<2x1xf32>
    %446 = math.log %445 : vector<2x1xf32>
    %447 = arith.addf %446, %440 : vector<2x1xf32>
    %448 = vector.broadcast %447 : vector<2x1xf32> to vector<2x128xf32>
    %449 = arith.subf %438, %448 : vector<2x128xf32>
    %450 = arith.index_cast %c2_i32_140 : i32 to index
    %c0_154 = arith.constant 0 : index
    %c0_155 = arith.constant 0 : index
    %451 = vector.load %arg7[%450, %c0_154, %c0_155] : memref<8x2x128xf32, #tpu.memory_space<vmem>>, vector<1x2x128xf32>
    %452 = vector.shape_cast %451 : vector<1x2x128xf32> to vector<2x128xf32>
    %453 = vector.shape_cast %449 : vector<2x128xf32> to vector<1x2x128xf32>
    tpu.vector_store %arg7[%450, %c0_154, %c0_155], %453 {strides = array<i32>} : memref<8x2x128xf32, #tpu.memory_space<vmem>>, vector<1x2x128xf32>,
    %c3_i32_156 = arith.constant 3 : i32
    %454 = tpu.concatenate %449, %436 in 1 : vector<2x128xf32>, vector<2x128xf32> -> vector<2x256xf32>
    %cst_157 = arith.constant dense<0.000000e+00> : vector<2x512xf32>
    %455 = tpu.matmul %454, %0, %cst_157 {dimension_numbers = #tpu.dot_dimension_numbers<[1], [0], [0], [1], [0, 0, 1, 1], [], []>} : vector<2x256xf32>, vector<256x512xf32>, vector<2x512xf32> -> vector<2x512xf32>
    %456 = arith.addf %455, %5 : vector<2x512xf32>
    %457 = vector.extract_strided_slice %456 {offsets = [0, 0], sizes = [2, 128], strides = [1, 1]} : vector<2x512xf32> to vector<2x128xf32>
    %cst_158 = arith.constant 5.000000e-01 : f32
    %458 = vector.broadcast %cst_158 : f32 to vector<2x128xf32>
    %459 = arith.mulf %458, %457 : vector<2x128xf32>
    %460 = math.tanh %459 : vector<2x128xf32>
    %cst_159 = arith.constant 1.000000e+00 : f32
    %461 = vector.broadcast %cst_159 : f32 to vector<2x128xf32>
    %462 = arith.addf %460, %461 : vector<2x128xf32>
    %cst_160 = arith.constant 5.000000e-01 : f32
    %463 = vector.broadcast %cst_160 : f32 to vector<2x128xf32>
    %464 = arith.mulf %463, %462 : vector<2x128xf32>
    %465 = vector.extract_strided_slice %456 {offsets = [0, 128], sizes = [2, 128], strides = [1, 1]} : vector<2x512xf32> to vector<2x128xf32>
    %cst_161 = arith.constant 5.000000e-01 : f32
    %466 = vector.broadcast %cst_161 : f32 to vector<2x128xf32>
    %467 = arith.mulf %466, %465 : vector<2x128xf32>
    %468 = math.tanh %467 : vector<2x128xf32>
    %cst_162 = arith.constant 1.000000e+00 : f32
    %469 = vector.broadcast %cst_162 : f32 to vector<2x128xf32>
    %470 = arith.addf %468, %469 : vector<2x128xf32>
    %cst_163 = arith.constant 5.000000e-01 : f32
    %471 = vector.broadcast %cst_163 : f32 to vector<2x128xf32>
    %472 = arith.mulf %471, %470 : vector<2x128xf32>
    %473 = vector.extract_strided_slice %456 {offsets = [0, 256], sizes = [2, 128], strides = [1, 1]} : vector<2x512xf32> to vector<2x128xf32>
    %474 = math.tanh %473 : vector<2x128xf32>
    %475 = vector.extract_strided_slice %456 {offsets = [0, 384], sizes = [2, 128], strides = [1, 1]} : vector<2x512xf32> to vector<2x128xf32>
    %cst_164 = arith.constant 5.000000e-01 : f32
    %476 = vector.broadcast %cst_164 : f32 to vector<2x128xf32>
    %477 = arith.mulf %476, %475 : vector<2x128xf32>
    %478 = math.tanh %477 : vector<2x128xf32>
    %cst_165 = arith.constant 1.000000e+00 : f32
    %479 = vector.broadcast %cst_165 : f32 to vector<2x128xf32>
    %480 = arith.addf %478, %479 : vector<2x128xf32>
    %cst_166 = arith.constant 5.000000e-01 : f32
    %481 = vector.broadcast %cst_166 : f32 to vector<2x128xf32>
    %482 = arith.mulf %481, %480 : vector<2x128xf32>
    %483 = arith.mulf %472, %434 : vector<2x128xf32>
    %484 = arith.mulf %464, %474 : vector<2x128xf32>
    %485 = arith.addf %483, %484 : vector<2x128xf32>
    %486 = math.tanh %485 : vector<2x128xf32>
    %487 = arith.mulf %482, %486 : vector<2x128xf32>
    %cst_167 = arith.constant dense<0.000000e+00> : vector<2x128xf32>
    %488 = tpu.matmul %487, %2, %cst_167 {dimension_numbers = #tpu.dot_dimension_numbers<[1], [0], [0], [1], [0, 0, 1, 1], [], []>} : vector<2x128xf32>, vector<128x128xf32>, vector<2x128xf32> -> vector<2x128xf32>
    %489 = arith.addf %488, %8 : vector<2x128xf32>
    %cst_168 = arith.constant dense<0xFF800000> : vector<2xf32>
    %490 = vector.multi_reduction <maximumf>, %489, %cst_168 [1] : vector<2x128xf32> to vector<2xf32>
    %491 = vector.shape_cast %490 : vector<2xf32> to vector<2x1xf32>
    %492 = vector.broadcast %491 : vector<2x1xf32> to vector<2x128xf32>
    %493 = arith.subf %489, %492 : vector<2x128xf32>
    %494 = math.exp %493 : vector<2x128xf32>
    %cst_169 = arith.constant dense<0.000000e+00> : vector<2xf32>
    %495 = vector.multi_reduction <add>, %494, %cst_169 [1] : vector<2x128xf32> to vector<2xf32>
    %496 = vector.shape_cast %495 : vector<2xf32> to vector<2x1xf32>
    %497 = math.log %496 : vector<2x1xf32>
    %498 = arith.addf %497, %491 : vector<2x1xf32>
    %499 = vector.broadcast %498 : vector<2x1xf32> to vector<2x128xf32>
    %500 = arith.subf %489, %499 : vector<2x128xf32>
    %501 = arith.index_cast %c3_i32_156 : i32 to index
    %c0_170 = arith.constant 0 : index
    %c0_171 = arith.constant 0 : index
    %502 = vector.load %arg7[%501, %c0_170, %c0_171] : memref<8x2x128xf32, #tpu.memory_space<vmem>>, vector<1x2x128xf32>
    %503 = vector.shape_cast %502 : vector<1x2x128xf32> to vector<2x128xf32>
    %504 = vector.shape_cast %500 : vector<2x128xf32> to vector<1x2x128xf32>
    tpu.vector_store %arg7[%501, %c0_170, %c0_171], %504 {strides = array<i32>} : memref<8x2x128xf32, #tpu.memory_space<vmem>>, vector<1x2x128xf32>,
    %c4_i32_172 = arith.constant 4 : i32
    %505 = tpu.concatenate %500, %487 in 1 : vector<2x128xf32>, vector<2x128xf32> -> vector<2x256xf32>
    %cst_173 = arith.constant dense<0.000000e+00> : vector<2x512xf32>
    %506 = tpu.matmul %505, %0, %cst_173 {dimension_numbers = #tpu.dot_dimension_numbers<[1], [0], [0], [1], [0, 0, 1, 1], [], []>} : vector<2x256xf32>, vector<256x512xf32>, vector<2x512xf32> -> vector<2x512xf32>
    %507 = arith.addf %506, %5 : vector<2x512xf32>
    %508 = vector.extract_strided_slice %507 {offsets = [0, 0], sizes = [2, 128], strides = [1, 1]} : vector<2x512xf32> to vector<2x128xf32>
    %cst_174 = arith.constant 5.000000e-01 : f32
    %509 = vector.broadcast %cst_174 : f32 to vector<2x128xf32>
    %510 = arith.mulf %509, %508 : vector<2x128xf32>
    %511 = math.tanh %510 : vector<2x128xf32>
    %cst_175 = arith.constant 1.000000e+00 : f32
    %512 = vector.broadcast %cst_175 : f32 to vector<2x128xf32>
    %513 = arith.addf %511, %512 : vector<2x128xf32>
    %cst_176 = arith.constant 5.000000e-01 : f32
    %514 = vector.broadcast %cst_176 : f32 to vector<2x128xf32>
    %515 = arith.mulf %514, %513 : vector<2x128xf32>
    %516 = vector.extract_strided_slice %507 {offsets = [0, 128], sizes = [2, 128], strides = [1, 1]} : vector<2x512xf32> to vector<2x128xf32>
    %cst_177 = arith.constant 5.000000e-01 : f32
    %517 = vector.broadcast %cst_177 : f32 to vector<2x128xf32>
    %518 = arith.mulf %517, %516 : vector<2x128xf32>
    %519 = math.tanh %518 : vector<2x128xf32>
    %cst_178 = arith.constant 1.000000e+00 : f32
    %520 = vector.broadcast %cst_178 : f32 to vector<2x128xf32>
    %521 = arith.addf %519, %520 : vector<2x128xf32>
    %cst_179 = arith.constant 5.000000e-01 : f32
    %522 = vector.broadcast %cst_179 : f32 to vector<2x128xf32>
    %523 = arith.mulf %522, %521 : vector<2x128xf32>
    %524 = vector.extract_strided_slice %507 {offsets = [0, 256], sizes = [2, 128], strides = [1, 1]} : vector<2x512xf32> to vector<2x128xf32>
    %525 = math.tanh %524 : vector<2x128xf32>
    %526 = vector.extract_strided_slice %507 {offsets = [0, 384], sizes = [2, 128], strides = [1, 1]} : vector<2x512xf32> to vector<2x128xf32>
    %cst_180 = arith.constant 5.000000e-01 : f32
    %527 = vector.broadcast %cst_180 : f32 to vector<2x128xf32>
    %528 = arith.mulf %527, %526 : vector<2x128xf32>
    %529 = math.tanh %528 : vector<2x128xf32>
    %cst_181 = arith.constant 1.000000e+00 : f32
    %530 = vector.broadcast %cst_181 : f32 to vector<2x128xf32>
    %531 = arith.addf %529, %530 : vector<2x128xf32>
    %cst_182 = arith.constant 5.000000e-01 : f32
    %532 = vector.broadcast %cst_182 : f32 to vector<2x128xf32>
    %533 = arith.mulf %532, %531 : vector<2x128xf32>
    %534 = arith.mulf %523, %485 : vector<2x128xf32>
    %535 = arith.mulf %515, %525 : vector<2x128xf32>
    %536 = arith.addf %534, %535 : vector<2x128xf32>
    %537 = math.tanh %536 : vector<2x128xf32>
    %538 = arith.mulf %533, %537 : vector<2x128xf32>
    %cst_183 = arith.constant dense<0.000000e+00> : vector<2x128xf32>
    %539 = tpu.matmul %538, %2, %cst_183 {dimension_numbers = #tpu.dot_dimension_numbers<[1], [0], [0], [1], [0, 0, 1, 1], [], []>} : vector<2x128xf32>, vector<128x128xf32>, vector<2x128xf32> -> vector<2x128xf32>
    %540 = arith.addf %539, %8 : vector<2x128xf32>
    %cst_184 = arith.constant dense<0xFF800000> : vector<2xf32>
    %541 = vector.multi_reduction <maximumf>, %540, %cst_184 [1] : vector<2x128xf32> to vector<2xf32>
    %542 = vector.shape_cast %541 : vector<2xf32> to vector<2x1xf32>
    %543 = vector.broadcast %542 : vector<2x1xf32> to vector<2x128xf32>
    %544 = arith.subf %540, %543 : vector<2x128xf32>
    %545 = math.exp %544 : vector<2x128xf32>
    %cst_185 = arith.constant dense<0.000000e+00> : vector<2xf32>
    %546 = vector.multi_reduction <add>, %545, %cst_185 [1] : vector<2x128xf32> to vector<2xf32>
    %547 = vector.shape_cast %546 : vector<2xf32> to vector<2x1xf32>
    %548 = math.log %547 : vector<2x1xf32>
    %549 = arith.addf %548, %542 : vector<2x1xf32>
    %550 = vector.broadcast %549 : vector<2x1xf32> to vector<2x128xf32>
    %551 = arith.subf %540, %550 : vector<2x128xf32>
    %552 = arith.index_cast %c4_i32_172 : i32 to index
    %c0_186 = arith.constant 0 : index
    %c0_187 = arith.constant 0 : index
    %553 = vector.load %arg7[%552, %c0_186, %c0_187] : memref<8x2x128xf32, #tpu.memory_space<vmem>>, vector<1x2x128xf32>
    %554 = vector.shape_cast %553 : vector<1x2x128xf32> to vector<2x128xf32>
    %555 = vector.shape_cast %551 : vector<2x128xf32> to vector<1x2x128xf32>
    tpu.vector_store %arg7[%552, %c0_186, %c0_187], %555 {strides = array<i32>} : memref<8x2x128xf32, #tpu.memory_space<vmem>>, vector<1x2x128xf32>,
    %c5_i32_188 = arith.constant 5 : i32
    %556 = tpu.concatenate %551, %538 in 1 : vector<2x128xf32>, vector<2x128xf32> -> vector<2x256xf32>
    %cst_189 = arith.constant dense<0.000000e+00> : vector<2x512xf32>
    %557 = tpu.matmul %556, %0, %cst_189 {dimension_numbers = #tpu.dot_dimension_numbers<[1], [0], [0], [1], [0, 0, 1, 1], [], []>} : vector<2x256xf32>, vector<256x512xf32>, vector<2x512xf32> -> vector<2x512xf32>
    %558 = arith.addf %557, %5 : vector<2x512xf32>
    %559 = vector.extract_strided_slice %558 {offsets = [0, 0], sizes = [2, 128], strides = [1, 1]} : vector<2x512xf32> to vector<2x128xf32>
    %cst_190 = arith.constant 5.000000e-01 : f32
    %560 = vector.broadcast %cst_190 : f32 to vector<2x128xf32>
    %561 = arith.mulf %560, %559 : vector<2x128xf32>
    %562 = math.tanh %561 : vector<2x128xf32>
    %cst_191 = arith.constant 1.000000e+00 : f32
    %563 = vector.broadcast %cst_191 : f32 to vector<2x128xf32>
    %564 = arith.addf %562, %563 : vector<2x128xf32>
    %cst_192 = arith.constant 5.000000e-01 : f32
    %565 = vector.broadcast %cst_192 : f32 to vector<2x128xf32>
    %566 = arith.mulf %565, %564 : vector<2x128xf32>
    %567 = vector.extract_strided_slice %558 {offsets = [0, 128], sizes = [2, 128], strides = [1, 1]} : vector<2x512xf32> to vector<2x128xf32>
    %cst_193 = arith.constant 5.000000e-01 : f32
    %568 = vector.broadcast %cst_193 : f32 to vector<2x128xf32>
    %569 = arith.mulf %568, %567 : vector<2x128xf32>
    %570 = math.tanh %569 : vector<2x128xf32>
    %cst_194 = arith.constant 1.000000e+00 : f32
    %571 = vector.broadcast %cst_194 : f32 to vector<2x128xf32>
    %572 = arith.addf %570, %571 : vector<2x128xf32>
    %cst_195 = arith.constant 5.000000e-01 : f32
    %573 = vector.broadcast %cst_195 : f32 to vector<2x128xf32>
    %574 = arith.mulf %573, %572 : vector<2x128xf32>
    %575 = vector.extract_strided_slice %558 {offsets = [0, 256], sizes = [2, 128], strides = [1, 1]} : vector<2x512xf32> to vector<2x128xf32>
    %576 = math.tanh %575 : vector<2x128xf32>
    %577 = vector.extract_strided_slice %558 {offsets = [0, 384], sizes = [2, 128], strides = [1, 1]} : vector<2x512xf32> to vector<2x128xf32>
    %cst_196 = arith.constant 5.000000e-01 : f32
    %578 = vector.broadcast %cst_196 : f32 to vector<2x128xf32>
    %579 = arith.mulf %578, %577 : vector<2x128xf32>
    %580 = math.tanh %579 : vector<2x128xf32>
    %cst_197 = arith.constant 1.000000e+00 : f32
    %581 = vector.broadcast %cst_197 : f32 to vector<2x128xf32>
    %582 = arith.addf %580, %581 : vector<2x128xf32>
    %cst_198 = arith.constant 5.000000e-01 : f32
    %583 = vector.broadcast %cst_198 : f32 to vector<2x128xf32>
    %584 = arith.mulf %583, %582 : vector<2x128xf32>
    %585 = arith.mulf %574, %536 : vector<2x128xf32>
    %586 = arith.mulf %566, %576 : vector<2x128xf32>
    %587 = arith.addf %585, %586 : vector<2x128xf32>
    %588 = math.tanh %587 : vector<2x128xf32>
    %589 = arith.mulf %584, %588 : vector<2x128xf32>
    %cst_199 = arith.constant dense<0.000000e+00> : vector<2x128xf32>
    %590 = tpu.matmul %589, %2, %cst_199 {dimension_numbers = #tpu.dot_dimension_numbers<[1], [0], [0], [1], [0, 0, 1, 1], [], []>} : vector<2x128xf32>, vector<128x128xf32>, vector<2x128xf32> -> vector<2x128xf32>
    %591 = arith.addf %590, %8 : vector<2x128xf32>
    %cst_200 = arith.constant dense<0xFF800000> : vector<2xf32>
    %592 = vector.multi_reduction <maximumf>, %591, %cst_200 [1] : vector<2x128xf32> to vector<2xf32>
    %593 = vector.shape_cast %592 : vector<2xf32> to vector<2x1xf32>
    %594 = vector.broadcast %593 : vector<2x1xf32> to vector<2x128xf32>
    %595 = arith.subf %591, %594 : vector<2x128xf32>
    %596 = math.exp %595 : vector<2x128xf32>
    %cst_201 = arith.constant dense<0.000000e+00> : vector<2xf32>
    %597 = vector.multi_reduction <add>, %596, %cst_201 [1] : vector<2x128xf32> to vector<2xf32>
    %598 = vector.shape_cast %597 : vector<2xf32> to vector<2x1xf32>
    %599 = math.log %598 : vector<2x1xf32>
    %600 = arith.addf %599, %593 : vector<2x1xf32>
    %601 = vector.broadcast %600 : vector<2x1xf32> to vector<2x128xf32>
    %602 = arith.subf %591, %601 : vector<2x128xf32>
    %603 = arith.index_cast %c5_i32_188 : i32 to index
    %c0_202 = arith.constant 0 : index
    %c0_203 = arith.constant 0 : index
    %604 = vector.load %arg7[%603, %c0_202, %c0_203] : memref<8x2x128xf32, #tpu.memory_space<vmem>>, vector<1x2x128xf32>
    %605 = vector.shape_cast %604 : vector<1x2x128xf32> to vector<2x128xf32>
    %606 = vector.shape_cast %602 : vector<2x128xf32> to vector<1x2x128xf32>
    tpu.vector_store %arg7[%603, %c0_202, %c0_203], %606 {strides = array<i32>} : memref<8x2x128xf32, #tpu.memory_space<vmem>>, vector<1x2x128xf32>,
    %c6_i32_204 = arith.constant 6 : i32
    %607 = tpu.concatenate %602, %589 in 1 : vector<2x128xf32>, vector<2x128xf32> -> vector<2x256xf32>
    %cst_205 = arith.constant dense<0.000000e+00> : vector<2x512xf32>
    %608 = tpu.matmul %607, %0, %cst_205 {dimension_numbers = #tpu.dot_dimension_numbers<[1], [0], [0], [1], [0, 0, 1, 1], [], []>} : vector<2x256xf32>, vector<256x512xf32>, vector<2x512xf32> -> vector<2x512xf32>
    %609 = arith.addf %608, %5 : vector<2x512xf32>
    %610 = vector.extract_strided_slice %609 {offsets = [0, 0], sizes = [2, 128], strides = [1, 1]} : vector<2x512xf32> to vector<2x128xf32>
    %cst_206 = arith.constant 5.000000e-01 : f32
    %611 = vector.broadcast %cst_206 : f32 to vector<2x128xf32>
    %612 = arith.mulf %611, %610 : vector<2x128xf32>
    %613 = math.tanh %612 : vector<2x128xf32>
    %cst_207 = arith.constant 1.000000e+00 : f32
    %614 = vector.broadcast %cst_207 : f32 to vector<2x128xf32>
    %615 = arith.addf %613, %614 : vector<2x128xf32>
    %cst_208 = arith.constant 5.000000e-01 : f32
    %616 = vector.broadcast %cst_208 : f32 to vector<2x128xf32>
    %617 = arith.mulf %616, %615 : vector<2x128xf32>
    %618 = vector.extract_strided_slice %609 {offsets = [0, 128], sizes = [2, 128], strides = [1, 1]} : vector<2x512xf32> to vector<2x128xf32>
    %cst_209 = arith.constant 5.000000e-01 : f32
    %619 = vector.broadcast %cst_209 : f32 to vector<2x128xf32>
    %620 = arith.mulf %619, %618 : vector<2x128xf32>
    %621 = math.tanh %620 : vector<2x128xf32>
    %cst_210 = arith.constant 1.000000e+00 : f32
    %622 = vector.broadcast %cst_210 : f32 to vector<2x128xf32>
    %623 = arith.addf %621, %622 : vector<2x128xf32>
    %cst_211 = arith.constant 5.000000e-01 : f32
    %624 = vector.broadcast %cst_211 : f32 to vector<2x128xf32>
    %625 = arith.mulf %624, %623 : vector<2x128xf32>
    %626 = vector.extract_strided_slice %609 {offsets = [0, 256], sizes = [2, 128], strides = [1, 1]} : vector<2x512xf32> to vector<2x128xf32>
    %627 = math.tanh %626 : vector<2x128xf32>
    %628 = vector.extract_strided_slice %609 {offsets = [0, 384], sizes = [2, 128], strides = [1, 1]} : vector<2x512xf32> to vector<2x128xf32>
    %cst_212 = arith.constant 5.000000e-01 : f32
    %629 = vector.broadcast %cst_212 : f32 to vector<2x128xf32>
    %630 = arith.mulf %629, %628 : vector<2x128xf32>
    %631 = math.tanh %630 : vector<2x128xf32>
    %cst_213 = arith.constant 1.000000e+00 : f32
    %632 = vector.broadcast %cst_213 : f32 to vector<2x128xf32>
    %633 = arith.addf %631, %632 : vector<2x128xf32>
    %cst_214 = arith.constant 5.000000e-01 : f32
    %634 = vector.broadcast %cst_214 : f32 to vector<2x128xf32>
    %635 = arith.mulf %634, %633 : vector<2x128xf32>
    %636 = arith.mulf %625, %587 : vector<2x128xf32>
    %637 = arith.mulf %617, %627 : vector<2x128xf32>
    %638 = arith.addf %636, %637 : vector<2x128xf32>
    %639 = math.tanh %638 : vector<2x128xf32>
    %640 = arith.mulf %635, %639 : vector<2x128xf32>
    %cst_215 = arith.constant dense<0.000000e+00> : vector<2x128xf32>
    %641 = tpu.matmul %640, %2, %cst_215 {dimension_numbers = #tpu.dot_dimension_numbers<[1], [0], [0], [1], [0, 0, 1, 1], [], []>} : vector<2x128xf32>, vector<128x128xf32>, vector<2x128xf32> -> vector<2x128xf32>
    %642 = arith.addf %641, %8 : vector<2x128xf32>
    %cst_216 = arith.constant dense<0xFF800000> : vector<2xf32>
    %643 = vector.multi_reduction <maximumf>, %642, %cst_216 [1] : vector<2x128xf32> to vector<2xf32>
    %644 = vector.shape_cast %643 : vector<2xf32> to vector<2x1xf32>
    %645 = vector.broadcast %644 : vector<2x1xf32> to vector<2x128xf32>
    %646 = arith.subf %642, %645 : vector<2x128xf32>
    %647 = math.exp %646 : vector<2x128xf32>
    %cst_217 = arith.constant dense<0.000000e+00> : vector<2xf32>
    %648 = vector.multi_reduction <add>, %647, %cst_217 [1] : vector<2x128xf32> to vector<2xf32>
    %649 = vector.shape_cast %648 : vector<2xf32> to vector<2x1xf32>
    %650 = math.log %649 : vector<2x1xf32>
    %651 = arith.addf %650, %644 : vector<2x1xf32>
    %652 = vector.broadcast %651 : vector<2x1xf32> to vector<2x128xf32>
    %653 = arith.subf %642, %652 : vector<2x128xf32>
    %654 = arith.index_cast %c6_i32_204 : i32 to index
    %c0_218 = arith.constant 0 : index
    %c0_219 = arith.constant 0 : index
    %655 = vector.load %arg7[%654, %c0_218, %c0_219] : memref<8x2x128xf32, #tpu.memory_space<vmem>>, vector<1x2x128xf32>
    %656 = vector.shape_cast %655 : vector<1x2x128xf32> to vector<2x128xf32>
    %657 = vector.shape_cast %653 : vector<2x128xf32> to vector<1x2x128xf32>
    tpu.vector_store %arg7[%654, %c0_218, %c0_219], %657 {strides = array<i32>} : memref<8x2x128xf32, #tpu.memory_space<vmem>>, vector<1x2x128xf32>,
    %c7_i32_220 = arith.constant 7 : i32
    %658 = tpu.concatenate %653, %640 in 1 : vector<2x128xf32>, vector<2x128xf32> -> vector<2x256xf32>
    %cst_221 = arith.constant dense<0.000000e+00> : vector<2x512xf32>
    %659 = tpu.matmul %658, %0, %cst_221 {dimension_numbers = #tpu.dot_dimension_numbers<[1], [0], [0], [1], [0, 0, 1, 1], [], []>} : vector<2x256xf32>, vector<256x512xf32>, vector<2x512xf32> -> vector<2x512xf32>
    %660 = arith.addf %659, %5 : vector<2x512xf32>
    %661 = vector.extract_strided_slice %660 {offsets = [0, 0], sizes = [2, 128], strides = [1, 1]} : vector<2x512xf32> to vector<2x128xf32>
    %cst_222 = arith.constant 5.000000e-01 : f32
    %662 = vector.broadcast %cst_222 : f32 to vector<2x128xf32>
    %663 = arith.mulf %662, %661 : vector<2x128xf32>
    %664 = math.tanh %663 : vector<2x128xf32>
    %cst_223 = arith.constant 1.000000e+00 : f32
    %665 = vector.broadcast %cst_223 : f32 to vector<2x128xf32>
    %666 = arith.addf %664, %665 : vector<2x128xf32>
    %cst_224 = arith.constant 5.000000e-01 : f32
    %667 = vector.broadcast %cst_224 : f32 to vector<2x128xf32>
    %668 = arith.mulf %667, %666 : vector<2x128xf32>
    %669 = vector.extract_strided_slice %660 {offsets = [0, 128], sizes = [2, 128], strides = [1, 1]} : vector<2x512xf32> to vector<2x128xf32>
    %cst_225 = arith.constant 5.000000e-01 : f32
    %670 = vector.broadcast %cst_225 : f32 to vector<2x128xf32>
    %671 = arith.mulf %670, %669 : vector<2x128xf32>
    %672 = math.tanh %671 : vector<2x128xf32>
    %cst_226 = arith.constant 1.000000e+00 : f32
    %673 = vector.broadcast %cst_226 : f32 to vector<2x128xf32>
    %674 = arith.addf %672, %673 : vector<2x128xf32>
    %cst_227 = arith.constant 5.000000e-01 : f32
    %675 = vector.broadcast %cst_227 : f32 to vector<2x128xf32>
    %676 = arith.mulf %675, %674 : vector<2x128xf32>
    %677 = vector.extract_strided_slice %660 {offsets = [0, 256], sizes = [2, 128], strides = [1, 1]} : vector<2x512xf32> to vector<2x128xf32>
    %678 = math.tanh %677 : vector<2x128xf32>
    %679 = vector.extract_strided_slice %660 {offsets = [0, 384], sizes = [2, 128], strides = [1, 1]} : vector<2x512xf32> to vector<2x128xf32>
    %cst_228 = arith.constant 5.000000e-01 : f32
    %680 = vector.broadcast %cst_228 : f32 to vector<2x128xf32>
    %681 = arith.mulf %680, %679 : vector<2x128xf32>
    %682 = math.tanh %681 : vector<2x128xf32>
    %cst_229 = arith.constant 1.000000e+00 : f32
    %683 = vector.broadcast %cst_229 : f32 to vector<2x128xf32>
    %684 = arith.addf %682, %683 : vector<2x128xf32>
    %cst_230 = arith.constant 5.000000e-01 : f32
    %685 = vector.broadcast %cst_230 : f32 to vector<2x128xf32>
    %686 = arith.mulf %685, %684 : vector<2x128xf32>
    %687 = arith.mulf %676, %638 : vector<2x128xf32>
    %688 = arith.mulf %668, %678 : vector<2x128xf32>
    %689 = arith.addf %687, %688 : vector<2x128xf32>
    %690 = math.tanh %689 : vector<2x128xf32>
    %691 = arith.mulf %686, %690 : vector<2x128xf32>
    %cst_231 = arith.constant dense<0.000000e+00> : vector<2x128xf32>
    %692 = tpu.matmul %691, %2, %cst_231 {dimension_numbers = #tpu.dot_dimension_numbers<[1], [0], [0], [1], [0, 0, 1, 1], [], []>} : vector<2x128xf32>, vector<128x128xf32>, vector<2x128xf32> -> vector<2x128xf32>
    %693 = arith.addf %692, %8 : vector<2x128xf32>
    %cst_232 = arith.constant dense<0xFF800000> : vector<2xf32>
    %694 = vector.multi_reduction <maximumf>, %693, %cst_232 [1] : vector<2x128xf32> to vector<2xf32>
    %695 = vector.shape_cast %694 : vector<2xf32> to vector<2x1xf32>
    %696 = vector.broadcast %695 : vector<2x1xf32> to vector<2x128xf32>
    %697 = arith.subf %693, %696 : vector<2x128xf32>
    %698 = math.exp %697 : vector<2x128xf32>
    %cst_233 = arith.constant dense<0.000000e+00> : vector<2xf32>
    %699 = vector.multi_reduction <add>, %698, %cst_233 [1] : vector<2x128xf32> to vector<2xf32>
    %700 = vector.shape_cast %699 : vector<2xf32> to vector<2x1xf32>
    %701 = math.log %700 : vector<2x1xf32>
    %702 = arith.addf %701, %695 : vector<2x1xf32>
    %703 = vector.broadcast %702 : vector<2x1xf32> to vector<2x128xf32>
    %704 = arith.subf %693, %703 : vector<2x128xf32>
    %705 = arith.index_cast %c7_i32_220 : i32 to index
    %c0_234 = arith.constant 0 : index
    %c0_235 = arith.constant 0 : index
    %706 = vector.load %arg7[%705, %c0_234, %c0_235] : memref<8x2x128xf32, #tpu.memory_space<vmem>>, vector<1x2x128xf32>
    %707 = vector.shape_cast %706 : vector<1x2x128xf32> to vector<2x128xf32>
    %708 = vector.shape_cast %704 : vector<2x128xf32> to vector<1x2x128xf32>
    tpu.vector_store %arg7[%705, %c0_234, %c0_235], %708 {strides = array<i32>} : memref<8x2x128xf32, #tpu.memory_space<vmem>>, vector<1x2x128xf32>,
    %c8_i32_236 = arith.constant 8 : i32
    return
  }
}

</mosaic_0001>

<bundles_post_ra>
// kernel: model_forward.1
= control target key start
LH: loop header
LB: loop body
LE: loop exit
PB: predicated region body
PF: predicated region fallthrough
CT: control target
= control target key end

     0   :  { %s9462_s0 = inlined_call_operand.vmem [shape: f32[8,2,512], index: 0, kind: input, shape index: {}]   ;;  %s9463_s1 = inlined_call_operand.vmem [shape: f32[2,128], index: 1, kind: input, shape index: {}]   ;;  %s9464_s2 = inlined_call_operand.vmem [shape: f32[256,512], index: 2, kind: input, shape index: {}]   ;;  %s9465_s3 = inlined_call_operand.vmem [shape: f32[1,512], index: 3, kind: input, shape index: {}]   ;;  %s9466_s4 = inlined_call_operand.vmem [shape: f32[128,128], index: 4, kind: input, shape index: {}]   ;;  %s9467_s5 = inlined_call_operand.vmem [shape: f32[1,128], index: 5, kind: input, shape index: {}]   ;;  %s9468_s6 = inlined_call_operand.hbm [shape: f32[2,128], index: 6, kind: output, shape index: {0}]   ;;  %s9469_s7 = inlined_call_operand.vmem [shape: f32[8,2,128], index: 7, kind: output, shape index: {1}]  }
   0x1   :  { %v4822_v0 = vld [vmem:[%s9464_s2 + $0x3e8] sm:$0xff]  ;;  %v4827_v1 = vld [vmem:[%s9464_s2 + $0x3f8] sm:$0xff]  ;;  %v4832_v2 = vld [vmem:[%s9464_s2 + $0x3e0] sm:$0xff] }
   0x2   :  { %9984 = vst [vmem:[#allocation5_spill] sm:$0xff] %v4822_v0  ;;  %9985 = vst [vmem:[#allocation6_spill] sm:$0xff] %v4827_v1  ;;  %200 = vmatprep.subr.mxu0 %v4822_v0  ;;  %271 = vmatprep.subr.mxu1 %v4827_v1  ;;  %v4839_v3 = vld [vmem:[%s9464_s2 + $0x3f0] sm:$0xff]  ;;  %v4844_v4 = vld [vmem:[%s9464_s2 + $0x3c8] sm:$0xff] }
   0x3   :  { %v4849_v5 = vld [vmem:[%s9464_s2 + $0x3d8] sm:$0xff]  ;;  %201 = vmatpush1.msra.mxu0 %v4832_v2  ;;  %272 = vmatpush1.msra.mxu1 %v4839_v3  ;;  %v4856_v6 = vld [vmem:[%s9464_s2 + $0x3c0] sm:$0xff]  ;;  %v4861_v7 = vld [vmem:[%s9464_s2 + $0x3d0] sm:$0xff] }
   0x4   :  { %v4866_v8 = vld [vmem:[%s9464_s2 + $0x3a8] sm:$0xff]  ;;  %202 = vmatprep.subr.mxu0 %v4844_v4  ;;  %273 = vmatprep.subr.mxu1 %v4849_v5  ;;  %v4873_v9 = vld [vmem:[%s9464_s2 + $0x3b8] sm:$0xff]  ;;  %v4878_v10 = vld [vmem:[%s9464_s2 + $0x3a0] sm:$0xff] }
   0x5   :  { %v4883_v11 = vld [vmem:[%s9464_s2 + $0x3b0] sm:$0xff]  ;;  %203 = vmatpush1.msra.mxu0 %v4856_v6  ;;  %274 = vmatpush1.msra.mxu1 %v4861_v7  ;;  %v4890_v12 = vld [vmem:[%s9464_s2 + $0x388] sm:$0xff]  ;;  %v4895_v13 = vld [vmem:[%s9464_s2 + $0x398] sm:$0xff] }
   0x6   :  { %204 = vmatprep.subr.mxu0 %v4866_v8  ;;  %275 = vmatprep.subr.mxu1 %v4873_v9  ;;  %v4902_v14 = vld [vmem:[%s9464_s2 + $0x380] sm:$0xff]  ;;  %v4907_v15 = vld [vmem:[%s9464_s2 + $0x390] sm:$0xff]  ;;  %v4914_v16 = vld [vmem:[%s9464_s2 + $0x368] sm:$0xff] }
   0x7   :  { %205 = vmatpush1.msra.mxu0 %v4878_v10  ;;  %276 = vmatpush1.msra.mxu1 %v4883_v11  ;;  %v4919_v17 = vld [vmem:[%s9464_s2 + $0x378] sm:$0xff]  ;;  %v4926_v18 = vld [vmem:[%s9464_s2 + $0x360] sm:$0xff]  ;;  %v4931_v19 = vld [vmem:[%s9464_s2 + $0x370] sm:$0xff] }
   0x8   :  { %206 = vmatprep.subr.mxu0 %v4890_v12  ;;  %277 = vmatprep.subr.mxu1 %v4895_v13  ;;  %v4938_v20 = vld [vmem:[%s9464_s2 + $0x348] sm:$0xff]  ;;  %v4943_v21 = vld [vmem:[%s9464_s2 + $0x358] sm:$0xff]  ;;  %v4950_v22 = vld [vmem:[%s9464_s2 + $0x340] sm:$0xff] }
   0x9   :  { %207 = vmatpush1.msra.mxu0 %v4902_v14  ;;  %278 = vmatpush1.msra.mxu1 %v4907_v15  ;;  %v4955_v23 = vld [vmem:[%s9464_s2 + $0x350] sm:$0xff]  ;;  %v4962_v24 = vld [vmem:[%s9464_s2 + $0x328] sm:$0xff]  ;;  %v4967_v25 = vld [vmem:[%s9464_s2 + $0x338] sm:$0xff] }
   0xa   :  { %208 = vmatprep.subr.mxu0 %v4914_v16  ;;  %279 = vmatprep.subr.mxu1 %v4919_v17  ;;  %v4974_v26 = vld [vmem:[%s9464_s2 + $0x320] sm:$0xff]  ;;  %v4979_v27 = vld [vmem:[%s9464_s2 + $0x330] sm:$0xff]  ;;  %v4986_v28 = vld [vmem:[%s9464_s2 + $0x308] sm:$0xff] }
   0xb   :  { %209 = vmatpush1.msra.mxu0 %v4926_v18  ;;  %280 = vmatpush1.msra.mxu1 %v4931_v19  ;;  %v4991_v29 = vld [vmem:[%s9464_s2 + $0x318] sm:$0xff]  ;;  %v4998_v30 = vld [vmem:[%s9464_s2 + $0x300] sm:$0xff]  ;;  %v5003_v31 = vld [vmem:[%s9464_s2 + $0x310] sm:$0xff] }
   0xc   :  { %210 = vmatprep.subr.mxu0 %v4938_v20  ;;  %281 = vmatprep.subr.mxu1 %v4943_v21  ;;  %v5010_v32 = vld [vmem:[%s9464_s2 + $0x2e8] sm:$0xff]  ;;  %v5015_v33 = vld [vmem:[%s9464_s2 + $0x2f8] sm:$0xff]  ;;  %v5022_v34 = vld [vmem:[%s9464_s2 + $0x2e0] sm:$0xff] }
   0xd   :  { %211 = vmatpush1.msra.mxu0 %v4950_v22  ;;  %282 = vmatpush1.msra.mxu1 %v4955_v23  ;;  %v5027_v35 = vld [vmem:[%s9464_s2 + $0x2f0] sm:$0xff]  ;;  %v5034_v36 = vld [vmem:[%s9464_s2 + $0x2c8] sm:$0xff]  ;;  %v5039_v37 = vld [vmem:[%s9464_s2 + $0x2d8] sm:$0xff] }
   0xe   :  { %212 = vmatprep.subr.mxu0 %v4962_v24  ;;  %283 = vmatprep.subr.mxu1 %v4967_v25  ;;  %v5046_v38 = vld [vmem:[%s9464_s2 + $0x2c0] sm:$0xff]  ;;  %v5051_v39 = vld [vmem:[%s9464_s2 + $0x2d0] sm:$0xff]  ;;  %v5058_v40 = vld [vmem:[%s9464_s2 + $0x2a8] sm:$0xff] }
   0xf   :  { %213 = vmatpush1.msra.mxu0 %v4974_v26  ;;  %284 = vmatpush1.msra.mxu1 %v4979_v27  ;;  %v5063_v41 = vld [vmem:[%s9464_s2 + $0x2b8] sm:$0xff]  ;;  %v5070_v42 = vld [vmem:[%s9464_s2 + $0x2a0] sm:$0xff]  ;;  %v5075_v43 = vld [vmem:[%s9464_s2 + $0x2b0] sm:$0xff] }
  0x10   :  { %214 = vmatprep.subr.mxu0 %v4986_v28  ;;  %285 = vmatprep.subr.mxu1 %v4991_v29  ;;  %v5082_v44 = vld [vmem:[%s9464_s2 + $0x288] sm:$0xff]  ;;  %v5087_v45 = vld [vmem:[%s9464_s2 + $0x298] sm:$0xff]  ;;  %v5094_v46 = vld [vmem:[%s9464_s2 + $0x280] sm:$0xff] }
  0x11   :  { %215 = vmatpush1.msra.mxu0 %v4998_v30  ;;  %286 = vmatpush1.msra.mxu1 %v5003_v31  ;;  %v5099_v47 = vld [vmem:[%s9464_s2 + $0x290] sm:$0xff] }
  0x12   :  { %216 = vmatprep.subr.mxu0 %v5010_v32  ;;  %287 = vmatprep.subr.mxu1 %v5015_v33  ;;  %9986 = vst [vmem:[#allocation7_spill] sm:$0xff] %v5099_v47 }
  0x13   :  { %217 = vmatpush1.msra.mxu0 %v5022_v34  ;;  %288 = vmatpush1.msra.mxu1 %v5027_v35 }
  0x14   :  { %218 = vmatprep.subr.mxu0 %v5034_v36  ;;  %289 = vmatprep.subr.mxu1 %v5039_v37 }
  0x15   :  { %219 = vmatpush1.msra.mxu0 %v5046_v38  ;;  %290 = vmatpush1.msra.mxu1 %v5051_v39 }
  0x16   :  { %220 = vmatprep.subr.mxu0 %v5058_v40  ;;  %291 = vmatprep.subr.mxu1 %v5063_v41 }
  0x17   :  { %13 = vsyncpa [#allocation3], 0  ;;  %221 = vmatpush1.msra.mxu0 %v5070_v42  ;;  %292 = vmatpush1.msra.mxu1 %v5075_v43  ;;  %v5106_v48 = vld [vmem:[%s9464_s2 + $0x268] sm:$0xff]  ;;  %v5111_v49 = vld [vmem:[%s9464_s2 + $0x278] sm:$0xff]  ;;  %vm4777_vm0 = vmmov 0   ;;  %vm1966_vm1 = vcmask 1041408  }
  0x18   :  { %9987 = vst [vmem:[#allocation8_spill] sm:$0xff] %v5106_v48  ;;  %9988 = vst [vmem:[#allocation9_spill] sm:$0xff] %v5111_v49  ;;  %222 = vmatprep.subr.mxu0 %v5082_v44  ;;  %293 = vmatprep.subr.mxu1 %v5087_v45  ;;  %v5118_v50 = vld [vmem:[%s9464_s2 + $0x260] sm:$0xff]  ;;  %v5123_v51 = vld [vmem:[%s9464_s2 + $0x270] sm:$0xff]  ;;  %s4778_s23 = smov [#allocation2]  }
  0x19   :  { %9989 = vst [vmem:[#allocation10_spill] sm:$0xff] %v5118_v50  ;;  %9990 = vst [vmem:[#allocation11_spill] sm:$0xff] %v5123_v51  ;;  %223 = vmatpush1.msra.mxu0 %v5094_v46  ;;  %294 = vmatpush1.msra.mxu1 %v5099_v47  ;;  %v5130_v52 = vld [vmem:[%s9464_s2 + $0x248] sm:$0xff]  ;;  %v5135_v53 = vld [vmem:[%s9464_s2 + $0x258] sm:$0xff]  ;;  %s3702_s24 = sshll.u32 %s4778_s23, 4  ;;  %s3703_s24 = int_to_ptr.vmem [resolvable:$true] %s3702_s24 }
  0x1a   :  { %9991 = vst [vmem:[#allocation12_spill] sm:$0xff] %v5130_v52  ;;  %9992 = vst [vmem:[#allocation13_spill] sm:$0xff] %v5135_v53  ;;  %224 = vmatprep.subr.mxu0 %v5106_v48  ;;  %295 = vmatprep.subr.mxu1 %v5111_v49  ;;  %v5142_v54 = vld [vmem:[%s9464_s2 + $0x240] sm:$0xff]  ;;  %v5147_v55 = vld [vmem:[%s9464_s2 + $0x250] sm:$0xff]  ;;  %s4753_s25 = scalar_lea.vmem %s3703_s24, 32  ;;  %p4758_p1 = scmp.lt.s32.totalorder %s3703_s24, %s3703_s24 }
  0x1b   :  { %9993 = vst [vmem:[#allocation14_spill] sm:$0xff] %v5142_v54  ;;  %9994 = vst [vmem:[#allocation15_spill] sm:$0xff] %v5147_v55  ;;  %225 = vmatpush1.msra.mxu0 %v5118_v50  ;;  %296 = vmatpush1.msra.mxu1 %v5123_v51  ;;  %v5154_v56 = vld [vmem:[%s9464_s2 + $0x228] sm:$0xff]  ;;  %v5159_v57 = vld [vmem:[%s9464_s2 + $0x238] sm:$0xff]  ;;  %p4754_p0 = scmp.ne.s32.totalorder %s3703_s24, %s4753_s25  ;;  %p4759_p2 = scmp.lt.s32.totalorder %s4753_s25, %s4753_s25 }
  0x1c   :  { %9995 = vst [vmem:[#allocation16_spill] sm:$0xff] %v5154_v56  ;;  %9996 = vst [vmem:[#allocation17_spill] sm:$0xff] %v5159_v57  ;;  %226 = vmatprep.subr.mxu0 %v5130_v52  ;;  %297 = vmatprep.subr.mxu1 %v5135_v53  ;;  %v5166_v58 = vld [vmem:[%s9464_s2 + $0x220] sm:$0xff]  ;;  %v5171_v59 = vld [vmem:[%s9464_s2 + $0x230] sm:$0xff] }
  0x1d   :  { %9997 = vst [vmem:[#allocation18_spill] sm:$0xff] %v5166_v58  ;;  %9998 = vst [vmem:[#allocation19_spill] sm:$0xff] %v5171_v59  ;;  %227 = vmatpush1.msra.mxu0 %v5142_v54  ;;  %298 = vmatpush1.msra.mxu1 %v5147_v55  ;;  %v5178_v60 = vld [vmem:[%s9464_s2 + $0x208] sm:$0xff]  ;;  %v5183_v61 = vld [vmem:[%s9464_s2 + $0x218] sm:$0xff]  ;;  %p4760_p3 = por %p4759_p2, %p4758_p1 }
  0x1e   :  { %9999 = vst [vmem:[#allocation20_spill] sm:$0xff] %v5178_v60  ;;  %10000 = vst [vmem:[#allocation21_spill] sm:$0xff] %v5183_v61  ;;  %228 = vmatprep.subr.mxu0 %v5154_v56  ;;  %299 = vmatprep.subr.mxu1 %v5159_v57  ;;  %v5190_v62 = vld [vmem:[%s9464_s2 + $0x200] sm:$0xff]  ;;  %v5197_v63 = vld [vmem:[%s9464_s2 + $0x210] sm:$0xff]  ;;  %v9472_v57 = vmov 0.0  }
  0x1f   :  { %10001 = vst [vmem:[#allocation22_spill] sm:$0xff] %v5190_v62  ;;  %229 = vmatpush1.msra.mxu0 %v5166_v58  ;;  %300 = vmatpush1.msra.mxu1 %v5171_v59  ;;  %10002 = vst [vmem:[#allocation23_spill] sm:$0xff] %v5197_v63  ;;  %p4761_p4 = pnand %p4760_p3, %p4754_p0 }
  0x20   :  { %230 = vmatprep.subr.mxu0 %v5178_v60  ;;  %301 = vmatprep.subr.mxu1 %v5183_v61 }
  0x21   :  { %231 = vmatpush1.msra.mxu0 %v5190_v62  ;;  %264 = vmatprep.mubr.f32.mxu0 %v9472_v57 }
  0x22   :  { %302 = vmatpush1.msra.mxu1 %v5197_v63  ;;  %335 = vmatprep.mubr.f32.mxu1 %v9472_v57 }
  0x23   :  { %265 = vmatmul.mubr.f32.vlgmr.msra.gmra.mxu0 %v9472_v57  ;;  %336 = vmatmul.mubr.f32.vlgmr.msra.gmra.mxu1 %v9472_v57  ;;  %v10003_v57 = vld [vmem:[#allocation17_spill] sm:$0xff] }
  0x24   :  { %392 = vmatprep.subr.mxu0 %v4822_v0  ;;  %463 = vmatprep.subr.mxu1 %v4827_v1 }
  0x25   :  { %393 = vmatpush1.msra.mxu0 %v4832_v2  ;;  %464 = vmatpush1.msra.mxu1 %v4839_v3 }
  0x26   :  { %394 = vmatprep.subr.mxu0 %v4844_v4  ;;  %465 = vmatprep.subr.mxu1 %v4849_v5 }
  0x27   :  { %395 = vmatpush1.msra.mxu0 %v4856_v6  ;;  %466 = vmatpush1.msra.mxu1 %v4861_v7 }
  0x28   :  { %396 = vmatprep.subr.mxu0 %v4866_v8  ;;  %467 = vmatprep.subr.mxu1 %v4873_v9 }
  0x29   :  { %397 = vmatpush1.msra.mxu0 %v4878_v10  ;;  %468 = vmatpush1.msra.mxu1 %v4883_v11 }
  0x2a   :  { %398 = vmatprep.subr.mxu0 %v4890_v12  ;;  %469 = vmatprep.subr.mxu1 %v4895_v13 }
  0x2b   :  { %399 = vmatpush1.msra.mxu0 %v4902_v14  ;;  %470 = vmatpush1.msra.mxu1 %v4907_v15 }
  0x2c   :  { %400 = vmatprep.subr.mxu0 %v4914_v16  ;;  %471 = vmatprep.subr.mxu1 %v4919_v17 }
  0x2d   :  { %401 = vmatpush1.msra.mxu0 %v4926_v18  ;;  %472 = vmatpush1.msra.mxu1 %v4931_v19 }
  0x2e   :  { %402 = vmatprep.subr.mxu0 %v4938_v20  ;;  %473 = vmatprep.subr.mxu1 %v4943_v21 }
  0x2f   :  { %403 = vmatpush1.msra.mxu0 %v4950_v22  ;;  %474 = vmatpush1.msra.mxu1 %v4955_v23 }
  0x30   :  { %404 = vmatprep.subr.mxu0 %v4962_v24  ;;  %475 = vmatprep.subr.mxu1 %v4967_v25 }
  0x31   :  { %405 = vmatpush1.msra.mxu0 %v4974_v26  ;;  %476 = vmatpush1.msra.mxu1 %v4979_v27 }
  0x32   :  { %406 = vmatprep.subr.mxu0 %v4986_v28  ;;  %477 = vmatprep.subr.mxu1 %v4991_v29 }
  0x33   :  { %407 = vmatpush1.msra.mxu0 %v4998_v30  ;;  %478 = vmatpush1.msra.mxu1 %v5003_v31 }
  0x34   :  { %408 = vmatprep.subr.mxu0 %v5010_v32  ;;  %479 = vmatprep.subr.mxu1 %v5015_v33 }
  0x35   :  { %409 = vmatpush1.msra.mxu0 %v5022_v34  ;;  %480 = vmatpush1.msra.mxu1 %v5027_v35 }
  0x36   :  { %410 = vmatprep.subr.mxu0 %v5034_v36  ;;  %481 = vmatprep.subr.mxu1 %v5039_v37 }
  0x37   :  { %411 = vmatpush1.msra.mxu0 %v5046_v38  ;;  %482 = vmatpush1.msra.mxu1 %v5051_v39 }
  0x38   :  { %412 = vmatprep.subr.mxu0 %v5058_v40  ;;  %483 = vmatprep.subr.mxu1 %v5063_v41 }
  0x39   :  { %413 = vmatpush1.msra.mxu0 %v5070_v42  ;;  %484 = vmatpush1.msra.mxu1 %v5075_v43 }
  0x3a   :  { %414 = vmatprep.subr.mxu0 %v5082_v44  ;;  %485 = vmatprep.subr.mxu1 %v5087_v45 }
  0x3b   :  { %415 = vmatpush1.msra.mxu0 %v5094_v46  ;;  %486 = vmatpush1.msra.mxu1 %v5099_v47 }
  0x3c   :  { %416 = vmatprep.subr.mxu0 %v5106_v48  ;;  %487 = vmatprep.subr.mxu1 %v5111_v49 }
  0x3d   :  { %417 = vmatpush1.msra.mxu0 %v5118_v50  ;;  %488 = vmatpush1.msra.mxu1 %v5123_v51 }
  0x3e   :  { %418 = vmatprep.subr.mxu0 %v5130_v52  ;;  %489 = vmatprep.subr.mxu1 %v5135_v53  ;;  %v10004_v52 = vmov 0.0  }
  0x3f   :  { %419 = vmatpush1.msra.mxu0 %v5142_v54  ;;  %490 = vmatpush1.msra.mxu1 %v5147_v55 }
  0x40   :  { %420 = vmatprep.subr.mxu0 %v5154_v56  ;;  %491 = vmatprep.subr.mxu1 %v10003_v57  ;;  %v172_v57 = vlaneseq }
  0x41   :  { %421 = vmatpush1.msra.mxu0 %v5166_v58  ;;  %492 = vmatpush1.msra.mxu1 %v5171_v59  ;;  %v4776_v58 = vmov 1983009808  }
  0x42   :  { %422 = vmatprep.subr.mxu0 %v5178_v60  ;;  %493 = vmatprep.subr.mxu1 %v5183_v61  ;;  %v349_v56 = vunpack.c.l.s4 %v4776_v58  ;;  %v5275_v59 = vshrl.u32 %v172_v57, 7  ;;  %v199_v58 = vld [vmem:[%s9462_s0] sm:$0xff] }
  0x43   :  { %423 = vmatpush1.msra.mxu0 %v5190_v62  ;;  %456 = vmatprep.mubr.f32.mxu0 %v10004_v52 }
  0x44   :  { %494 = vmatpush1.msra.mxu1 %v5197_v63  ;;  %527 = vmatprep.mubr.f32.mxu1 %v10004_v52  ;;  %10005 = vst [vmem:[#allocation24_spill] sm:$0xff] %v5275_v59  ;;  %v350_v60 = vunpack.c.0.s8 %v349_v56 }
  0x45   :  { %584 = vmatprep.subr.mxu0 %v4822_v0  ;;  %655 = vmatprep.subr.mxu1 %v4827_v1 }
  0x46   :  { %v5278_v62 = vsub.s32 %v350_v60, %v5275_v59 }
  0x48   :  { %10006 = vst [vmem:[#allocation25_spill] sm:$0xff] %v5278_v62 }
  0xe3   :  { %v266_v55 = vpop.f32.mrf.mxu0  ;;  %v337_v61 = vpop.f32.mrf.mxu1 }
  0xe5   :  { %v268_v54 = vpop.f32.mrf.mxu0  ;;  %v339_v53 = vpop.f32.mrf.mxu1 }
  0xe6   :  { %v346_v63 = vcombine.low %v266_v55, %v268_v54  ;;  %v347_v51 = vcombine.low %v337_v61, %v339_v53 }
  0xe8   :  { %v354_v52 = vrot.slane %v346_v63, %v5278_v62  ;;  %v361_v0 = vrot.slane %v347_v51, %v5278_v62 }
  0xea   :  { %v362_v57 = vcombine.low %v354_v52, %v361_v0 }
  0xec   :  { %v364_v1 = vadd.f32 %v362_v57, %v199_v58 }
  0xee   :  { %v365_v56 = vmul.f32 0.5, %v364_v1  ;;  %v370_v50 = vrot.slane %v364_v1, 2  ;;  %v376_v60 = vrot.slane %v364_v1, 4  ;;  %v379_v59 = vrot.slane %v364_v1, 6 }
  0xf0   :  { %4149 = vtanh.f32 %v365_v56  ;;  %v372_v49 = vmul.f32 0.5, %v370_v50  ;;  %v381_v54 = vmul.f32 0.5, %v379_v59  ;;  %v10009_v59 = vld [vmem:[#allocation9_spill] sm:$0xff]  ;;  %v10011_v56 = vld [vmem:[#allocation11_spill] sm:$0xff] }
  0xf2   :  { %4151 = vtanh.f32 %v372_v49 }
  0xf3   :  { %4153 = vtanh.f32 %v376_v60  ;;  %v10012_v60 = vld [vmem:[#allocation12_spill] sm:$0xff] }
  0xf4   :  { %4155 = vtanh.f32 %v381_v54  ;;  %v10013_v54 = vld [vmem:[#allocation13_spill] sm:$0xff] }
  0xfd   :  { %v4150_v53 = vpop.eup %4149 }
  0xfe   :  { %v367_v55 = vadd.f32 1.0, %v4150_v53  ;;  %v10014_v53 = vld [vmem:[#allocation14_spill] sm:$0xff] }
  0xff   :  { %v4152_v61 = vpop.eup %4151 }
 0x100   :  { %v368_v63 = vmul.f32 0.5, %v367_v55  ;;  %v374_v51 = vadd.f32 1.0, %v4152_v61  ;;  %v4154_v48 = vpop.eup %4153  ;;  %v10015_v55 = vld [vmem:[#allocation15_spill] sm:$0xff]  ;;  %v10016_v61 = vld [vmem:[#allocation16_spill] sm:$0xff] }
 0x101   :  { %v4156_v50 = vpop.eup %4155 }
 0x102   :  { %v375_v62 = vmul.f32 0.5, %v374_v51  ;;  %v386_v0 = vmul.f32 %v4154_v48, %v368_v63  ;;  %v383_v49 = vadd.f32 1.0, %v4156_v50  ;;  %v10008_v48 = vld [vmem:[#allocation8_spill] sm:$0xff]  ;;  %v10017_v63 = vld [vmem:[#allocation17_spill] sm:$0xff]  ;;  %v10018_v51 = vld [vmem:[#allocation18_spill] sm:$0xff] }
 0x103   :  { %v10020_v50 = vld [vmem:[#allocation20_spill] sm:$0xff] }
 0x104   :  { %v385_v47 = vmul.f32 0.0, %v375_v62  ;;  %v384_v58 = vmul.f32 0.5, %v383_v49  ;;  %v10010_v62 = vld [vmem:[#allocation10_spill] sm:$0xff]  ;;  %v10021_v49 = vld [vmem:[#allocation21_spill] sm:$0xff] }
 0x106   :  { %v5285_v52 = vadd.f32 %v386_v0, %v385_v47  ;;  %v10007_v47 = vld [vmem:[#allocation7_spill] sm:$0xff] }
 0x107   :  { %v10019_v0 = vld [vmem:[#allocation19_spill] sm:$0xff] }
 0x108   :  { %4157 = vtanh.f32 %v5285_v52 }
 0x115   :  { %v4158_v57 = vpop.eup %4157 }
 0x116   :  { %v389_v1 = vmul.f32 %v4158_v57, %v384_v58  ;;  %v10022_v58 = vld [vmem:[#allocation22_spill] sm:$0xff]  ;;  %v10023_v57 = vmov 0.0  }
 0x118   :  { %457 = vmatmul.mubr.f32.vlgmr.msra.gmra.mxu0 %v389_v1  ;;  %528 = vmatmul.mubr.f32.vlgmr.msra.gmra.mxu1 %v389_v1  ;;  %v10024_v1 = vld [vmem:[#allocation23_spill] sm:$0xff] }
 0x119   :  { %585 = vmatpush1.msra.mxu0 %v4832_v2  ;;  %656 = vmatpush1.msra.mxu1 %v4839_v3 }
 0x11a   :  { %586 = vmatprep.subr.mxu0 %v4844_v4  ;;  %657 = vmatprep.subr.mxu1 %v4849_v5 }
 0x11b   :  { %587 = vmatpush1.msra.mxu0 %v4856_v6  ;;  %658 = vmatpush1.msra.mxu1 %v4861_v7 }
 0x11c   :  { %588 = vmatprep.subr.mxu0 %v4866_v8  ;;  %659 = vmatprep.subr.mxu1 %v4873_v9 }
 0x11d   :  { %589 = vmatpush1.msra.mxu0 %v4878_v10  ;;  %660 = vmatpush1.msra.mxu1 %v4883_v11 }
 0x11e   :  { %590 = vmatprep.subr.mxu0 %v4890_v12  ;;  %661 = vmatprep.subr.mxu1 %v4895_v13 }
 0x11f   :  { %591 = vmatpush1.msra.mxu0 %v4902_v14  ;;  %662 = vmatpush1.msra.mxu1 %v4907_v15 }
 0x120   :  { %592 = vmatprep.subr.mxu0 %v4914_v16  ;;  %663 = vmatprep.subr.mxu1 %v4919_v17 }
 0x121   :  { %593 = vmatpush1.msra.mxu0 %v4926_v18  ;;  %664 = vmatpush1.msra.mxu1 %v4931_v19 }
 0x122   :  { %594 = vmatprep.subr.mxu0 %v4938_v20  ;;  %665 = vmatprep.subr.mxu1 %v4943_v21 }
 0x123   :  { %595 = vmatpush1.msra.mxu0 %v4950_v22  ;;  %666 = vmatpush1.msra.mxu1 %v4955_v23 }
 0x124   :  { %596 = vmatprep.subr.mxu0 %v4962_v24  ;;  %667 = vmatprep.subr.mxu1 %v4967_v25 }
 0x125   :  { %597 = vmatpush1.msra.mxu0 %v4974_v26  ;;  %668 = vmatpush1.msra.mxu1 %v4979_v27 }
 0x126   :  { %598 = vmatprep.subr.mxu0 %v4986_v28  ;;  %669 = vmatprep.subr.mxu1 %v4991_v29 }
 0x127   :  { %599 = vmatpush1.msra.mxu0 %v4998_v30  ;;  %670 = vmatpush1.msra.mxu1 %v5003_v31 }
 0x128   :  { %600 = vmatprep.subr.mxu0 %v5010_v32  ;;  %671 = vmatprep.subr.mxu1 %v5015_v33 }
 0x129   :  { %601 = vmatpush1.msra.mxu0 %v5022_v34  ;;  %672 = vmatpush1.msra.mxu1 %v5027_v35 }
 0x12a   :  { %602 = vmatprep.subr.mxu0 %v5034_v36  ;;  %673 = vmatprep.subr.mxu1 %v5039_v37 }
 0x12b   :  { %603 = vmatpush1.msra.mxu0 %v5046_v38  ;;  %674 = vmatpush1.msra.mxu1 %v5051_v39 }
 0x12c   :  { %604 = vmatprep.subr.mxu0 %v5058_v40  ;;  %675 = vmatprep.subr.mxu1 %v5063_v41 }
 0x12d   :  { %605 = vmatpush1.msra.mxu0 %v5070_v42  ;;  %676 = vmatpush1.msra.mxu1 %v5075_v43 }
 0x12e   :  { %606 = vmatprep.subr.mxu0 %v5082_v44  ;;  %677 = vmatprep.subr.mxu1 %v5087_v45 }
 0x12f   :  { %607 = vmatpush1.msra.mxu0 %v5094_v46  ;;  %678 = vmatpush1.msra.mxu1 %v10007_v47 }
 0x130   :  { %608 = vmatprep.subr.mxu0 %v10008_v48  ;;  %679 = vmatprep.subr.mxu1 %v10009_v59 }
 0x131   :  { %609 = vmatpush1.msra.mxu0 %v10010_v62  ;;  %680 = vmatpush1.msra.mxu1 %v10011_v56 }
 0x132   :  { %610 = vmatprep.subr.mxu0 %v10012_v60  ;;  %681 = vmatprep.subr.mxu1 %v10013_v54  ;;  %v10027_v60 = vld [vmem:[#allocation25_spill] sm:$0xff] }
 0x133   :  { %611 = vmatpush1.msra.mxu0 %v10014_v53  ;;  %682 = vmatpush1.msra.mxu1 %v10015_v55  ;;  %v10025_v55 = vld [vmem:[#allocation5_spill] sm:$0xff] }
 0x134   :  { %612 = vmatprep.subr.mxu0 %v10016_v61  ;;  %683 = vmatprep.subr.mxu1 %v10017_v63  ;;  %v10026_v61 = vld [vmem:[#allocation6_spill] sm:$0xff] }
 0x135   :  { %613 = vmatpush1.msra.mxu0 %v10018_v51  ;;  %684 = vmatpush1.msra.mxu1 %v10019_v0 }
 0x136   :  { %614 = vmatprep.subr.mxu0 %v10020_v50  ;;  %685 = vmatprep.subr.mxu1 %v10021_v49 }
 0x137   :  { %615 = vmatpush1.msra.mxu0 %v10022_v58  ;;  %648 = vmatprep.mubr.f32.mxu0 %v10023_v57 }
 0x138   :  { %686 = vmatpush1.msra.mxu1 %v10024_v1  ;;  %719 = vmatprep.mubr.f32.mxu1 %v10023_v57  ;;  %v3715_v1 = vld [vmem:[%s9462_s0 + $0x8] sm:$0xff] }
 0x139   :  { %776 = vmatprep.subr.mxu0 %v10025_v55  ;;  %847 = vmatprep.subr.mxu1 %v10026_v61 }
 0x1d8   :  { %v458_v63 = vpop.f32.mrf.mxu0  ;;  %v529_v51 = vpop.f32.mrf.mxu1 }
 0x1da   :  { %v460_v53 = vpop.f32.mrf.mxu0  ;;  %v531_v0 = vpop.f32.mrf.mxu1 }
 0x1db   :  { %v538_v54 = vcombine.low %v458_v63, %v460_v53  ;;  %v539_v50 = vcombine.low %v529_v51, %v531_v0 }
 0x1dd   :  { %v546_v49 = vrot.slane %v538_v54, %v10027_v60  ;;  %v553_v58 = vrot.slane %v539_v50, %v10027_v60 }
 0x1df   :  { %v554_v56 = vcombine.low %v546_v49, %v553_v58 }
 0x1e1   :  { %v556_v57 = vadd.f32 %v3715_v1, %v554_v56  ;;  %v10032_v1 = vld [vmem:[#allocation11_spill] sm:$0xff] }
 0x1e3   :  { %v557_v62 = vmul.f32 0.5, %v556_v57  ;;  %v562_v55 = vrot.slane %v556_v57, 2  ;;  %v568_v59 = vrot.slane %v556_v57, 4  ;;  %v571_v48 = vrot.slane %v556_v57, 6  ;;  %v10031_v57 = vld [vmem:[#allocation10_spill] sm:$0xff] }
 0x1e5   :  { %4159 = vtanh.f32 %v557_v62  ;;  %v564_v61 = vmul.f32 0.5, %v562_v55  ;;  %v573_v53 = vmul.f32 0.5, %v571_v48 }
 0x1e7   :  { %4161 = vtanh.f32 %v564_v61 }
 0x1e8   :  { %4163 = vtanh.f32 %v568_v59 }
 0x1e9   :  { %4165 = vtanh.f32 %v573_v53  ;;  %v10033_v53 = vld [vmem:[#allocation12_spill] sm:$0xff] }
 0x1f2   :  { %v4160_v63 = vpop.eup %4159 }
 0x1f3   :  { %v559_v51 = vadd.f32 1.0, %v4160_v63  ;;  %v10034_v63 = vld [vmem:[#allocation13_spill] sm:$0xff] }
 0x1f4   :  { %v4162_v54 = vpop.eup %4161 }
 0x1f5   :  { %v560_v0 = vmul.f32 0.5, %v559_v51  ;;  %v566_v50 = vadd.f32 1.0, %v4162_v54  ;;  %v4164_v47 = vpop.eup %4163  ;;  %v10035_v51 = vld [vmem:[#allocation14_spill] sm:$0xff]  ;;  %v10036_v54 = vld [vmem:[#allocation15_spill] sm:$0xff] }
 0x1f6   :  { %v4166_v62 = vpop.eup %4165 }
 0x1f7   :  { %v567_v60 = vmul.f32 0.5, %v566_v50  ;;  %v578_v56 = vmul.f32 %v4164_v47, %v560_v0  ;;  %v575_v55 = vadd.f32 1.0, %v4166_v62  ;;  %v10029_v47 = vld [vmem:[#allocation8_spill] sm:$0xff]  ;;  %v10038_v50 = vld [vmem:[#allocation17_spill] sm:$0xff] }
 0x1f8   :  { %v10037_v0 = vld [vmem:[#allocation16_spill] sm:$0xff] }
 0x1f9   :  { %v577_v49 = vmul.f32 %v567_v60, %v5285_v52  ;;  %v576_v59 = vmul.f32 0.5, %v575_v55  ;;  %v10028_v52 = vld [vmem:[#allocation7_spill] sm:$0xff]  ;;  %v10030_v60 = vld [vmem:[#allocation9_spill] sm:$0xff]  ;;  %v10041_v62 = vld [vmem:[#allocation20_spill] sm:$0xff] }
 0x1fa   :  { %v10042_v55 = vld [vmem:[#allocation21_spill] sm:$0xff] }
 0x1fb   :  { %v5360_v58 = vadd.f32 %v578_v56, %v577_v49  ;;  %v10039_v49 = vld [vmem:[#allocation18_spill] sm:$0xff]  ;;  %v10040_v56 = vld [vmem:[#allocation19_spill] sm:$0xff] }
 0x1fd   :  { %4167 = vtanh.f32 %v5360_v58 }
 0x20a   :  { %v4168_v61 = vpop.eup %4167 }
 0x20b   :  { %v581_v48 = vmul.f32 %v4168_v61, %v576_v59  ;;  %v10043_v59 = vld [vmem:[#allocation22_spill] sm:$0xff]  ;;  %v10044_v61 = vmov 0.0  }
 0x20d   :  { %649 = vmatmul.mubr.f32.vlgmr.msra.gmra.mxu0 %v581_v48  ;;  %720 = vmatmul.mubr.f32.vlgmr.msra.gmra.mxu1 %v581_v48  ;;  %v10045_v48 = vld [vmem:[#allocation23_spill] sm:$0xff] }
 0x20e   :  { %777 = vmatpush1.msra.mxu0 %v4832_v2  ;;  %848 = vmatpush1.msra.mxu1 %v4839_v3 }
 0x20f   :  { %778 = vmatprep.subr.mxu0 %v4844_v4  ;;  %849 = vmatprep.subr.mxu1 %v4849_v5 }
 0x210   :  { %779 = vmatpush1.msra.mxu0 %v4856_v6  ;;  %850 = vmatpush1.msra.mxu1 %v4861_v7 }
 0x211   :  { %780 = vmatprep.subr.mxu0 %v4866_v8  ;;  %851 = vmatprep.subr.mxu1 %v4873_v9 }
 0x212   :  { %781 = vmatpush1.msra.mxu0 %v4878_v10  ;;  %852 = vmatpush1.msra.mxu1 %v4883_v11 }
 0x213   :  { %782 = vmatprep.subr.mxu0 %v4890_v12  ;;  %853 = vmatprep.subr.mxu1 %v4895_v13 }
 0x214   :  { %783 = vmatpush1.msra.mxu0 %v4902_v14  ;;  %854 = vmatpush1.msra.mxu1 %v4907_v15 }
 0x215   :  { %784 = vmatprep.subr.mxu0 %v4914_v16  ;;  %855 = vmatprep.subr.mxu1 %v4919_v17 }
 0x216   :  { %785 = vmatpush1.msra.mxu0 %v4926_v18  ;;  %856 = vmatpush1.msra.mxu1 %v4931_v19 }
 0x217   :  { %786 = vmatprep.subr.mxu0 %v4938_v20  ;;  %857 = vmatprep.subr.mxu1 %v4943_v21 }
 0x218   :  { %787 = vmatpush1.msra.mxu0 %v4950_v22  ;;  %858 = vmatpush1.msra.mxu1 %v4955_v23 }
 0x219   :  { %788 = vmatprep.subr.mxu0 %v4962_v24  ;;  %859 = vmatprep.subr.mxu1 %v4967_v25 }
 0x21a   :  { %789 = vmatpush1.msra.mxu0 %v4974_v26  ;;  %860 = vmatpush1.msra.mxu1 %v4979_v27 }
 0x21b   :  { %790 = vmatprep.subr.mxu0 %v4986_v28  ;;  %861 = vmatprep.subr.mxu1 %v4991_v29 }
 0x21c   :  { %791 = vmatpush1.msra.mxu0 %v4998_v30  ;;  %862 = vmatpush1.msra.mxu1 %v5003_v31 }
 0x21d   :  { %792 = vmatprep.subr.mxu0 %v5010_v32  ;;  %863 = vmatprep.subr.mxu1 %v5015_v33 }
 0x21e   :  { %793 = vmatpush1.msra.mxu0 %v5022_v34  ;;  %864 = vmatpush1.msra.mxu1 %v5027_v35 }
 0x21f   :  { %794 = vmatprep.subr.mxu0 %v5034_v36  ;;  %865 = vmatprep.subr.mxu1 %v5039_v37 }
 0x220   :  { %795 = vmatpush1.msra.mxu0 %v5046_v38  ;;  %866 = vmatpush1.msra.mxu1 %v5051_v39 }
 0x221   :  { %796 = vmatprep.subr.mxu0 %v5058_v40  ;;  %867 = vmatprep.subr.mxu1 %v5063_v41 }
 0x222   :  { %797 = vmatpush1.msra.mxu0 %v5070_v42  ;;  %868 = vmatpush1.msra.mxu1 %v5075_v43 }
 0x223   :  { %798 = vmatprep.subr.mxu0 %v5082_v44  ;;  %869 = vmatprep.subr.mxu1 %v5087_v45 }
 0x224   :  { %799 = vmatpush1.msra.mxu0 %v5094_v46  ;;  %870 = vmatpush1.msra.mxu1 %v10028_v52 }
 0x225   :  { %800 = vmatprep.subr.mxu0 %v10029_v47  ;;  %871 = vmatprep.subr.mxu1 %v10030_v60 }
 0x226   :  { %801 = vmatpush1.msra.mxu0 %v10031_v57  ;;  %872 = vmatpush1.msra.mxu1 %v10032_v1 }
 0x227   :  { %802 = vmatprep.subr.mxu0 %v10033_v53  ;;  %873 = vmatprep.subr.mxu1 %v10034_v63  ;;  %v10048_v53 = vld [vmem:[#allocation25_spill] sm:$0xff] }
 0x228   :  { %803 = vmatpush1.msra.mxu0 %v10035_v51  ;;  %874 = vmatpush1.msra.mxu1 %v10036_v54  ;;  %v10046_v54 = vld [vmem:[#allocation5_spill] sm:$0xff] }
 0x229   :  { %804 = vmatprep.subr.mxu0 %v10037_v0  ;;  %875 = vmatprep.subr.mxu1 %v10038_v50  ;;  %v10047_v0 = vld [vmem:[#allocation6_spill] sm:$0xff] }
 0x22a   :  { %805 = vmatpush1.msra.mxu0 %v10039_v49  ;;  %876 = vmatpush1.msra.mxu1 %v10040_v56 }
 0x22b   :  { %806 = vmatprep.subr.mxu0 %v10041_v62  ;;  %877 = vmatprep.subr.mxu1 %v10042_v55 }
 0x22c   :  { %807 = vmatpush1.msra.mxu0 %v10043_v59  ;;  %840 = vmatprep.mubr.f32.mxu0 %v10044_v61 }
 0x22d   :  { %878 = vmatpush1.msra.mxu1 %v10045_v48  ;;  %911 = vmatprep.mubr.f32.mxu1 %v10044_v61  ;;  %v3716_v48 = vld [vmem:[%s9462_s0 + $0x10] sm:$0xff] }
 0x22e   :  { %968 = vmatprep.subr.mxu0 %v10046_v54  ;;  %1039 = vmatprep.subr.mxu1 %v10047_v0 }
 0x2cd   :  { %v650_v50 = vpop.f32.mrf.mxu0  ;;  %v721_v49 = vpop.f32.mrf.mxu1 }
 0x2cf   :  { %v652_v51 = vpop.f32.mrf.mxu0  ;;  %v723_v56 = vpop.f32.mrf.mxu1 }
 0x2d0   :  { %v730_v63 = vcombine.low %v650_v50, %v652_v51  ;;  %v731_v62 = vcombine.low %v721_v49, %v723_v56 }
 0x2d2   :  { %v738_v55 = vrot.slane %v730_v63, %v10048_v53  ;;  %v745_v59 = vrot.slane %v731_v62, %v10048_v53 }
 0x2d4   :  { %v746_v1 = vcombine.low %v738_v55, %v745_v59 }
 0x2d6   :  { %v748_v61 = vadd.f32 %v3716_v48, %v746_v1 }
 0x2d8   :  { %v749_v57 = vmul.f32 0.5, %v748_v61  ;;  %v754_v54 = vrot.slane %v748_v61, 2  ;;  %v760_v60 = vrot.slane %v748_v61, 4  ;;  %v763_v47 = vrot.slane %v748_v61, 6 }
 0x2da   :  { %4169 = vtanh.f32 %v749_v57  ;;  %v756_v0 = vmul.f32 0.5, %v754_v54  ;;  %v765_v51 = vmul.f32 0.5, %v763_v47 }
 0x2dc   :  { %4171 = vtanh.f32 %v756_v0 }
 0x2dd   :  { %4173 = vtanh.f32 %v760_v60 }
 0x2de   :  { %4175 = vtanh.f32 %v765_v51 }
 0x2e7   :  { %v4170_v50 = vpop.eup %4169 }
 0x2e8   :  { %v751_v49 = vadd.f32 1.0, %v4170_v50 }
 0x2e9   :  { %v4172_v63 = vpop.eup %4171 }
 0x2ea   :  { %v752_v56 = vmul.f32 0.5, %v751_v49  ;;  %v758_v62 = vadd.f32 1.0, %v4172_v63  ;;  %v4174_v52 = vpop.eup %4173  ;;  %v5526_v63 = vld [vmem:[%s9464_s2 + $0x3e0] sm:$0xff] }
 0x2eb   :  { %v4176_v57 = vpop.eup %4175 }
 0x2ec   :  { %v759_v53 = vmul.f32 0.5, %v758_v62  ;;  %v770_v1 = vmul.f32 %v4174_v52, %v752_v56  ;;  %v767_v48 = vadd.f32 1.0, %v4176_v57  ;;  %v5532_v56 = vld [vmem:[%s9464_s2 + $0x3f0] sm:$0xff]  ;;  %v5538_v62 = vld [vmem:[%s9464_s2 + $0x3c8] sm:$0xff] }
 0x2ed   :  { %v5562_v57 = vld [vmem:[%s9464_s2 + $0x3a8] sm:$0xff] }
 0x2ee   :  { %v769_v55 = vmul.f32 %v759_v53, %v5360_v58  ;;  %v768_v60 = vmul.f32 0.5, %v767_v48  ;;  %v5568_v48 = vld [vmem:[%s9464_s2 + $0x3b8] sm:$0xff] }
 0x2f0   :  { %v5435_v59 = vadd.f32 %v770_v1, %v769_v55  ;;  %v5544_v55 = vld [vmem:[%s9464_s2 + $0x3d8] sm:$0xff]  ;;  %v5550_v1 = vld [vmem:[%s9464_s2 + $0x3c0] sm:$0xff] }
 0x2f2   :  { %4177 = vtanh.f32 %v5435_v59 }
 0x2ff   :  { %v4178_v61 = vpop.eup %4177 }
 0x300   :  { %v773_v47 = vmul.f32 %v4178_v61, %v768_v60  ;;  %v5574_v60 = vld [vmem:[%s9464_s2 + $0x3a0] sm:$0xff]  ;;  %v5580_v61 = vld [vmem:[%s9464_s2 + $0x3b0] sm:$0xff] }
 0x302   :  { %841 = vmatmul.mubr.f32.vlgmr.msra.gmra.mxu0 %v773_v47  ;;  %912 = vmatmul.mubr.f32.vlgmr.msra.gmra.mxu1 %v773_v47  ;;  %v5586_v47 = vld [vmem:[%s9464_s2 + $0x388] sm:$0xff] }
 0x303   :  { %969 = vmatpush1.msra.mxu0 %v4832_v2  ;;  %1040 = vmatpush1.msra.mxu1 %v4839_v3  ;;  %v10049_v2 = vld [vmem:[#allocation7_spill] sm:$0xff]  ;;  %v10050_v3 = vld [vmem:[#allocation8_spill] sm:$0xff] }
 0x304   :  { %970 = vmatprep.subr.mxu0 %v4844_v4  ;;  %1041 = vmatprep.subr.mxu1 %v4849_v5  ;;  %v10051_v4 = vld [vmem:[#allocation9_spill] sm:$0xff]  ;;  %v10052_v5 = vld [vmem:[#allocation10_spill] sm:$0xff] }
 0x305   :  { %971 = vmatpush1.msra.mxu0 %v4856_v6  ;;  %1042 = vmatpush1.msra.mxu1 %v4861_v7  ;;  %v10053_v6 = vld [vmem:[#allocation11_spill] sm:$0xff]  ;;  %v10054_v7 = vld [vmem:[#allocation12_spill] sm:$0xff] }
 0x306   :  { %972 = vmatprep.subr.mxu0 %v4866_v8  ;;  %1043 = vmatprep.subr.mxu1 %v4873_v9  ;;  %v10055_v8 = vld [vmem:[#allocation13_spill] sm:$0xff]  ;;  %v10056_v9 = vld [vmem:[#allocation14_spill] sm:$0xff] }
 0x307   :  { %973 = vmatpush1.msra.mxu0 %v4878_v10  ;;  %1044 = vmatpush1.msra.mxu1 %v4883_v11  ;;  %v10057_v10 = vld [vmem:[#allocation15_spill] sm:$0xff]  ;;  %v10058_v11 = vld [vmem:[#allocation16_spill] sm:$0xff] }
 0x308   :  { %974 = vmatprep.subr.mxu0 %v4890_v12  ;;  %1045 = vmatprep.subr.mxu1 %v4895_v13  ;;  %v10059_v12 = vld [vmem:[#allocation17_spill] sm:$0xff]  ;;  %v10060_v13 = vld [vmem:[#allocation18_spill] sm:$0xff] }
 0x309   :  { %975 = vmatpush1.msra.mxu0 %v4902_v14  ;;  %1046 = vmatpush1.msra.mxu1 %v4907_v15  ;;  %v10061_v14 = vld [vmem:[#allocation19_spill] sm:$0xff]  ;;  %v10062_v15 = vld [vmem:[#allocation20_spill] sm:$0xff] }
 0x30a   :  { %976 = vmatprep.subr.mxu0 %v4914_v16  ;;  %1047 = vmatprep.subr.mxu1 %v4919_v17  ;;  %v10063_v16 = vld [vmem:[#allocation21_spill] sm:$0xff]  ;;  %v10064_v17 = vld [vmem:[#allocation22_spill] sm:$0xff] }
 0x30b   :  { %977 = vmatpush1.msra.mxu0 %v4926_v18  ;;  %1048 = vmatpush1.msra.mxu1 %v4931_v19  ;;  %v10065_v18 = vmov 0.0   ;;  %v10066_v19 = vld [vmem:[#allocation23_spill] sm:$0xff] }
 0x30c   :  { %978 = vmatprep.subr.mxu0 %v4938_v20  ;;  %1049 = vmatprep.subr.mxu1 %v4943_v21  ;;  %v5505_v20 = vld [vmem:[%s9464_s2 + $0x3e8] sm:$0xff]  ;;  %v5511_v21 = vld [vmem:[%s9464_s2 + $0x3f8] sm:$0xff] }
 0x30d   :  { %979 = vmatpush1.msra.mxu0 %v4950_v22  ;;  %1050 = vmatpush1.msra.mxu1 %v4955_v23  ;;  %10067 = vst [vmem:[#allocation5_spill] sm:$0xff] %v5505_v20  ;;  %10068 = vst [vmem:[#allocation6_spill] sm:$0xff] %v5511_v21 }
 0x30e   :  { %980 = vmatprep.subr.mxu0 %v4962_v24  ;;  %1051 = vmatprep.subr.mxu1 %v4967_v25 }
 0x30f   :  { %981 = vmatpush1.msra.mxu0 %v4974_v26  ;;  %1052 = vmatpush1.msra.mxu1 %v4979_v27 }
 0x310   :  { %982 = vmatprep.subr.mxu0 %v4986_v28  ;;  %1053 = vmatprep.subr.mxu1 %v4991_v29  ;;  %v10069_v28 = vld [vmem:[#allocation25_spill] sm:$0xff] }
 0x311   :  { %983 = vmatpush1.msra.mxu0 %v4998_v30  ;;  %1054 = vmatpush1.msra.mxu1 %v5003_v31  ;;  %v3717_v31 = vld [vmem:[%s9462_s0 + $0x18] sm:$0xff] }
 0x312   :  { %984 = vmatprep.subr.mxu0 %v5010_v32  ;;  %1055 = vmatprep.subr.mxu1 %v5015_v33 }
 0x313   :  { %985 = vmatpush1.msra.mxu0 %v5022_v34  ;;  %1056 = vmatpush1.msra.mxu1 %v5027_v35 }
 0x314   :  { %986 = vmatprep.subr.mxu0 %v5034_v36  ;;  %1057 = vmatprep.subr.mxu1 %v5039_v37 }
 0x315   :  { %987 = vmatpush1.msra.mxu0 %v5046_v38  ;;  %1058 = vmatpush1.msra.mxu1 %v5051_v39 }
 0x316   :  { %988 = vmatprep.subr.mxu0 %v5058_v40  ;;  %1059 = vmatprep.subr.mxu1 %v5063_v41 }
 0x317   :  { %989 = vmatpush1.msra.mxu0 %v5070_v42  ;;  %1060 = vmatpush1.msra.mxu1 %v5075_v43 }
 0x318   :  { %990 = vmatprep.subr.mxu0 %v5082_v44  ;;  %1061 = vmatprep.subr.mxu1 %v5087_v45 }
 0x319   :  { %991 = vmatpush1.msra.mxu0 %v5094_v46  ;;  %1062 = vmatpush1.msra.mxu1 %v10049_v2  ;;  %v5592_v2 = vld [vmem:[%s9464_s2 + $0x398] sm:$0xff] }
 0x31a   :  { %992 = vmatprep.subr.mxu0 %v10050_v3  ;;  %1063 = vmatprep.subr.mxu1 %v10051_v4  ;;  %v5598_v3 = vld [vmem:[%s9464_s2 + $0x380] sm:$0xff]  ;;  %v5604_v4 = vld [vmem:[%s9464_s2 + $0x390] sm:$0xff] }
 0x31b   :  { %993 = vmatpush1.msra.mxu0 %v10052_v5  ;;  %1064 = vmatpush1.msra.mxu1 %v10053_v6  ;;  %v5610_v5 = vld [vmem:[%s9464_s2 + $0x368] sm:$0xff]  ;;  %v5616_v6 = vld [vmem:[%s9464_s2 + $0x378] sm:$0xff] }
 0x31c   :  { %994 = vmatprep.subr.mxu0 %v10054_v7  ;;  %1065 = vmatprep.subr.mxu1 %v10055_v8 }
 0x31d   :  { %995 = vmatpush1.msra.mxu0 %v10056_v9  ;;  %1066 = vmatpush1.msra.mxu1 %v10057_v10 }
 0x31e   :  { %996 = vmatprep.subr.mxu0 %v10058_v11  ;;  %1067 = vmatprep.subr.mxu1 %v10059_v12 }
 0x31f   :  { %997 = vmatpush1.msra.mxu0 %v10060_v13  ;;  %1068 = vmatpush1.msra.mxu1 %v10061_v14 }
 0x320   :  { %998 = vmatprep.subr.mxu0 %v10062_v15  ;;  %1069 = vmatprep.subr.mxu1 %v10063_v16 }
 0x321   :  { %999 = vmatpush1.msra.mxu0 %v10064_v17  ;;  %1032 = vmatprep.mubr.f32.mxu0 %v10065_v18 }
 0x322   :  { %1070 = vmatpush1.msra.mxu1 %v10066_v19  ;;  %1103 = vmatprep.mubr.f32.mxu1 %v10065_v18 }
 0x323   :  { %1160 = vmatprep.subr.mxu0 %v5505_v20  ;;  %1231 = vmatprep.subr.mxu1 %v5511_v21 }
 0x3c2   :  { %v842_v22 = vpop.f32.mrf.mxu0  ;;  %v913_v23 = vpop.f32.mrf.mxu1 }
 0x3c4   :  { %v844_v24 = vpop.f32.mrf.mxu0  ;;  %v915_v25 = vpop.f32.mrf.mxu1 }
 0x3c5   :  { %v922_v26 = vcombine.low %v842_v22, %v844_v24  ;;  %v923_v27 = vcombine.low %v913_v23, %v915_v25  ;;  %v5622_v22 = vld [vmem:[%s9464_s2 + $0x360] sm:$0xff]  ;;  %v5628_v23 = vld [vmem:[%s9464_s2 + $0x370] sm:$0xff]  ;;  %v5634_v24 = vld [vmem:[%s9464_s2 + $0x348] sm:$0xff] }
 0x3c6   :  { %v5640_v25 = vld [vmem:[%s9464_s2 + $0x358] sm:$0xff] }
 0x3c7   :  { %v930_v29 = vrot.slane %v922_v26, %v10069_v28  ;;  %v937_v30 = vrot.slane %v923_v27, %v10069_v28  ;;  %v5646_v26 = vld [vmem:[%s9464_s2 + $0x340] sm:$0xff]  ;;  %v5652_v27 = vld [vmem:[%s9464_s2 + $0x350] sm:$0xff] }
 0x3c9   :  { %v938_v32 = vcombine.low %v930_v29, %v937_v30  ;;  %v5658_v29 = vld [vmem:[%s9464_s2 + $0x328] sm:$0xff]  ;;  %v5664_v30 = vld [vmem:[%s9464_s2 + $0x338] sm:$0xff] }
 0x3cb   :  { %v940_v33 = vadd.f32 %v3717_v31, %v938_v32  ;;  %v5670_v31 = vld [vmem:[%s9464_s2 + $0x320] sm:$0xff]  ;;  %v5676_v32 = vld [vmem:[%s9464_s2 + $0x330] sm:$0xff] }
 0x3cd   :  { %v941_v34 = vmul.f32 0.5, %v940_v33  ;;  %v946_v35 = vrot.slane %v940_v33, 2  ;;  %v952_v37 = vrot.slane %v940_v33, 4  ;;  %v955_v38 = vrot.slane %v940_v33, 6  ;;  %v5682_v33 = vld [vmem:[%s9464_s2 + $0x308] sm:$0xff] }
 0x3cf   :  { %4179 = vtanh.f32 %v941_v34  ;;  %v948_v36 = vmul.f32 0.5, %v946_v35  ;;  %v957_v39 = vmul.f32 0.5, %v955_v38  ;;  %v5688_v34 = vld [vmem:[%s9464_s2 + $0x318] sm:$0xff]  ;;  %v5694_v35 = vld [vmem:[%s9464_s2 + $0x300] sm:$0xff] }
 0x3d0   :  { %v5712_v38 = vld [vmem:[%s9464_s2 + $0x2f8] sm:$0xff] }
 0x3d1   :  { %4181 = vtanh.f32 %v948_v36  ;;  %v5700_v36 = vld [vmem:[%s9464_s2 + $0x310] sm:$0xff] }
 0x3d2   :  { %4183 = vtanh.f32 %v952_v37  ;;  %v5706_v37 = vld [vmem:[%s9464_s2 + $0x2e8] sm:$0xff] }
 0x3d3   :  { %4185 = vtanh.f32 %v957_v39  ;;  %v5718_v39 = vld [vmem:[%s9464_s2 + $0x2e0] sm:$0xff] }
 0x3dc   :  { %v4180_v40 = vpop.eup %4179 }
 0x3dd   :  { %v943_v41 = vadd.f32 1.0, %v4180_v40  ;;  %v5724_v40 = vld [vmem:[%s9464_s2 + $0x2f0] sm:$0xff] }
 0x3de   :  { %v4182_v42 = vpop.eup %4181 }
 0x3df   :  { %v944_v43 = vmul.f32 0.5, %v943_v41  ;;  %v950_v44 = vadd.f32 1.0, %v4182_v42  ;;  %v4184_v46 = vpop.eup %4183  ;;  %v5730_v41 = vld [vmem:[%s9464_s2 + $0x2c8] sm:$0xff]  ;;  %v5736_v42 = vld [vmem:[%s9464_s2 + $0x2d8] sm:$0xff] }
 0x3e0   :  { %v4186_v54 = vpop.eup %4185 }
 0x3e1   :  { %v951_v45 = vmul.f32 0.5, %v950_v44  ;;  %v962_v52 = vmul.f32 %v4184_v46, %v944_v43  ;;  %v959_v0 = vadd.f32 1.0, %v4186_v54  ;;  %v5742_v43 = vld [vmem:[%s9464_s2 + $0x2c0] sm:$0xff]  ;;  %v5748_v44 = vld [vmem:[%s9464_s2 + $0x2d0] sm:$0xff]  ;;  %v5760_v46 = vld [vmem:[%s9464_s2 + $0x2b8] sm:$0xff] }
 0x3e2   :  { %10070 = vst [vmem:[#allocation7_spill] sm:$0xff] %v5760_v46  ;;  %v5778_v54 = vld [vmem:[%s9464_s2 + $0x288] sm:$0xff] }
 0x3e3   :  { %v961_v58 = vmul.f32 %v951_v45, %v5435_v59  ;;  %v960_v51 = vmul.f32 0.5, %v959_v0  ;;  %v5556_v59 = vld [vmem:[%s9464_s2 + $0x3d0] sm:$0xff]  ;;  %v5754_v45 = vld [vmem:[%s9464_s2 + $0x2a8] sm:$0xff]  ;;  %v5784_v0 = vld [vmem:[%s9464_s2 + $0x298] sm:$0xff] }
 0x3e4   :  { %10072 = vst [vmem:[#allocation9_spill] sm:$0xff] %v5784_v0 }
 0x3e5   :  { %v5520_v53 = vadd.f32 %v962_v52, %v961_v58  ;;  %v5766_v58 = vld [vmem:[%s9464_s2 + $0x2a0] sm:$0xff]  ;;  %v5772_v52 = vld [vmem:[%s9464_s2 + $0x2b0] sm:$0xff] }
 0x3e6   :  { %10071 = vst [vmem:[#allocation8_spill] sm:$0xff] %v5772_v52 }
 0x3e7   :  { %4187 = vtanh.f32 %v5520_v53 }
 0x3f4   :  { %v4188_v50 = vpop.eup %4187 }
 0x3f5   :  { %v965_v49 = vmul.f32 %v4188_v50, %v960_v51  ;;  %v5790_v51 = vld [vmem:[%s9464_s2 + $0x280] sm:$0xff]  ;;  %v5796_v50 = vld [vmem:[%s9464_s2 + $0x290] sm:$0xff] }
 0x3f6   :  { %10073 = vst [vmem:[#allocation10_spill] sm:$0xff] %v5790_v51  ;;  %10074 = vst [vmem:[#allocation11_spill] sm:$0xff] %v5796_v50 }
 0x3f7   :  { %1033 = vmatmul.mubr.f32.vlgmr.msra.gmra.mxu0 %v965_v49  ;;  %1104 = vmatmul.mubr.f32.vlgmr.msra.gmra.mxu1 %v965_v49  ;;  %v5802_v49 = vld [vmem:[%s9464_s2 + $0x268] sm:$0xff] }
 0x3f8   :  { %1161 = vmatpush1.msra.mxu0 %v5526_v63  ;;  %1232 = vmatpush1.msra.mxu1 %v5532_v56  ;;  %10075 = vst [vmem:[#allocation12_spill] sm:$0xff] %v5802_v49 }
 0x3f9   :  { %1162 = vmatprep.subr.mxu0 %v5538_v62  ;;  %1233 = vmatprep.subr.mxu1 %v5544_v55 }
 0x3fa   :  { %1163 = vmatpush1.msra.mxu0 %v5550_v1  ;;  %1234 = vmatpush1.msra.mxu1 %v5556_v59 }
 0x3fb   :  { %1164 = vmatprep.subr.mxu0 %v5562_v57  ;;  %1235 = vmatprep.subr.mxu1 %v5568_v48 }
 0x3fc   :  { %1165 = vmatpush1.msra.mxu0 %v5574_v60  ;;  %1236 = vmatpush1.msra.mxu1 %v5580_v61 }
 0x3fd   :  { %1166 = vmatprep.subr.mxu0 %v5586_v47  ;;  %1237 = vmatprep.subr.mxu1 %v5592_v2 }
 0x3fe   :  { %1167 = vmatpush1.msra.mxu0 %v5598_v3  ;;  %1238 = vmatpush1.msra.mxu1 %v5604_v4 }
 0x3ff   :  { %1168 = vmatprep.subr.mxu0 %v5610_v5  ;;  %1239 = vmatprep.subr.mxu1 %v5616_v6 }
 0x400   :  { %1169 = vmatpush1.msra.mxu0 %v5622_v22  ;;  %1240 = vmatpush1.msra.mxu1 %v5628_v23 }
 0x401   :  { %1170 = vmatprep.subr.mxu0 %v5634_v24  ;;  %1241 = vmatprep.subr.mxu1 %v5640_v25 }
 0x402   :  { %1171 = vmatpush1.msra.mxu0 %v5646_v26  ;;  %1242 = vmatpush1.msra.mxu1 %v5652_v27 }
 0x403   :  { %1172 = vmatprep.subr.mxu0 %v5658_v29  ;;  %1243 = vmatprep.subr.mxu1 %v5664_v30 }
 0x404   :  { %1173 = vmatpush1.msra.mxu0 %v5670_v31  ;;  %1244 = vmatpush1.msra.mxu1 %v5676_v32 }
 0x405   :  { %1174 = vmatprep.subr.mxu0 %v5682_v33  ;;  %1245 = vmatprep.subr.mxu1 %v5688_v34 }
 0x406   :  { %1175 = vmatpush1.msra.mxu0 %v5694_v35  ;;  %1246 = vmatpush1.msra.mxu1 %v5700_v36 }
 0x407   :  { %1176 = vmatprep.subr.mxu0 %v5706_v37  ;;  %1247 = vmatprep.subr.mxu1 %v5712_v38 }
 0x408   :  { %1177 = vmatpush1.msra.mxu0 %v5718_v39  ;;  %1248 = vmatpush1.msra.mxu1 %v5724_v40 }
 0x409   :  { %1178 = vmatprep.subr.mxu0 %v5730_v41  ;;  %1249 = vmatprep.subr.mxu1 %v5736_v42 }
 0x40a   :  { %1179 = vmatpush1.msra.mxu0 %v5742_v43  ;;  %1250 = vmatpush1.msra.mxu1 %v5748_v44 }
 0x40b   :  { %1180 = vmatprep.subr.mxu0 %v5754_v45  ;;  %1251 = vmatprep.subr.mxu1 %v5760_v46 }
 0x40c   :  { %1181 = vmatpush1.msra.mxu0 %v5766_v58  ;;  %1252 = vmatpush1.msra.mxu1 %v5772_v52 }
 0x40d   :  { %1182 = vmatprep.subr.mxu0 %v5778_v54  ;;  %1253 = vmatprep.subr.mxu1 %v5784_v0  ;;  %v5808_v0 = vld [vmem:[%s9464_s2 + $0x278] sm:$0xff] }
 0x40e   :  { %1183 = vmatpush1.msra.mxu0 %v5790_v51  ;;  %1254 = vmatpush1.msra.mxu1 %v5796_v50  ;;  %10076 = vst [vmem:[#allocation13_spill] sm:$0xff] %v5808_v0  ;;  %v5814_v51 = vld [vmem:[%s9464_s2 + $0x260] sm:$0xff]  ;;  %v5820_v50 = vld [vmem:[%s9464_s2 + $0x270] sm:$0xff] }
 0x40f   :  { %1184 = vmatprep.subr.mxu0 %v5802_v49  ;;  %1255 = vmatprep.subr.mxu1 %v5808_v0  ;;  %10077 = vst [vmem:[#allocation14_spill] sm:$0xff] %v5814_v51  ;;  %10078 = vst [vmem:[#allocation15_spill] sm:$0xff] %v5820_v50 }
 0x410   :  { %1185 = vmatpush1.msra.mxu0 %v5814_v51  ;;  %1256 = vmatpush1.msra.mxu1 %v5820_v50 }
 0x411   :  { %1186 = vmatprep.subr.mxu0 %v10054_v7  ;;  %1257 = vmatprep.subr.mxu1 %v10055_v8 }
 0x412   :  { %1187 = vmatpush1.msra.mxu0 %v10056_v9  ;;  %1258 = vmatpush1.msra.mxu1 %v10057_v10 }
 0x413   :  { %1188 = vmatprep.subr.mxu0 %v10058_v11  ;;  %1259 = vmatprep.subr.mxu1 %v10059_v12 }
 0x414   :  { %1189 = vmatpush1.msra.mxu0 %v10060_v13  ;;  %1260 = vmatpush1.msra.mxu1 %v10061_v14 }
 0x415   :  { %1190 = vmatprep.subr.mxu0 %v10062_v15  ;;  %1261 = vmatprep.subr.mxu1 %v10063_v16  ;;  %v3718_v15 = vld [vmem:[%s9462_s0 + $0x20] sm:$0xff] }
 0x416   :  { %1191 = vmatpush1.msra.mxu0 %v10064_v17  ;;  %1224 = vmatprep.mubr.f32.mxu0 %v10065_v18 }
 0x417   :  { %1262 = vmatpush1.msra.mxu1 %v10066_v19  ;;  %1295 = vmatprep.mubr.f32.mxu1 %v10065_v18 }
 0x418   :  { %1352 = vmatprep.subr.mxu0 %v5505_v20  ;;  %1423 = vmatprep.subr.mxu1 %v5511_v21 }
 0x4b7   :  { %v1034_v7 = vpop.f32.mrf.mxu0  ;;  %v1105_v8 = vpop.f32.mrf.mxu1 }
 0x4b9   :  { %v1036_v9 = vpop.f32.mrf.mxu0  ;;  %v1107_v10 = vpop.f32.mrf.mxu1 }
 0x4ba   :  { %v1114_v11 = vcombine.low %v1034_v7, %v1036_v9  ;;  %v1115_v12 = vcombine.low %v1105_v8, %v1107_v10 }
 0x4bc   :  { %v1122_v13 = vrot.slane %v1114_v11, %v10069_v28  ;;  %v1129_v14 = vrot.slane %v1115_v12, %v10069_v28 }
 0x4be   :  { %v1130_v16 = vcombine.low %v1122_v13, %v1129_v14 }
 0x4c0   :  { %v1132_v17 = vadd.f32 %v3718_v15, %v1130_v16 }
 0x4c2   :  { %v1133_v19 = vmul.f32 0.5, %v1132_v17  ;;  %v1138_v20 = vrot.slane %v1132_v17, 2  ;;  %v1144_v18 = vrot.slane %v1132_v17, 4  ;;  %v1147_v50 = vrot.slane %v1132_v17, 6  ;;  %v10082_v17 = vld [vmem:[#allocation14_spill] sm:$0xff] }
 0x4c4   :  { %4189 = vtanh.f32 %v1133_v19  ;;  %v1140_v21 = vmul.f32 0.5, %v1138_v20  ;;  %v1149_v7 = vmul.f32 0.5, %v1147_v50  ;;  %v10083_v19 = vld [vmem:[#allocation15_spill] sm:$0xff] }
 0x4c6   :  { %4191 = vtanh.f32 %v1140_v21 }
 0x4c7   :  { %4193 = vtanh.f32 %v1144_v18 }
 0x4c8   :  { %4195 = vtanh.f32 %v1149_v7  ;;  %v5901_v7 = vld [vmem:[%s9464_s2 + $0x248] sm:$0xff] }
 0x4c9   :  { %10084 = vst [vmem:[#allocation16_spill] sm:$0xff] %v5901_v7 }
 0x4d1   :  { %v4190_v8 = vpop.eup %4189 }
 0x4d2   :  { %v1135_v9 = vadd.f32 1.0, %v4190_v8  ;;  %v5907_v8 = vld [vmem:[%s9464_s2 + $0x258] sm:$0xff] }
 0x4d3   :  { %v4192_v10 = vpop.eup %4191  ;;  %10085 = vst [vmem:[#allocation17_spill] sm:$0xff] %v5907_v8 }
 0x4d4   :  { %v1136_v11 = vmul.f32 0.5, %v1135_v9  ;;  %v1142_v12 = vadd.f32 1.0, %v4192_v10  ;;  %v4194_v51 = vpop.eup %4193  ;;  %v5913_v9 = vld [vmem:[%s9464_s2 + $0x240] sm:$0xff]  ;;  %v5919_v10 = vld [vmem:[%s9464_s2 + $0x250] sm:$0xff] }
 0x4d5   :  { %v4196_v20 = vpop.eup %4195  ;;  %10086 = vst [vmem:[#allocation18_spill] sm:$0xff] %v5913_v9  ;;  %10087 = vst [vmem:[#allocation19_spill] sm:$0xff] %v5919_v10 }
 0x4d6   :  { %v1143_v28 = vmul.f32 0.5, %v1142_v12  ;;  %v1154_v14 = vmul.f32 %v4194_v51, %v1136_v11  ;;  %v1151_v21 = vadd.f32 1.0, %v4196_v20  ;;  %v10081_v51 = vld [vmem:[#allocation11_spill] sm:$0xff]  ;;  %v5925_v11 = vld [vmem:[%s9464_s2 + $0x228] sm:$0xff] }
 0x4d7   :  { %10088 = vst [vmem:[#allocation20_spill] sm:$0xff] %v5925_v11  ;;  %v5931_v12 = vld [vmem:[%s9464_s2 + $0x238] sm:$0xff]  ;;  %v5949_v20 = vld [vmem:[%s9464_s2 + $0x208] sm:$0xff] }
 0x4d8   :  { %v1153_v13 = vmul.f32 %v1143_v28, %v5520_v53  ;;  %v1152_v18 = vmul.f32 0.5, %v1151_v21  ;;  %v10079_v28 = vld [vmem:[#allocation9_spill] sm:$0xff]  ;;  %v10080_v53 = vld [vmem:[#allocation10_spill] sm:$0xff]  ;;  %10089 = vst [vmem:[#allocation21_spill] sm:$0xff] %v5931_v12  ;;  %v5955_v21 = vld [vmem:[%s9464_s2 + $0x218] sm:$0xff] }
 0x4d9   :  { %10092 = vst [vmem:[#allocation10_spill] sm:$0xff] %v5949_v20  ;;  %10093 = vst [vmem:[#allocation26_spill] sm:$0xff] %v5955_v21 }
 0x4da   :  { %v5845_v15 = vadd.f32 %v1154_v14, %v1153_v13  ;;  %v5937_v13 = vld [vmem:[%s9464_s2 + $0x220] sm:$0xff]  ;;  %v5943_v14 = vld [vmem:[%s9464_s2 + $0x230] sm:$0xff] }
 0x4db   :  { %10090 = vst [vmem:[#allocation22_spill] sm:$0xff] %v5937_v13  ;;  %10091 = vst [vmem:[#allocation23_spill] sm:$0xff] %v5943_v14 }
 0x4dc   :  { %4197 = vtanh.f32 %v5845_v15 }
 0x4e9   :  { %v4198_v16 = vpop.eup %4197 }
 0x4ea   :  { %v1157_v50 = vmul.f32 %v4198_v16, %v1152_v18  ;;  %v5961_v18 = vld [vmem:[%s9464_s2 + $0x200] sm:$0xff]  ;;  %v10095_v16 = vmov 0.0  }
 0x4eb   :  { %10094 = vst [vmem:[#allocation27_spill] sm:$0xff] %v5961_v18 }
 0x4ec   :  { %1225 = vmatmul.mubr.f32.vlgmr.msra.gmra.mxu0 %v1157_v50  ;;  %1296 = vmatmul.mubr.f32.vlgmr.msra.gmra.mxu1 %v1157_v50  ;;  %v5968_v50 = vld [vmem:[%s9464_s2 + $0x210] sm:$0xff] }
 0x4ed   :  { %1353 = vmatpush1.msra.mxu0 %v5526_v63  ;;  %1424 = vmatpush1.msra.mxu1 %v5532_v56  ;;  %10096 = vst [vmem:[#allocation28_spill] sm:$0xff] %v5968_v50 }
 0x4ee   :  { %1354 = vmatprep.subr.mxu0 %v5538_v62  ;;  %1425 = vmatprep.subr.mxu1 %v5544_v55 }
 0x4ef   :  { %1355 = vmatpush1.msra.mxu0 %v5550_v1  ;;  %1426 = vmatpush1.msra.mxu1 %v5556_v59 }
 0x4f0   :  { %1356 = vmatprep.subr.mxu0 %v5562_v57  ;;  %1427 = vmatprep.subr.mxu1 %v5568_v48 }
 0x4f1   :  { %1357 = vmatpush1.msra.mxu0 %v5574_v60  ;;  %1428 = vmatpush1.msra.mxu1 %v5580_v61 }
 0x4f2   :  { %1358 = vmatprep.subr.mxu0 %v5586_v47  ;;  %1429 = vmatprep.subr.mxu1 %v5592_v2 }
 0x4f3   :  { %1359 = vmatpush1.msra.mxu0 %v5598_v3  ;;  %1430 = vmatpush1.msra.mxu1 %v5604_v4 }
 0x4f4   :  { %1360 = vmatprep.subr.mxu0 %v5610_v5  ;;  %1431 = vmatprep.subr.mxu1 %v5616_v6 }
 0x4f5   :  { %1361 = vmatpush1.msra.mxu0 %v5622_v22  ;;  %1432 = vmatpush1.msra.mxu1 %v5628_v23 }
 0x4f6   :  { %1362 = vmatprep.subr.mxu0 %v5634_v24  ;;  %1433 = vmatprep.subr.mxu1 %v5640_v25 }
 0x4f7   :  { %1363 = vmatpush1.msra.mxu0 %v5646_v26  ;;  %1434 = vmatpush1.msra.mxu1 %v5652_v27 }
 0x4f8   :  { %1364 = vmatprep.subr.mxu0 %v5658_v29  ;;  %1435 = vmatprep.subr.mxu1 %v5664_v30 }
 0x4f9   :  { %1365 = vmatpush1.msra.mxu0 %v5670_v31  ;;  %1436 = vmatpush1.msra.mxu1 %v5676_v32 }
 0x4fa   :  { %1366 = vmatprep.subr.mxu0 %v5682_v33  ;;  %1437 = vmatprep.subr.mxu1 %v5688_v34 }
 0x4fb   :  { %1367 = vmatpush1.msra.mxu0 %v5694_v35  ;;  %1438 = vmatpush1.msra.mxu1 %v5700_v36 }
 0x4fc   :  { %1368 = vmatprep.subr.mxu0 %v5706_v37  ;;  %1439 = vmatprep.subr.mxu1 %v5712_v38 }
 0x4fd   :  { %1369 = vmatpush1.msra.mxu0 %v5718_v39  ;;  %1440 = vmatpush1.msra.mxu1 %v5724_v40 }
 0x4fe   :  { %1370 = vmatprep.subr.mxu0 %v5730_v41  ;;  %1441 = vmatprep.subr.mxu1 %v5736_v42 }
 0x4ff   :  { %1371 = vmatpush1.msra.mxu0 %v5742_v43  ;;  %1442 = vmatpush1.msra.mxu1 %v5748_v44 }
 0x500   :  { %1372 = vmatprep.subr.mxu0 %v5754_v45  ;;  %1443 = vmatprep.subr.mxu1 %v5760_v46 }
 0x501   :  { %1373 = vmatpush1.msra.mxu0 %v5766_v58  ;;  %1444 = vmatpush1.msra.mxu1 %v5772_v52 }
 0x502   :  { %1374 = vmatprep.subr.mxu0 %v5778_v54  ;;  %1445 = vmatprep.subr.mxu1 %v10079_v28 }
 0x503   :  { %1375 = vmatpush1.msra.mxu0 %v10080_v53  ;;  %1446 = vmatpush1.msra.mxu1 %v10081_v51 }
 0x504   :  { %1376 = vmatprep.subr.mxu0 %v5802_v49  ;;  %1447 = vmatprep.subr.mxu1 %v5808_v0 }
 0x505   :  { %1377 = vmatpush1.msra.mxu0 %v10082_v17  ;;  %1448 = vmatpush1.msra.mxu1 %v10083_v19 }
 0x506   :  { %1378 = vmatprep.subr.mxu0 %v5901_v7  ;;  %1449 = vmatprep.subr.mxu1 %v5907_v8 }
 0x507   :  { %1379 = vmatpush1.msra.mxu0 %v5913_v9  ;;  %1450 = vmatpush1.msra.mxu1 %v5919_v10  ;;  %v10099_v9 = vld [vmem:[#allocation25_spill] sm:$0xff] }
 0x508   :  { %1380 = vmatprep.subr.mxu0 %v5925_v11  ;;  %1451 = vmatprep.subr.mxu1 %v5931_v12 }
 0x509   :  { %1381 = vmatpush1.msra.mxu0 %v5937_v13  ;;  %1452 = vmatpush1.msra.mxu1 %v5943_v14 }
 0x50a   :  { %1382 = vmatprep.subr.mxu0 %v5949_v20  ;;  %1453 = vmatprep.subr.mxu1 %v5955_v21  ;;  %v10097_v20 = vld [vmem:[#allocation5_spill] sm:$0xff]  ;;  %v10098_v21 = vld [vmem:[#allocation6_spill] sm:$0xff] }
 0x50b   :  { %1383 = vmatpush1.msra.mxu0 %v5961_v18  ;;  %1416 = vmatprep.mubr.f32.mxu0 %v10095_v16 }
 0x50c   :  { %1454 = vmatpush1.msra.mxu1 %v5968_v50  ;;  %1487 = vmatprep.mubr.f32.mxu1 %v10095_v16  ;;  %v3719_v50 = vld [vmem:[%s9462_s0 + $0x28] sm:$0xff] }
 0x50d   :  { %1544 = vmatprep.subr.mxu0 %v10097_v20  ;;  %1615 = vmatprep.subr.mxu1 %v10098_v21 }
 0x5ac   :  { %v1226_v14 = vpop.f32.mrf.mxu0  ;;  %v1297_v13 = vpop.f32.mrf.mxu1 }
 0x5ae   :  { %v1228_v12 = vpop.f32.mrf.mxu0  ;;  %v1299_v11 = vpop.f32.mrf.mxu1 }
 0x5af   :  { %v1306_v18 = vcombine.low %v1226_v14, %v1228_v12  ;;  %v1307_v10 = vcombine.low %v1297_v13, %v1299_v11 }
 0x5b1   :  { %v1314_v8 = vrot.slane %v1306_v18, %v10099_v9  ;;  %v1321_v7 = vrot.slane %v1307_v10, %v10099_v9 }
 0x5b3   :  { %v1322_v19 = vcombine.low %v1314_v8, %v1321_v7 }
 0x5b5   :  { %v1324_v16 = vadd.f32 %v3719_v50, %v1322_v19  ;;  %v10104_v50 = vld [vmem:[#allocation15_spill] sm:$0xff] }
 0x5b7   :  { %v1325_v17 = vmul.f32 0.5, %v1324_v16  ;;  %v1330_v20 = vrot.slane %v1324_v16, 2  ;;  %v1336_v0 = vrot.slane %v1324_v16, 4  ;;  %v1339_v49 = vrot.slane %v1324_v16, 6  ;;  %v10103_v16 = vld [vmem:[#allocation14_spill] sm:$0xff] }
 0x5b9   :  { %4199 = vtanh.f32 %v1325_v17  ;;  %v1332_v21 = vmul.f32 0.5, %v1330_v20  ;;  %v1341_v12 = vmul.f32 0.5, %v1339_v49 }
 0x5bb   :  { %4201 = vtanh.f32 %v1332_v21 }
 0x5bc   :  { %4203 = vtanh.f32 %v1336_v0 }
 0x5bd   :  { %4205 = vtanh.f32 %v1341_v12  ;;  %v10105_v12 = vld [vmem:[#allocation16_spill] sm:$0xff] }
 0x5c6   :  { %v4200_v11 = vpop.eup %4199 }
 0x5c7   :  { %v1327_v13 = vadd.f32 1.0, %v4200_v11  ;;  %v10106_v11 = vld [vmem:[#allocation17_spill] sm:$0xff] }
 0x5c8   :  { %v4202_v14 = vpop.eup %4201 }
 0x5c9   :  { %v1328_v18 = vmul.f32 0.5, %v1327_v13  ;;  %v1334_v10 = vadd.f32 1.0, %v4202_v14  ;;  %v4204_v51 = vpop.eup %4203  ;;  %v10107_v13 = vld [vmem:[#allocation18_spill] sm:$0xff]  ;;  %v10108_v14 = vld [vmem:[#allocation19_spill] sm:$0xff] }
 0x5ca   :  { %v4206_v17 = vpop.eup %4205 }
 0x5cb   :  { %v1335_v9 = vmul.f32 0.5, %v1334_v10  ;;  %v1346_v19 = vmul.f32 %v4204_v51, %v1328_v18  ;;  %v1343_v20 = vadd.f32 1.0, %v4206_v17  ;;  %v10101_v51 = vld [vmem:[#allocation12_spill] sm:$0xff]  ;;  %v10110_v10 = vld [vmem:[#allocation21_spill] sm:$0xff]  ;;  %v10113_v17 = vld [vmem:[#allocation10_spill] sm:$0xff] }
 0x5cc   :  { %v10109_v18 = vld [vmem:[#allocation20_spill] sm:$0xff] }
 0x5cd   :  { %v1345_v7 = vmul.f32 %v1335_v9, %v5845_v15  ;;  %v1344_v0 = vmul.f32 0.5, %v1343_v20  ;;  %v10100_v15 = vld [vmem:[#allocation11_spill] sm:$0xff]  ;;  %v10102_v9 = vld [vmem:[#allocation13_spill] sm:$0xff]  ;;  %v10114_v20 = vld [vmem:[#allocation26_spill] sm:$0xff] }
 0x5cf   :  { %v5980_v8 = vadd.f32 %v1346_v19, %v1345_v7  ;;  %v10111_v7 = vld [vmem:[#allocation22_spill] sm:$0xff]  ;;  %v10112_v19 = vld [vmem:[#allocation23_spill] sm:$0xff] }
 0x5d1   :  { %4207 = vtanh.f32 %v5980_v8 }
 0x5de   :  { %v4208_v21 = vpop.eup %4207 }
 0x5df   :  { %v1349_v49 = vmul.f32 %v4208_v21, %v1344_v0  ;;  %v10115_v0 = vld [vmem:[#allocation27_spill] sm:$0xff]  ;;  %v10116_v21 = vmov 0.0  }
 0x5e1   :  { %1417 = vmatmul.mubr.f32.vlgmr.msra.gmra.mxu0 %v1349_v49  ;;  %1488 = vmatmul.mubr.f32.vlgmr.msra.gmra.mxu1 %v1349_v49  ;;  %v10117_v49 = vld [vmem:[#allocation28_spill] sm:$0xff] }
 0x5e2   :  { %1545 = vmatpush1.msra.mxu0 %v5526_v63  ;;  %1616 = vmatpush1.msra.mxu1 %v5532_v56 }
 0x5e3   :  { %1546 = vmatprep.subr.mxu0 %v5538_v62  ;;  %1617 = vmatprep.subr.mxu1 %v5544_v55 }
 0x5e4   :  { %1547 = vmatpush1.msra.mxu0 %v5550_v1  ;;  %1618 = vmatpush1.msra.mxu1 %v5556_v59 }
 0x5e5   :  { %1548 = vmatprep.subr.mxu0 %v5562_v57  ;;  %1619 = vmatprep.subr.mxu1 %v5568_v48 }
 0x5e6   :  { %1549 = vmatpush1.msra.mxu0 %v5574_v60  ;;  %1620 = vmatpush1.msra.mxu1 %v5580_v61 }
 0x5e7   :  { %1550 = vmatprep.subr.mxu0 %v5586_v47  ;;  %1621 = vmatprep.subr.mxu1 %v5592_v2 }
 0x5e8   :  { %1551 = vmatpush1.msra.mxu0 %v5598_v3  ;;  %1622 = vmatpush1.msra.mxu1 %v5604_v4 }
 0x5e9   :  { %1552 = vmatprep.subr.mxu0 %v5610_v5  ;;  %1623 = vmatprep.subr.mxu1 %v5616_v6 }
 0x5ea   :  { %1553 = vmatpush1.msra.mxu0 %v5622_v22  ;;  %1624 = vmatpush1.msra.mxu1 %v5628_v23 }
 0x5eb   :  { %1554 = vmatprep.subr.mxu0 %v5634_v24  ;;  %1625 = vmatprep.subr.mxu1 %v5640_v25 }
 0x5ec   :  { %1555 = vmatpush1.msra.mxu0 %v5646_v26  ;;  %1626 = vmatpush1.msra.mxu1 %v5652_v27 }
 0x5ed   :  { %1556 = vmatprep.subr.mxu0 %v5658_v29  ;;  %1627 = vmatprep.subr.mxu1 %v5664_v30 }
 0x5ee   :  { %1557 = vmatpush1.msra.mxu0 %v5670_v31  ;;  %1628 = vmatpush1.msra.mxu1 %v5676_v32 }
 0x5ef   :  { %1558 = vmatprep.subr.mxu0 %v5682_v33  ;;  %1629 = vmatprep.subr.mxu1 %v5688_v34 }
 0x5f0   :  { %1559 = vmatpush1.msra.mxu0 %v5694_v35  ;;  %1630 = vmatpush1.msra.mxu1 %v5700_v36 }
 0x5f1   :  { %1560 = vmatprep.subr.mxu0 %v5706_v37  ;;  %1631 = vmatprep.subr.mxu1 %v5712_v38 }
 0x5f2   :  { %1561 = vmatpush1.msra.mxu0 %v5718_v39  ;;  %1632 = vmatpush1.msra.mxu1 %v5724_v40 }
 0x5f3   :  { %1562 = vmatprep.subr.mxu0 %v5730_v41  ;;  %1633 = vmatprep.subr.mxu1 %v5736_v42 }
 0x5f4   :  { %1563 = vmatpush1.msra.mxu0 %v5742_v43  ;;  %1634 = vmatpush1.msra.mxu1 %v5748_v44 }
 0x5f5   :  { %1564 = vmatprep.subr.mxu0 %v5754_v45  ;;  %1635 = vmatprep.subr.mxu1 %v5760_v46 }
 0x5f6   :  { %1565 = vmatpush1.msra.mxu0 %v5766_v58  ;;  %1636 = vmatpush1.msra.mxu1 %v5772_v52 }
 0x5f7   :  { %1566 = vmatprep.subr.mxu0 %v5778_v54  ;;  %1637 = vmatprep.subr.mxu1 %v10079_v28 }
 0x5f8   :  { %1567 = vmatpush1.msra.mxu0 %v10080_v53  ;;  %1638 = vmatpush1.msra.mxu1 %v10100_v15 }
 0x5f9   :  { %1568 = vmatprep.subr.mxu0 %v10101_v51  ;;  %1639 = vmatprep.subr.mxu1 %v10102_v9 }
 0x5fa   :  { %1569 = vmatpush1.msra.mxu0 %v10103_v16  ;;  %1640 = vmatpush1.msra.mxu1 %v10104_v50 }
 0x5fb   :  { %1570 = vmatprep.subr.mxu0 %v10105_v12  ;;  %1641 = vmatprep.subr.mxu1 %v10106_v11 }
 0x5fc   :  { %1571 = vmatpush1.msra.mxu0 %v10107_v13  ;;  %1642 = vmatpush1.msra.mxu1 %v10108_v14 }
 0x5fd   :  { %1572 = vmatprep.subr.mxu0 %v10109_v18  ;;  %1643 = vmatprep.subr.mxu1 %v10110_v10  ;;  %v6050_v10 = vld [vmem:[%s9464_s2 + $0x1e8] sm:$0xff] }
 0x5fe   :  { %1573 = vmatpush1.msra.mxu0 %v10111_v7  ;;  %1644 = vmatpush1.msra.mxu1 %v10112_v19  ;;  %10118 = vst [vmem:[#allocation12_spill] sm:$0xff] %v6050_v10  ;;  %v6056_v19 = vld [vmem:[%s9464_s2 + $0x1f8] sm:$0xff] }
 0x5ff   :  { %1574 = vmatprep.subr.mxu0 %v10113_v17  ;;  %1645 = vmatprep.subr.mxu1 %v10114_v20  ;;  %10119 = vst [vmem:[#allocation14_spill] sm:$0xff] %v6056_v19 }
 0x600   :  { %1575 = vmatpush1.msra.mxu0 %v10115_v0  ;;  %1608 = vmatprep.mubr.f32.mxu0 %v10116_v21  ;;  %v10120_v0 = vld [vmem:[#allocation25_spill] sm:$0xff] }
 0x601   :  { %1646 = vmatpush1.msra.mxu1 %v10117_v49  ;;  %1679 = vmatprep.mubr.f32.mxu1 %v10116_v21 }
 0x602   :  { %1736 = vmatprep.subr.mxu0 %v6050_v10  ;;  %1807 = vmatprep.subr.mxu1 %v6056_v19  ;;  %v3720_v10 = vld [vmem:[%s9462_s0 + $0x30] sm:$0xff] }
 0x6a1   :  { %v1418_v20 = vpop.f32.mrf.mxu0  ;;  %v1489_v14 = vpop.f32.mrf.mxu1 }
 0x6a3   :  { %v1420_v11 = vpop.f32.mrf.mxu0  ;;  %v1491_v49 = vpop.f32.mrf.mxu1 }
 0x6a4   :  { %v1498_v50 = vcombine.low %v1418_v20, %v1420_v11  ;;  %v1499_v21 = vcombine.low %v1489_v14, %v1491_v49 }
 0x6a6   :  { %v1506_v9 = vrot.slane %v1498_v50, %v10120_v0  ;;  %v1513_v17 = vrot.slane %v1499_v21, %v10120_v0 }
 0x6a8   :  { %v1514_v15 = vcombine.low %v1506_v9, %v1513_v17  ;;  %v6076_v17 = vld [vmem:[%s9464_s2 + $0x1f0] sm:$0xff] }
 0x6a9   :  { %10121 = vst [vmem:[#allocation16_spill] sm:$0xff] %v6076_v17 }
 0x6aa   :  { %v1516_v7 = vadd.f32 %v3720_v10, %v1514_v15 }
 0x6ac   :  { %v1517_v28 = vmul.f32 0.5, %v1516_v7  ;;  %v1522_v18 = vrot.slane %v1516_v7, 2  ;;  %v1528_v52 = vrot.slane %v1516_v7, 4  ;;  %v1531_v13 = vrot.slane %v1516_v7, 6 }
 0x6ae   :  { %4209 = vtanh.f32 %v1517_v28  ;;  %v1524_v19 = vmul.f32 0.5, %v1522_v18  ;;  %v1533_v11 = vmul.f32 0.5, %v1531_v13 }
 0x6b0   :  { %4211 = vtanh.f32 %v1524_v19  ;;  %v6071_v19 = vld [vmem:[%s9464_s2 + $0x1e0] sm:$0xff] }
 0x6b1   :  { %4213 = vtanh.f32 %v1528_v52 }
 0x6b2   :  { %4215 = vtanh.f32 %v1533_v11  ;;  %v6096_v11 = vld [vmem:[%s9464_s2 + $0x1d0] sm:$0xff] }
 0x6b3   :  { %10123 = vst [vmem:[#allocation30_spill] sm:$0xff] %v6096_v11 }
 0x6bb   :  { %v4210_v14 = vpop.eup %4209 }
 0x6bc   :  { %v1519_v20 = vadd.f32 1.0, %v4210_v14  ;;  %v6102_v14 = vld [vmem:[%s9464_s2 + $0x1a8] sm:$0xff] }
 0x6bd   :  { %v4212_v50 = vpop.eup %4211 }
 0x6be   :  { %v1520_v49 = vmul.f32 0.5, %v1519_v20  ;;  %v1526_v21 = vadd.f32 1.0, %v4212_v50  ;;  %v4214_v46 = vpop.eup %4213  ;;  %v6109_v20 = vld [vmem:[%s9464_s2 + $0x1a0] sm:$0xff]  ;;  %v6116_v50 = vld [vmem:[%s9464_s2 + $0x188] sm:$0xff] }
 0x6bf   :  { %v4216_v28 = vpop.eup %4215 }
 0x6c0   :  { %v1527_v0 = vmul.f32 0.5, %v1526_v21  ;;  %v1538_v15 = vmul.f32 %v4214_v46, %v1520_v49  ;;  %v1535_v18 = vadd.f32 1.0, %v4216_v28  ;;  %v6081_v46 = vld [vmem:[%s9464_s2 + $0x1c8] sm:$0xff]  ;;  %v6123_v49 = vld [vmem:[%s9464_s2 + $0x180] sm:$0xff]  ;;  %v6148_v28 = vld [vmem:[%s9464_s2 + $0x1b8] sm:$0xff] }
 0x6c1   :  { %v6129_v21 = vld [vmem:[%s9464_s2 + $0x168] sm:$0xff]  ;;  %10124 = vst [vmem:[#allocation31_spill] sm:$0xff] %v6148_v28 }
 0x6c2   :  { %v1537_v9 = vmul.f32 %v1527_v0, %v5980_v8  ;;  %v1536_v52 = vmul.f32 0.5, %v1535_v18  ;;  %v6086_v8 = vld [vmem:[%s9464_s2 + $0x1d8] sm:$0xff]  ;;  %v6091_v0 = vld [vmem:[%s9464_s2 + $0x1c0] sm:$0xff] }
 0x6c3   :  { %10122 = vst [vmem:[#allocation29_spill] sm:$0xff] %v6086_v8  ;;  %v6153_v18 = vld [vmem:[%s9464_s2 + $0x140] sm:$0xff] }
 0x6c4   :  { %v6065_v10 = vadd.f32 %v1538_v15, %v1537_v9  ;;  %v6135_v9 = vld [vmem:[%s9464_s2 + $0x160] sm:$0xff]  ;;  %v6143_v15 = vld [vmem:[%s9464_s2 + $0x148] sm:$0xff] }
 0x6c6   :  { %4217 = vtanh.f32 %v6065_v10 }
 0x6d3   :  { %v4218_v7 = vpop.eup %4217 }
 0x6d4   :  { %v1541_v13 = vmul.f32 %v4218_v7, %v1536_v52  ;;  %v6160_v52 = vld [vmem:[%s9464_s2 + $0x1b0] sm:$0xff]  ;;  %v6167_v7 = vld [vmem:[%s9464_s2 + $0x128] sm:$0xff] }
 0x6d5   :  { %10125 = vst [vmem:[#allocation32_spill] sm:$0xff] %v6160_v52 }
 0x6d6   :  { %1609 = vmatmul.mubr.f32.vlgmr.msra.gmra.mxu0 %v1541_v13  ;;  %1680 = vmatmul.mubr.f32.vlgmr.msra.gmra.mxu1 %v1541_v13  ;;  %v6172_v13 = vld [vmem:[%s9464_s2 + $0x198] sm:$0xff] }
 0x6d7   :  { %1737 = vmatpush1.msra.mxu0 %v6071_v19  ;;  %1808 = vmatpush1.msra.mxu1 %v6076_v17  ;;  %10126 = vst [vmem:[#allocation33_spill] sm:$0xff] %v6172_v13  ;;  %v6215_v17 = vld [vmem:[%s9464_s2 + $0xe8] sm:$0xff] }
 0x6d8   :  { %1738 = vmatprep.subr.mxu0 %v6081_v46  ;;  %1809 = vmatprep.subr.mxu1 %v6086_v8  ;;  %v6203_v8 = vld [vmem:[%s9464_s2 + $0x100] sm:$0xff]  ;;  %10132 = vst [vmem:[#allocation39_spill] sm:$0xff] %v6215_v17 }
 0x6d9   :  { %1739 = vmatpush1.msra.mxu0 %v6091_v0  ;;  %1810 = vmatpush1.msra.mxu1 %v6096_v11  ;;  %v6191_v11 = vld [vmem:[%s9464_s2 + $0x108] sm:$0xff]  ;;  %10130 = vst [vmem:[#allocation37_spill] sm:$0xff] %v6203_v8 }
 0x6da   :  { %1740 = vmatprep.subr.mxu0 %v6102_v14  ;;  %1811 = vmatprep.subr.mxu1 %v6148_v28  ;;  %v6179_v28 = vld [vmem:[%s9464_s2 + $0x120] sm:$0xff]  ;;  %10128 = vst [vmem:[#allocation35_spill] sm:$0xff] %v6191_v11 }
 0x6db   :  { %1741 = vmatpush1.msra.mxu0 %v6109_v20  ;;  %1812 = vmatpush1.msra.mxu1 %v6160_v52  ;;  %v6184_v52 = vld [vmem:[%s9464_s2 + $0x190] sm:$0xff] }
 0x6dc   :  { %1742 = vmatprep.subr.mxu0 %v6116_v50  ;;  %1813 = vmatprep.subr.mxu1 %v6172_v13  ;;  %10127 = vst [vmem:[#allocation34_spill] sm:$0xff] %v6184_v52  ;;  %v6196_v13 = vld [vmem:[%s9464_s2 + $0x178] sm:$0xff] }
 0x6dd   :  { %1743 = vmatpush1.msra.mxu0 %v6123_v49  ;;  %1814 = vmatpush1.msra.mxu1 %v6184_v52  ;;  %10129 = vst [vmem:[#allocation36_spill] sm:$0xff] %v6196_v13  ;;  %v6208_v52 = vld [vmem:[%s9464_s2 + $0x170] sm:$0xff] }
 0x6de   :  { %1744 = vmatprep.subr.mxu0 %v6129_v21  ;;  %1815 = vmatprep.subr.mxu1 %v6196_v13  ;;  %10131 = vst [vmem:[#allocation38_spill] sm:$0xff] %v6208_v52  ;;  %v6220_v13 = vld [vmem:[%s9464_s2 + $0x158] sm:$0xff] }
 0x6df   :  { %1745 = vmatpush1.msra.mxu0 %v6135_v9  ;;  %1816 = vmatpush1.msra.mxu1 %v6208_v52  ;;  %10133 = vst [vmem:[#allocation40_spill] sm:$0xff] %v6220_v13  ;;  %v6232_v52 = vld [vmem:[%s9464_s2 + $0x150] sm:$0xff] }
 0x6e0   :  { %1746 = vmatprep.subr.mxu0 %v6143_v15  ;;  %1817 = vmatprep.subr.mxu1 %v6220_v13  ;;  %10135 = vst [vmem:[#allocation42_spill] sm:$0xff] %v6232_v52  ;;  %v6244_v13 = vld [vmem:[%s9464_s2 + $0x138] sm:$0xff] }
 0x6e1   :  { %1747 = vmatpush1.msra.mxu0 %v6153_v18  ;;  %1818 = vmatpush1.msra.mxu1 %v6232_v52  ;;  %10137 = vst [vmem:[#allocation44_spill] sm:$0xff] %v6244_v13  ;;  %v6256_v52 = vld [vmem:[%s9464_s2 + $0x130] sm:$0xff] }
 0x6e2   :  { %1748 = vmatprep.subr.mxu0 %v6167_v7  ;;  %1819 = vmatprep.subr.mxu1 %v6244_v13  ;;  %10139 = vst [vmem:[#allocation46_spill] sm:$0xff] %v6256_v52  ;;  %v6268_v13 = vld [vmem:[%s9464_s2 + $0x118] sm:$0xff] }
 0x6e3   :  { %1749 = vmatpush1.msra.mxu0 %v6179_v28  ;;  %1820 = vmatpush1.msra.mxu1 %v6256_v52  ;;  %10141 = vst [vmem:[#allocation48_spill] sm:$0xff] %v6268_v13  ;;  %v6280_v52 = vld [vmem:[%s9464_s2 + $0x110] sm:$0xff] }
 0x6e4   :  { %1750 = vmatprep.subr.mxu0 %v6191_v11  ;;  %1821 = vmatprep.subr.mxu1 %v6268_v13  ;;  %10143 = vst [vmem:[#allocation50_spill] sm:$0xff] %v6280_v52  ;;  %v6292_v13 = vld [vmem:[%s9464_s2 + $0xf8] sm:$0xff]  ;;  %v6414_v11 = vld [vmem:[%s9464_s2 + $0x50] sm:$0xff] }
 0x6e5   :  { %1751 = vmatpush1.msra.mxu0 %v6203_v8  ;;  %v6227_v8 = vld [vmem:[%s9464_s2 + $0xe0] sm:$0xff]  ;;  %1822 = vmatpush1.msra.mxu1 %v6280_v52  ;;  %10145 = vst [vmem:[#allocation52_spill] sm:$0xff] %v6292_v13  ;;  %v6304_v52 = vld [vmem:[%s9464_s2 + $0xf0] sm:$0xff] }
 0x6e6   :  { %1752 = vmatprep.subr.mxu0 %v6215_v17  ;;  %10134 = vst [vmem:[#allocation41_spill] sm:$0xff] %v6227_v8  ;;  %v6239_v17 = vld [vmem:[%s9464_s2 + $0xc8] sm:$0xff]  ;;  %1823 = vmatprep.subr.mxu1 %v6292_v13  ;;  %10147 = vst [vmem:[#allocation54_spill] sm:$0xff] %v6304_v52  ;;  %v6316_v13 = vld [vmem:[%s9464_s2 + $0xd8] sm:$0xff] }
 0x6e7   :  { %1753 = vmatpush1.msra.mxu0 %v6227_v8  ;;  %10136 = vst [vmem:[#allocation43_spill] sm:$0xff] %v6239_v17  ;;  %v6251_v8 = vld [vmem:[%s9464_s2 + $0xc0] sm:$0xff]  ;;  %1824 = vmatpush1.msra.mxu1 %v6304_v52  ;;  %10149 = vst [vmem:[#allocation56_spill] sm:$0xff] %v6316_v13  ;;  %v6328_v52 = vld [vmem:[%s9464_s2 + $0xd0] sm:$0xff] }
 0x6e8   :  { %1754 = vmatprep.subr.mxu0 %v6239_v17  ;;  %10138 = vst [vmem:[#allocation45_spill] sm:$0xff] %v6251_v8  ;;  %v6263_v17 = vld [vmem:[%s9464_s2 + $0xa8] sm:$0xff]  ;;  %1825 = vmatprep.subr.mxu1 %v6316_v13  ;;  %10151 = vst [vmem:[#allocation58_spill] sm:$0xff] %v6328_v52  ;;  %v6340_v13 = vld [vmem:[%s9464_s2 + $0xb8] sm:$0xff] }
 0x6e9   :  { %1755 = vmatpush1.msra.mxu0 %v6251_v8  ;;  %10140 = vst [vmem:[#allocation47_spill] sm:$0xff] %v6263_v17  ;;  %v6275_v8 = vld [vmem:[%s9464_s2 + $0xa0] sm:$0xff]  ;;  %1826 = vmatpush1.msra.mxu1 %v6328_v52  ;;  %10153 = vst [vmem:[#allocation60_spill] sm:$0xff] %v6340_v13  ;;  %v6352_v52 = vld [vmem:[%s9464_s2 + $0xb0] sm:$0xff] }
 0x6ea   :  { %1756 = vmatprep.subr.mxu0 %v6263_v17  ;;  %10142 = vst [vmem:[#allocation49_spill] sm:$0xff] %v6275_v8  ;;  %v6287_v17 = vld [vmem:[%s9464_s2 + $0x88] sm:$0xff]  ;;  %1827 = vmatprep.subr.mxu1 %v6340_v13  ;;  %10155 = vst [vmem:[#allocation62_spill] sm:$0xff] %v6352_v52  ;;  %v6364_v13 = vld [vmem:[%s9464_s2 + $0x98] sm:$0xff] }
 0x6eb   :  { %1757 = vmatpush1.msra.mxu0 %v6275_v8  ;;  %10144 = vst [vmem:[#allocation51_spill] sm:$0xff] %v6287_v17  ;;  %v6299_v8 = vld [vmem:[%s9464_s2 + $0x80] sm:$0xff]  ;;  %1828 = vmatpush1.msra.mxu1 %v6352_v52  ;;  %10157 = vst [vmem:[#allocation64_spill] sm:$0xff] %v6364_v13  ;;  %v6376_v52 = vld [vmem:[%s9464_s2 + $0x90] sm:$0xff] }
 0x6ec   :  { %1758 = vmatprep.subr.mxu0 %v6287_v17  ;;  %10146 = vst [vmem:[#allocation53_spill] sm:$0xff] %v6299_v8  ;;  %v6311_v17 = vld [vmem:[%s9464_s2 + $0x68] sm:$0xff]  ;;  %1829 = vmatprep.subr.mxu1 %v6364_v13  ;;  %10159 = vst [vmem:[#allocation66_spill] sm:$0xff] %v6376_v52  ;;  %v6388_v13 = vld [vmem:[%s9464_s2 + $0x78] sm:$0xff] }
 0x6ed   :  { %1759 = vmatpush1.msra.mxu0 %v6299_v8  ;;  %10148 = vst [vmem:[#allocation55_spill] sm:$0xff] %v6311_v17  ;;  %v6323_v8 = vld [vmem:[%s9464_s2 + $0x60] sm:$0xff]  ;;  %1830 = vmatpush1.msra.mxu1 %v6376_v52  ;;  %10161 = vst [vmem:[#allocation68_spill] sm:$0xff] %v6388_v13  ;;  %v6400_v52 = vld [vmem:[%s9464_s2 + $0x70] sm:$0xff] }
 0x6ee   :  { %1760 = vmatprep.subr.mxu0 %v6311_v17  ;;  %10150 = vst [vmem:[#allocation57_spill] sm:$0xff] %v6323_v8  ;;  %v6335_v17 = vld [vmem:[%s9464_s2 + $0x48] sm:$0xff]  ;;  %1831 = vmatprep.subr.mxu1 %v6388_v13  ;;  %10163 = vst [vmem:[#allocation70_spill] sm:$0xff] %v6400_v52 }
 0x6ef   :  { %1761 = vmatpush1.msra.mxu0 %v6323_v8  ;;  %10152 = vst [vmem:[#allocation59_spill] sm:$0xff] %v6335_v17  ;;  %v6347_v8 = vld [vmem:[%s9464_s2 + $0x40] sm:$0xff]  ;;  %1832 = vmatpush1.msra.mxu1 %v6400_v52  ;;  %v6421_v52 = vld [vmem:[%s9464_s2 + $0x38] sm:$0xff] }
 0x6f0   :  { %1762 = vmatprep.subr.mxu0 %v6335_v17  ;;  %10154 = vst [vmem:[#allocation61_spill] sm:$0xff] %v6347_v8  ;;  %v6359_v17 = vld [vmem:[%s9464_s2 + $0x28] sm:$0xff] }
 0x6f1   :  { %1763 = vmatpush1.msra.mxu0 %v6347_v8  ;;  %10156 = vst [vmem:[#allocation63_spill] sm:$0xff] %v6359_v17  ;;  %v6371_v8 = vld [vmem:[%s9464_s2 + $0x20] sm:$0xff] }
 0x6f2   :  { %1764 = vmatprep.subr.mxu0 %v6359_v17  ;;  %10158 = vst [vmem:[#allocation65_spill] sm:$0xff] %v6371_v8  ;;  %v6383_v17 = vld [vmem:[%s9464_s2 + $0x8] sm:$0xff] }
 0x6f3   :  { %1765 = vmatpush1.msra.mxu0 %v6371_v8  ;;  %10160 = vst [vmem:[#allocation67_spill] sm:$0xff] %v6383_v17  ;;  %v6395_v8 = vld [vmem:[%s9464_s2] sm:$0xff] }
 0x6f4   :  { %1766 = vmatprep.subr.mxu0 %v6383_v17  ;;  %10162 = vst [vmem:[#allocation69_spill] sm:$0xff] %v6395_v8  ;;  %v6407_v17 = vld [vmem:[%s9464_s2 + $0x58] sm:$0xff]  ;;  %v10164_v13 = vld [vmem:[#allocation5_spill] sm:$0xff] }
 0x6f5   :  { %1767 = vmatpush1.msra.mxu0 %v6395_v8  ;;  %1833 = vmatprep.subr.mxu1 %v6407_v17 }
 0x6f6   :  { %1768 = vmatprep.subr.mxu0 %v10164_v13  ;;  %1834 = vmatpush1.msra.mxu1 %v6414_v11  ;;  %v6428_v13 = vld [vmem:[%s9464_s2 + $0x30] sm:$0xff] }
 0x6f7   :  { %1769 = vmatpush2.msra.mxu0 %v5526_v63  ;;  %1835 = vmatprep.subr.mxu1 %v6421_v52  ;;  %v6435_v63 = vld [vmem:[%s9464_s2 + $0x18] sm:$0xff] }
 0x6f8   :  { %1770 = vmatprep.subr.mxu0 %v5538_v62  ;;  %1836 = vmatpush1.msra.mxu1 %v6428_v13  ;;  %v6442_v62 = vld [vmem:[%s9464_s2 + $0x10] sm:$0xff] }
 0x6f9   :  { %1771 = vmatpush2.msra.mxu0 %v5550_v1  ;;  %1837 = vmatprep.subr.mxu1 %v6435_v63  ;;  %v10165_v1 = vld [vmem:[#allocation6_spill] sm:$0xff] }
 0x6fa   :  { %1772 = vmatprep.subr.mxu0 %v5562_v57  ;;  %1838 = vmatpush1.msra.mxu1 %v6442_v62  ;;  %v10169_v57 = vld [vmem:[#allocation20_spill] sm:$0xff] }
 0x6fb   :  { %1773 = vmatpush2.msra.mxu0 %v5574_v60  ;;  %1839 = vmatprep.subr.mxu1 %v10165_v1  ;;  %v10171_v60 = vld [vmem:[#allocation22_spill] sm:$0xff] }
 0x6fc   :  { %1774 = vmatprep.subr.mxu0 %v5586_v47  ;;  %1840 = vmatpush2.msra.mxu1 %v5532_v56  ;;  %v10166_v56 = vld [vmem:[#allocation7_spill] sm:$0xff]  ;;  %v10173_v47 = vld [vmem:[#allocation10_spill] sm:$0xff] }
 0x6fd   :  { %1775 = vmatpush2.msra.mxu0 %v5598_v3  ;;  %1841 = vmatprep.subr.mxu1 %v5544_v55  ;;  %v10167_v55 = vld [vmem:[#allocation18_spill] sm:$0xff]  ;;  %v10175_v3 = vld [vmem:[#allocation27_spill] sm:$0xff] }
 0x6fe   :  { %1776 = vmatprep.subr.mxu0 %v5610_v5  ;;  %1842 = vmatpush2.msra.mxu1 %v5556_v59  ;;  %v10168_v59 = vld [vmem:[#allocation8_spill] sm:$0xff]  ;;  %v10177_v5 = vld [vmem:[#allocation17_spill] sm:$0xff] }
 0x6ff   :  { %1777 = vmatpush2.msra.mxu0 %v5622_v22  ;;  %1843 = vmatprep.subr.mxu1 %v5568_v48  ;;  %v10170_v48 = vld [vmem:[#allocation9_spill] sm:$0xff]  ;;  %v10179_v22 = vld [vmem:[#allocation19_spill] sm:$0xff] }
 0x700   :  { %1778 = vmatprep.subr.mxu0 %v5634_v24  ;;  %1844 = vmatpush2.msra.mxu1 %v5580_v61  ;;  %v10172_v61 = vld [vmem:[#allocation11_spill] sm:$0xff] }
 0x701   :  { %1779 = vmatpush2.msra.mxu0 %v5646_v26  ;;  %1845 = vmatprep.subr.mxu1 %v5592_v2  ;;  %v10174_v2 = vld [vmem:[#allocation13_spill] sm:$0xff]  ;;  %v10181_v24 = vld [vmem:[#allocation23_spill] sm:$0xff]  ;;  %v10183_v26 = vld [vmem:[#allocation28_spill] sm:$0xff] }
 0x702   :  { %1780 = vmatprep.subr.mxu0 %v5658_v29  ;;  %1846 = vmatpush2.msra.mxu1 %v5604_v4  ;;  %v10176_v4 = vld [vmem:[#allocation15_spill] sm:$0xff] }
 0x703   :  { %1781 = vmatpush2.msra.mxu0 %v5670_v31  ;;  %1847 = vmatprep.subr.mxu1 %v5616_v6  ;;  %v10178_v6 = vmov 0.0  }
 0x704   :  { %1782 = vmatprep.subr.mxu0 %v5682_v33  ;;  %1848 = vmatpush2.msra.mxu1 %v5628_v23  ;;  %v10180_v23 = vld [vmem:[#allocation21_spill] sm:$0xff] }
 0x705   :  { %1783 = vmatpush2.msra.mxu0 %v5694_v35  ;;  %1849 = vmatprep.subr.mxu1 %v5640_v25  ;;  %v10182_v25 = vld [vmem:[#allocation26_spill] sm:$0xff]  ;;  %v10185_v35 = vld [vmem:[#allocation25_spill] sm:$0xff] }
 0x706   :  { %1784 = vmatprep.subr.mxu0 %v5706_v37  ;;  %1850 = vmatpush2.msra.mxu1 %v5652_v27  ;;  %v10184_v27 = vld [vmem:[#allocation12_spill] sm:$0xff] }
 0x707   :  { %1785 = vmatpush2.msra.mxu0 %v5718_v39  ;;  %1851 = vmatprep.subr.mxu1 %v5664_v30 }
 0x708   :  { %1786 = vmatprep.subr.mxu0 %v5730_v41  ;;  %1852 = vmatpush2.msra.mxu1 %v5676_v32 }
 0x709   :  { %1787 = vmatpush2.msra.mxu0 %v5742_v43  ;;  %1853 = vmatprep.subr.mxu1 %v5688_v34 }
 0x70a   :  { %1788 = vmatprep.subr.mxu0 %v5754_v45  ;;  %1854 = vmatpush2.msra.mxu1 %v5700_v36 }
 0x70b   :  { %1789 = vmatpush2.msra.mxu0 %v5766_v58  ;;  %1855 = vmatprep.subr.mxu1 %v5712_v38  ;;  %v3721_v38 = vld [vmem:[%s9462_s0 + $0x38] sm:$0xff] }
 0x70c   :  { %1790 = vmatprep.subr.mxu0 %v5778_v54  ;;  %1856 = vmatpush2.msra.mxu1 %v5724_v40 }
 0x70d   :  { %1791 = vmatpush2.msra.mxu0 %v10080_v53  ;;  %1857 = vmatprep.subr.mxu1 %v5736_v42 }
 0x70e   :  { %1792 = vmatprep.subr.mxu0 %v10101_v51  ;;  %1858 = vmatpush2.msra.mxu1 %v5748_v44 }
 0x70f   :  { %1793 = vmatpush2.msra.mxu0 %v10103_v16  ;;  %1859 = vmatprep.subr.mxu1 %v10166_v56 }
 0x710   :  { %1794 = vmatprep.subr.mxu0 %v10105_v12  ;;  %1860 = vmatpush2.msra.mxu1 %v10168_v59 }
 0x711   :  { %1795 = vmatpush2.msra.mxu0 %v10167_v55  ;;  %1861 = vmatprep.subr.mxu1 %v10170_v48 }
 0x712   :  { %1796 = vmatprep.subr.mxu0 %v10169_v57  ;;  %1862 = vmatpush2.msra.mxu1 %v10172_v61 }
 0x713   :  { %1797 = vmatpush2.msra.mxu0 %v10171_v60  ;;  %1863 = vmatprep.subr.mxu1 %v10174_v2 }
 0x714   :  { %1798 = vmatprep.subr.mxu0 %v10173_v47  ;;  %1864 = vmatpush2.msra.mxu1 %v10176_v4 }
 0x715   :  { %1799 = vmatpush2.msra.mxu0 %v10175_v3  ;;  %1865 = vmatprep.subr.mxu1 %v10177_v5 }
 0x716   :  { %3865 = vmatprep.subr.mxu0 %v10178_v6  ;;  %1866 = vmatpush2.msra.mxu1 %v10179_v22 }
 0x717   :  { %1867 = vmatprep.subr.mxu1 %v10180_v23 }
 0x718   :  { %1868 = vmatpush2.msra.mxu1 %v10181_v24 }
 0x719   :  { %1869 = vmatprep.subr.mxu1 %v10182_v25  ;;  %v1735_v25 = vld [vmem:[%s9463_s1] sm:$0x3] }
 0x71a   :  { %1870 = vmatpush2.msra.mxu1 %v10183_v26  ;;  %v10187_v26 = vld [vmem:[#allocation37_spill] sm:$0xff] }
 0x71b   :  { %1981 = vmatprep.subr.mxu1 %v10184_v27 }
 0x796   :  { %v1610_v29 = vpop.f32.mrf.mxu0  ;;  %v1681_v30 = vpop.f32.mrf.mxu1 }
 0x798   :  { %v1612_v31 = vpop.f32.mrf.mxu0  ;;  %v1683_v32 = vpop.f32.mrf.mxu1 }
 0x799   :  { %v1690_v33 = vcombine.low %v1610_v29, %v1612_v31  ;;  %v1691_v34 = vcombine.low %v1681_v30, %v1683_v32  ;;  %v10188_v29 = vld [vmem:[#allocation39_spill] sm:$0xff]  ;;  %v10189_v30 = vld [vmem:[#allocation41_spill] sm:$0xff] }
 0x79a   :  { %v10190_v31 = vld [vmem:[#allocation43_spill] sm:$0xff]  ;;  %v10191_v32 = vld [vmem:[#allocation45_spill] sm:$0xff] }
 0x79b   :  { %v1698_v36 = vrot.slane %v1690_v33, %v10185_v35  ;;  %v1705_v37 = vrot.slane %v1691_v34, %v10185_v35  ;;  %v10192_v33 = vld [vmem:[#allocation47_spill] sm:$0xff]  ;;  %v10193_v34 = vld [vmem:[#allocation49_spill] sm:$0xff] }
 0x79c   :  { %v10194_v35 = vld [vmem:[#allocation51_spill] sm:$0xff] }
 0x79d   :  { %v1706_v39 = vcombine.low %v1698_v36, %v1705_v37  ;;  %v10195_v36 = vld [vmem:[#allocation53_spill] sm:$0xff]  ;;  %v10196_v37 = vld [vmem:[#allocation55_spill] sm:$0xff] }
 0x79f   :  { %v1708_v40 = vadd.f32 %v3721_v38, %v1706_v39  ;;  %v10197_v38 = vld [vmem:[#allocation57_spill] sm:$0xff]  ;;  %v10198_v39 = vld [vmem:[#allocation59_spill] sm:$0xff] }
 0x7a1   :  { %v1709_v41 = vmul.f32 0.5, %v1708_v40  ;;  %v1714_v42 = vrot.slane %v1708_v40, 2  ;;  %v1720_v44 = vrot.slane %v1708_v40, 4  ;;  %v1723_v45 = vrot.slane %v1708_v40, 6  ;;  %v10199_v40 = vld [vmem:[#allocation61_spill] sm:$0xff] }
 0x7a3   :  { %4219 = vtanh.f32 %v1709_v41  ;;  %v1716_v43 = vmul.f32 0.5, %v1714_v42  ;;  %v1725_v58 = vmul.f32 0.5, %v1723_v45  ;;  %v10200_v41 = vld [vmem:[#allocation63_spill] sm:$0xff]  ;;  %v10201_v42 = vld [vmem:[#allocation65_spill] sm:$0xff] }
 0x7a4   :  { %v6558_v45 = vld [vmem:[%s9464_s2 + $0x3e0] sm:$0xff] }
 0x7a5   :  { %4221 = vtanh.f32 %v1716_v43  ;;  %v10202_v43 = vld [vmem:[#allocation67_spill] sm:$0xff]  ;;  %10204 = vst [vmem:[#allocation6_spill] sm:$0xff] %v6558_v45 }
 0x7a6   :  { %4223 = vtanh.f32 %v1720_v44  ;;  %v6552_v44 = vld [vmem:[%s9464_s2 + $0x3e8] sm:$0xff] }
 0x7a7   :  { %4225 = vtanh.f32 %v1725_v58  ;;  %10203 = vst [vmem:[#allocation5_spill] sm:$0xff] %v6552_v44  ;;  %v6564_v58 = vld [vmem:[%s9464_s2 + $0x3c8] sm:$0xff] }
 0x7a8   :  { %10205 = vst [vmem:[#allocation7_spill] sm:$0xff] %v6564_v58 }
 0x7b0   :  { %v4220_v54 = vpop.eup %4219 }
 0x7b1   :  { %v1711_v53 = vadd.f32 1.0, %v4220_v54  ;;  %v6570_v54 = vld [vmem:[%s9464_s2 + $0x3c0] sm:$0xff] }
 0x7b2   :  { %v4222_v51 = vpop.eup %4221  ;;  %10206 = vst [vmem:[#allocation18_spill] sm:$0xff] %v6570_v54 }
 0x7b3   :  { %v1712_v16 = vmul.f32 0.5, %v1711_v53  ;;  %v1718_v1 = vadd.f32 1.0, %v4222_v51  ;;  %v4224_v59 = vpop.eup %4223  ;;  %v6576_v53 = vld [vmem:[%s9464_s2 + $0x3a8] sm:$0xff]  ;;  %v6582_v51 = vld [vmem:[%s9464_s2 + $0x3a0] sm:$0xff] }
 0x7b4   :  { %v4226_v4 = vpop.eup %4225  ;;  %10207 = vst [vmem:[#allocation8_spill] sm:$0xff] %v6576_v53  ;;  %10208 = vst [vmem:[#allocation20_spill] sm:$0xff] %v6582_v51 }
 0x7b5   :  { %v1719_v56 = vmul.f32 0.5, %v1718_v1  ;;  %v1730_v61 = vmul.f32 %v4224_v59, %v1712_v16  ;;  %v1727_v5 = vadd.f32 1.0, %v4226_v4  ;;  %v6588_v16 = vld [vmem:[%s9464_s2 + $0x388] sm:$0xff]  ;;  %v6594_v1 = vld [vmem:[%s9464_s2 + $0x380] sm:$0xff] }
 0x7b6   :  { %10209 = vst [vmem:[#allocation9_spill] sm:$0xff] %v6588_v16  ;;  %10210 = vst [vmem:[#allocation22_spill] sm:$0xff] %v6594_v1  ;;  %v6606_v59 = vld [vmem:[%s9464_s2 + $0x360] sm:$0xff]  ;;  %v6624_v4 = vld [vmem:[%s9464_s2 + $0x328] sm:$0xff] }
 0x7b7   :  { %v1729_v48 = vmul.f32 %v1719_v56, %v6065_v10  ;;  %v1728_v22 = vmul.f32 0.5, %v1727_v5  ;;  %v10186_v10 = vld [vmem:[#allocation35_spill] sm:$0xff]  ;;  %v6600_v56 = vld [vmem:[%s9464_s2 + $0x368] sm:$0xff]  ;;  %10212 = vst [vmem:[#allocation10_spill] sm:$0xff] %v6606_v59  ;;  %10215 = vst [vmem:[#allocation15_spill] sm:$0xff] %v6624_v4 }
 0x7b8   :  { %10211 = vst [vmem:[#allocation11_spill] sm:$0xff] %v6600_v56  ;;  %v6630_v5 = vld [vmem:[%s9464_s2 + $0x320] sm:$0xff] }
 0x7b9   :  { %v6512_v2 = vadd.f32 %v1730_v61, %v1729_v48  ;;  %v6612_v48 = vld [vmem:[%s9464_s2 + $0x348] sm:$0xff]  ;;  %v6618_v61 = vld [vmem:[%s9464_s2 + $0x340] sm:$0xff]  ;;  %10216 = vst [vmem:[#allocation17_spill] sm:$0xff] %v6630_v5 }
 0x7ba   :  { %10213 = vst [vmem:[#allocation13_spill] sm:$0xff] %v6612_v48  ;;  %10214 = vst [vmem:[#allocation27_spill] sm:$0xff] %v6618_v61 }
 0x7bb   :  { %4227 = vtanh.f32 %v6512_v2 }
 0x7c8   :  { %v4228_v23 = vpop.eup %4227 }
 0x7c9   :  { %v1733_v24 = vmul.f32 %v4228_v23, %v1728_v22  ;;  %v6636_v22 = vld [vmem:[%s9464_s2 + $0x308] sm:$0xff]  ;;  %v6642_v23 = vld [vmem:[%s9464_s2 + $0x300] sm:$0xff] }
 0x7ca   :  { %10217 = vst [vmem:[#allocation19_spill] sm:$0xff] %v6636_v22  ;;  %10218 = vst [vmem:[#allocation21_spill] sm:$0xff] %v6642_v23 }
 0x7cb   :  { %1800 = vmatprep.mubr.f32.mxu0 %v1733_v24  ;;  %1734 = vst [vmem:[#allocation2] sm:$0x3] %v1733_v24  ;;  %1871 = vmatprep.mubr.f32.mxu1 %v1733_v24  ;;  %v6648_v24 = vld [vmem:[%s9464_s2 + $0x2e8] sm:$0xff] }
 0x7cc   :  { %1801 = vmatmul.mubr.f32.vlgmr.msra.gmra.mxu0 %v1735_v25  ;;  %1872 = vmatmul.mubr.f32.vlgmr.msra.gmra.mxu1 %v1735_v25  ;;  %10219 = vst [vmem:[#allocation23_spill] sm:$0xff] %v6648_v24  ;;  %v6654_v25 = vld [vmem:[%s9464_s2 + $0x2e0] sm:$0xff] }
 0x7cd   :  { %1982 = vmatpush1.msra.mxu1 %v6071_v19  ;;  %10220 = vst [vmem:[#allocation26_spill] sm:$0xff] %v6654_v25  ;;  %3897 = vmatprep.mubr.msk.f32.mxu0 %vm4777_vm0, %v10178_v6 }
 0x7ce   :  { %1983 = vmatprep.subr.mxu1 %v6081_v46 }
 0x7cf   :  { %1984 = vmatpush1.msra.mxu1 %v6091_v0 }
 0x7d0   :  { %1985 = vmatprep.subr.mxu1 %v6102_v14 }
 0x7d1   :  { %1986 = vmatpush1.msra.mxu1 %v6109_v20 }
 0x7d2   :  { %1987 = vmatprep.subr.mxu1 %v6116_v50 }
 0x7d3   :  { %1988 = vmatpush1.msra.mxu1 %v6123_v49 }
 0x7d4   :  { %1989 = vmatprep.subr.mxu1 %v6129_v21 }
 0x7d5   :  { %1990 = vmatpush1.msra.mxu1 %v6135_v9 }
 0x7d6   :  { %1991 = vmatprep.subr.mxu1 %v6143_v15 }
 0x7d7   :  { %1992 = vmatpush1.msra.mxu1 %v6153_v18 }
 0x7d8   :  { %1993 = vmatprep.subr.mxu1 %v6167_v7 }
 0x7d9   :  { %1994 = vmatpush1.msra.mxu1 %v6179_v28 }
 0x7da   :  { %1995 = vmatprep.subr.mxu1 %v10186_v10 }
 0x7db   :  { %1996 = vmatpush1.msra.mxu1 %v10187_v26 }
 0x7dc   :  { %1997 = vmatprep.subr.mxu1 %v10188_v29 }
 0x7dd   :  { %1998 = vmatpush1.msra.mxu1 %v10189_v30 }
 0x7de   :  { %1999 = vmatprep.subr.mxu1 %v10190_v31 }
 0x7df   :  { %2000 = vmatpush1.msra.mxu1 %v10191_v32 }
 0x7e0   :  { %2001 = vmatprep.subr.mxu1 %v10192_v33 }
 0x7e1   :  { %2002 = vmatpush1.msra.mxu1 %v10193_v34 }
 0x7e2   :  { %2003 = vmatprep.subr.mxu1 %v10194_v35 }
 0x7e3   :  { %2004 = vmatpush1.msra.mxu1 %v10195_v36 }
 0x7e4   :  { %2005 = vmatprep.subr.mxu1 %v10196_v37 }
 0x7e5   :  { %2006 = vmatpush1.msra.mxu1 %v10197_v38 }
 0x7e6   :  { %2007 = vmatprep.subr.mxu1 %v10198_v39 }
 0x7e7   :  { %2008 = vmatpush1.msra.mxu1 %v10199_v40 }
 0x7e8   :  { %2009 = vmatprep.subr.mxu1 %v10200_v41 }
 0x7e9   :  { %2010 = vmatpush1.msra.mxu1 %v10201_v42 }
 0x7ea   :  { %2011 = vmatprep.subr.mxu1 %v10202_v43 }
 0x7eb   :  { %2012 = vmatpush1.msra.mxu1 %v6395_v8 }
 0x7ec   :  { %2013 = vmatprep.subr.mxu1 %v6552_v44 }
 0x7ed   :  { %2014 = vmatpush2.msra.mxu1 %v6558_v45 }
 0x7ee   :  { %2015 = vmatprep.subr.mxu1 %v6564_v58 }
 0x7ef   :  { %2016 = vmatpush2.msra.mxu1 %v6570_v54 }
 0x7f0   :  { %2017 = vmatprep.subr.mxu1 %v6576_v53  ;;  %v170_v53 = vld [vmem:[%s9465_s3] sm:$0xf] }
 0x7f1   :  { %2018 = vmatpush2.msra.mxu1 %v6582_v51 }
 0x7f2   :  { %2019 = vmatprep.subr.mxu1 %v6588_v16  ;;  %v10234_v16 = vld [vmem:[#allocation24_spill] sm:$0xff] }
 0x7f3   :  { %2020 = vmatpush2.msra.mxu1 %v6594_v1  ;;  %v10233_v1 = vld [vmem:[#allocation14_spill] sm:$0xff]  ;;  %v174_v51 = vsub.s32 0, %v10234_v16  ;;  %v178_v54 = vsub.s32 1, %v10234_v16  ;;  %v182_v45 = vsub.s32 2, %v10234_v16 }
 0x7f4   :  { %2021 = vmatprep.subr.mxu1 %v6600_v56  ;;  %v6820_v56 = vld [vmem:[%s9466_s4] sm:$0xff] }
 0x7f5   :  { %2022 = vmatpush2.msra.mxu1 %v6606_v59  ;;  %v6813_v59 = vld [vmem:[%s9466_s4 + $0x8] sm:$0xff]  ;;  %10232 = vst [vmem:[#allocation51_spill] sm:$0xff] %v6820_v56  ;;  %v6831_v58 = vrot.slane %v170_v53, %v174_v51  ;;  %v6834_v44 = vrot.slane %v170_v53, %v178_v54  ;;  %v186_v51 = vsub.s32 3, %v10234_v16 }
 0x7f6   :  { %2023 = vmatprep.subr.mxu1 %v6612_v48  ;;  %v6806_v48 = vld [vmem:[%s9466_s4 + $0x10] sm:$0xff]  ;;  %10231 = vst [vmem:[#allocation49_spill] sm:$0xff] %v6813_v59 }
 0x7f7   :  { %2024 = vmatpush2.msra.mxu1 %v6618_v61  ;;  %v6799_v61 = vld [vmem:[%s9466_s4 + $0x18] sm:$0xff]  ;;  %10230 = vst [vmem:[#allocation47_spill] sm:$0xff] %v6806_v48  ;;  %10235 = vst [vmem:[#allocation53_spill] sm:$0xff] %v6831_v58  ;;  %v6842_v54 = vrot.slane %v170_v53, %v186_v51 }
 0x7f8   :  { %2025 = vmatprep.subr.mxu1 %v6624_v4  ;;  %v6792_v4 = vld [vmem:[%s9466_s4 + $0x20] sm:$0xff]  ;;  %10229 = vst [vmem:[#allocation45_spill] sm:$0xff] %v6799_v61 }
 0x7f9   :  { %2026 = vmatpush2.msra.mxu1 %v6630_v5  ;;  %v6785_v5 = vld [vmem:[%s9466_s4 + $0x28] sm:$0xff] }
 0x7fa   :  { %2027 = vmatprep.subr.mxu1 %v6636_v22  ;;  %v6660_v22 = vld [vmem:[%s9464_s2 + $0x2c8] sm:$0xff] }
 0x7fb   :  { %2028 = vmatpush2.msra.mxu1 %v6642_v23  ;;  %10221 = vst [vmem:[#allocation28_spill] sm:$0xff] %v6660_v22  ;;  %v6666_v23 = vld [vmem:[%s9464_s2 + $0x2c0] sm:$0xff] }
 0x7fc   :  { %2029 = vmatprep.subr.mxu1 %v6648_v24  ;;  %10222 = vst [vmem:[#allocation12_spill] sm:$0xff] %v6666_v23  ;;  %v6672_v24 = vld [vmem:[%s9464_s2 + $0x2a8] sm:$0xff] }
 0x7fd   :  { %2030 = vmatpush2.msra.mxu1 %v6654_v25  ;;  %10223 = vst [vmem:[#allocation25_spill] sm:$0xff] %v6672_v24  ;;  %v6678_v25 = vld [vmem:[%s9464_s2 + $0x2a0] sm:$0xff] }
 0x7fe   :  { %2031 = vmatprep.subr.mxu1 %v6660_v22  ;;  %10224 = vst [vmem:[#allocation35_spill] sm:$0xff] %v6678_v25  ;;  %v6684_v22 = vld [vmem:[%s9464_s2 + $0x288] sm:$0xff] }
 0x7ff   :  { %2032 = vmatpush2.msra.mxu1 %v6666_v23  ;;  %10225 = vst [vmem:[#allocation37_spill] sm:$0xff] %v6684_v22  ;;  %v6690_v23 = vld [vmem:[%s9464_s2 + $0x280] sm:$0xff] }
 0x800   :  { %2033 = vmatprep.subr.mxu1 %v6672_v24  ;;  %10226 = vst [vmem:[#allocation39_spill] sm:$0xff] %v6690_v23  ;;  %v6696_v24 = vld [vmem:[%s9464_s2 + $0x268] sm:$0xff] }
 0x801   :  { %2034 = vmatpush2.msra.mxu1 %v6678_v25  ;;  %10227 = vst [vmem:[#allocation41_spill] sm:$0xff] %v6696_v24  ;;  %v6702_v25 = vld [vmem:[%s9464_s2 + $0x260] sm:$0xff] }
 0x802   :  { %2035 = vmatprep.subr.mxu1 %v6684_v22  ;;  %10228 = vst [vmem:[#allocation43_spill] sm:$0xff] %v6702_v25  ;;  %v6776_v22 = vld [vmem:[%s9466_s4 + $0x30] sm:$0xff] }
 0x803   :  { %2036 = vmatpush2.msra.mxu1 %v6690_v23  ;;  %v6770_v23 = vld [vmem:[%s9466_s4 + $0x38] sm:$0xff] }
 0x804   :  { %2037 = vmatprep.subr.mxu1 %v6696_v24  ;;  %v6715_v24 = vld [vmem:[%s9466_s4 + $0x78] sm:$0xff] }
 0x805   :  { %2038 = vmatpush2.msra.mxu1 %v6702_v25  ;;  %3866 = vmatpush3.msra.mxu0 %v6715_v24  ;;  %v6764_v25 = vld [vmem:[%s9466_s4 + $0x40] sm:$0xff] }
 0x806   :  { %2039 = vmatprep.subr.mxu1 %v10105_v12  ;;  %3867 = vmatprep.subr.mxu0 %v10178_v6  ;;  %v6722_v12 = vld [vmem:[%s9466_s4 + $0x70] sm:$0xff] }
 0x807   :  { %2040 = vmatpush2.msra.mxu1 %v10167_v55  ;;  %3868 = vmatpush3.msra.mxu0 %v6722_v12  ;;  %v6729_v55 = vld [vmem:[%s9466_s4 + $0x68] sm:$0xff] }
 0x808   :  { %2041 = vmatprep.subr.mxu1 %v10169_v57  ;;  %3869 = vmatprep.subr.mxu0 %v10178_v6  ;;  %v6736_v57 = vld [vmem:[%s9466_s4 + $0x60] sm:$0xff] }
 0x809   :  { %2042 = vmatpush2.msra.mxu1 %v10171_v60  ;;  %3870 = vmatpush3.msra.mxu0 %v6729_v55  ;;  %v6743_v60 = vld [vmem:[%s9466_s4 + $0x58] sm:$0xff] }
 0x80a   :  { %2043 = vmatprep.subr.mxu1 %v10173_v47  ;;  %3871 = vmatprep.subr.mxu0 %v10178_v6  ;;  %v6750_v47 = vld [vmem:[%s9466_s4 + $0x50] sm:$0xff] }
 0x80b   :  { %2044 = vmatpush2.msra.mxu1 %v10175_v3  ;;  %3872 = vmatpush3.msra.mxu0 %v6736_v57  ;;  %v6757_v3 = vld [vmem:[%s9466_s4 + $0x48] sm:$0xff] }
 0x80c   :  { %3900 = vmatprep.subr.mxu1 %v10178_v6  ;;  %3873 = vmatprep.subr.mxu0 %v10178_v6 }
 0x80d   :  { %3874 = vmatpush3.msra.mxu0 %v6743_v60 }
 0x80e   :  { %3875 = vmatprep.subr.mxu0 %v10178_v6 }
 0x80f   :  { %3876 = vmatpush3.msra.mxu0 %v6750_v47 }
 0x810   :  { %3877 = vmatprep.subr.mxu0 %v10178_v6 }
 0x811   :  { %3878 = vmatpush3.msra.mxu0 %v6757_v3 }
 0x812   :  { %3879 = vmatprep.subr.mxu0 %v10178_v6 }
 0x813   :  { %3880 = vmatpush3.msra.mxu0 %v6764_v25 }
 0x814   :  { %3881 = vmatprep.subr.mxu0 %v10178_v6 }
 0x815   :  { %3882 = vmatpush3.msra.mxu0 %v6770_v23 }
 0x816   :  { %3883 = vmatprep.subr.mxu0 %v10178_v6 }
 0x817   :  { %3884 = vmatpush3.msra.mxu0 %v6776_v22 }
 0x818   :  { %3885 = vmatprep.subr.mxu0 %v10178_v6 }
 0x819   :  { %3886 = vmatpush3.msra.mxu0 %v6785_v5 }
 0x81a   :  { %3887 = vmatprep.subr.mxu0 %v10178_v6 }
 0x81b   :  { %3888 = vmatpush3.msra.mxu0 %v6792_v4 }
 0x81c   :  { %3889 = vmatprep.subr.mxu0 %v10178_v6 }
 0x81d   :  { %3890 = vmatpush3.msra.mxu0 %v6799_v61 }
 0x81e   :  { %3891 = vmatprep.subr.mxu0 %v10178_v6 }
 0x81f   :  { %3892 = vmatpush3.msra.mxu0 %v6806_v48 }
 0x820   :  { %3893 = vmatprep.subr.mxu0 %v10178_v6 }
 0x821   :  { %3894 = vmatpush3.msra.mxu0 %v6813_v59 }
 0x822   :  { %3895 = vmatprep.subr.mxu0 %v10178_v6 }
 0x823   :  { %3896 = vmatpush3.msra.mxu0 %v6820_v56  ;;  %v6837_v56 = vrot.slane %v170_v53, %v182_v45 }
 0x824   :  { %2052 = vmatprep.subr.mxu0 %v10233_v1 }
 0x88c   :  { %v1802_v8 = vpop.f32.mrf.mxu0  ;;  %v1873_v42 = vpop.f32.mrf.mxu1 }
 0x88d   :  { %v1803_v43 = vadd.f32 %v1802_v8, %v6831_v58  ;;  %v1874_v39 = vadd.f32 %v1873_v42, %v6837_v56 }
 0x88e   :  { %v1804_v1 = vpop.f32.mrf.mxu0  ;;  %v1875_v48 = vpop.f32.mrf.mxu1 }
 0x88f   :  { %v1878_v41 = vmul.f32 0.5, %v1803_v43  ;;  %v1805_v59 = vadd.f32 %v1804_v1, %v6834_v44  ;;  %v1876_v8 = vadd.f32 %v1875_v48, %v6842_v54 }
 0x891   :  { %4229 = vtanh.f32 %v1878_v41  ;;  %v1882_v40 = vmul.f32 0.5, %v1805_v59  ;;  %v1887_v45 = vmul.f32 0.5, %v1876_v8  ;;  %v10241_v8 = vld [vmem:[#allocation33_spill] sm:$0xff] }
 0x893   :  { %4231 = vtanh.f32 %v1882_v40 }
 0x894   :  { %4233 = vtanh.f32 %v1874_v39 }
 0x895   :  { %4235 = vtanh.f32 %v1887_v45  ;;  %v10242_v45 = vld [vmem:[#allocation34_spill] sm:$0xff] }
 0x89e   :  { %v4230_v58 = vpop.eup %4229 }
 0x89f   :  { %v1880_v38 = vadd.f32 1.0, %v4230_v58  ;;  %v10238_v58 = vld [vmem:[#allocation30_spill] sm:$0xff] }
 0x8a0   :  { %v4232_v37 = vpop.eup %4231 }
 0x8a1   :  { %v1881_v43 = vmul.f32 0.5, %v1880_v38  ;;  %v1884_v61 = vadd.f32 1.0, %v4232_v37  ;;  %v4234_v41 = vpop.eup %4233  ;;  %v10236_v38 = vld [vmem:[#allocation16_spill] sm:$0xff]  ;;  %v10237_v37 = vld [vmem:[#allocation29_spill] sm:$0xff] }
 0x8a2   :  { %v4236_v39 = vpop.eup %4235 }
 0x8a3   :  { %v1885_v59 = vmul.f32 0.5, %v1884_v61  ;;  %v1892_v1 = vmul.f32 %v4234_v41, %v1881_v43  ;;  %v1889_v40 = vadd.f32 1.0, %v4236_v39  ;;  %v10240_v61 = vld [vmem:[#allocation32_spill] sm:$0xff]  ;;  %v10244_v41 = vld [vmem:[#allocation38_spill] sm:$0xff] }
 0x8a4   :  { %v10243_v43 = vld [vmem:[#allocation36_spill] sm:$0xff]  ;;  %v10248_v39 = vld [vmem:[#allocation46_spill] sm:$0xff] }
 0x8a5   :  { %v1891_v42 = vmul.f32 %v1885_v59, %v6512_v2  ;;  %v1890_v53 = vmul.f32 0.5, %v1889_v40  ;;  %v10239_v2 = vld [vmem:[#allocation31_spill] sm:$0xff]  ;;  %v10245_v59 = vld [vmem:[#allocation40_spill] sm:$0xff] }
 0x8a6   :  { %v10249_v40 = vld [vmem:[#allocation48_spill] sm:$0xff] }
 0x8a7   :  { %v6846_v16 = vadd.f32 %v1892_v1, %v1891_v42  ;;  %v10246_v42 = vld [vmem:[#allocation42_spill] sm:$0xff]  ;;  %v10247_v1 = vld [vmem:[#allocation44_spill] sm:$0xff] }
 0x8a9   :  { %4237 = vtanh.f32 %v6846_v16 }
 0x8b6   :  { %v4238_v48 = vpop.eup %4237 }
 0x8b7   :  { %v1895_v51 = vmul.f32 %v4238_v48, %v1890_v53  ;;  %v10250_v53 = vld [vmem:[#allocation50_spill] sm:$0xff]  ;;  %v10251_v48 = vld [vmem:[#allocation52_spill] sm:$0xff] }
 0x8b9   :  { %3898 = vmatmul.mubr.f32.vlgmr.msra.gmra.mxu0 %v1895_v51  ;;  %2045 = vmatprep.mubr.f32.mxu1 %v1895_v51 }
 0x8ba   :  { %2116 = vmatprep.mubr.f32.mxu0 %v1895_v51  ;;  %2053 = vmatpush1.msra.mxu0 %v10236_v38  ;;  %v10252_v51 = vld [vmem:[#allocation54_spill] sm:$0xff]  ;;  %v10253_v38 = vld [vmem:[#allocation56_spill] sm:$0xff] }
 0x8bb   :  { %2054 = vmatprep.subr.mxu0 %v10237_v37  ;;  %v10254_v37 = vld [vmem:[#allocation58_spill] sm:$0xff] }
 0x8bc   :  { %2055 = vmatpush1.msra.mxu0 %v10238_v58  ;;  %v10255_v58 = vld [vmem:[#allocation60_spill] sm:$0xff] }
 0x8bd   :  { %2056 = vmatprep.subr.mxu0 %v10239_v2  ;;  %v10256_v2 = vld [vmem:[#allocation62_spill] sm:$0xff] }
 0x8be   :  { %2057 = vmatpush1.msra.mxu0 %v10240_v61  ;;  %v10257_v61 = vld [vmem:[#allocation64_spill] sm:$0xff] }
 0x8bf   :  { %2058 = vmatprep.subr.mxu0 %v10241_v8  ;;  %v10258_v8 = vld [vmem:[#allocation66_spill] sm:$0xff] }
 0x8c0   :  { %2059 = vmatpush1.msra.mxu0 %v10242_v45  ;;  %v10259_v45 = vld [vmem:[#allocation68_spill] sm:$0xff] }
 0x8c1   :  { %2060 = vmatprep.subr.mxu0 %v10243_v43  ;;  %v10260_v43 = vld [vmem:[#allocation70_spill] sm:$0xff] }
 0x8c2   :  { %2061 = vmatpush1.msra.mxu0 %v10244_v41  ;;  %v6883_v41 = vld [vmem:[%s9464_s2 + $0x3f8] sm:$0xff] }
 0x8c3   :  { %2062 = vmatprep.subr.mxu0 %v10245_v59  ;;  %10261 = vst [vmem:[#allocation14_spill] sm:$0xff] %v6883_v41  ;;  %v6919_v59 = vld [vmem:[%s9464_s2 + $0x398] sm:$0xff] }
 0x8c4   :  { %2063 = vmatpush1.msra.mxu0 %v10246_v42  ;;  %10267 = vst [vmem:[#allocation32_spill] sm:$0xff] %v6919_v59  ;;  %v6925_v42 = vld [vmem:[%s9464_s2 + $0x390] sm:$0xff] }
 0x8c5   :  { %2064 = vmatprep.subr.mxu0 %v10247_v1  ;;  %10268 = vst [vmem:[#allocation33_spill] sm:$0xff] %v6925_v42  ;;  %v6931_v1 = vld [vmem:[%s9464_s2 + $0x378] sm:$0xff] }
 0x8c6   :  { %2065 = vmatpush1.msra.mxu0 %v10248_v39  ;;  %10269 = vst [vmem:[#allocation34_spill] sm:$0xff] %v6931_v1  ;;  %v6937_v39 = vld [vmem:[%s9464_s2 + $0x370] sm:$0xff] }
 0x8c7   :  { %2066 = vmatprep.subr.mxu0 %v10249_v40  ;;  %10270 = vst [vmem:[#allocation36_spill] sm:$0xff] %v6937_v39  ;;  %v6943_v40 = vld [vmem:[%s9464_s2 + $0x358] sm:$0xff] }
 0x8c8   :  { %2067 = vmatpush1.msra.mxu0 %v10250_v53  ;;  %10271 = vst [vmem:[#allocation38_spill] sm:$0xff] %v6943_v40  ;;  %v6949_v53 = vld [vmem:[%s9464_s2 + $0x350] sm:$0xff] }
 0x8c9   :  { %2068 = vmatprep.subr.mxu0 %v10251_v48  ;;  %10272 = vst [vmem:[#allocation40_spill] sm:$0xff] %v6949_v53  ;;  %v6955_v48 = vld [vmem:[%s9464_s2 + $0x338] sm:$0xff] }
 0x8ca   :  { %2069 = vmatpush1.msra.mxu0 %v10252_v51  ;;  %10273 = vst [vmem:[#allocation42_spill] sm:$0xff] %v6955_v48  ;;  %v6961_v51 = vld [vmem:[%s9464_s2 + $0x330] sm:$0xff] }
 0x8cb   :  { %2070 = vmatprep.subr.mxu0 %v10253_v38  ;;  %10274 = vst [vmem:[#allocation44_spill] sm:$0xff] %v6961_v51  ;;  %v6967_v38 = vld [vmem:[%s9464_s2 + $0x318] sm:$0xff] }
 0x8cc   :  { %2071 = vmatpush1.msra.mxu0 %v10254_v37  ;;  %10275 = vst [vmem:[#allocation46_spill] sm:$0xff] %v6967_v38  ;;  %v6973_v37 = vld [vmem:[%s9464_s2 + $0x310] sm:$0xff] }
 0x8cd   :  { %2072 = vmatprep.subr.mxu0 %v10255_v58  ;;  %10276 = vst [vmem:[#allocation48_spill] sm:$0xff] %v6973_v37  ;;  %v6979_v58 = vld [vmem:[%s9464_s2 + $0x2f8] sm:$0xff] }
 0x8ce   :  { %2073 = vmatpush1.msra.mxu0 %v10256_v2  ;;  %10277 = vst [vmem:[#allocation50_spill] sm:$0xff] %v6979_v58  ;;  %v6985_v2 = vld [vmem:[%s9464_s2 + $0x2f0] sm:$0xff] }
 0x8cf   :  { %2074 = vmatprep.subr.mxu0 %v10257_v61  ;;  %10278 = vst [vmem:[#allocation52_spill] sm:$0xff] %v6985_v2  ;;  %v6991_v61 = vld [vmem:[%s9464_s2 + $0x2d8] sm:$0xff] }
 0x8d0   :  { %2075 = vmatpush1.msra.mxu0 %v10258_v8  ;;  %10279 = vst [vmem:[#allocation54_spill] sm:$0xff] %v6991_v61  ;;  %v6997_v8 = vld [vmem:[%s9464_s2 + $0x2d0] sm:$0xff] }
 0x8d1   :  { %2076 = vmatprep.subr.mxu0 %v10259_v45  ;;  %10280 = vst [vmem:[#allocation56_spill] sm:$0xff] %v6997_v8  ;;  %v7003_v45 = vld [vmem:[%s9464_s2 + $0x2b8] sm:$0xff] }
 0x8d2   :  { %2077 = vmatpush1.msra.mxu0 %v10260_v43  ;;  %10281 = vst [vmem:[#allocation58_spill] sm:$0xff] %v7003_v45  ;;  %v7009_v43 = vld [vmem:[%s9464_s2 + $0x2b0] sm:$0xff] }
 0x8d3   :  { %2078 = vmatprep.subr.mxu0 %v6407_v17  ;;  %v6889_v17 = vld [vmem:[%s9464_s2 + $0x3f0] sm:$0xff]  ;;  %10282 = vst [vmem:[#allocation60_spill] sm:$0xff] %v7009_v43 }
 0x8d4   :  { %2079 = vmatpush1.msra.mxu0 %v6414_v11  ;;  %10262 = vst [vmem:[#allocation24_spill] sm:$0xff] %v6889_v17  ;;  %v6895_v11 = vld [vmem:[%s9464_s2 + $0x3d8] sm:$0xff] }
 0x8d5   :  { %2080 = vmatprep.subr.mxu0 %v6421_v52  ;;  %10263 = vst [vmem:[#allocation16_spill] sm:$0xff] %v6895_v11  ;;  %v6901_v52 = vld [vmem:[%s9464_s2 + $0x3d0] sm:$0xff] }
 0x8d6   :  { %2081 = vmatpush1.msra.mxu0 %v6428_v13  ;;  %10264 = vst [vmem:[#allocation29_spill] sm:$0xff] %v6901_v52  ;;  %v6907_v13 = vld [vmem:[%s9464_s2 + $0x3b8] sm:$0xff] }
 0x8d7   :  { %2082 = vmatprep.subr.mxu0 %v6435_v63  ;;  %10265 = vst [vmem:[#allocation30_spill] sm:$0xff] %v6907_v13  ;;  %v6913_v63 = vld [vmem:[%s9464_s2 + $0x3b0] sm:$0xff] }
 0x8d8   :  { %2083 = vmatpush1.msra.mxu0 %v6442_v62  ;;  %10266 = vst [vmem:[#allocation31_spill] sm:$0xff] %v6913_v63 }
 0x8d9   :  { %2084 = vmatprep.subr.mxu0 %v6883_v41 }
 0x8da   :  { %2085 = vmatpush2.msra.mxu0 %v6889_v17 }
 0x8db   :  { %2086 = vmatprep.subr.mxu0 %v6895_v11 }
 0x8dc   :  { %2087 = vmatpush2.msra.mxu0 %v6901_v52 }
 0x8dd   :  { %2088 = vmatprep.subr.mxu0 %v6907_v13 }
 0x8de   :  { %2089 = vmatpush2.msra.mxu0 %v6913_v63 }
 0x8df   :  { %2090 = vmatprep.subr.mxu0 %v6919_v59 }
 0x8e0   :  { %2091 = vmatpush2.msra.mxu0 %v6925_v42 }
 0x8e1   :  { %2092 = vmatprep.subr.mxu0 %v6931_v1 }
 0x8e2   :  { %2093 = vmatpush2.msra.mxu0 %v6937_v39 }
 0x8e3   :  { %2094 = vmatprep.subr.mxu0 %v6943_v40 }
 0x8e4   :  { %2095 = vmatpush2.msra.mxu0 %v6949_v53 }
 0x8e5   :  { %2096 = vmatprep.subr.mxu0 %v6955_v48 }
 0x8e6   :  { %2097 = vmatpush2.msra.mxu0 %v6961_v51 }
 0x8e7   :  { %2098 = vmatprep.subr.mxu0 %v6967_v38 }
 0x8e8   :  { %2099 = vmatpush2.msra.mxu0 %v6973_v37 }
 0x8e9   :  { %2100 = vmatprep.subr.mxu0 %v6979_v58 }
 0x8ea   :  { %2101 = vmatpush2.msra.mxu0 %v6985_v2 }
 0x8eb   :  { %2102 = vmatprep.subr.mxu0 %v6991_v61  ;;  %v7015_v61 = vld [vmem:[%s9464_s2 + $0x298] sm:$0xff] }
 0x8ec   :  { %2103 = vmatpush2.msra.mxu0 %v6997_v8  ;;  %10283 = vst [vmem:[#allocation62_spill] sm:$0xff] %v7015_v61  ;;  %v7021_v8 = vld [vmem:[%s9464_s2 + $0x290] sm:$0xff] }
 0x8ed   :  { %2104 = vmatprep.subr.mxu0 %v7003_v45  ;;  %10284 = vst [vmem:[#allocation64_spill] sm:$0xff] %v7021_v8  ;;  %v7027_v45 = vld [vmem:[%s9464_s2 + $0x278] sm:$0xff] }
 0x8ee   :  { %2105 = vmatpush2.msra.mxu0 %v7009_v43  ;;  %10285 = vst [vmem:[#allocation66_spill] sm:$0xff] %v7027_v45  ;;  %v7033_v43 = vld [vmem:[%s9464_s2 + $0x270] sm:$0xff] }
 0x8ef   :  { %2106 = vmatprep.subr.mxu0 %v7015_v61  ;;  %10286 = vst [vmem:[#allocation68_spill] sm:$0xff] %v7033_v43  ;;  %v7039_v61 = vld [vmem:[%s9464_s2 + $0x258] sm:$0xff] }
 0x8f0   :  { %2107 = vmatpush2.msra.mxu0 %v7021_v8  ;;  %10287 = vst [vmem:[#allocation70_spill] sm:$0xff] %v7039_v61  ;;  %v7045_v8 = vld [vmem:[%s9464_s2 + $0x250] sm:$0xff] }
 0x8f1   :  { %2108 = vmatprep.subr.mxu0 %v7027_v45  ;;  %10288 = vst [vmem:[#allocation71_spill] sm:$0xff] %v7045_v8  ;;  %v7051_v45 = vld [vmem:[%s9464_s2 + $0x238] sm:$0xff] }
 0x8f2   :  { %2109 = vmatpush2.msra.mxu0 %v7033_v43  ;;  %10289 = vst [vmem:[#allocation72_spill] sm:$0xff] %v7051_v45  ;;  %v7057_v43 = vld [vmem:[%s9464_s2 + $0x230] sm:$0xff] }
 0x8f3   :  { %2110 = vmatprep.subr.mxu0 %v7039_v61  ;;  %10290 = vst [vmem:[#allocation73_spill] sm:$0xff] %v7057_v43  ;;  %v7063_v61 = vld [vmem:[%s9464_s2 + $0x218] sm:$0xff] }
 0x8f4   :  { %2111 = vmatpush2.msra.mxu0 %v7045_v8  ;;  %10291 = vst [vmem:[#allocation74_spill] sm:$0xff] %v7063_v61  ;;  %v7069_v8 = vld [vmem:[%s9464_s2 + $0x210] sm:$0xff] }
 0x8f5   :  { %2112 = vmatprep.subr.mxu0 %v7051_v45  ;;  %10292 = vst [vmem:[#allocation75_spill] sm:$0xff] %v7069_v8 }
 0x8f6   :  { %2113 = vmatpush2.msra.mxu0 %v7057_v43  ;;  %v7076_v43 = vld [vmem:[%s9467_s5] ss:$0 sm:$0xff] }
 0x8f7   :  { %2114 = vmatprep.subr.mxu0 %v7063_v61 }
 0x8f8   :  { %2115 = vmatpush2.msra.mxu0 %v7069_v8 }
 0x8f9   :  { %2226 = vmatprep.subr.mxu0 %v10184_v27 }
 0x979   :  { %v1962_v45 = vpop.f32.mrf.mxu0 }
 0x97a   :  { %v1963_v2 = vadd.f32 %v7076_v43, %v1962_v45  ;;  %v10327_v45 = vld [vmem:[#allocation37_spill] sm:$0xff] }
 0x97b   :  { %v3899_v58 = vpop.f32.mrf.mxu0 }
 0x97c   :  { %v1967_v61 = vsel %vm1966_vm1, %v1963_v2, -inf  ;;  %v10323_v58 = vld [vmem:[#allocation28_spill] sm:$0xff] }
 0x97d   :  { %1968 = vmax.xlane.f32.xlu0 %v1967_v61  ;;  %v10325_v61 = vld [vmem:[#allocation25_spill] sm:$0xff] }
 0xa06   :  { %v1969_v37 = vpop.xlane.xlu0 %1968 }
 0xa07   :  { %v1970_v38 = vsub.f32 %v1963_v2, %v1969_v37 }
 0xa09   :  { %v1971_v51 = vmul.f32 1.442695, %v1970_v38  ;;  %v10321_v38 = vld [vmem:[#allocation23_spill] sm:$0xff] }
 0xa0b   :  { %4239 = vpow2.f32 %v1971_v51  ;;  %v10320_v51 = vld [vmem:[#allocation21_spill] sm:$0xff] }
 0xa18   :  { %v4240_v8 = vpop.eup %4239 }
 0xa19   :  { %v1973_v27 = vsel %vm1966_vm1, %v4240_v8, 0.0  ;;  %v10326_v8 = vld [vmem:[#allocation35_spill] sm:$0xff] }
 0xa1a   :  { %1974 = vadd.xlane.f32.xlu0 %v1973_v27  ;;  %v10328_v27 = vld [vmem:[#allocation39_spill] sm:$0xff] }
 0xaa3   :  { %v1975_v48 = vpop.xlane.xlu0 %1974 }
 0xaa4   :  { %4241 = vlog2.f32 %v1975_v48  ;;  %v10319_v48 = vld [vmem:[#allocation19_spill] sm:$0xff] }
 0xab1   :  { %v4242_v53 = vpop.eup %4241 }
 0xab2   :  { %v1977_v40 = vmul.f32 0.6931472, %v4242_v53  ;;  %v10318_v53 = vld [vmem:[#allocation17_spill] sm:$0xff] }
 0xab4   :  { %v1978_v39 = vadd.f32 %v1977_v40, %v1969_v37  ;;  %v10317_v40 = vld [vmem:[#allocation15_spill] sm:$0xff]  ;;  %v10322_v37 = vld [vmem:[#allocation26_spill] sm:$0xff] }
 0xab6   :  { %v1979_v1 = vsub.f32 %v1963_v2, %v1978_v39  ;;  %v10316_v39 = vld [vmem:[#allocation27_spill] sm:$0xff]  ;;  %v10324_v2 = vld [vmem:[#allocation12_spill] sm:$0xff] }
 0xab8   :  { %1980 = vst [vmem:[%s9469_s7] sm:$0x3] %v1979_v1  ;;  %2046 = vmatmul.mubr.f32.vlgmr.msra.gmra.mxu1 %v1979_v1  ;;  %2117 = vmatmul.mubr.f32.vlgmr.msra.gmra.mxu0 %v1979_v1  ;;  %v10315_v1 = vld [vmem:[#allocation13_spill] sm:$0xff] }
 0xab9   :  { %3901 = vmatpush3.msra.mxu1 %v6715_v24  ;;  %3932 = vmatprep.mubr.msk.f32.mxu1 %vm4777_vm0, %v10178_v6 }
 0xaba   :  { %3902 = vmatprep.subr.mxu1 %v10178_v6  ;;  %2227 = vmatpush1.msra.mxu0 %v6071_v19  ;;  %v10293_v19 = vld [vmem:[#allocation45_spill] sm:$0xff] }
 0xabb   :  { %3903 = vmatpush3.msra.mxu1 %v6722_v12  ;;  %2228 = vmatprep.subr.mxu0 %v6081_v46  ;;  %v10294_v46 = vld [vmem:[#allocation55_spill] sm:$0xff] }
 0xabc   :  { %3904 = vmatprep.subr.mxu1 %v10178_v6  ;;  %2229 = vmatpush1.msra.mxu0 %v6091_v0  ;;  %v10295_v0 = vld [vmem:[#allocation57_spill] sm:$0xff] }
 0xabd   :  { %3905 = vmatpush3.msra.mxu1 %v6729_v55  ;;  %2230 = vmatprep.subr.mxu0 %v6102_v14  ;;  %v10296_v14 = vld [vmem:[#allocation47_spill] sm:$0xff] }
 0xabe   :  { %3906 = vmatprep.subr.mxu1 %v10178_v6  ;;  %2231 = vmatpush1.msra.mxu0 %v6109_v20  ;;  %v10297_v20 = vld [vmem:[#allocation59_spill] sm:$0xff] }
 0xabf   :  { %3907 = vmatpush3.msra.mxu1 %v6736_v57  ;;  %2232 = vmatprep.subr.mxu0 %v6116_v50  ;;  %v10298_v50 = vld [vmem:[#allocation61_spill] sm:$0xff] }
 0xac0   :  { %3908 = vmatprep.subr.mxu1 %v10178_v6  ;;  %2233 = vmatpush1.msra.mxu0 %v6123_v49  ;;  %v10299_v49 = vld [vmem:[#allocation49_spill] sm:$0xff] }
 0xac1   :  { %3909 = vmatpush3.msra.mxu1 %v6743_v60  ;;  %2234 = vmatprep.subr.mxu0 %v6129_v21  ;;  %v10300_v21 = vld [vmem:[#allocation63_spill] sm:$0xff] }
 0xac2   :  { %3910 = vmatprep.subr.mxu1 %v10178_v6  ;;  %2235 = vmatpush1.msra.mxu0 %v6135_v9  ;;  %v10301_v9 = vld [vmem:[#allocation65_spill] sm:$0xff] }
 0xac3   :  { %3911 = vmatpush3.msra.mxu1 %v6750_v47  ;;  %2236 = vmatprep.subr.mxu0 %v6143_v15  ;;  %v10302_v15 = vld [vmem:[#allocation51_spill] sm:$0xff] }
 0xac4   :  { %3912 = vmatprep.subr.mxu1 %v10178_v6  ;;  %2237 = vmatpush1.msra.mxu0 %v6153_v18  ;;  %v7150_v18 = vld [vmem:[%s9464_s2 + $0x1f8] sm:$0xff] }
 0xac5   :  { %3913 = vmatpush3.msra.mxu1 %v6757_v3  ;;  %2238 = vmatprep.subr.mxu0 %v6167_v7  ;;  %v10304_v7 = vld [vmem:[#allocation69_spill] sm:$0xff] }
 0xac6   :  { %3914 = vmatprep.subr.mxu1 %v10178_v6  ;;  %2239 = vmatpush1.msra.mxu0 %v6179_v28  ;;  %v10303_v28 = vld [vmem:[#allocation67_spill] sm:$0xff] }
 0xac7   :  { %3915 = vmatpush3.msra.mxu1 %v6764_v25  ;;  %2240 = vmatprep.subr.mxu0 %v10186_v10  ;;  %v10305_v10 = vld [vmem:[#allocation5_spill] sm:$0xff] }
 0xac8   :  { %3916 = vmatprep.subr.mxu1 %v10178_v6  ;;  %2241 = vmatpush1.msra.mxu0 %v10187_v26  ;;  %v10306_v26 = vld [vmem:[#allocation6_spill] sm:$0xff] }
 0xac9   :  { %3917 = vmatpush3.msra.mxu1 %v6770_v23  ;;  %2242 = vmatprep.subr.mxu0 %v10188_v29  ;;  %v10307_v29 = vld [vmem:[#allocation7_spill] sm:$0xff] }
 0xaca   :  { %3918 = vmatprep.subr.mxu1 %v10178_v6  ;;  %2243 = vmatpush1.msra.mxu0 %v10189_v30  ;;  %v10308_v30 = vld [vmem:[#allocation18_spill] sm:$0xff] }
 0xacb   :  { %3919 = vmatpush3.msra.mxu1 %v6776_v22  ;;  %2244 = vmatprep.subr.mxu0 %v10190_v31  ;;  %v10309_v31 = vld [vmem:[#allocation8_spill] sm:$0xff] }
 0xacc   :  { %3920 = vmatprep.subr.mxu1 %v10178_v6  ;;  %2245 = vmatpush1.msra.mxu0 %v10191_v32  ;;  %v10310_v32 = vld [vmem:[#allocation20_spill] sm:$0xff] }
 0xacd   :  { %3921 = vmatpush3.msra.mxu1 %v6785_v5  ;;  %2246 = vmatprep.subr.mxu0 %v10192_v33  ;;  %v10311_v33 = vld [vmem:[#allocation9_spill] sm:$0xff] }
 0xace   :  { %3922 = vmatprep.subr.mxu1 %v10178_v6  ;;  %2247 = vmatpush1.msra.mxu0 %v10193_v34  ;;  %v10312_v34 = vld [vmem:[#allocation22_spill] sm:$0xff] }
 0xacf   :  { %3923 = vmatpush3.msra.mxu1 %v6792_v4  ;;  %2248 = vmatprep.subr.mxu0 %v10194_v35  ;;  %v10313_v35 = vld [vmem:[#allocation11_spill] sm:$0xff] }
 0xad0   :  { %3924 = vmatprep.subr.mxu1 %v10178_v6  ;;  %2249 = vmatpush1.msra.mxu0 %v10195_v36  ;;  %v10314_v36 = vld [vmem:[#allocation10_spill] sm:$0xff] }
 0xad1   :  { %3925 = vmatpush3.msra.mxu1 %v10293_v19  ;;  %2250 = vmatprep.subr.mxu0 %v10294_v46  ;;  %v10329_v46 = vld [vmem:[#allocation41_spill] sm:$0xff] }
 0xad2   :  { %3926 = vmatprep.subr.mxu1 %v10178_v6  ;;  %2251 = vmatpush1.msra.mxu0 %v10295_v0  ;;  %v10330_v0 = vld [vmem:[#allocation43_spill] sm:$0xff] }
 0xad3   :  { %3927 = vmatpush3.msra.mxu1 %v10296_v14  ;;  %2252 = vmatprep.subr.mxu0 %v10297_v20  ;;  %v7183_v20 = vld [vmem:[%s9464_s2 + $0x248] sm:$0xff] }
 0xad4   :  { %3928 = vmatprep.subr.mxu1 %v10178_v6  ;;  %2253 = vmatpush1.msra.mxu0 %v10298_v50  ;;  %10331 = vst [vmem:[#allocation45_spill] sm:$0xff] %v7183_v20  ;;  %v7189_v50 = vld [vmem:[%s9464_s2 + $0x240] sm:$0xff] }
 0xad5   :  { %3929 = vmatpush3.msra.mxu1 %v10299_v49  ;;  %2254 = vmatprep.subr.mxu0 %v10300_v21  ;;  %10332 = vst [vmem:[#allocation55_spill] sm:$0xff] %v7189_v50  ;;  %v7195_v21 = vld [vmem:[%s9464_s2 + $0x228] sm:$0xff] }
 0xad6   :  { %3930 = vmatprep.subr.mxu1 %v10178_v6  ;;  %2255 = vmatpush1.msra.mxu0 %v10301_v9  ;;  %10333 = vst [vmem:[#allocation57_spill] sm:$0xff] %v7195_v21  ;;  %v7201_v9 = vld [vmem:[%s9464_s2 + $0x220] sm:$0xff] }
 0xad7   :  { %3931 = vmatpush3.msra.mxu1 %v10302_v15  ;;  %2256 = vmatprep.subr.mxu0 %v10303_v28  ;;  %10334 = vst [vmem:[#allocation47_spill] sm:$0xff] %v7201_v9  ;;  %v7207_v28 = vld [vmem:[%s9464_s2 + $0x208] sm:$0xff] }
 0xad8   :  { %2297 = vmatprep.subr.mxu1 %v7150_v18  ;;  %2257 = vmatpush1.msra.mxu0 %v10304_v7  ;;  %10335 = vst [vmem:[#allocation59_spill] sm:$0xff] %v7207_v28  ;;  %v7213_v7 = vld [vmem:[%s9464_s2 + $0x200] sm:$0xff] }
 0xad9   :  { %2258 = vmatprep.subr.mxu0 %v10305_v10  ;;  %10336 = vst [vmem:[#allocation61_spill] sm:$0xff] %v7213_v7 }
 0xada   :  { %2259 = vmatpush2.msra.mxu0 %v10306_v26 }
 0xadb   :  { %2260 = vmatprep.subr.mxu0 %v10307_v29 }
 0xadc   :  { %2261 = vmatpush2.msra.mxu0 %v10308_v30 }
 0xadd   :  { %2262 = vmatprep.subr.mxu0 %v10309_v31 }
 0xade   :  { %2263 = vmatpush2.msra.mxu0 %v10310_v32 }
 0xadf   :  { %2264 = vmatprep.subr.mxu0 %v10311_v33 }
 0xae0   :  { %2265 = vmatpush2.msra.mxu0 %v10312_v34 }
 0xae1   :  { %2266 = vmatprep.subr.mxu0 %v10313_v35 }
 0xae2   :  { %2267 = vmatpush2.msra.mxu0 %v10314_v36 }
 0xae3   :  { %2268 = vmatprep.subr.mxu0 %v10315_v1 }
 0xae4   :  { %2269 = vmatpush2.msra.mxu0 %v10316_v39 }
 0xae5   :  { %2270 = vmatprep.subr.mxu0 %v10317_v40 }
 0xae6   :  { %2271 = vmatpush2.msra.mxu0 %v10318_v53 }
 0xae7   :  { %2272 = vmatprep.subr.mxu0 %v10319_v48 }
 0xae8   :  { %2273 = vmatpush2.msra.mxu0 %v10320_v51 }
 0xae9   :  { %2274 = vmatprep.subr.mxu0 %v10321_v38 }
 0xaea   :  { %2275 = vmatpush2.msra.mxu0 %v10322_v37 }
 0xaeb   :  { %2276 = vmatprep.subr.mxu0 %v10323_v58 }
 0xaec   :  { %2277 = vmatpush2.msra.mxu0 %v10324_v2 }
 0xaed   :  { %2278 = vmatprep.subr.mxu0 %v10325_v61 }
 0xaee   :  { %2279 = vmatpush2.msra.mxu0 %v10326_v8 }
 0xaef   :  { %2280 = vmatprep.subr.mxu0 %v10327_v45 }
 0xaf0   :  { %2281 = vmatpush2.msra.mxu0 %v10328_v27 }
 0xaf1   :  { %2282 = vmatprep.subr.mxu0 %v10329_v46 }
 0xaf2   :  { %2283 = vmatpush2.msra.mxu0 %v10330_v0 }
 0xaf3   :  { %2284 = vmatprep.subr.mxu0 %v7183_v20 }
 0xaf4   :  { %2285 = vmatpush2.msra.mxu0 %v7189_v50  ;;  %v10337_v50 = vld [vmem:[#allocation53_spill] sm:$0xff] }
 0xaf5   :  { %2286 = vmatprep.subr.mxu0 %v7195_v21 }
 0xaf6   :  { %2287 = vmatpush2.msra.mxu0 %v7201_v9 }
 0xaf7   :  { %2288 = vmatprep.subr.mxu0 %v7207_v28 }
 0xaf8   :  { %2289 = vmatpush2.msra.mxu0 %v7213_v7 }
 0xaf9   :  { %3935 = vmatprep.subr.mxu0 %v10178_v6 }
 0xb78   :  { %v2047_v21 = vpop.f32.mrf.mxu1  ;;  %v2118_v27 = vpop.f32.mrf.mxu0 }
 0xb79   :  { %v2048_v20 = vadd.f32 %v2047_v21, %v10337_v50  ;;  %v2119_v28 = vadd.f32 %v2118_v27, %v6837_v56 }
 0xb7a   :  { %v2049_v9 = vpop.f32.mrf.mxu1  ;;  %v2120_v8 = vpop.f32.mrf.mxu0 }
 0xb7b   :  { %v2123_v0 = vmul.f32 0.5, %v2048_v20  ;;  %v2050_v46 = vadd.f32 %v2049_v9, %v6834_v44  ;;  %v2121_v61 = vadd.f32 %v2120_v8, %v6842_v54 }
 0xb7d   :  { %4243 = vtanh.f32 %v2123_v0  ;;  %v2127_v45 = vmul.f32 0.5, %v2050_v46  ;;  %v2132_v7 = vmul.f32 0.5, %v2121_v61 }
 0xb7f   :  { %4245 = vtanh.f32 %v2127_v45 }
 0xb80   :  { %4247 = vtanh.f32 %v2119_v28 }
 0xb81   :  { %4249 = vtanh.f32 %v2132_v7  ;;  %v7264_v7 = vld [vmem:[%s9464_s2 + $0x190] sm:$0xff] }
 0xb8a   :  { %v4244_v2 = vpop.eup %4243 }
 0xb8b   :  { %v2125_v58 = vadd.f32 1.0, %v4244_v2  ;;  %v7252_v2 = vld [vmem:[%s9464_s2 + $0x1b0] sm:$0xff] }
 0xb8c   :  { %v4246_v37 = vpop.eup %4245 }
 0xb8d   :  { %v2126_v38 = vmul.f32 0.5, %v2125_v58  ;;  %v2129_v21 = vadd.f32 1.0, %v4246_v37  ;;  %v4248_v50 = vpop.eup %4247  ;;  %v7228_v37 = vld [vmem:[%s9464_s2 + $0x1f0] sm:$0xff]  ;;  %v7246_v58 = vld [vmem:[%s9464_s2 + $0x1b8] sm:$0xff] }
 0xb8e   :  { %v4250_v45 = vpop.eup %4249 }
 0xb8f   :  { %v2130_v20 = vmul.f32 0.5, %v2129_v21  ;;  %v2137_v0 = vmul.f32 %v4248_v50, %v2126_v38  ;;  %v2134_v27 = vadd.f32 1.0, %v4250_v45  ;;  %v7240_v38 = vld [vmem:[%s9464_s2 + $0x1d0] sm:$0xff]  ;;  %v7258_v50 = vld [vmem:[%s9464_s2 + $0x198] sm:$0xff] }
 0xb90   :  { %v7270_v21 = vld [vmem:[%s9464_s2 + $0x178] sm:$0xff] }
 0xb91   :  { %v2136_v9 = vmul.f32 %v2130_v20, %v6846_v16  ;;  %v2135_v28 = vmul.f32 0.5, %v2134_v27  ;;  %v7234_v16 = vld [vmem:[%s9464_s2 + $0x1d8] sm:$0xff]  ;;  %v7276_v20 = vld [vmem:[%s9464_s2 + $0x170] sm:$0xff] }
 0xb92   :  { %v7294_v45 = vld [vmem:[%s9464_s2 + $0x138] sm:$0xff]  ;;  %v7300_v27 = vld [vmem:[%s9464_s2 + $0x130] sm:$0xff] }
 0xb93   :  { %v7222_v46 = vadd.f32 %v2137_v0, %v2136_v9  ;;  %v7282_v9 = vld [vmem:[%s9464_s2 + $0x158] sm:$0xff]  ;;  %v7288_v0 = vld [vmem:[%s9464_s2 + $0x150] sm:$0xff]  ;;  %10338 = vst [vmem:[#allocation49_spill] sm:$0xff] %v7294_v45  ;;  %10339 = vst [vmem:[#allocation63_spill] sm:$0xff] %v7300_v27 }
 0xb95   :  { %4251 = vtanh.f32 %v7222_v46 }
 0xba2   :  { %v4252_v8 = vpop.eup %4251 }
 0xba3   :  { %v2140_v61 = vmul.f32 %v4252_v8, %v2135_v28  ;;  %v7306_v28 = vld [vmem:[%s9464_s2 + $0x118] sm:$0xff]  ;;  %v7312_v8 = vld [vmem:[%s9464_s2 + $0x110] sm:$0xff] }
 0xba4   :  { %10340 = vst [vmem:[#allocation65_spill] sm:$0xff] %v7306_v28  ;;  %10341 = vst [vmem:[#allocation51_spill] sm:$0xff] %v7312_v8 }
 0xba5   :  { %3933 = vmatmul.mubr.f32.vlgmr.msra.gmra.mxu1 %v2140_v61  ;;  %2290 = vmatprep.mubr.f32.mxu0 %v2140_v61 }
 0xba6   :  { %2361 = vmatprep.mubr.f32.mxu1 %v2140_v61  ;;  %2298 = vmatpush1.msra.mxu1 %v7228_v37  ;;  %v7318_v61 = vld [vmem:[%s9464_s2 + $0xf8] sm:$0xff] }
 0xba7   :  { %2299 = vmatprep.subr.mxu1 %v7234_v16  ;;  %10342 = vst [vmem:[#allocation67_spill] sm:$0xff] %v7318_v61 }
 0xba8   :  { %2300 = vmatpush1.msra.mxu1 %v7240_v38 }
 0xba9   :  { %2301 = vmatprep.subr.mxu1 %v7246_v58 }
 0xbaa   :  { %2302 = vmatpush1.msra.mxu1 %v7252_v2 }
 0xbab   :  { %2303 = vmatprep.subr.mxu1 %v7258_v50 }
 0xbac   :  { %2304 = vmatpush1.msra.mxu1 %v7264_v7 }
 0xbad   :  { %2305 = vmatprep.subr.mxu1 %v7270_v21 }
 0xbae   :  { %2306 = vmatpush1.msra.mxu1 %v7276_v20 }
 0xbaf   :  { %2307 = vmatprep.subr.mxu1 %v7282_v9 }
 0xbb0   :  { %2308 = vmatpush1.msra.mxu1 %v7288_v0 }
 0xbb1   :  { %2309 = vmatprep.subr.mxu1 %v7294_v45 }
 0xbb2   :  { %2310 = vmatpush1.msra.mxu1 %v7300_v27  ;;  %v7324_v27 = vld [vmem:[%s9464_s2 + $0xf0] sm:$0xff] }
 0xbb3   :  { %2311 = vmatprep.subr.mxu1 %v7306_v28  ;;  %10343 = vst [vmem:[#allocation69_spill] sm:$0xff] %v7324_v27  ;;  %v7330_v28 = vld [vmem:[%s9464_s2 + $0xd8] sm:$0xff] }
 0xbb4   :  { %2312 = vmatpush1.msra.mxu1 %v7312_v8  ;;  %10344 = vst [vmem:[#allocation5_spill] sm:$0xff] %v7330_v28  ;;  %v7336_v8 = vld [vmem:[%s9464_s2 + $0xd0] sm:$0xff] }
 0xbb5   :  { %2313 = vmatprep.subr.mxu1 %v7318_v61  ;;  %10345 = vst [vmem:[#allocation6_spill] sm:$0xff] %v7336_v8  ;;  %v7342_v61 = vld [vmem:[%s9464_s2 + $0xb8] sm:$0xff] }
 0xbb6   :  { %2314 = vmatpush1.msra.mxu1 %v7324_v27  ;;  %10346 = vst [vmem:[#allocation7_spill] sm:$0xff] %v7342_v61  ;;  %v7348_v27 = vld [vmem:[%s9464_s2 + $0xb0] sm:$0xff] }
 0xbb7   :  { %2315 = vmatprep.subr.mxu1 %v7330_v28  ;;  %10347 = vst [vmem:[#allocation18_spill] sm:$0xff] %v7348_v27  ;;  %v7354_v28 = vld [vmem:[%s9464_s2 + $0x98] sm:$0xff] }
 0xbb8   :  { %2316 = vmatpush1.msra.mxu1 %v7336_v8  ;;  %10348 = vst [vmem:[#allocation8_spill] sm:$0xff] %v7354_v28  ;;  %v7360_v8 = vld [vmem:[%s9464_s2 + $0x90] sm:$0xff] }
 0xbb9   :  { %2317 = vmatprep.subr.mxu1 %v7342_v61  ;;  %10349 = vst [vmem:[#allocation20_spill] sm:$0xff] %v7360_v8  ;;  %v7366_v61 = vld [vmem:[%s9464_s2 + $0x78] sm:$0xff] }
 0xbba   :  { %2318 = vmatpush1.msra.mxu1 %v7348_v27  ;;  %10350 = vst [vmem:[#allocation9_spill] sm:$0xff] %v7366_v61  ;;  %v7372_v27 = vld [vmem:[%s9464_s2 + $0x70] sm:$0xff] }
 0xbbb   :  { %2319 = vmatprep.subr.mxu1 %v7354_v28  ;;  %10351 = vst [vmem:[#allocation22_spill] sm:$0xff] %v7372_v27  ;;  %v7378_v28 = vld [vmem:[%s9464_s2 + $0x58] sm:$0xff] }
 0xbbc   :  { %2320 = vmatpush1.msra.mxu1 %v7360_v8  ;;  %10352 = vst [vmem:[#allocation11_spill] sm:$0xff] %v7378_v28  ;;  %v7384_v8 = vld [vmem:[%s9464_s2 + $0x50] sm:$0xff] }
 0xbbd   :  { %2321 = vmatprep.subr.mxu1 %v7366_v61  ;;  %10353 = vst [vmem:[#allocation10_spill] sm:$0xff] %v7384_v8  ;;  %v7390_v61 = vld [vmem:[%s9464_s2 + $0x38] sm:$0xff] }
 0xbbe   :  { %2322 = vmatpush1.msra.mxu1 %v7372_v27  ;;  %10354 = vst [vmem:[#allocation13_spill] sm:$0xff] %v7390_v61  ;;  %v7396_v27 = vld [vmem:[%s9464_s2 + $0x30] sm:$0xff] }
 0xbbf   :  { %2323 = vmatprep.subr.mxu1 %v7378_v28  ;;  %10355 = vst [vmem:[#allocation27_spill] sm:$0xff] %v7396_v27  ;;  %v7402_v28 = vld [vmem:[%s9464_s2 + $0x18] sm:$0xff] }
 0xbc0   :  { %2324 = vmatpush1.msra.mxu1 %v7384_v8  ;;  %10356 = vst [vmem:[#allocation15_spill] sm:$0xff] %v7402_v28 }
 0xbc1   :  { %2325 = vmatprep.subr.mxu1 %v7390_v61 }
 0xbc2   :  { %2326 = vmatpush1.msra.mxu1 %v7396_v27  ;;  %v10357_v27 = vld [vmem:[#allocation34_spill] sm:$0xff] }
 0xbc3   :  { %2327 = vmatprep.subr.mxu1 %v7402_v28  ;;  %v10358_v28 = vld [vmem:[#allocation36_spill] sm:$0xff] }
 0xbc4   :  { %2328 = vmatpush1.msra.mxu1 %v6442_v62  ;;  %v10359_v62 = vld [vmem:[#allocation38_spill] sm:$0xff] }
 0xbc5   :  { %2329 = vmatprep.subr.mxu1 %v6883_v41  ;;  %v10360_v41 = vld [vmem:[#allocation40_spill] sm:$0xff] }
 0xbc6   :  { %2330 = vmatpush2.msra.mxu1 %v6889_v17  ;;  %v10361_v17 = vld [vmem:[#allocation42_spill] sm:$0xff] }
 0xbc7   :  { %2331 = vmatprep.subr.mxu1 %v6895_v11  ;;  %v10362_v11 = vld [vmem:[#allocation44_spill] sm:$0xff] }
 0xbc8   :  { %2332 = vmatpush2.msra.mxu1 %v6901_v52  ;;  %v10363_v52 = vld [vmem:[#allocation46_spill] sm:$0xff] }
 0xbc9   :  { %2333 = vmatprep.subr.mxu1 %v6907_v13  ;;  %v10364_v13 = vld [vmem:[#allocation48_spill] sm:$0xff] }
 0xbca   :  { %2334 = vmatpush2.msra.mxu1 %v6913_v63  ;;  %v10365_v63 = vld [vmem:[#allocation50_spill] sm:$0xff] }
 0xbcb   :  { %2335 = vmatprep.subr.mxu1 %v6919_v59  ;;  %v10366_v59 = vld [vmem:[#allocation52_spill] sm:$0xff] }
 0xbcc   :  { %2336 = vmatpush2.msra.mxu1 %v6925_v42  ;;  %v10367_v42 = vld [vmem:[#allocation54_spill] sm:$0xff] }
 0xbcd   :  { %2337 = vmatprep.subr.mxu1 %v10357_v27  ;;  %v10368_v27 = vld [vmem:[#allocation56_spill] sm:$0xff] }
 0xbce   :  { %2338 = vmatpush2.msra.mxu1 %v10358_v28  ;;  %v10369_v28 = vld [vmem:[#allocation58_spill] sm:$0xff] }
 0xbcf   :  { %2339 = vmatprep.subr.mxu1 %v10359_v62  ;;  %v10370_v62 = vld [vmem:[#allocation60_spill] sm:$0xff] }
 0xbd0   :  { %2340 = vmatpush2.msra.mxu1 %v10360_v41  ;;  %v10371_v41 = vld [vmem:[#allocation62_spill] sm:$0xff] }
 0xbd1   :  { %2341 = vmatprep.subr.mxu1 %v10361_v17  ;;  %v10372_v17 = vld [vmem:[#allocation64_spill] sm:$0xff] }
 0xbd2   :  { %2342 = vmatpush2.msra.mxu1 %v10362_v11  ;;  %v10373_v11 = vld [vmem:[#allocation66_spill] sm:$0xff] }
 0xbd3   :  { %2343 = vmatprep.subr.mxu1 %v10363_v52  ;;  %v10374_v52 = vld [vmem:[#allocation68_spill] sm:$0xff] }
 0xbd4   :  { %2344 = vmatpush2.msra.mxu1 %v10364_v13  ;;  %v10375_v13 = vld [vmem:[#allocation70_spill] sm:$0xff] }
 0xbd5   :  { %2345 = vmatprep.subr.mxu1 %v10365_v63  ;;  %v10376_v63 = vld [vmem:[#allocation71_spill] sm:$0xff] }
 0xbd6   :  { %2346 = vmatpush2.msra.mxu1 %v10366_v59  ;;  %v10377_v59 = vld [vmem:[#allocation72_spill] sm:$0xff] }
 0xbd7   :  { %2347 = vmatprep.subr.mxu1 %v10367_v42  ;;  %v10378_v42 = vld [vmem:[#allocation73_spill] sm:$0xff] }
 0xbd8   :  { %2348 = vmatpush2.msra.mxu1 %v10368_v27  ;;  %v10379_v27 = vld [vmem:[#allocation74_spill] sm:$0xff] }
 0xbd9   :  { %2349 = vmatprep.subr.mxu1 %v10369_v28  ;;  %v10380_v28 = vld [vmem:[#allocation75_spill] sm:$0xff] }
 0xbda   :  { %2350 = vmatpush2.msra.mxu1 %v10370_v62 }
 0xbdb   :  { %2351 = vmatprep.subr.mxu1 %v10371_v41 }
 0xbdc   :  { %2352 = vmatpush2.msra.mxu1 %v10372_v17  ;;  %v7441_v17 = vld [vmem:[%s9464_s2 + $0x1e8] sm:$0xff] }
 0xbdd   :  { %2353 = vmatprep.subr.mxu1 %v10373_v11  ;;  %10381 = vst [vmem:[#allocation17_spill] sm:$0xff] %v7441_v17 }
 0xbde   :  { %2354 = vmatpush2.msra.mxu1 %v10374_v52 }
 0xbdf   :  { %2355 = vmatprep.subr.mxu1 %v10375_v13 }
 0xbe0   :  { %2356 = vmatpush2.msra.mxu1 %v10376_v63 }
 0xbe1   :  { %2357 = vmatprep.subr.mxu1 %v10377_v59 }
 0xbe2   :  { %2358 = vmatpush2.msra.mxu1 %v10378_v42 }
 0xbe3   :  { %2359 = vmatprep.subr.mxu1 %v10379_v27 }
 0xbe4   :  { %2360 = vmatpush2.msra.mxu1 %v10380_v28 }
 0xbe5   :  { %2471 = vmatprep.subr.mxu1 %v7441_v17 }
 0xc65   :  { %v2207_v52 = vpop.f32.mrf.mxu1 }
 0xc66   :  { %v2208_v13 = vadd.f32 %v7076_v43, %v2207_v52  ;;  %v7499_v52 = vld [vmem:[%s9464_s2 + $0x180] sm:$0xff] }
 0xc67   :  { %v3934_v11 = vpop.f32.mrf.mxu1 }
 0xc68   :  { %v2211_v63 = vsel %vm1966_vm1, %v2208_v13, -inf  ;;  %v7485_v11 = vld [vmem:[%s9464_s2 + $0x1a0] sm:$0xff] }
 0xc69   :  { %2212 = vmax.xlane.f32.xlu1 %v2211_v63  ;;  %v7527_v63 = vld [vmem:[%s9464_s2 + $0x140] sm:$0xff] }
 0xcf2   :  { %v2213_v59 = vpop.xlane.xlu1 %2212 }
 0xcf3   :  { %v2214_v42 = vsub.f32 %v2208_v13, %v2213_v59 }
 0xcf5   :  { %v2215_v41 = vmul.f32 1.442695, %v2214_v42  ;;  %v7555_v42 = vld [vmem:[%s9464_s2 + $0x100] sm:$0xff] }
 0xcf7   :  { %4253 = vpow2.f32 %v2215_v41  ;;  %v7457_v41 = vld [vmem:[%s9464_s2 + $0x1e0] sm:$0xff] }
 0xd04   :  { %v4254_v27 = vpop.eup %4253 }
 0xd05   :  { %v2217_v28 = vsel %vm1966_vm1, %v4254_v27, 0.0  ;;  %v7583_v27 = vld [vmem:[%s9464_s2 + $0xc0] sm:$0xff] }
 0xd06   :  { %2218 = vadd.xlane.f32.xlu1 %v2217_v28  ;;  %v7597_v28 = vld [vmem:[%s9464_s2 + $0xa0] sm:$0xff] }
 0xd07   :  { %10383 = vst [vmem:[#allocation21_spill] sm:$0xff] %v7597_v28 }
 0xd8f   :  { %v2219_v62 = vpop.xlane.xlu1 %2218 }
 0xd90   :  { %4255 = vlog2.f32 %v2219_v62  ;;  %v7639_v62 = vld [vmem:[%s9464_s2 + $0x40] sm:$0xff] }
 0xd91   :  { %10389 = vst [vmem:[#allocation81_spill] sm:$0xff] %v7639_v62 }
 0xd9d   :  { %v4256_v61 = vpop.eup %4255 }
 0xd9e   :  { %v2221_v8 = vmul.f32 0.6931472, %v4256_v61  ;;  %v7625_v61 = vld [vmem:[%s9464_s2 + $0x60] sm:$0xff] }
 0xd9f   :  { %10387 = vst [vmem:[#allocation79_spill] sm:$0xff] %v7625_v61 }
 0xda0   :  { %v2222_v17 = vadd.f32 %v2221_v8, %v2213_v59  ;;  %v7541_v59 = vld [vmem:[%s9464_s2 + $0x120] sm:$0xff] }
 0xda1   :  { %v7611_v8 = vld [vmem:[%s9464_s2 + $0x80] sm:$0xff] }
 0xda2   :  { %v2223_v45 = vsub.f32 %v2208_v13, %v2222_v17  ;;  %v7464_v17 = vld [vmem:[%s9464_s2 + $0x1c8] sm:$0xff]  ;;  %v7513_v13 = vld [vmem:[%s9464_s2 + $0x160] sm:$0xff]  ;;  %10385 = vst [vmem:[#allocation77_spill] sm:$0xff] %v7611_v8 }
 0xda4   :  { %3722 = vst [vmem:[%s9469_s7 + $0x2] sm:$0x3] %v2223_v45  ;;  %2291 = vmatmul.mubr.f32.vlgmr.msra.gmra.mxu0 %v2223_v45  ;;  %2362 = vmatmul.mubr.f32.vlgmr.msra.gmra.mxu1 %v2223_v45  ;;  %v7569_v45 = vld [vmem:[%s9464_s2 + $0xe0] sm:$0xff] }
 0xda5   :  { %3936 = vmatpush3.msra.mxu0 %v6715_v24  ;;  %3967 = vmatprep.mubr.msk.f32.mxu0 %vm4777_vm0, %v10178_v6  ;;  %v7471_v24 = vld [vmem:[%s9464_s2 + $0x1c0] sm:$0xff] }
 0xda6   :  { %3937 = vmatprep.subr.mxu0 %v10178_v6  ;;  %2472 = vmatpush1.msra.mxu1 %v7457_v41 }
 0xda7   :  { %3938 = vmatpush3.msra.mxu0 %v6722_v12  ;;  %2473 = vmatprep.subr.mxu1 %v7464_v17  ;;  %v7478_v12 = vld [vmem:[%s9464_s2 + $0x1a8] sm:$0xff] }
 0xda8   :  { %3939 = vmatprep.subr.mxu0 %v10178_v6  ;;  %2474 = vmatpush1.msra.mxu1 %v7471_v24 }
 0xda9   :  { %3940 = vmatpush3.msra.mxu0 %v6729_v55  ;;  %2475 = vmatprep.subr.mxu1 %v7478_v12  ;;  %v7492_v55 = vld [vmem:[%s9464_s2 + $0x188] sm:$0xff] }
 0xdaa   :  { %3941 = vmatprep.subr.mxu0 %v10178_v6  ;;  %2476 = vmatpush1.msra.mxu1 %v7485_v11 }
 0xdab   :  { %3942 = vmatpush3.msra.mxu0 %v6736_v57  ;;  %2477 = vmatprep.subr.mxu1 %v7492_v55  ;;  %v7506_v57 = vld [vmem:[%s9464_s2 + $0x168] sm:$0xff] }
 0xdac   :  { %3943 = vmatprep.subr.mxu0 %v10178_v6  ;;  %2478 = vmatpush1.msra.mxu1 %v7499_v52 }
 0xdad   :  { %3944 = vmatpush3.msra.mxu0 %v6743_v60  ;;  %2479 = vmatprep.subr.mxu1 %v7506_v57  ;;  %v7520_v60 = vld [vmem:[%s9464_s2 + $0x148] sm:$0xff] }
 0xdae   :  { %3945 = vmatprep.subr.mxu0 %v10178_v6  ;;  %2480 = vmatpush1.msra.mxu1 %v7513_v13 }
 0xdaf   :  { %3946 = vmatpush3.msra.mxu0 %v6750_v47  ;;  %2481 = vmatprep.subr.mxu1 %v7520_v60  ;;  %v7534_v47 = vld [vmem:[%s9464_s2 + $0x128] sm:$0xff] }
 0xdb0   :  { %3947 = vmatprep.subr.mxu0 %v10178_v6  ;;  %2482 = vmatpush1.msra.mxu1 %v7527_v63 }
 0xdb1   :  { %3948 = vmatpush3.msra.mxu0 %v6757_v3  ;;  %2483 = vmatprep.subr.mxu1 %v7534_v47  ;;  %v7548_v3 = vld [vmem:[%s9464_s2 + $0x108] sm:$0xff] }
 0xdb2   :  { %3949 = vmatprep.subr.mxu0 %v10178_v6  ;;  %2484 = vmatpush1.msra.mxu1 %v7541_v59 }
 0xdb3   :  { %3950 = vmatpush3.msra.mxu0 %v6764_v25  ;;  %2485 = vmatprep.subr.mxu1 %v7548_v3  ;;  %v7562_v25 = vld [vmem:[%s9464_s2 + $0xe8] sm:$0xff] }
 0xdb4   :  { %3951 = vmatprep.subr.mxu0 %v10178_v6  ;;  %2486 = vmatpush1.msra.mxu1 %v7555_v42 }
 0xdb5   :  { %3952 = vmatpush3.msra.mxu0 %v6770_v23  ;;  %2487 = vmatprep.subr.mxu1 %v7562_v25  ;;  %v7576_v23 = vld [vmem:[%s9464_s2 + $0xc8] sm:$0xff] }
 0xdb6   :  { %3953 = vmatprep.subr.mxu0 %v10178_v6  ;;  %2488 = vmatpush1.msra.mxu1 %v7569_v45 }
 0xdb7   :  { %3954 = vmatpush3.msra.mxu0 %v6776_v22  ;;  %2489 = vmatprep.subr.mxu1 %v7576_v23  ;;  %v7590_v22 = vld [vmem:[%s9464_s2 + $0xa8] sm:$0xff] }
 0xdb8   :  { %3955 = vmatprep.subr.mxu0 %v10178_v6  ;;  %2490 = vmatpush1.msra.mxu1 %v7583_v27  ;;  %10382 = vst [vmem:[#allocation19_spill] sm:$0xff] %v7590_v22 }
 0xdb9   :  { %3956 = vmatpush3.msra.mxu0 %v6785_v5  ;;  %2491 = vmatprep.subr.mxu1 %v7590_v22  ;;  %v7604_v5 = vld [vmem:[%s9464_s2 + $0x88] sm:$0xff] }
 0xdba   :  { %3957 = vmatprep.subr.mxu0 %v10178_v6  ;;  %2492 = vmatpush1.msra.mxu1 %v7597_v28  ;;  %10384 = vst [vmem:[#allocation76_spill] sm:$0xff] %v7604_v5 }
 0xdbb   :  { %3958 = vmatpush3.msra.mxu0 %v6792_v4  ;;  %2493 = vmatprep.subr.mxu1 %v7604_v5  ;;  %v7618_v4 = vld [vmem:[%s9464_s2 + $0x68] sm:$0xff] }
 0xdbc   :  { %3959 = vmatprep.subr.mxu0 %v10178_v6  ;;  %2494 = vmatpush1.msra.mxu1 %v7611_v8  ;;  %10386 = vst [vmem:[#allocation78_spill] sm:$0xff] %v7618_v4 }
 0xdbd   :  { %3960 = vmatpush3.msra.mxu0 %v10293_v19  ;;  %2495 = vmatprep.subr.mxu1 %v7618_v4  ;;  %v7632_v19 = vld [vmem:[%s9464_s2 + $0x48] sm:$0xff] }
 0xdbe   :  { %3961 = vmatprep.subr.mxu0 %v10178_v6  ;;  %2496 = vmatpush1.msra.mxu1 %v7625_v61  ;;  %10388 = vst [vmem:[#allocation80_spill] sm:$0xff] %v7632_v19 }
 0xdbf   :  { %3962 = vmatpush3.msra.mxu0 %v10296_v14  ;;  %2497 = vmatprep.subr.mxu1 %v7632_v19  ;;  %v7646_v14 = vld [vmem:[%s9464_s2 + $0x28] sm:$0xff]  ;;  %v7653_v19 = vld [vmem:[%s9464_s2 + $0x20] sm:$0xff] }
 0xdc0   :  { %3963 = vmatprep.subr.mxu0 %v10178_v6  ;;  %2498 = vmatpush1.msra.mxu1 %v7639_v62  ;;  %10390 = vst [vmem:[#allocation82_spill] sm:$0xff] %v7646_v14  ;;  %10391 = vst [vmem:[#allocation83_spill] sm:$0xff] %v7653_v19 }
 0xdc1   :  { %3964 = vmatpush3.msra.mxu0 %v10299_v49  ;;  %2499 = vmatprep.subr.mxu1 %v7646_v14  ;;  %v7660_v49 = vld [vmem:[%s9464_s2 + $0x8] sm:$0xff]  ;;  %v7667_v14 = vld [vmem:[%s9464_s2] sm:$0xff] }
 0xdc2   :  { %3965 = vmatprep.subr.mxu0 %v10178_v6  ;;  %2500 = vmatpush1.msra.mxu1 %v7653_v19  ;;  %10392 = vst [vmem:[#allocation84_spill] sm:$0xff] %v7660_v49  ;;  %10393 = vst [vmem:[#allocation85_spill] sm:$0xff] %v7667_v14 }
 0xdc3   :  { %3966 = vmatpush3.msra.mxu0 %v10302_v15  ;;  %2501 = vmatprep.subr.mxu1 %v7660_v49  ;;  %v10394_v15 = vld [vmem:[#allocation23_spill] sm:$0xff] }
 0xdc4   :  { %2542 = vmatprep.subr.mxu0 %v7150_v18  ;;  %2502 = vmatpush1.msra.mxu1 %v7667_v14 }
 0xdc5   :  { %2503 = vmatprep.subr.mxu1 %v10305_v10  ;;  %v10395_v10 = vld [vmem:[#allocation26_spill] sm:$0xff] }
 0xdc6   :  { %2504 = vmatpush2.msra.mxu1 %v10306_v26  ;;  %v10396_v26 = vld [vmem:[#allocation28_spill] sm:$0xff] }
 0xdc7   :  { %2505 = vmatprep.subr.mxu1 %v10307_v29  ;;  %v10397_v29 = vld [vmem:[#allocation12_spill] sm:$0xff] }
 0xdc8   :  { %2506 = vmatpush2.msra.mxu1 %v10308_v30  ;;  %v10398_v30 = vld [vmem:[#allocation25_spill] sm:$0xff] }
 0xdc9   :  { %2507 = vmatprep.subr.mxu1 %v10309_v31  ;;  %v10399_v31 = vld [vmem:[#allocation35_spill] sm:$0xff] }
 0xdca   :  { %2508 = vmatpush2.msra.mxu1 %v10310_v32  ;;  %v10400_v32 = vld [vmem:[#allocation37_spill] sm:$0xff] }
 0xdcb   :  { %2509 = vmatprep.subr.mxu1 %v10311_v33  ;;  %v10401_v33 = vld [vmem:[#allocation39_spill] sm:$0xff] }
 0xdcc   :  { %2510 = vmatpush2.msra.mxu1 %v10312_v34  ;;  %v10402_v34 = vld [vmem:[#allocation41_spill] sm:$0xff] }
 0xdcd   :  { %2511 = vmatprep.subr.mxu1 %v10313_v35  ;;  %v10403_v35 = vld [vmem:[#allocation43_spill] sm:$0xff] }
 0xdce   :  { %2512 = vmatpush2.msra.mxu1 %v10314_v36  ;;  %v10404_v36 = vld [vmem:[#allocation45_spill] sm:$0xff] }
 0xdcf   :  { %2513 = vmatprep.subr.mxu1 %v10315_v1  ;;  %v10405_v1 = vld [vmem:[#allocation55_spill] sm:$0xff] }
 0xdd0   :  { %2514 = vmatpush2.msra.mxu1 %v10316_v39  ;;  %v10406_v39 = vld [vmem:[#allocation57_spill] sm:$0xff] }
 0xdd1   :  { %2515 = vmatprep.subr.mxu1 %v10317_v40  ;;  %v10407_v40 = vld [vmem:[#allocation47_spill] sm:$0xff] }
 0xdd2   :  { %2516 = vmatpush2.msra.mxu1 %v10318_v53  ;;  %v10408_v53 = vld [vmem:[#allocation59_spill] sm:$0xff] }
 0xdd3   :  { %2517 = vmatprep.subr.mxu1 %v10319_v48  ;;  %v10409_v48 = vld [vmem:[#allocation61_spill] sm:$0xff] }
 0xdd4   :  { %2518 = vmatpush2.msra.mxu1 %v10320_v51 }
 0xdd5   :  { %2519 = vmatprep.subr.mxu1 %v10394_v15  ;;  %v10410_v15 = vld [vmem:[#allocation53_spill] sm:$0xff] }
 0xdd6   :  { %2520 = vmatpush2.msra.mxu1 %v10395_v10 }
 0xdd7   :  { %2521 = vmatprep.subr.mxu1 %v10396_v26 }
 0xdd8   :  { %2522 = vmatpush2.msra.mxu1 %v10397_v29 }
 0xdd9   :  { %2523 = vmatprep.subr.mxu1 %v10398_v30 }
 0xdda   :  { %2524 = vmatpush2.msra.mxu1 %v10399_v31 }
 0xddb   :  { %2525 = vmatprep.subr.mxu1 %v10400_v32 }
 0xddc   :  { %2526 = vmatpush2.msra.mxu1 %v10401_v33 }
 0xddd   :  { %2527 = vmatprep.subr.mxu1 %v10402_v34 }
 0xdde   :  { %2528 = vmatpush2.msra.mxu1 %v10403_v35 }
 0xddf   :  { %2529 = vmatprep.subr.mxu1 %v10404_v36 }
 0xde0   :  { %2530 = vmatpush2.msra.mxu1 %v10405_v1 }
 0xde1   :  { %2531 = vmatprep.subr.mxu1 %v10406_v39 }
 0xde2   :  { %2532 = vmatpush2.msra.mxu1 %v10407_v40 }
 0xde3   :  { %2533 = vmatprep.subr.mxu1 %v10408_v53 }
 0xde4   :  { %2534 = vmatpush2.msra.mxu1 %v10409_v48 }
 0xde5   :  { %3970 = vmatprep.subr.mxu1 %v10178_v6 }
 0xe64   :  { %v2292_v51 = vpop.f32.mrf.mxu0  ;;  %v2363_v31 = vpop.f32.mrf.mxu1 }
 0xe65   :  { %v2293_v10 = vadd.f32 %v2292_v51, %v10410_v15  ;;  %v2364_v33 = vadd.f32 %v2363_v31, %v6837_v56 }
 0xe66   :  { %v2294_v26 = vpop.f32.mrf.mxu0  ;;  %v2365_v34 = vpop.f32.mrf.mxu1 }
 0xe67   :  { %v2368_v29 = vmul.f32 0.5, %v2293_v10  ;;  %v2295_v30 = vadd.f32 %v2294_v26, %v6834_v44  ;;  %v2366_v35 = vadd.f32 %v2365_v34, %v6842_v54 }
 0xe69   :  { %4257 = vtanh.f32 %v2368_v29  ;;  %v2372_v32 = vmul.f32 0.5, %v2295_v30  ;;  %v2377_v48 = vmul.f32 0.5, %v2366_v35 }
 0xe6b   :  { %4259 = vtanh.f32 %v2372_v32 }
 0xe6c   :  { %4261 = vtanh.f32 %v2364_v33 }
 0xe6d   :  { %4263 = vtanh.f32 %v2377_v48  ;;  %v10416_v48 = vld [vmem:[#allocation69_spill] sm:$0xff] }
 0xe76   :  { %v4258_v53 = vpop.eup %4257 }
 0xe77   :  { %v2370_v40 = vadd.f32 1.0, %v4258_v53  ;;  %v10415_v53 = vld [vmem:[#allocation67_spill] sm:$0xff] }
 0xe78   :  { %v4260_v39 = vpop.eup %4259 }
 0xe79   :  { %v2371_v1 = vmul.f32 0.5, %v2370_v40  ;;  %v2374_v51 = vadd.f32 1.0, %v4260_v39  ;;  %v4262_v15 = vpop.eup %4261  ;;  %v10413_v39 = vld [vmem:[#allocation65_spill] sm:$0xff]  ;;  %v10414_v40 = vld [vmem:[#allocation51_spill] sm:$0xff] }
 0xe7a   :  { %v4264_v31 = vpop.eup %4263 }
 0xe7b   :  { %v2375_v10 = vmul.f32 0.5, %v2374_v51  ;;  %v2382_v29 = vmul.f32 %v4262_v15, %v2371_v1  ;;  %v2379_v32 = vadd.f32 1.0, %v4264_v31  ;;  %v10412_v1 = vld [vmem:[#allocation63_spill] sm:$0xff]  ;;  %v10417_v15 = vld [vmem:[#allocation5_spill] sm:$0xff]  ;;  %v10418_v51 = vld [vmem:[#allocation6_spill] sm:$0xff] }
 0xe7c   :  { %v10422_v31 = vld [vmem:[#allocation20_spill] sm:$0xff] }
 0xe7d   :  { %v2381_v26 = vmul.f32 %v2375_v10, %v7222_v46  ;;  %v2380_v33 = vmul.f32 0.5, %v2379_v32  ;;  %v10411_v46 = vld [vmem:[#allocation49_spill] sm:$0xff]  ;;  %v10419_v10 = vld [vmem:[#allocation7_spill] sm:$0xff] }
 0xe7e   :  { %v10423_v32 = vld [vmem:[#allocation9_spill] sm:$0xff] }
 0xe7f   :  { %v7708_v30 = vadd.f32 %v2382_v29, %v2381_v26  ;;  %v10420_v26 = vld [vmem:[#allocation18_spill] sm:$0xff]  ;;  %v10421_v29 = vld [vmem:[#allocation8_spill] sm:$0xff] }
 0xe81   :  { %4265 = vtanh.f32 %v7708_v30 }
 0xe8e   :  { %v4266_v34 = vpop.eup %4265 }
 0xe8f   :  { %v2385_v35 = vmul.f32 %v4266_v34, %v2380_v33  ;;  %v10424_v33 = vld [vmem:[#allocation22_spill] sm:$0xff]  ;;  %v10425_v34 = vld [vmem:[#allocation11_spill] sm:$0xff] }
 0xe91   :  { %3968 = vmatmul.mubr.f32.vlgmr.msra.gmra.mxu0 %v2385_v35  ;;  %2535 = vmatprep.mubr.f32.mxu1 %v2385_v35 }
 0xe92   :  { %2606 = vmatprep.mubr.f32.mxu0 %v2385_v35  ;;  %2543 = vmatpush1.msra.mxu0 %v7228_v37  ;;  %v10426_v35 = vld [vmem:[#allocation10_spill] sm:$0xff] }
 0xe93   :  { %2544 = vmatprep.subr.mxu0 %v7234_v16 }
 0xe94   :  { %2545 = vmatpush1.msra.mxu0 %v7240_v38 }
 0xe95   :  { %2546 = vmatprep.subr.mxu0 %v7246_v58 }
 0xe96   :  { %2547 = vmatpush1.msra.mxu0 %v7252_v2 }
 0xe97   :  { %2548 = vmatprep.subr.mxu0 %v7258_v50 }
 0xe98   :  { %2549 = vmatpush1.msra.mxu0 %v7264_v7 }
 0xe99   :  { %2550 = vmatprep.subr.mxu0 %v7270_v21 }
 0xe9a   :  { %2551 = vmatpush1.msra.mxu0 %v7276_v20 }
 0xe9b   :  { %2552 = vmatprep.subr.mxu0 %v7282_v9 }
 0xe9c   :  { %2553 = vmatpush1.msra.mxu0 %v7288_v0 }
 0xe9d   :  { %2554 = vmatprep.subr.mxu0 %v10411_v46 }
 0xe9e   :  { %2555 = vmatpush1.msra.mxu0 %v10412_v1 }
 0xe9f   :  { %2556 = vmatprep.subr.mxu0 %v10413_v39 }
 0xea0   :  { %2557 = vmatpush1.msra.mxu0 %v10414_v40 }
 0xea1   :  { %2558 = vmatprep.subr.mxu0 %v10415_v53 }
 0xea2   :  { %2559 = vmatpush1.msra.mxu0 %v10416_v48  ;;  %v10427_v48 = vld [vmem:[#allocation13_spill] sm:$0xff] }
 0xea3   :  { %2560 = vmatprep.subr.mxu0 %v10417_v15  ;;  %v10428_v15 = vld [vmem:[#allocation27_spill] sm:$0xff] }
 0xea4   :  { %2561 = vmatpush1.msra.mxu0 %v10418_v51  ;;  %v10429_v51 = vld [vmem:[#allocation15_spill] sm:$0xff] }
 0xea5   :  { %2562 = vmatprep.subr.mxu0 %v10419_v10  ;;  %v10440_v10 = vld [vmem:[#allocation36_spill] sm:$0xff] }
 0xea6   :  { %2563 = vmatpush1.msra.mxu0 %v10420_v26  ;;  %v10439_v26 = vld [vmem:[#allocation34_spill] sm:$0xff] }
 0xea7   :  { %2564 = vmatprep.subr.mxu0 %v10421_v29  ;;  %v7744_v29 = vld [vmem:[%s9464_s2 + $0x10] sm:$0xff] }
 0xea8   :  { %2565 = vmatpush1.msra.mxu0 %v10422_v31  ;;  %10430 = vst [vmem:[#allocation23_spill] sm:$0xff] %v7744_v29  ;;  %v10438_v31 = vld [vmem:[#allocation33_spill] sm:$0xff] }
 0xea9   :  { %2566 = vmatprep.subr.mxu0 %v10423_v32  ;;  %v10431_v32 = vld [vmem:[#allocation14_spill] sm:$0xff] }
 0xeaa   :  { %2567 = vmatpush1.msra.mxu0 %v10424_v33  ;;  %v10432_v33 = vld [vmem:[#allocation24_spill] sm:$0xff] }
 0xeab   :  { %2568 = vmatprep.subr.mxu0 %v10425_v34  ;;  %v10433_v34 = vld [vmem:[#allocation16_spill] sm:$0xff] }
 0xeac   :  { %2569 = vmatpush1.msra.mxu0 %v10426_v35  ;;  %v10434_v35 = vld [vmem:[#allocation29_spill] sm:$0xff] }
 0xead   :  { %2570 = vmatprep.subr.mxu0 %v10427_v48  ;;  %v10435_v48 = vld [vmem:[#allocation30_spill] sm:$0xff] }
 0xeae   :  { %2571 = vmatpush1.msra.mxu0 %v10428_v15  ;;  %v10436_v15 = vld [vmem:[#allocation31_spill] sm:$0xff] }
 0xeaf   :  { %2572 = vmatprep.subr.mxu0 %v10429_v51  ;;  %v10437_v51 = vld [vmem:[#allocation32_spill] sm:$0xff] }
 0xeb0   :  { %2573 = vmatpush1.msra.mxu0 %v7744_v29  ;;  %v10441_v29 = vld [vmem:[#allocation38_spill] sm:$0xff] }
 0xeb1   :  { %2574 = vmatprep.subr.mxu0 %v10431_v32  ;;  %v10442_v32 = vld [vmem:[#allocation40_spill] sm:$0xff] }
 0xeb2   :  { %2575 = vmatpush2.msra.mxu0 %v10432_v33  ;;  %v10443_v33 = vld [vmem:[#allocation42_spill] sm:$0xff] }
 0xeb3   :  { %2576 = vmatprep.subr.mxu0 %v10433_v34  ;;  %v10444_v34 = vld [vmem:[#allocation44_spill] sm:$0xff] }
 0xeb4   :  { %2577 = vmatpush2.msra.mxu0 %v10434_v35  ;;  %v10445_v35 = vld [vmem:[#allocation46_spill] sm:$0xff] }
 0xeb5   :  { %2578 = vmatprep.subr.mxu0 %v10435_v48  ;;  %v10446_v48 = vld [vmem:[#allocation48_spill] sm:$0xff] }
 0xeb6   :  { %2579 = vmatpush2.msra.mxu0 %v10436_v15  ;;  %v10447_v15 = vld [vmem:[#allocation50_spill] sm:$0xff] }
 0xeb7   :  { %2580 = vmatprep.subr.mxu0 %v10437_v51  ;;  %v10448_v51 = vld [vmem:[#allocation52_spill] sm:$0xff] }
 0xeb8   :  { %2581 = vmatpush2.msra.mxu0 %v10438_v31  ;;  %v10449_v31 = vld [vmem:[#allocation54_spill] sm:$0xff] }
 0xeb9   :  { %2582 = vmatprep.subr.mxu0 %v10439_v26  ;;  %v10450_v26 = vld [vmem:[#allocation56_spill] sm:$0xff] }
 0xeba   :  { %2583 = vmatpush2.msra.mxu0 %v10440_v10  ;;  %v10451_v10 = vld [vmem:[#allocation58_spill] sm:$0xff] }
 0xebb   :  { %2584 = vmatprep.subr.mxu0 %v10441_v29  ;;  %v10452_v29 = vld [vmem:[#allocation60_spill] sm:$0xff] }
 0xebc   :  { %2585 = vmatpush2.msra.mxu0 %v10442_v32  ;;  %v10453_v32 = vld [vmem:[#allocation62_spill] sm:$0xff] }
 0xebd   :  { %2586 = vmatprep.subr.mxu0 %v10443_v33  ;;  %v10454_v33 = vld [vmem:[#allocation64_spill] sm:$0xff] }
 0xebe   :  { %2587 = vmatpush2.msra.mxu0 %v10444_v34  ;;  %v10455_v34 = vld [vmem:[#allocation66_spill] sm:$0xff] }
 0xebf   :  { %2588 = vmatprep.subr.mxu0 %v10445_v35  ;;  %v10456_v35 = vld [vmem:[#allocation68_spill] sm:$0xff] }
 0xec0   :  { %2589 = vmatpush2.msra.mxu0 %v10446_v48  ;;  %v10457_v48 = vld [vmem:[#allocation70_spill] sm:$0xff] }
 0xec1   :  { %2590 = vmatprep.subr.mxu0 %v10447_v15  ;;  %v10458_v15 = vld [vmem:[#allocation71_spill] sm:$0xff] }
 0xec2   :  { %2591 = vmatpush2.msra.mxu0 %v10448_v51  ;;  %v10459_v51 = vld [vmem:[#allocation72_spill] sm:$0xff] }
 0xec3   :  { %2592 = vmatprep.subr.mxu0 %v10449_v31  ;;  %v10460_v31 = vld [vmem:[#allocation73_spill] sm:$0xff] }
 0xec4   :  { %2593 = vmatpush2.msra.mxu0 %v10450_v26  ;;  %v10461_v26 = vld [vmem:[#allocation74_spill] sm:$0xff] }
 0xec5   :  { %2594 = vmatprep.subr.mxu0 %v10451_v10  ;;  %v10462_v10 = vld [vmem:[#allocation75_spill] sm:$0xff] }
 0xec6   :  { %2595 = vmatpush2.msra.mxu0 %v10452_v29  ;;  %v10463_v29 = vld [vmem:[#allocation17_spill] sm:$0xff] }
 0xec7   :  { %2596 = vmatprep.subr.mxu0 %v10453_v32 }
 0xec8   :  { %2597 = vmatpush2.msra.mxu0 %v10454_v33 }
 0xec9   :  { %2598 = vmatprep.subr.mxu0 %v10455_v34 }
 0xeca   :  { %2599 = vmatpush2.msra.mxu0 %v10456_v35 }
 0xecb   :  { %2600 = vmatprep.subr.mxu0 %v10457_v48 }
 0xecc   :  { %2601 = vmatpush2.msra.mxu0 %v10458_v15 }
 0xecd   :  { %2602 = vmatprep.subr.mxu0 %v10459_v51 }
 0xece   :  { %2603 = vmatpush2.msra.mxu0 %v10460_v31 }
 0xecf   :  { %2604 = vmatprep.subr.mxu0 %v10461_v26 }
 0xed0   :  { %2605 = vmatpush2.msra.mxu0 %v10462_v10 }
 0xed1   :  { %2716 = vmatprep.subr.mxu0 %v10463_v29 }
 0xf51   :  { %v2452_v32 = vpop.f32.mrf.mxu0 }
 0xf52   :  { %v2453_v33 = vadd.f32 %v7076_v43, %v2452_v32  ;;  %v7789_v43 = vld [vmem:[%s9466_s4 + $0x78] sm:$0xff]  ;;  %v7835_v32 = vld [vmem:[%s9466_s4 + $0x50] sm:$0xff] }
 0xf53   :  { %v3969_v34 = vpop.f32.mrf.mxu0 }
 0xf54   :  { %v2456_v35 = vsel %vm1966_vm1, %v2453_v33, -inf  ;;  %v7853_v34 = vld [vmem:[%s9466_s4 + $0x40] sm:$0xff] }
 0xf55   :  { %2457 = vmax.xlane.f32.xlu0 %v2456_v35  ;;  %v7862_v35 = vld [vmem:[%s9466_s4 + $0x38] sm:$0xff] }
 0xfde   :  { %v2458_v48 = vpop.xlane.xlu0 %2457 }
 0xfdf   :  { %v2459_v53 = vsub.f32 %v2453_v33, %v2458_v48 }
 0xfe1   :  { %v2460_v15 = vmul.f32 1.442695, %v2459_v53  ;;  %v7817_v53 = vld [vmem:[%s9466_s4 + $0x60] sm:$0xff] }
 0xfe3   :  { %4267 = vpow2.f32 %v2460_v15  ;;  %v7880_v15 = vld [vmem:[%s9466_s4 + $0x28] sm:$0xff] }
 0xff0   :  { %v4268_v51 = vpop.eup %4267 }
 0xff1   :  { %v2462_v31 = vsel %vm1966_vm1, %v4268_v51, 0.0  ;;  %v7889_v51 = vld [vmem:[%s9466_s4 + $0x20] sm:$0xff] }
 0xff2   :  { %2463 = vadd.xlane.f32.xlu1 %v2462_v31  ;;  %10464 = vst [vmem:[#allocation26_spill] sm:$0xff] %v7889_v51  ;;  %v7898_v31 = vld [vmem:[%s9466_s4 + $0x18] sm:$0xff] }
 0xff3   :  { %10465 = vst [vmem:[#allocation28_spill] sm:$0xff] %v7898_v31 }
0x107b   :  { %v2464_v26 = vpop.xlane.xlu1 %2463 }
0x107c   :  { %4269 = vlog2.f32 %v2464_v26  ;;  %v7907_v26 = vld [vmem:[%s9466_s4 + $0x10] sm:$0xff] }
0x107d   :  { %10466 = vst [vmem:[#allocation12_spill] sm:$0xff] %v7907_v26 }
0x1089   :  { %v4270_v10 = vpop.eup %4269 }
0x108a   :  { %v2466_v40 = vmul.f32 0.6931472, %v4270_v10  ;;  %v10467_v10 = vld [vmem:[#allocation80_spill] sm:$0xff] }
0x108c   :  { %v2467_v29 = vadd.f32 %v2466_v40, %v2458_v48  ;;  %v7799_v40 = vld [vmem:[%s9466_s4 + $0x70] sm:$0xff] }
0x108d   :  { %v7871_v48 = vld [vmem:[%s9466_s4 + $0x30] sm:$0xff] }
0x108e   :  { %v2468_v39 = vsub.f32 %v2453_v33, %v2467_v29  ;;  %v7826_v29 = vld [vmem:[%s9466_s4 + $0x58] sm:$0xff]  ;;  %v7844_v33 = vld [vmem:[%s9466_s4 + $0x48] sm:$0xff] }
0x1090   :  { %3723 = vst [vmem:[%s9469_s7 + $0x4] sm:$0x3] %v2468_v39  ;;  %2536 = vmatmul.mubr.f32.vlgmr.msra.gmra.mxu1 %v2468_v39  ;;  %2607 = vmatmul.mubr.f32.vlgmr.msra.gmra.mxu0 %v2468_v39  ;;  %v7808_v39 = vld [vmem:[%s9466_s4 + $0x68] sm:$0xff] }
0x1091   :  { %3971 = vmatpush3.msra.mxu1 %v7789_v43  ;;  %4002 = vmatprep.mubr.msk.f32.mxu1 %vm4777_vm0, %v10178_v6 }
0x1092   :  { %3972 = vmatprep.subr.mxu1 %v10178_v6  ;;  %2717 = vmatpush1.msra.mxu0 %v7457_v41 }
0x1093   :  { %3973 = vmatpush3.msra.mxu1 %v7799_v40  ;;  %2718 = vmatprep.subr.mxu0 %v7464_v17 }
0x1094   :  { %3974 = vmatprep.subr.mxu1 %v10178_v6  ;;  %2719 = vmatpush1.msra.mxu0 %v7471_v24 }
0x1095   :  { %3975 = vmatpush3.msra.mxu1 %v7808_v39  ;;  %2720 = vmatprep.subr.mxu0 %v7478_v12 }
0x1096   :  { %3976 = vmatprep.subr.mxu1 %v10178_v6  ;;  %2721 = vmatpush1.msra.mxu0 %v7485_v11 }
0x1097   :  { %3977 = vmatpush3.msra.mxu1 %v7817_v53  ;;  %2722 = vmatprep.subr.mxu0 %v7492_v55 }
0x1098   :  { %3978 = vmatprep.subr.mxu1 %v10178_v6  ;;  %2723 = vmatpush1.msra.mxu0 %v7499_v52 }
0x1099   :  { %3979 = vmatpush3.msra.mxu1 %v7826_v29  ;;  %2724 = vmatprep.subr.mxu0 %v7506_v57 }
0x109a   :  { %3980 = vmatprep.subr.mxu1 %v10178_v6  ;;  %2725 = vmatpush1.msra.mxu0 %v7513_v13 }
0x109b   :  { %3981 = vmatpush3.msra.mxu1 %v7835_v32  ;;  %2726 = vmatprep.subr.mxu0 %v7520_v60 }
0x109c   :  { %3982 = vmatprep.subr.mxu1 %v10178_v6  ;;  %2727 = vmatpush1.msra.mxu0 %v7527_v63 }
0x109d   :  { %3983 = vmatpush3.msra.mxu1 %v7844_v33  ;;  %2728 = vmatprep.subr.mxu0 %v7534_v47 }
0x109e   :  { %3984 = vmatprep.subr.mxu1 %v10178_v6  ;;  %2729 = vmatpush1.msra.mxu0 %v7541_v59 }
0x109f   :  { %3985 = vmatpush3.msra.mxu1 %v7853_v34  ;;  %2730 = vmatprep.subr.mxu0 %v7548_v3 }
0x10a0   :  { %3986 = vmatprep.subr.mxu1 %v10178_v6  ;;  %2731 = vmatpush1.msra.mxu0 %v7555_v42 }
0x10a1   :  { %3987 = vmatpush3.msra.mxu1 %v7862_v35  ;;  %2732 = vmatprep.subr.mxu0 %v7562_v25 }
0x10a2   :  { %3988 = vmatprep.subr.mxu1 %v10178_v6  ;;  %2733 = vmatpush1.msra.mxu0 %v7569_v45 }
0x10a3   :  { %3989 = vmatpush3.msra.mxu1 %v7871_v48  ;;  %2734 = vmatprep.subr.mxu0 %v7576_v23 }
0x10a4   :  { %3990 = vmatprep.subr.mxu1 %v10178_v6  ;;  %2735 = vmatpush1.msra.mxu0 %v7583_v27 }
0x10a5   :  { %3991 = vmatpush3.msra.mxu1 %v7880_v15  ;;  %2736 = vmatprep.subr.mxu0 %v7590_v22 }
0x10a6   :  { %3992 = vmatprep.subr.mxu1 %v10178_v6  ;;  %2737 = vmatpush1.msra.mxu0 %v7597_v28 }
0x10a7   :  { %3993 = vmatpush3.msra.mxu1 %v7889_v51  ;;  %2738 = vmatprep.subr.mxu0 %v7604_v5 }
0x10a8   :  { %3994 = vmatprep.subr.mxu1 %v10178_v6  ;;  %2739 = vmatpush1.msra.mxu0 %v7611_v8 }
0x10a9   :  { %3995 = vmatpush3.msra.mxu1 %v7898_v31  ;;  %2740 = vmatprep.subr.mxu0 %v7618_v4  ;;  %v7916_v4 = vld [vmem:[%s9466_s4 + $0x8] sm:$0xff] }
0x10aa   :  { %3996 = vmatprep.subr.mxu1 %v10178_v6  ;;  %2741 = vmatpush1.msra.mxu0 %v7625_v61  ;;  %10468 = vst [vmem:[#allocation25_spill] sm:$0xff] %v7916_v4  ;;  %v10469_v61 = vld [vmem:[#allocation82_spill] sm:$0xff] }
0x10ab   :  { %3997 = vmatpush3.msra.mxu1 %v7907_v26  ;;  %2742 = vmatprep.subr.mxu0 %v10467_v10  ;;  %v7925_v10 = vld [vmem:[%s9466_s4] sm:$0xff] }
0x10ac   :  { %3998 = vmatprep.subr.mxu1 %v10178_v6  ;;  %2743 = vmatpush1.msra.mxu0 %v7639_v62  ;;  %10470 = vst [vmem:[#allocation35_spill] sm:$0xff] %v7925_v10  ;;  %v10502_v62 = vld [vmem:[#allocation53_spill] sm:$0xff] }
0x10ad   :  { %3999 = vmatpush3.msra.mxu1 %v7916_v4  ;;  %2744 = vmatprep.subr.mxu0 %v10469_v61  ;;  %v7934_v61 = vld [vmem:[%s9464_s2 + $0x3e8] sm:$0xff] }
0x10ae   :  { %4000 = vmatprep.subr.mxu1 %v10178_v6  ;;  %2745 = vmatpush1.msra.mxu0 %v7653_v19  ;;  %10471 = vst [vmem:[#allocation37_spill] sm:$0xff] %v7934_v61  ;;  %v7940_v19 = vld [vmem:[%s9464_s2 + $0x3e0] sm:$0xff] }
0x10af   :  { %4001 = vmatpush3.msra.mxu1 %v7925_v10  ;;  %2746 = vmatprep.subr.mxu0 %v7660_v49  ;;  %10472 = vst [vmem:[#allocation39_spill] sm:$0xff] %v7940_v19  ;;  %v10498_v49 = vld [vmem:[#allocation57_spill] sm:$0xff]  ;;  %v10500_v10 = vld [vmem:[#allocation59_spill] sm:$0xff] }
0x10b0   :  { %2787 = vmatprep.subr.mxu1 %v7150_v18  ;;  %2747 = vmatpush1.msra.mxu0 %v7667_v14  ;;  %v7946_v18 = vld [vmem:[%s9464_s2 + $0x3c8] sm:$0xff]  ;;  %v7952_v14 = vld [vmem:[%s9464_s2 + $0x3c0] sm:$0xff] }
0x10b1   :  { %2748 = vmatprep.subr.mxu0 %v7934_v61  ;;  %10473 = vst [vmem:[#allocation41_spill] sm:$0xff] %v7946_v18  ;;  %10474 = vst [vmem:[#allocation43_spill] sm:$0xff] %v7952_v14  ;;  %v7958_v61 = vld [vmem:[%s9464_s2 + $0x3a8] sm:$0xff] }
0x10b2   :  { %2749 = vmatpush2.msra.mxu0 %v7940_v19  ;;  %10475 = vst [vmem:[#allocation45_spill] sm:$0xff] %v7958_v61  ;;  %v7964_v19 = vld [vmem:[%s9464_s2 + $0x3a0] sm:$0xff] }
0x10b3   :  { %2750 = vmatprep.subr.mxu0 %v7946_v18  ;;  %10476 = vst [vmem:[#allocation49_spill] sm:$0xff] %v7964_v19  ;;  %v7970_v18 = vld [vmem:[%s9464_s2 + $0x388] sm:$0xff] }
0x10b4   :  { %2751 = vmatpush2.msra.mxu0 %v7952_v14  ;;  %10477 = vst [vmem:[#allocation63_spill] sm:$0xff] %v7970_v18  ;;  %v7976_v14 = vld [vmem:[%s9464_s2 + $0x380] sm:$0xff] }
0x10b5   :  { %2752 = vmatprep.subr.mxu0 %v7958_v61  ;;  %10478 = vst [vmem:[#allocation14_spill] sm:$0xff] %v7976_v14  ;;  %v7982_v61 = vld [vmem:[%s9464_s2 + $0x368] sm:$0xff] }
0x10b6   :  { %2753 = vmatpush2.msra.mxu0 %v7964_v19  ;;  %10479 = vst [vmem:[#allocation24_spill] sm:$0xff] %v7982_v61  ;;  %v7988_v19 = vld [vmem:[%s9464_s2 + $0x360] sm:$0xff] }
0x10b7   :  { %2754 = vmatprep.subr.mxu0 %v7970_v18  ;;  %10480 = vst [vmem:[#allocation16_spill] sm:$0xff] %v7988_v19  ;;  %v7994_v18 = vld [vmem:[%s9464_s2 + $0x348] sm:$0xff] }
0x10b8   :  { %2755 = vmatpush2.msra.mxu0 %v7976_v14  ;;  %10481 = vst [vmem:[#allocation29_spill] sm:$0xff] %v7994_v18  ;;  %v8000_v14 = vld [vmem:[%s9464_s2 + $0x340] sm:$0xff] }
0x10b9   :  { %2756 = vmatprep.subr.mxu0 %v7982_v61  ;;  %10482 = vst [vmem:[#allocation30_spill] sm:$0xff] %v8000_v14  ;;  %v8006_v61 = vld [vmem:[%s9464_s2 + $0x328] sm:$0xff] }
0x10ba   :  { %2757 = vmatpush2.msra.mxu0 %v7988_v19  ;;  %10483 = vst [vmem:[#allocation31_spill] sm:$0xff] %v8006_v61  ;;  %v8012_v19 = vld [vmem:[%s9464_s2 + $0x320] sm:$0xff] }
0x10bb   :  { %2758 = vmatprep.subr.mxu0 %v7994_v18  ;;  %10484 = vst [vmem:[#allocation32_spill] sm:$0xff] %v8012_v19  ;;  %v8018_v18 = vld [vmem:[%s9464_s2 + $0x308] sm:$0xff] }
0x10bc   :  { %2759 = vmatpush2.msra.mxu0 %v8000_v14  ;;  %10485 = vst [vmem:[#allocation33_spill] sm:$0xff] %v8018_v18  ;;  %v8024_v14 = vld [vmem:[%s9464_s2 + $0x300] sm:$0xff] }
0x10bd   :  { %2760 = vmatprep.subr.mxu0 %v8006_v61  ;;  %10486 = vst [vmem:[#allocation34_spill] sm:$0xff] %v8024_v14  ;;  %v8030_v61 = vld [vmem:[%s9464_s2 + $0x2e8] sm:$0xff] }
0x10be   :  { %2761 = vmatpush2.msra.mxu0 %v8012_v19  ;;  %10487 = vst [vmem:[#allocation36_spill] sm:$0xff] %v8030_v61  ;;  %v8036_v19 = vld [vmem:[%s9464_s2 + $0x2e0] sm:$0xff] }
0x10bf   :  { %2762 = vmatprep.subr.mxu0 %v8018_v18  ;;  %10488 = vst [vmem:[#allocation38_spill] sm:$0xff] %v8036_v19  ;;  %v8042_v18 = vld [vmem:[%s9464_s2 + $0x2c8] sm:$0xff] }
0x10c0   :  { %2763 = vmatpush2.msra.mxu0 %v8024_v14  ;;  %10489 = vst [vmem:[#allocation40_spill] sm:$0xff] %v8042_v18  ;;  %v8048_v14 = vld [vmem:[%s9464_s2 + $0x2c0] sm:$0xff] }
0x10c1   :  { %2764 = vmatprep.subr.mxu0 %v8030_v61  ;;  %10490 = vst [vmem:[#allocation42_spill] sm:$0xff] %v8048_v14  ;;  %v8054_v61 = vld [vmem:[%s9464_s2 + $0x2a8] sm:$0xff] }
0x10c2   :  { %2765 = vmatpush2.msra.mxu0 %v8036_v19  ;;  %10491 = vst [vmem:[#allocation44_spill] sm:$0xff] %v8054_v61  ;;  %v8060_v19 = vld [vmem:[%s9464_s2 + $0x2a0] sm:$0xff] }
0x10c3   :  { %2766 = vmatprep.subr.mxu0 %v8042_v18  ;;  %10492 = vst [vmem:[#allocation46_spill] sm:$0xff] %v8060_v19  ;;  %v8066_v18 = vld [vmem:[%s9464_s2 + $0x288] sm:$0xff] }
0x10c4   :  { %2767 = vmatpush2.msra.mxu0 %v8048_v14  ;;  %10493 = vst [vmem:[#allocation48_spill] sm:$0xff] %v8066_v18  ;;  %v8072_v14 = vld [vmem:[%s9464_s2 + $0x280] sm:$0xff] }
0x10c5   :  { %2768 = vmatprep.subr.mxu0 %v8054_v61  ;;  %10494 = vst [vmem:[#allocation50_spill] sm:$0xff] %v8072_v14  ;;  %v8078_v61 = vld [vmem:[%s9464_s2 + $0x268] sm:$0xff] }
0x10c6   :  { %2769 = vmatpush2.msra.mxu0 %v8060_v19  ;;  %10495 = vst [vmem:[#allocation52_spill] sm:$0xff] %v8078_v61  ;;  %v8084_v19 = vld [vmem:[%s9464_s2 + $0x260] sm:$0xff] }
0x10c7   :  { %2770 = vmatprep.subr.mxu0 %v8066_v18  ;;  %10496 = vst [vmem:[#allocation54_spill] sm:$0xff] %v8084_v19  ;;  %v10497_v18 = vld [vmem:[#allocation55_spill] sm:$0xff]  ;;  %v10501_v4 = vld [vmem:[#allocation61_spill] sm:$0xff] }
0x10c8   :  { %2771 = vmatpush2.msra.mxu0 %v8072_v14  ;;  %v10499_v14 = vld [vmem:[#allocation47_spill] sm:$0xff] }
0x10c9   :  { %2772 = vmatprep.subr.mxu0 %v8078_v61 }
0x10ca   :  { %2773 = vmatpush2.msra.mxu0 %v8084_v19 }
0x10cb   :  { %2774 = vmatprep.subr.mxu0 %v10404_v36 }
0x10cc   :  { %2775 = vmatpush2.msra.mxu0 %v10497_v18 }
0x10cd   :  { %2776 = vmatprep.subr.mxu0 %v10498_v49 }
0x10ce   :  { %2777 = vmatpush2.msra.mxu0 %v10499_v14 }
0x10cf   :  { %2778 = vmatprep.subr.mxu0 %v10500_v10 }
0x10d0   :  { %2779 = vmatpush2.msra.mxu0 %v10501_v4 }
0x10d1   :  { %4005 = vmatprep.subr.mxu0 %v10178_v6 }
0x1150   :  { %v2537_v61 = vpop.f32.mrf.mxu1  ;;  %v2608_v36 = vpop.f32.mrf.mxu0 }
0x1151   :  { %v2538_v26 = vadd.f32 %v2537_v61, %v10502_v62  ;;  %v2609_v49 = vadd.f32 %v2608_v36, %v6837_v56 }
0x1152   :  { %v2539_v31 = vpop.f32.mrf.mxu1  ;;  %v2610_v14 = vpop.f32.mrf.mxu0 }
0x1153   :  { %v2613_v8 = vmul.f32 0.5, %v2538_v26  ;;  %v2540_v19 = vadd.f32 %v2539_v31, %v6834_v44  ;;  %v2611_v10 = vadd.f32 %v2610_v14, %v6842_v54 }
0x1155   :  { %4271 = vtanh.f32 %v2613_v8  ;;  %v2617_v18 = vmul.f32 0.5, %v2540_v19  ;;  %v2622_v4 = vmul.f32 0.5, %v2611_v10 }
0x1157   :  { %4273 = vtanh.f32 %v2617_v18 }
0x1158   :  { %4275 = vtanh.f32 %v2609_v49 }
0x1159   :  { %4277 = vtanh.f32 %v2622_v4  ;;  %v8142_v4 = vld [vmem:[%s9464_s2 + $0x3f0] sm:$0xff] }
0x115a   :  { %10522 = vst [vmem:[#allocation58_spill] sm:$0xff] %v8142_v4 }
0x1162   :  { %v4272_v5 = vpop.eup %4271 }
0x1163   :  { %v2615_v51 = vadd.f32 1.0, %v4272_v5  ;;  %v10516_v5 = vld [vmem:[#allocation10_spill] sm:$0xff] }
0x1164   :  { %v4274_v28 = vpop.eup %4273 }
0x1165   :  { %v2616_v22 = vmul.f32 0.5, %v2615_v51  ;;  %v2619_v61 = vadd.f32 1.0, %v4274_v28  ;;  %v4276_v62 = vpop.eup %4275  ;;  %v10515_v28 = vld [vmem:[#allocation11_spill] sm:$0xff] }
0x1166   :  { %v4278_v36 = vpop.eup %4277  ;;  %v8136_v51 = vld [vmem:[%s9464_s2 + $0x3f8] sm:$0xff] }
0x1167   :  { %v2620_v26 = vmul.f32 0.5, %v2619_v61  ;;  %v2627_v8 = vmul.f32 %v4276_v62, %v2616_v22  ;;  %v2624_v18 = vadd.f32 1.0, %v4278_v36  ;;  %v10514_v22 = vld [vmem:[#allocation22_spill] sm:$0xff]  ;;  %v10517_v62 = vld [vmem:[#allocation13_spill] sm:$0xff]  ;;  %10521 = vst [vmem:[#allocation56_spill] sm:$0xff] %v8136_v51  ;;  %v8148_v61 = vld [vmem:[%s9464_s2 + $0x3d8] sm:$0xff] }
0x1168   :  { %10523 = vst [vmem:[#allocation60_spill] sm:$0xff] %v8148_v61  ;;  %v8172_v36 = vld [vmem:[%s9464_s2 + $0x398] sm:$0xff] }
0x1169   :  { %v2626_v31 = vmul.f32 %v2620_v26, %v7708_v30  ;;  %v2625_v49 = vmul.f32 0.5, %v2624_v18  ;;  %v10518_v30 = vld [vmem:[#allocation27_spill] sm:$0xff]  ;;  %10527 = vst [vmem:[#allocation68_spill] sm:$0xff] %v8172_v36 }
0x116a   :  { %v8154_v26 = vld [vmem:[%s9464_s2 + $0x3d0] sm:$0xff] }
0x116b   :  { %v8099_v19 = vadd.f32 %v2627_v8, %v2626_v31  ;;  %10524 = vst [vmem:[#allocation62_spill] sm:$0xff] %v8154_v26  ;;  %v8160_v31 = vld [vmem:[%s9464_s2 + $0x3b8] sm:$0xff]  ;;  %v8166_v8 = vld [vmem:[%s9464_s2 + $0x3b0] sm:$0xff] }
0x116c   :  { %10525 = vst [vmem:[#allocation64_spill] sm:$0xff] %v8160_v31  ;;  %10526 = vst [vmem:[#allocation66_spill] sm:$0xff] %v8166_v8  ;;  %v8178_v18 = vld [vmem:[%s9464_s2 + $0x390] sm:$0xff] }
0x116d   :  { %4279 = vtanh.f32 %v8099_v19  ;;  %10528 = vst [vmem:[#allocation70_spill] sm:$0xff] %v8178_v18 }
0x117a   :  { %v4280_v14 = vpop.eup %4279 }
0x117b   :  { %v2630_v10 = vmul.f32 %v4280_v14, %v2625_v49  ;;  %v8184_v49 = vld [vmem:[%s9464_s2 + $0x378] sm:$0xff]  ;;  %v8190_v14 = vld [vmem:[%s9464_s2 + $0x370] sm:$0xff] }
0x117c   :  { %10529 = vst [vmem:[#allocation71_spill] sm:$0xff] %v8184_v49  ;;  %10530 = vst [vmem:[#allocation72_spill] sm:$0xff] %v8190_v14 }
0x117d   :  { %4003 = vmatmul.mubr.f32.vlgmr.msra.gmra.mxu1 %v2630_v10  ;;  %2780 = vmatprep.mubr.f32.mxu0 %v2630_v10 }
0x117e   :  { %2851 = vmatprep.mubr.f32.mxu1 %v2630_v10  ;;  %2788 = vmatpush1.msra.mxu1 %v7228_v37  ;;  %v10503_v37 = vld [vmem:[#allocation65_spill] sm:$0xff]  ;;  %v8196_v10 = vld [vmem:[%s9464_s2 + $0x358] sm:$0xff] }
0x117f   :  { %2789 = vmatprep.subr.mxu1 %v7234_v16  ;;  %v10504_v16 = vld [vmem:[#allocation51_spill] sm:$0xff]  ;;  %10531 = vst [vmem:[#allocation73_spill] sm:$0xff] %v8196_v10 }
0x1180   :  { %2790 = vmatpush1.msra.mxu1 %v7240_v38  ;;  %v10505_v38 = vld [vmem:[#allocation67_spill] sm:$0xff] }
0x1181   :  { %2791 = vmatprep.subr.mxu1 %v7246_v58  ;;  %v10506_v58 = vld [vmem:[#allocation69_spill] sm:$0xff] }
0x1182   :  { %2792 = vmatpush1.msra.mxu1 %v7252_v2  ;;  %v10507_v2 = vld [vmem:[#allocation5_spill] sm:$0xff] }
0x1183   :  { %2793 = vmatprep.subr.mxu1 %v7258_v50  ;;  %v10508_v50 = vld [vmem:[#allocation6_spill] sm:$0xff] }
0x1184   :  { %2794 = vmatpush1.msra.mxu1 %v7264_v7  ;;  %v10509_v7 = vld [vmem:[#allocation7_spill] sm:$0xff] }
0x1185   :  { %2795 = vmatprep.subr.mxu1 %v7270_v21  ;;  %v10510_v21 = vld [vmem:[#allocation18_spill] sm:$0xff] }
0x1186   :  { %2796 = vmatpush1.msra.mxu1 %v7276_v20  ;;  %v10511_v20 = vld [vmem:[#allocation8_spill] sm:$0xff] }
0x1187   :  { %2797 = vmatprep.subr.mxu1 %v7282_v9  ;;  %v10512_v9 = vld [vmem:[#allocation20_spill] sm:$0xff] }
0x1188   :  { %2798 = vmatpush1.msra.mxu1 %v7288_v0  ;;  %v10513_v0 = vld [vmem:[#allocation9_spill] sm:$0xff] }
0x1189   :  { %2799 = vmatprep.subr.mxu1 %v10411_v46  ;;  %v10519_v46 = vld [vmem:[#allocation15_spill] sm:$0xff] }
0x118a   :  { %2800 = vmatpush1.msra.mxu1 %v10412_v1  ;;  %v10520_v1 = vld [vmem:[#allocation23_spill] sm:$0xff] }
0x118b   :  { %2801 = vmatprep.subr.mxu1 %v10503_v37  ;;  %v8202_v37 = vld [vmem:[%s9464_s2 + $0x350] sm:$0xff] }
0x118c   :  { %2802 = vmatpush1.msra.mxu1 %v10504_v16  ;;  %10532 = vst [vmem:[#allocation74_spill] sm:$0xff] %v8202_v37  ;;  %v8208_v16 = vld [vmem:[%s9464_s2 + $0x338] sm:$0xff] }
0x118d   :  { %2803 = vmatprep.subr.mxu1 %v10505_v38  ;;  %10533 = vst [vmem:[#allocation75_spill] sm:$0xff] %v8208_v16  ;;  %v8214_v38 = vld [vmem:[%s9464_s2 + $0x330] sm:$0xff] }
0x118e   :  { %2804 = vmatpush1.msra.mxu1 %v10506_v58  ;;  %10534 = vst [vmem:[#allocation55_spill] sm:$0xff] %v8214_v38  ;;  %v8220_v58 = vld [vmem:[%s9464_s2 + $0x318] sm:$0xff] }
0x118f   :  { %2805 = vmatprep.subr.mxu1 %v10507_v2  ;;  %10535 = vst [vmem:[#allocation57_spill] sm:$0xff] %v8220_v58  ;;  %v8226_v2 = vld [vmem:[%s9464_s2 + $0x310] sm:$0xff] }
0x1190   :  { %2806 = vmatpush1.msra.mxu1 %v10508_v50  ;;  %10536 = vst [vmem:[#allocation47_spill] sm:$0xff] %v8226_v2  ;;  %v8232_v50 = vld [vmem:[%s9464_s2 + $0x2f8] sm:$0xff] }
0x1191   :  { %2807 = vmatprep.subr.mxu1 %v10509_v7  ;;  %10537 = vst [vmem:[#allocation59_spill] sm:$0xff] %v8232_v50  ;;  %v8238_v7 = vld [vmem:[%s9464_s2 + $0x2f0] sm:$0xff] }
0x1192   :  { %2808 = vmatpush1.msra.mxu1 %v10510_v21  ;;  %10538 = vst [vmem:[#allocation61_spill] sm:$0xff] %v8238_v7  ;;  %v8244_v21 = vld [vmem:[%s9464_s2 + $0x2d8] sm:$0xff] }
0x1193   :  { %2809 = vmatprep.subr.mxu1 %v10511_v20  ;;  %10539 = vst [vmem:[#allocation65_spill] sm:$0xff] %v8244_v21  ;;  %v8250_v20 = vld [vmem:[%s9464_s2 + $0x2d0] sm:$0xff] }
0x1194   :  { %2810 = vmatpush1.msra.mxu1 %v10512_v9  ;;  %10540 = vst [vmem:[#allocation51_spill] sm:$0xff] %v8250_v20  ;;  %v8256_v9 = vld [vmem:[%s9464_s2 + $0x2b8] sm:$0xff] }
0x1195   :  { %2811 = vmatprep.subr.mxu1 %v10513_v0  ;;  %10541 = vst [vmem:[#allocation67_spill] sm:$0xff] %v8256_v9  ;;  %v8262_v0 = vld [vmem:[%s9464_s2 + $0x2b0] sm:$0xff] }
0x1196   :  { %2812 = vmatpush1.msra.mxu1 %v10514_v22  ;;  %10542 = vst [vmem:[#allocation69_spill] sm:$0xff] %v8262_v0  ;;  %v8268_v22 = vld [vmem:[%s9464_s2 + $0x298] sm:$0xff] }
0x1197   :  { %2813 = vmatprep.subr.mxu1 %v10515_v28  ;;  %10543 = vst [vmem:[#allocation5_spill] sm:$0xff] %v8268_v22  ;;  %v8274_v28 = vld [vmem:[%s9464_s2 + $0x290] sm:$0xff] }
0x1198   :  { %2814 = vmatpush1.msra.mxu1 %v10516_v5  ;;  %10544 = vst [vmem:[#allocation6_spill] sm:$0xff] %v8274_v28  ;;  %v8280_v5 = vld [vmem:[%s9464_s2 + $0x278] sm:$0xff] }
0x1199   :  { %2815 = vmatprep.subr.mxu1 %v10517_v62  ;;  %10545 = vst [vmem:[#allocation7_spill] sm:$0xff] %v8280_v5  ;;  %v8286_v62 = vld [vmem:[%s9464_s2 + $0x270] sm:$0xff] }
0x119a   :  { %2816 = vmatpush1.msra.mxu1 %v10518_v30  ;;  %10546 = vst [vmem:[#allocation18_spill] sm:$0xff] %v8286_v62  ;;  %v8292_v30 = vld [vmem:[%s9464_s2 + $0x258] sm:$0xff] }
0x119b   :  { %2817 = vmatprep.subr.mxu1 %v10519_v46  ;;  %10547 = vst [vmem:[#allocation8_spill] sm:$0xff] %v8292_v30  ;;  %v8298_v46 = vld [vmem:[%s9464_s2 + $0x250] sm:$0xff] }
0x119c   :  { %2818 = vmatpush1.msra.mxu1 %v10520_v1  ;;  %10548 = vst [vmem:[#allocation20_spill] sm:$0xff] %v8298_v46 }
0x119d   :  { %2819 = vmatprep.subr.mxu1 %v8136_v51 }
0x119e   :  { %2820 = vmatpush2.msra.mxu1 %v8142_v4 }
0x119f   :  { %2821 = vmatprep.subr.mxu1 %v8148_v61 }
0x11a0   :  { %2822 = vmatpush2.msra.mxu1 %v8154_v26 }
0x11a1   :  { %2823 = vmatprep.subr.mxu1 %v8160_v31 }
0x11a2   :  { %2824 = vmatpush2.msra.mxu1 %v8166_v8 }
0x11a3   :  { %2825 = vmatprep.subr.mxu1 %v8172_v36 }
0x11a4   :  { %2826 = vmatpush2.msra.mxu1 %v8178_v18 }
0x11a5   :  { %2827 = vmatprep.subr.mxu1 %v8184_v49 }
0x11a6   :  { %2828 = vmatpush2.msra.mxu1 %v8190_v14 }
0x11a7   :  { %2829 = vmatprep.subr.mxu1 %v8196_v10 }
0x11a8   :  { %2830 = vmatpush2.msra.mxu1 %v8202_v37 }
0x11a9   :  { %2831 = vmatprep.subr.mxu1 %v8208_v16 }
0x11aa   :  { %2832 = vmatpush2.msra.mxu1 %v8214_v38 }
0x11ab   :  { %2833 = vmatprep.subr.mxu1 %v8220_v58 }
0x11ac   :  { %2834 = vmatpush2.msra.mxu1 %v8226_v2 }
0x11ad   :  { %2835 = vmatprep.subr.mxu1 %v8232_v50 }
0x11ae   :  { %2836 = vmatpush2.msra.mxu1 %v8238_v7 }
0x11af   :  { %2837 = vmatprep.subr.mxu1 %v8244_v21 }
0x11b0   :  { %2838 = vmatpush2.msra.mxu1 %v8250_v20 }
0x11b1   :  { %2839 = vmatprep.subr.mxu1 %v8256_v9 }
0x11b2   :  { %2840 = vmatpush2.msra.mxu1 %v8262_v0 }
0x11b3   :  { %2841 = vmatprep.subr.mxu1 %v8268_v22 }
0x11b4   :  { %2842 = vmatpush2.msra.mxu1 %v8274_v28 }
0x11b5   :  { %2843 = vmatprep.subr.mxu1 %v8280_v5  ;;  %v8304_v5 = vld [vmem:[%s9464_s2 + $0x238] sm:$0xff] }
0x11b6   :  { %2844 = vmatpush2.msra.mxu1 %v8286_v62  ;;  %10549 = vst [vmem:[#allocation9_spill] sm:$0xff] %v8304_v5  ;;  %v8310_v62 = vld [vmem:[%s9464_s2 + $0x230] sm:$0xff] }
0x11b7   :  { %2845 = vmatprep.subr.mxu1 %v8292_v30  ;;  %10550 = vst [vmem:[#allocation22_spill] sm:$0xff] %v8310_v62  ;;  %v8316_v30 = vld [vmem:[%s9464_s2 + $0x218] sm:$0xff] }
0x11b8   :  { %2846 = vmatpush2.msra.mxu1 %v8298_v46  ;;  %10551 = vst [vmem:[#allocation11_spill] sm:$0xff] %v8316_v30  ;;  %v8322_v46 = vld [vmem:[%s9464_s2 + $0x210] sm:$0xff] }
0x11b9   :  { %2847 = vmatprep.subr.mxu1 %v8304_v5  ;;  %10552 = vst [vmem:[#allocation10_spill] sm:$0xff] %v8322_v46  ;;  %v10553_v5 = vld [vmem:[#allocation17_spill] sm:$0xff] }
0x11ba   :  { %2848 = vmatpush2.msra.mxu1 %v8310_v62  ;;  %v8329_v62 = vld [vmem:[%s9467_s5] ss:$0 sm:$0xff] }
0x11bb   :  { %2849 = vmatprep.subr.mxu1 %v8316_v30 }
0x11bc   :  { %2850 = vmatpush2.msra.mxu1 %v8322_v46 }
0x11bd   :  { %2961 = vmatprep.subr.mxu1 %v10553_v5 }
0x123d   :  { %v2697_v28 = vpop.f32.mrf.mxu1 }
0x123e   :  { %v2698_v22 = vadd.f32 %v8329_v62, %v2697_v28  ;;  %v10583_v28 = vld [vmem:[#allocation30_spill] sm:$0xff] }
0x123f   :  { %v4004_v0 = vpop.f32.mrf.mxu1 }
0x1240   :  { %v2701_v30 = vsel %vm1966_vm1, %v2698_v22, -inf  ;;  %v10581_v0 = vld [vmem:[#allocation16_spill] sm:$0xff] }
0x1241   :  { %2702 = vmax.xlane.f32.xlu0 %v2701_v30  ;;  %v10584_v30 = vld [vmem:[#allocation31_spill] sm:$0xff] }
0x12ca   :  { %v2703_v9 = vpop.xlane.xlu0 %2702 }
0x12cb   :  { %v2704_v20 = vsub.f32 %v2698_v22, %v2703_v9 }
0x12cd   :  { %v2705_v21 = vmul.f32 1.442695, %v2704_v20  ;;  %v10579_v20 = vld [vmem:[#allocation14_spill] sm:$0xff] }
0x12cf   :  { %4281 = vpow2.f32 %v2705_v21  ;;  %v10578_v21 = vld [vmem:[#allocation63_spill] sm:$0xff] }
0x12dc   :  { %v4282_v7 = vpop.eup %4281 }
0x12dd   :  { %v2707_v46 = vsel %vm1966_vm1, %v4282_v7, 0.0  ;;  %v10577_v7 = vld [vmem:[#allocation49_spill] sm:$0xff] }
0x12de   :  { %2708 = vadd.xlane.f32.xlu1 %v2707_v46  ;;  %v10585_v46 = vld [vmem:[#allocation32_spill] sm:$0xff] }
0x1367   :  { %v2709_v5 = vpop.xlane.xlu1 %2708 }
0x1368   :  { %4283 = vlog2.f32 %v2709_v5  ;;  %v10586_v5 = vld [vmem:[#allocation33_spill] sm:$0xff] }
0x1375   :  { %v4284_v50 = vpop.eup %4283 }
0x1376   :  { %v2711_v2 = vmul.f32 0.6931472, %v4284_v50  ;;  %v10576_v50 = vld [vmem:[#allocation45_spill] sm:$0xff] }
0x1378   :  { %v2712_v58 = vadd.f32 %v2711_v2, %v2703_v9  ;;  %v10575_v2 = vld [vmem:[#allocation43_spill] sm:$0xff]  ;;  %v10580_v9 = vld [vmem:[#allocation24_spill] sm:$0xff] }
0x137a   :  { %v2713_v38 = vsub.f32 %v2698_v22, %v2712_v58  ;;  %v10574_v58 = vld [vmem:[#allocation41_spill] sm:$0xff] }
0x137b   :  { %v10582_v22 = vld [vmem:[#allocation29_spill] sm:$0xff] }
0x137c   :  { %3724 = vst [vmem:[%s9469_s7 + $0x6] sm:$0x3] %v2713_v38  ;;  %2781 = vmatmul.mubr.f32.vlgmr.msra.gmra.mxu0 %v2713_v38  ;;  %2852 = vmatmul.mubr.f32.vlgmr.msra.gmra.mxu1 %v2713_v38  ;;  %v10573_v38 = vld [vmem:[#allocation39_spill] sm:$0xff] }
0x137d   :  { %4006 = vmatpush3.msra.mxu0 %v7789_v43  ;;  %4037 = vmatprep.mubr.msk.f32.mxu0 %vm4777_vm0, %v10178_v6 }
0x137e   :  { %4007 = vmatprep.subr.mxu0 %v10178_v6  ;;  %2962 = vmatpush1.msra.mxu1 %v7457_v41  ;;  %v10554_v41 = vld [vmem:[#allocation19_spill] sm:$0xff] }
0x137f   :  { %4008 = vmatpush3.msra.mxu0 %v7799_v40  ;;  %2963 = vmatprep.subr.mxu1 %v7464_v17  ;;  %v10555_v17 = vld [vmem:[#allocation21_spill] sm:$0xff] }
0x1380   :  { %4009 = vmatprep.subr.mxu0 %v10178_v6  ;;  %2964 = vmatpush1.msra.mxu1 %v7471_v24  ;;  %v10556_v24 = vld [vmem:[#allocation26_spill] sm:$0xff] }
0x1381   :  { %4010 = vmatpush3.msra.mxu0 %v7808_v39  ;;  %2965 = vmatprep.subr.mxu1 %v7478_v12  ;;  %v10557_v12 = vld [vmem:[#allocation76_spill] sm:$0xff] }
0x1382   :  { %4011 = vmatprep.subr.mxu0 %v10178_v6  ;;  %2966 = vmatpush1.msra.mxu1 %v7485_v11  ;;  %v10558_v11 = vld [vmem:[#allocation77_spill] sm:$0xff] }
0x1383   :  { %4012 = vmatpush3.msra.mxu0 %v7817_v53  ;;  %2967 = vmatprep.subr.mxu1 %v7492_v55  ;;  %v10559_v55 = vld [vmem:[#allocation28_spill] sm:$0xff] }
0x1384   :  { %4013 = vmatprep.subr.mxu0 %v10178_v6  ;;  %2968 = vmatpush1.msra.mxu1 %v7499_v52  ;;  %v10560_v52 = vld [vmem:[#allocation78_spill] sm:$0xff] }
0x1385   :  { %4014 = vmatpush3.msra.mxu0 %v7826_v29  ;;  %2969 = vmatprep.subr.mxu1 %v7506_v57  ;;  %v10561_v57 = vld [vmem:[#allocation79_spill] sm:$0xff] }
0x1386   :  { %4015 = vmatprep.subr.mxu0 %v10178_v6  ;;  %2970 = vmatpush1.msra.mxu1 %v7513_v13  ;;  %v10562_v13 = vld [vmem:[#allocation12_spill] sm:$0xff] }
0x1387   :  { %4016 = vmatpush3.msra.mxu0 %v7835_v32  ;;  %2971 = vmatprep.subr.mxu1 %v7520_v60  ;;  %v10563_v60 = vld [vmem:[#allocation80_spill] sm:$0xff] }
0x1388   :  { %4017 = vmatprep.subr.mxu0 %v10178_v6  ;;  %2972 = vmatpush1.msra.mxu1 %v7527_v63  ;;  %v10564_v63 = vld [vmem:[#allocation81_spill] sm:$0xff] }
0x1389   :  { %4018 = vmatpush3.msra.mxu0 %v7844_v33  ;;  %2973 = vmatprep.subr.mxu1 %v7534_v47  ;;  %v10565_v47 = vld [vmem:[#allocation25_spill] sm:$0xff] }
0x138a   :  { %4019 = vmatprep.subr.mxu0 %v10178_v6  ;;  %2974 = vmatpush1.msra.mxu1 %v7541_v59  ;;  %v10566_v59 = vld [vmem:[#allocation82_spill] sm:$0xff] }
0x138b   :  { %4020 = vmatpush3.msra.mxu0 %v7853_v34  ;;  %2975 = vmatprep.subr.mxu1 %v7548_v3  ;;  %v10567_v3 = vld [vmem:[#allocation83_spill] sm:$0xff] }
0x138c   :  { %4021 = vmatprep.subr.mxu0 %v10178_v6  ;;  %2976 = vmatpush1.msra.mxu1 %v7555_v42  ;;  %v10568_v42 = vld [vmem:[#allocation35_spill] sm:$0xff] }
0x138d   :  { %4022 = vmatpush3.msra.mxu0 %v7862_v35  ;;  %2977 = vmatprep.subr.mxu1 %v7562_v25  ;;  %v10569_v25 = vld [vmem:[#allocation84_spill] sm:$0xff] }
0x138e   :  { %4023 = vmatprep.subr.mxu0 %v10178_v6  ;;  %2978 = vmatpush1.msra.mxu1 %v7569_v45  ;;  %v8403_v45 = vld [vmem:[%s9464_s2 + $0x1f8] sm:$0xff] }
0x138f   :  { %4024 = vmatpush3.msra.mxu0 %v7871_v48  ;;  %2979 = vmatprep.subr.mxu1 %v7576_v23  ;;  %10570 = vst [vmem:[#allocation13_spill] sm:$0xff] %v8403_v45  ;;  %v10571_v23 = vld [vmem:[#allocation85_spill] sm:$0xff] }
0x1390   :  { %4025 = vmatprep.subr.mxu0 %v10178_v6  ;;  %2980 = vmatpush1.msra.mxu1 %v7583_v27  ;;  %v10572_v27 = vld [vmem:[#allocation37_spill] sm:$0xff] }
0x1391   :  { %4026 = vmatpush3.msra.mxu0 %v7880_v15  ;;  %2981 = vmatprep.subr.mxu1 %v10554_v41  ;;  %v10587_v41 = vld [vmem:[#allocation34_spill] sm:$0xff] }
0x1392   :  { %4027 = vmatprep.subr.mxu0 %v10178_v6  ;;  %2982 = vmatpush1.msra.mxu1 %v10555_v17  ;;  %v10588_v17 = vld [vmem:[#allocation36_spill] sm:$0xff] }
0x1393   :  { %4028 = vmatpush3.msra.mxu0 %v10556_v24  ;;  %2983 = vmatprep.subr.mxu1 %v10557_v12  ;;  %v10589_v12 = vld [vmem:[#allocation38_spill] sm:$0xff] }
0x1394   :  { %4029 = vmatprep.subr.mxu0 %v10178_v6  ;;  %2984 = vmatpush1.msra.mxu1 %v10558_v11  ;;  %v10590_v11 = vld [vmem:[#allocation40_spill] sm:$0xff] }
0x1395   :  { %4030 = vmatpush3.msra.mxu0 %v10559_v55  ;;  %2985 = vmatprep.subr.mxu1 %v10560_v52  ;;  %v10591_v52 = vld [vmem:[#allocation42_spill] sm:$0xff] }
0x1396   :  { %4031 = vmatprep.subr.mxu0 %v10178_v6  ;;  %2986 = vmatpush1.msra.mxu1 %v10561_v57  ;;  %v10592_v57 = vld [vmem:[#allocation44_spill] sm:$0xff] }
0x1397   :  { %4032 = vmatpush3.msra.mxu0 %v10562_v13  ;;  %2987 = vmatprep.subr.mxu1 %v10563_v60  ;;  %v10593_v60 = vld [vmem:[#allocation46_spill] sm:$0xff] }
0x1398   :  { %4033 = vmatprep.subr.mxu0 %v10178_v6  ;;  %2988 = vmatpush1.msra.mxu1 %v10564_v63  ;;  %v10594_v63 = vld [vmem:[#allocation48_spill] sm:$0xff] }
0x1399   :  { %4034 = vmatpush3.msra.mxu0 %v10565_v47  ;;  %2989 = vmatprep.subr.mxu1 %v10566_v59  ;;  %v10595_v59 = vld [vmem:[#allocation50_spill] sm:$0xff] }
0x139a   :  { %4035 = vmatprep.subr.mxu0 %v10178_v6  ;;  %2990 = vmatpush1.msra.mxu1 %v10567_v3  ;;  %v10596_v3 = vld [vmem:[#allocation52_spill] sm:$0xff] }
0x139b   :  { %4036 = vmatpush3.msra.mxu0 %v10568_v42  ;;  %2991 = vmatprep.subr.mxu1 %v10569_v25  ;;  %v10597_v25 = vld [vmem:[#allocation54_spill] sm:$0xff] }
0x139c   :  { %3032 = vmatprep.subr.mxu0 %v8403_v45  ;;  %2992 = vmatpush1.msra.mxu1 %v10571_v23  ;;  %v8436_v23 = vld [vmem:[%s9464_s2 + $0x248] sm:$0xff] }
0x139d   :  { %2993 = vmatprep.subr.mxu1 %v10572_v27  ;;  %10598 = vst [vmem:[#allocation27_spill] sm:$0xff] %v8436_v23 }
0x139e   :  { %2994 = vmatpush2.msra.mxu1 %v10573_v38 }
0x139f   :  { %2995 = vmatprep.subr.mxu1 %v10574_v58 }
0x13a0   :  { %2996 = vmatpush2.msra.mxu1 %v10575_v2 }
0x13a1   :  { %2997 = vmatprep.subr.mxu1 %v10576_v50 }
0x13a2   :  { %2998 = vmatpush2.msra.mxu1 %v10577_v7 }
0x13a3   :  { %2999 = vmatprep.subr.mxu1 %v10578_v21 }
0x13a4   :  { %3000 = vmatpush2.msra.mxu1 %v10579_v20 }
0x13a5   :  { %3001 = vmatprep.subr.mxu1 %v10580_v9 }
0x13a6   :  { %3002 = vmatpush2.msra.mxu1 %v10581_v0 }
0x13a7   :  { %3003 = vmatprep.subr.mxu1 %v10582_v22 }
0x13a8   :  { %3004 = vmatpush2.msra.mxu1 %v10583_v28 }
0x13a9   :  { %3005 = vmatprep.subr.mxu1 %v10584_v30 }
0x13aa   :  { %3006 = vmatpush2.msra.mxu1 %v10585_v46 }
0x13ab   :  { %3007 = vmatprep.subr.mxu1 %v10586_v5 }
0x13ac   :  { %3008 = vmatpush2.msra.mxu1 %v10587_v41 }
0x13ad   :  { %3009 = vmatprep.subr.mxu1 %v10588_v17 }
0x13ae   :  { %3010 = vmatpush2.msra.mxu1 %v10589_v12 }
0x13af   :  { %3011 = vmatprep.subr.mxu1 %v10590_v11 }
0x13b0   :  { %3012 = vmatpush2.msra.mxu1 %v10591_v52 }
0x13b1   :  { %3013 = vmatprep.subr.mxu1 %v10592_v57  ;;  %v8442_v57 = vld [vmem:[%s9464_s2 + $0x240] sm:$0xff] }
0x13b2   :  { %3014 = vmatpush2.msra.mxu1 %v10593_v60  ;;  %10599 = vst [vmem:[#allocation15_spill] sm:$0xff] %v8442_v57 }
0x13b3   :  { %3015 = vmatprep.subr.mxu1 %v10594_v63 }
0x13b4   :  { %3016 = vmatpush2.msra.mxu1 %v10595_v59  ;;  %v10604_v59 = vld [vmem:[#allocation53_spill] sm:$0xff] }
0x13b5   :  { %3017 = vmatprep.subr.mxu1 %v10596_v3  ;;  %v8448_v3 = vld [vmem:[%s9464_s2 + $0x228] sm:$0xff] }
0x13b6   :  { %3018 = vmatpush2.msra.mxu1 %v10597_v25  ;;  %10600 = vst [vmem:[#allocation23_spill] sm:$0xff] %v8448_v3  ;;  %v8454_v25 = vld [vmem:[%s9464_s2 + $0x220] sm:$0xff] }
0x13b7   :  { %3019 = vmatprep.subr.mxu1 %v8436_v23  ;;  %10601 = vst [vmem:[#allocation17_spill] sm:$0xff] %v8454_v25  ;;  %v8460_v23 = vld [vmem:[%s9464_s2 + $0x208] sm:$0xff] }
0x13b8   :  { %3020 = vmatpush2.msra.mxu1 %v8442_v57  ;;  %10602 = vst [vmem:[#allocation19_spill] sm:$0xff] %v8460_v23  ;;  %v8466_v57 = vld [vmem:[%s9464_s2 + $0x200] sm:$0xff] }
0x13b9   :  { %3021 = vmatprep.subr.mxu1 %v8448_v3  ;;  %10603 = vst [vmem:[#allocation21_spill] sm:$0xff] %v8466_v57 }
0x13ba   :  { %3022 = vmatpush2.msra.mxu1 %v8454_v25 }
0x13bb   :  { %3023 = vmatprep.subr.mxu1 %v8460_v23 }
0x13bc   :  { %3024 = vmatpush2.msra.mxu1 %v8466_v57 }
0x13bd   :  { %4040 = vmatprep.subr.mxu1 %v10178_v6 }
0x143c   :  { %v2782_v3 = vpop.f32.mrf.mxu0  ;;  %v2853_v11 = vpop.f32.mrf.mxu1 }
0x143d   :  { %v2783_v63 = vadd.f32 %v2782_v3, %v10604_v59  ;;  %v2854_v23 = vadd.f32 %v2853_v11, %v6837_v56 }
0x143e   :  { %v2784_v25 = vpop.f32.mrf.mxu0  ;;  %v2855_v17 = vpop.f32.mrf.mxu1 }
0x143f   :  { %v2858_v60 = vmul.f32 0.5, %v2783_v63  ;;  %v2785_v52 = vadd.f32 %v2784_v25, %v6834_v44  ;;  %v2856_v41 = vadd.f32 %v2855_v17, %v6842_v54 }
0x1441   :  { %4285 = vtanh.f32 %v2858_v60  ;;  %v2862_v12 = vmul.f32 0.5, %v2785_v52  ;;  %v2867_v57 = vmul.f32 0.5, %v2856_v41 }
0x1443   :  { %4287 = vtanh.f32 %v2862_v12 }
0x1444   :  { %4289 = vtanh.f32 %v2854_v23 }
0x1445   :  { %4291 = vtanh.f32 %v2867_v57  ;;  %v8511_v57 = vld [vmem:[%s9464_s2 + $0x198] sm:$0xff] }
0x144e   :  { %v4286_v5 = vpop.eup %4285 }
0x144f   :  { %v2860_v46 = vadd.f32 1.0, %v4286_v5  ;;  %v8505_v5 = vld [vmem:[%s9464_s2 + $0x1b0] sm:$0xff] }
0x1450   :  { %v4288_v30 = vpop.eup %4287 }
0x1451   :  { %v2861_v28 = vmul.f32 0.5, %v2860_v46  ;;  %v2864_v3 = vadd.f32 1.0, %v4288_v30  ;;  %v4290_v59 = vpop.eup %4289  ;;  %v8481_v30 = vld [vmem:[%s9464_s2 + $0x1f0] sm:$0xff]  ;;  %v8499_v46 = vld [vmem:[%s9464_s2 + $0x1b8] sm:$0xff] }
0x1452   :  { %v4292_v12 = vpop.eup %4291 }
0x1453   :  { %v2865_v63 = vmul.f32 0.5, %v2864_v3  ;;  %v2872_v60 = vmul.f32 %v4290_v59, %v2861_v28  ;;  %v2869_v11 = vadd.f32 1.0, %v4292_v12  ;;  %v8493_v28 = vld [vmem:[%s9464_s2 + $0x1d0] sm:$0xff]  ;;  %v8523_v3 = vld [vmem:[%s9464_s2 + $0x178] sm:$0xff] }
0x1454   :  { %v8517_v59 = vld [vmem:[%s9464_s2 + $0x190] sm:$0xff]  ;;  %v8547_v12 = vld [vmem:[%s9464_s2 + $0x138] sm:$0xff] }
0x1455   :  { %v2871_v25 = vmul.f32 %v2865_v63, %v8099_v19  ;;  %v2870_v23 = vmul.f32 0.5, %v2869_v11  ;;  %v8487_v19 = vld [vmem:[%s9464_s2 + $0x1d8] sm:$0xff]  ;;  %v8529_v63 = vld [vmem:[%s9464_s2 + $0x170] sm:$0xff] }
0x1456   :  { %v8553_v11 = vld [vmem:[%s9464_s2 + $0x130] sm:$0xff] }
0x1457   :  { %v8475_v52 = vadd.f32 %v2872_v60, %v2871_v25  ;;  %v8535_v25 = vld [vmem:[%s9464_s2 + $0x158] sm:$0xff]  ;;  %v8541_v60 = vld [vmem:[%s9464_s2 + $0x150] sm:$0xff]  ;;  %10605 = vst [vmem:[#allocation26_spill] sm:$0xff] %v8553_v11 }
0x1459   :  { %4293 = vtanh.f32 %v8475_v52 }
0x1466   :  { %v4294_v17 = vpop.eup %4293 }
0x1467   :  { %v2875_v41 = vmul.f32 %v4294_v17, %v2870_v23  ;;  %v8559_v23 = vld [vmem:[%s9464_s2 + $0x118] sm:$0xff]  ;;  %v8565_v17 = vld [vmem:[%s9464_s2 + $0x110] sm:$0xff] }
0x1468   :  { %10606 = vst [vmem:[#allocation76_spill] sm:$0xff] %v8559_v23  ;;  %10607 = vst [vmem:[#allocation77_spill] sm:$0xff] %v8565_v17 }
0x1469   :  { %4038 = vmatmul.mubr.f32.vlgmr.msra.gmra.mxu0 %v2875_v41  ;;  %3025 = vmatprep.mubr.f32.mxu1 %v2875_v41 }
0x146a   :  { %3096 = vmatprep.mubr.f32.mxu0 %v2875_v41  ;;  %3033 = vmatpush1.msra.mxu0 %v8481_v30  ;;  %v8571_v41 = vld [vmem:[%s9464_s2 + $0xf8] sm:$0xff] }
0x146b   :  { %3034 = vmatprep.subr.mxu0 %v8487_v19  ;;  %10608 = vst [vmem:[#allocation28_spill] sm:$0xff] %v8571_v41 }
0x146c   :  { %3035 = vmatpush1.msra.mxu0 %v8493_v28 }
0x146d   :  { %3036 = vmatprep.subr.mxu0 %v8499_v46 }
0x146e   :  { %3037 = vmatpush1.msra.mxu0 %v8505_v5 }
0x146f   :  { %3038 = vmatprep.subr.mxu0 %v8511_v57 }
0x1470   :  { %3039 = vmatpush1.msra.mxu0 %v8517_v59 }
0x1471   :  { %3040 = vmatprep.subr.mxu0 %v8523_v3 }
0x1472   :  { %3041 = vmatpush1.msra.mxu0 %v8529_v63 }
0x1473   :  { %3042 = vmatprep.subr.mxu0 %v8535_v25 }
0x1474   :  { %3043 = vmatpush1.msra.mxu0 %v8541_v60 }
0x1475   :  { %3044 = vmatprep.subr.mxu0 %v8547_v12 }
0x1476   :  { %3045 = vmatpush1.msra.mxu0 %v8553_v11  ;;  %v8577_v11 = vld [vmem:[%s9464_s2 + $0xf0] sm:$0xff] }
0x1477   :  { %3046 = vmatprep.subr.mxu0 %v8559_v23  ;;  %10609 = vst [vmem:[#allocation78_spill] sm:$0xff] %v8577_v11  ;;  %v8583_v23 = vld [vmem:[%s9464_s2 + $0xd8] sm:$0xff] }
0x1478   :  { %3047 = vmatpush1.msra.mxu0 %v8565_v17  ;;  %10610 = vst [vmem:[#allocation79_spill] sm:$0xff] %v8583_v23  ;;  %v8589_v17 = vld [vmem:[%s9464_s2 + $0xd0] sm:$0xff] }
0x1479   :  { %3048 = vmatprep.subr.mxu0 %v8571_v41  ;;  %10611 = vst [vmem:[#allocation12_spill] sm:$0xff] %v8589_v17  ;;  %v8595_v41 = vld [vmem:[%s9464_s2 + $0xb8] sm:$0xff] }
0x147a   :  { %3049 = vmatpush1.msra.mxu0 %v8577_v11  ;;  %10612 = vst [vmem:[#allocation80_spill] sm:$0xff] %v8595_v41  ;;  %v8601_v11 = vld [vmem:[%s9464_s2 + $0xb0] sm:$0xff] }
0x147b   :  { %3050 = vmatprep.subr.mxu0 %v8583_v23  ;;  %10613 = vst [vmem:[#allocation81_spill] sm:$0xff] %v8601_v11  ;;  %v8607_v23 = vld [vmem:[%s9464_s2 + $0x98] sm:$0xff] }
0x147c   :  { %3051 = vmatpush1.msra.mxu0 %v8589_v17  ;;  %10614 = vst [vmem:[#allocation25_spill] sm:$0xff] %v8607_v23  ;;  %v8613_v17 = vld [vmem:[%s9464_s2 + $0x90] sm:$0xff] }
0x147d   :  { %3052 = vmatprep.subr.mxu0 %v8595_v41  ;;  %10615 = vst [vmem:[#allocation82_spill] sm:$0xff] %v8613_v17  ;;  %v8619_v41 = vld [vmem:[%s9464_s2 + $0x78] sm:$0xff] }
0x147e   :  { %3053 = vmatpush1.msra.mxu0 %v8601_v11  ;;  %10616 = vst [vmem:[#allocation83_spill] sm:$0xff] %v8619_v41  ;;  %v8625_v11 = vld [vmem:[%s9464_s2 + $0x70] sm:$0xff] }
0x147f   :  { %3054 = vmatprep.subr.mxu0 %v8607_v23  ;;  %10617 = vst [vmem:[#allocation35_spill] sm:$0xff] %v8625_v11  ;;  %v8631_v23 = vld [vmem:[%s9464_s2 + $0x58] sm:$0xff] }
0x1480   :  { %3055 = vmatpush1.msra.mxu0 %v8613_v17  ;;  %10618 = vst [vmem:[#allocation84_spill] sm:$0xff] %v8631_v23  ;;  %v8637_v17 = vld [vmem:[%s9464_s2 + $0x50] sm:$0xff] }
0x1481   :  { %3056 = vmatprep.subr.mxu0 %v8619_v41  ;;  %10619 = vst [vmem:[#allocation85_spill] sm:$0xff] %v8637_v17  ;;  %v8643_v41 = vld [vmem:[%s9464_s2 + $0x38] sm:$0xff] }
0x1482   :  { %3057 = vmatpush1.msra.mxu0 %v8625_v11  ;;  %10620 = vst [vmem:[#allocation37_spill] sm:$0xff] %v8643_v41  ;;  %v8649_v11 = vld [vmem:[%s9464_s2 + $0x30] sm:$0xff] }
0x1483   :  { %3058 = vmatprep.subr.mxu0 %v8631_v23  ;;  %10621 = vst [vmem:[#allocation39_spill] sm:$0xff] %v8649_v11  ;;  %v8655_v23 = vld [vmem:[%s9464_s2 + $0x18] sm:$0xff] }
0x1484   :  { %3059 = vmatpush1.msra.mxu0 %v8637_v17  ;;  %10622 = vst [vmem:[#allocation41_spill] sm:$0xff] %v8655_v23 }
0x1485   :  { %3060 = vmatprep.subr.mxu0 %v8643_v41 }
0x1486   :  { %3061 = vmatpush1.msra.mxu0 %v8649_v11 }
0x1487   :  { %3062 = vmatprep.subr.mxu0 %v8655_v23 }
0x1488   :  { %3063 = vmatpush1.msra.mxu0 %v10520_v1  ;;  %v10623_v1 = vld [vmem:[#allocation55_spill] sm:$0xff] }
0x1489   :  { %3064 = vmatprep.subr.mxu0 %v8136_v51 }
0x148a   :  { %3065 = vmatpush2.msra.mxu0 %v8142_v4 }
0x148b   :  { %3066 = vmatprep.subr.mxu0 %v8148_v61 }
0x148c   :  { %3067 = vmatpush2.msra.mxu0 %v8154_v26  ;;  %v10624_v26 = vld [vmem:[#allocation57_spill] sm:$0xff] }
0x148d   :  { %3068 = vmatprep.subr.mxu0 %v8160_v31  ;;  %v10625_v31 = vld [vmem:[#allocation47_spill] sm:$0xff] }
0x148e   :  { %3069 = vmatpush2.msra.mxu0 %v8166_v8  ;;  %v10626_v8 = vld [vmem:[#allocation59_spill] sm:$0xff] }
0x148f   :  { %3070 = vmatprep.subr.mxu0 %v8172_v36  ;;  %v10627_v36 = vld [vmem:[#allocation61_spill] sm:$0xff] }
0x1490   :  { %3071 = vmatpush2.msra.mxu0 %v8178_v18  ;;  %v10628_v18 = vld [vmem:[#allocation65_spill] sm:$0xff] }
0x1491   :  { %3072 = vmatprep.subr.mxu0 %v8184_v49  ;;  %v10629_v49 = vld [vmem:[#allocation51_spill] sm:$0xff] }
0x1492   :  { %3073 = vmatpush2.msra.mxu0 %v8190_v14  ;;  %v10630_v14 = vld [vmem:[#allocation67_spill] sm:$0xff] }
0x1493   :  { %3074 = vmatprep.subr.mxu0 %v8196_v10  ;;  %v10631_v10 = vld [vmem:[#allocation69_spill] sm:$0xff] }
0x1494   :  { %3075 = vmatpush2.msra.mxu0 %v8202_v37  ;;  %v10632_v37 = vld [vmem:[#allocation5_spill] sm:$0xff] }
0x1495   :  { %3076 = vmatprep.subr.mxu0 %v8208_v16  ;;  %v10633_v16 = vld [vmem:[#allocation6_spill] sm:$0xff] }
0x1496   :  { %3077 = vmatpush2.msra.mxu0 %v10623_v1  ;;  %v10634_v1 = vld [vmem:[#allocation7_spill] sm:$0xff] }
0x1497   :  { %3078 = vmatprep.subr.mxu0 %v10624_v26  ;;  %v10635_v26 = vld [vmem:[#allocation18_spill] sm:$0xff] }
0x1498   :  { %3079 = vmatpush2.msra.mxu0 %v10625_v31  ;;  %v10636_v31 = vld [vmem:[#allocation8_spill] sm:$0xff] }
0x1499   :  { %3080 = vmatprep.subr.mxu0 %v10626_v8  ;;  %v10637_v8 = vld [vmem:[#allocation20_spill] sm:$0xff] }
0x149a   :  { %3081 = vmatpush2.msra.mxu0 %v10627_v36  ;;  %v10638_v36 = vld [vmem:[#allocation9_spill] sm:$0xff] }
0x149b   :  { %3082 = vmatprep.subr.mxu0 %v10628_v18  ;;  %v10639_v18 = vld [vmem:[#allocation22_spill] sm:$0xff] }
0x149c   :  { %3083 = vmatpush2.msra.mxu0 %v10629_v49  ;;  %v10640_v49 = vld [vmem:[#allocation11_spill] sm:$0xff] }
0x149d   :  { %3084 = vmatprep.subr.mxu0 %v10630_v14  ;;  %v10641_v14 = vld [vmem:[#allocation10_spill] sm:$0xff] }
0x149e   :  { %3085 = vmatpush2.msra.mxu0 %v10631_v10 }
0x149f   :  { %3086 = vmatprep.subr.mxu0 %v10632_v37 }
0x14a0   :  { %3087 = vmatpush2.msra.mxu0 %v10633_v16  ;;  %v8694_v16 = vld [vmem:[%s9464_s2 + $0x1e8] sm:$0xff] }
0x14a1   :  { %3088 = vmatprep.subr.mxu0 %v10634_v1  ;;  %10642 = vst [vmem:[#allocation43_spill] sm:$0xff] %v8694_v16 }
0x14a2   :  { %3089 = vmatpush2.msra.mxu0 %v10635_v26 }
0x14a3   :  { %3090 = vmatprep.subr.mxu0 %v10636_v31 }
0x14a4   :  { %3091 = vmatpush2.msra.mxu0 %v10637_v8 }
0x14a5   :  { %3092 = vmatprep.subr.mxu0 %v10638_v36 }
0x14a6   :  { %3093 = vmatpush2.msra.mxu0 %v10639_v18 }
0x14a7   :  { %3094 = vmatprep.subr.mxu0 %v10640_v49 }
0x14a8   :  { %3095 = vmatpush2.msra.mxu0 %v10641_v14 }
0x14a9   :  { %3206 = vmatprep.subr.mxu0 %v8694_v16 }
0x1529   :  { %v2942_v26 = vpop.f32.mrf.mxu0 }
0x152a   :  { %v2943_v31 = vadd.f32 %v8329_v62, %v2942_v26  ;;  %v8710_v26 = vld [vmem:[%s9464_s2 + $0x1e0] sm:$0xff] }
0x152b   :  { %v4039_v1 = vpop.f32.mrf.mxu0 }
0x152c   :  { %v2946_v8 = vsel %vm1966_vm1, %v2943_v31, -inf  ;;  %v8892_v1 = vld [vmem:[%s9464_s2 + $0x40] sm:$0xff] }
0x152d   :  { %2947 = vmax.xlane.f32.xlu0 %v2946_v8  ;;  %v8780_v8 = vld [vmem:[%s9464_s2 + $0x140] sm:$0xff] }
0x15b6   :  { %v2948_v36 = vpop.xlane.xlu0 %2947 }
0x15b7   :  { %v2949_v18 = vsub.f32 %v2943_v31, %v2948_v36 }
0x15b9   :  { %v2950_v37 = vmul.f32 1.442695, %v2949_v18  ;;  %v8808_v18 = vld [vmem:[%s9464_s2 + $0x100] sm:$0xff] }
0x15bb   :  { %4295 = vpow2.f32 %v2950_v37  ;;  %v8864_v37 = vld [vmem:[%s9464_s2 + $0x80] sm:$0xff] }
0x15c8   :  { %v4296_v49 = vpop.eup %4295 }
0x15c9   :  { %v2952_v14 = vsel %vm1966_vm1, %v4296_v49, 0.0  ;;  %v8822_v49 = vld [vmem:[%s9464_s2 + $0xe0] sm:$0xff] }
0x15ca   :  { %2953 = vadd.xlane.f32.xlu1 %v2952_v14  ;;  %v8836_v14 = vld [vmem:[%s9464_s2 + $0xc0] sm:$0xff] }
0x1653   :  { %v2954_v10 = vpop.xlane.xlu1 %2953 }
0x1654   :  { %4297 = vlog2.f32 %v2954_v10  ;;  %v8850_v10 = vld [vmem:[%s9464_s2 + $0xa0] sm:$0xff] }
0x1661   :  { %v4298_v61 = vpop.eup %4297 }
0x1662   :  { %v2956_v4 = vmul.f32 0.6931472, %v4298_v61  ;;  %v8752_v61 = vld [vmem:[%s9464_s2 + $0x180] sm:$0xff] }
0x1664   :  { %v2957_v16 = vadd.f32 %v2956_v4, %v2948_v36  ;;  %v8738_v4 = vld [vmem:[%s9464_s2 + $0x1a0] sm:$0xff] }
0x1665   :  { %v8794_v36 = vld [vmem:[%s9464_s2 + $0x120] sm:$0xff] }
0x1666   :  { %v2958_v51 = vsub.f32 %v2943_v31, %v2957_v16  ;;  %v8766_v31 = vld [vmem:[%s9464_s2 + $0x160] sm:$0xff]  ;;  %v8871_v16 = vld [vmem:[%s9464_s2 + $0x68] sm:$0xff] }
0x1668   :  { %3725 = vst [vmem:[%s9469_s7 + $0x8] sm:$0x3] %v2958_v51  ;;  %3026 = vmatmul.mubr.f32.vlgmr.msra.gmra.mxu1 %v2958_v51  ;;  %3097 = vmatmul.mubr.f32.vlgmr.msra.gmra.mxu0 %v2958_v51  ;;  %v8717_v51 = vld [vmem:[%s9464_s2 + $0x1c8] sm:$0xff] }
0x1669   :  { %4041 = vmatpush3.msra.mxu1 %v7789_v43  ;;  %4072 = vmatprep.mubr.msk.f32.mxu1 %vm4777_vm0, %v10178_v6  ;;  %v8724_v43 = vld [vmem:[%s9464_s2 + $0x1c0] sm:$0xff] }
0x166a   :  { %4042 = vmatprep.subr.mxu1 %v10178_v6  ;;  %3207 = vmatpush1.msra.mxu0 %v8710_v26 }
0x166b   :  { %4043 = vmatpush3.msra.mxu1 %v7799_v40  ;;  %3208 = vmatprep.subr.mxu0 %v8717_v51  ;;  %v8731_v40 = vld [vmem:[%s9464_s2 + $0x1a8] sm:$0xff] }
0x166c   :  { %4044 = vmatprep.subr.mxu1 %v10178_v6  ;;  %3209 = vmatpush1.msra.mxu0 %v8724_v43 }
0x166d   :  { %4045 = vmatpush3.msra.mxu1 %v7808_v39  ;;  %3210 = vmatprep.subr.mxu0 %v8731_v40  ;;  %v8745_v39 = vld [vmem:[%s9464_s2 + $0x188] sm:$0xff] }
0x166e   :  { %4046 = vmatprep.subr.mxu1 %v10178_v6  ;;  %3211 = vmatpush1.msra.mxu0 %v8738_v4 }
0x166f   :  { %4047 = vmatpush3.msra.mxu1 %v7817_v53  ;;  %3212 = vmatprep.subr.mxu0 %v8745_v39  ;;  %v8759_v53 = vld [vmem:[%s9464_s2 + $0x168] sm:$0xff] }
0x1670   :  { %4048 = vmatprep.subr.mxu1 %v10178_v6  ;;  %3213 = vmatpush1.msra.mxu0 %v8752_v61 }
0x1671   :  { %4049 = vmatpush3.msra.mxu1 %v7826_v29  ;;  %3214 = vmatprep.subr.mxu0 %v8759_v53  ;;  %v8773_v29 = vld [vmem:[%s9464_s2 + $0x148] sm:$0xff] }
0x1672   :  { %4050 = vmatprep.subr.mxu1 %v10178_v6  ;;  %3215 = vmatpush1.msra.mxu0 %v8766_v31 }
0x1673   :  { %4051 = vmatpush3.msra.mxu1 %v7835_v32  ;;  %3216 = vmatprep.subr.mxu0 %v8773_v29  ;;  %v8787_v32 = vld [vmem:[%s9464_s2 + $0x128] sm:$0xff] }
0x1674   :  { %4052 = vmatprep.subr.mxu1 %v10178_v6  ;;  %3217 = vmatpush1.msra.mxu0 %v8780_v8 }
0x1675   :  { %4053 = vmatpush3.msra.mxu1 %v7844_v33  ;;  %3218 = vmatprep.subr.mxu0 %v8787_v32  ;;  %v8801_v33 = vld [vmem:[%s9464_s2 + $0x108] sm:$0xff] }
0x1676   :  { %4054 = vmatprep.subr.mxu1 %v10178_v6  ;;  %3219 = vmatpush1.msra.mxu0 %v8794_v36 }
0x1677   :  { %4055 = vmatpush3.msra.mxu1 %v7853_v34  ;;  %3220 = vmatprep.subr.mxu0 %v8801_v33  ;;  %v8815_v34 = vld [vmem:[%s9464_s2 + $0xe8] sm:$0xff] }
0x1678   :  { %4056 = vmatprep.subr.mxu1 %v10178_v6  ;;  %3221 = vmatpush1.msra.mxu0 %v8808_v18 }
0x1679   :  { %4057 = vmatpush3.msra.mxu1 %v7862_v35  ;;  %3222 = vmatprep.subr.mxu0 %v8815_v34  ;;  %v8829_v35 = vld [vmem:[%s9464_s2 + $0xc8] sm:$0xff] }
0x167a   :  { %4058 = vmatprep.subr.mxu1 %v10178_v6  ;;  %3223 = vmatpush1.msra.mxu0 %v8822_v49 }
0x167b   :  { %4059 = vmatpush3.msra.mxu1 %v7871_v48  ;;  %3224 = vmatprep.subr.mxu0 %v8829_v35  ;;  %v8843_v48 = vld [vmem:[%s9464_s2 + $0xa8] sm:$0xff] }
0x167c   :  { %4060 = vmatprep.subr.mxu1 %v10178_v6  ;;  %3225 = vmatpush1.msra.mxu0 %v8836_v14 }
0x167d   :  { %4061 = vmatpush3.msra.mxu1 %v7880_v15  ;;  %3226 = vmatprep.subr.mxu0 %v8843_v48  ;;  %v8857_v15 = vld [vmem:[%s9464_s2 + $0x88] sm:$0xff] }
0x167e   :  { %4062 = vmatprep.subr.mxu1 %v10178_v6  ;;  %3227 = vmatpush1.msra.mxu0 %v8850_v10 }
0x167f   :  { %4063 = vmatpush3.msra.mxu1 %v10556_v24  ;;  %3228 = vmatprep.subr.mxu0 %v8857_v15  ;;  %v8878_v24 = vld [vmem:[%s9464_s2 + $0x60] sm:$0xff] }
0x1680   :  { %4064 = vmatprep.subr.mxu1 %v10178_v6  ;;  %3229 = vmatpush1.msra.mxu0 %v8864_v37 }
0x1681   :  { %4065 = vmatpush3.msra.mxu1 %v10559_v55  ;;  %3230 = vmatprep.subr.mxu0 %v8871_v16  ;;  %v8885_v55 = vld [vmem:[%s9464_s2 + $0x48] sm:$0xff] }
0x1682   :  { %4066 = vmatprep.subr.mxu1 %v10178_v6  ;;  %3231 = vmatpush1.msra.mxu0 %v8878_v24  ;;  %10643 = vst [vmem:[#allocation45_spill] sm:$0xff] %v8885_v55 }
0x1683   :  { %4067 = vmatpush3.msra.mxu1 %v10562_v13  ;;  %3232 = vmatprep.subr.mxu0 %v8885_v55  ;;  %v8899_v13 = vld [vmem:[%s9464_s2 + $0x28] sm:$0xff]  ;;  %v8906_v55 = vld [vmem:[%s9464_s2 + $0x20] sm:$0xff] }
0x1684   :  { %4068 = vmatprep.subr.mxu1 %v10178_v6  ;;  %3233 = vmatpush1.msra.mxu0 %v8892_v1  ;;  %10644 = vst [vmem:[#allocation49_spill] sm:$0xff] %v8899_v13  ;;  %10645 = vst [vmem:[#allocation63_spill] sm:$0xff] %v8906_v55 }
0x1685   :  { %4069 = vmatpush3.msra.mxu1 %v10565_v47  ;;  %3234 = vmatprep.subr.mxu0 %v8899_v13  ;;  %v8913_v47 = vld [vmem:[%s9464_s2 + $0x8] sm:$0xff]  ;;  %v8920_v13 = vld [vmem:[%s9464_s2] sm:$0xff] }
0x1686   :  { %4070 = vmatprep.subr.mxu1 %v10178_v6  ;;  %3235 = vmatpush1.msra.mxu0 %v8906_v55  ;;  %10646 = vst [vmem:[#allocation14_spill] sm:$0xff] %v8913_v47  ;;  %10647 = vst [vmem:[#allocation24_spill] sm:$0xff] %v8920_v13 }
0x1687   :  { %4071 = vmatpush3.msra.mxu1 %v10568_v42  ;;  %3236 = vmatprep.subr.mxu0 %v8913_v47  ;;  %v10648_v42 = vld [vmem:[#allocation30_spill] sm:$0xff] }
0x1688   :  { %3277 = vmatprep.subr.mxu1 %v8403_v45  ;;  %3237 = vmatpush1.msra.mxu0 %v8920_v13 }
0x1689   :  { %3238 = vmatprep.subr.mxu0 %v10572_v27  ;;  %v10649_v27 = vld [vmem:[#allocation31_spill] sm:$0xff] }
0x168a   :  { %3239 = vmatpush2.msra.mxu0 %v10573_v38  ;;  %v10650_v38 = vld [vmem:[#allocation32_spill] sm:$0xff] }
0x168b   :  { %3240 = vmatprep.subr.mxu0 %v10574_v58  ;;  %v10651_v58 = vld [vmem:[#allocation33_spill] sm:$0xff] }
0x168c   :  { %3241 = vmatpush2.msra.mxu0 %v10575_v2  ;;  %v10652_v2 = vld [vmem:[#allocation34_spill] sm:$0xff] }
0x168d   :  { %3242 = vmatprep.subr.mxu0 %v10576_v50  ;;  %v10653_v50 = vld [vmem:[#allocation36_spill] sm:$0xff] }
0x168e   :  { %3243 = vmatpush2.msra.mxu0 %v10577_v7  ;;  %v10654_v7 = vld [vmem:[#allocation38_spill] sm:$0xff] }
0x168f   :  { %3244 = vmatprep.subr.mxu0 %v10578_v21  ;;  %v10655_v21 = vld [vmem:[#allocation40_spill] sm:$0xff] }
0x1690   :  { %3245 = vmatpush2.msra.mxu0 %v10579_v20  ;;  %v10656_v20 = vld [vmem:[#allocation42_spill] sm:$0xff] }
0x1691   :  { %3246 = vmatprep.subr.mxu0 %v10580_v9  ;;  %v10657_v9 = vld [vmem:[#allocation44_spill] sm:$0xff] }
0x1692   :  { %3247 = vmatpush2.msra.mxu0 %v10581_v0  ;;  %v10658_v0 = vld [vmem:[#allocation46_spill] sm:$0xff] }
0x1693   :  { %3248 = vmatprep.subr.mxu0 %v10582_v22  ;;  %v10659_v22 = vld [vmem:[#allocation48_spill] sm:$0xff] }
0x1694   :  { %3249 = vmatpush2.msra.mxu0 %v10648_v42  ;;  %v10660_v42 = vld [vmem:[#allocation50_spill] sm:$0xff] }
0x1695   :  { %3250 = vmatprep.subr.mxu0 %v10649_v27  ;;  %v10661_v27 = vld [vmem:[#allocation52_spill] sm:$0xff] }
0x1696   :  { %3251 = vmatpush2.msra.mxu0 %v10650_v38  ;;  %v10662_v38 = vld [vmem:[#allocation54_spill] sm:$0xff] }
0x1697   :  { %3252 = vmatprep.subr.mxu0 %v10651_v58  ;;  %v10663_v58 = vld [vmem:[#allocation27_spill] sm:$0xff] }
0x1698   :  { %3253 = vmatpush2.msra.mxu0 %v10652_v2  ;;  %v10664_v2 = vld [vmem:[#allocation15_spill] sm:$0xff] }
0x1699   :  { %3254 = vmatprep.subr.mxu0 %v10653_v50  ;;  %v10665_v50 = vld [vmem:[#allocation23_spill] sm:$0xff] }
0x169a   :  { %3255 = vmatpush2.msra.mxu0 %v10654_v7  ;;  %v10666_v7 = vld [vmem:[#allocation17_spill] sm:$0xff] }
0x169b   :  { %3256 = vmatprep.subr.mxu0 %v10655_v21  ;;  %v10667_v21 = vld [vmem:[#allocation19_spill] sm:$0xff] }
0x169c   :  { %3257 = vmatpush2.msra.mxu0 %v10656_v20  ;;  %v10668_v20 = vld [vmem:[#allocation21_spill] sm:$0xff] }
0x169d   :  { %3258 = vmatprep.subr.mxu0 %v10657_v9 }
0x169e   :  { %3259 = vmatpush2.msra.mxu0 %v10658_v0  ;;  %v10669_v0 = vld [vmem:[#allocation53_spill] sm:$0xff] }
0x169f   :  { %3260 = vmatprep.subr.mxu0 %v10659_v22 }
0x16a0   :  { %3261 = vmatpush2.msra.mxu0 %v10660_v42 }
0x16a1   :  { %3262 = vmatprep.subr.mxu0 %v10661_v27 }
0x16a2   :  { %3263 = vmatpush2.msra.mxu0 %v10662_v38 }
0x16a3   :  { %3264 = vmatprep.subr.mxu0 %v10663_v58 }
0x16a4   :  { %3265 = vmatpush2.msra.mxu0 %v10664_v2 }
0x16a5   :  { %3266 = vmatprep.subr.mxu0 %v10665_v50 }
0x16a6   :  { %3267 = vmatpush2.msra.mxu0 %v10666_v7 }
0x16a7   :  { %3268 = vmatprep.subr.mxu0 %v10667_v21 }
0x16a8   :  { %3269 = vmatpush2.msra.mxu0 %v10668_v20 }
0x16a9   :  { %4075 = vmatprep.subr.mxu0 %v10178_v6 }
0x1728   :  { %v3027_v9 = vpop.f32.mrf.mxu1  ;;  %v3098_v58 = vpop.f32.mrf.mxu0 }
0x1729   :  { %v3028_v22 = vadd.f32 %v3027_v9, %v10669_v0  ;;  %v3099_v50 = vadd.f32 %v3098_v58, %v6837_v56 }
0x172a   :  { %v3029_v42 = vpop.f32.mrf.mxu1  ;;  %v3100_v7 = vpop.f32.mrf.mxu0 }
0x172b   :  { %v3103_v27 = vmul.f32 0.5, %v3028_v22  ;;  %v3030_v38 = vadd.f32 %v3029_v42, %v6834_v44  ;;  %v3101_v21 = vadd.f32 %v3100_v7, %v6842_v54 }
0x172d   :  { %4299 = vtanh.f32 %v3103_v27  ;;  %v3107_v2 = vmul.f32 0.5, %v3030_v38  ;;  %v3112_v20 = vmul.f32 0.5, %v3101_v21 }
0x172f   :  { %4301 = vtanh.f32 %v3107_v2 }
0x1730   :  { %4303 = vtanh.f32 %v3099_v50 }
0x1731   :  { %4305 = vtanh.f32 %v3112_v20  ;;  %v10675_v20 = vld [vmem:[#allocation79_spill] sm:$0xff] }
0x173a   :  { %v4300_v13 = vpop.eup %4299 }
0x173b   :  { %v3105_v45 = vadd.f32 1.0, %v4300_v13  ;;  %v10673_v13 = vld [vmem:[#allocation28_spill] sm:$0xff] }
0x173c   :  { %v4302_v47 = vpop.eup %4301 }
0x173d   :  { %v3106_v55 = vmul.f32 0.5, %v3105_v45  ;;  %v3109_v9 = vadd.f32 1.0, %v4302_v47  ;;  %v4304_v0 = vpop.eup %4303  ;;  %v10670_v45 = vld [vmem:[#allocation26_spill] sm:$0xff] }
0x173e   :  { %v4306_v58 = vpop.eup %4305  ;;  %v10674_v47 = vld [vmem:[#allocation78_spill] sm:$0xff] }
0x173f   :  { %v3110_v22 = vmul.f32 0.5, %v3109_v9  ;;  %v3117_v27 = vmul.f32 %v4304_v0, %v3106_v55  ;;  %v3114_v2 = vadd.f32 1.0, %v4306_v58  ;;  %v10672_v55 = vld [vmem:[#allocation77_spill] sm:$0xff]  ;;  %v10676_v0 = vld [vmem:[#allocation12_spill] sm:$0xff]  ;;  %v10681_v58 = vld [vmem:[#allocation83_spill] sm:$0xff] }
0x1740   :  { %v10677_v9 = vld [vmem:[#allocation80_spill] sm:$0xff] }
0x1741   :  { %v3116_v42 = vmul.f32 %v3110_v22, %v8475_v52  ;;  %v3115_v50 = vmul.f32 0.5, %v3114_v2  ;;  %v10671_v52 = vld [vmem:[#allocation76_spill] sm:$0xff]  ;;  %v10678_v22 = vld [vmem:[#allocation81_spill] sm:$0xff]  ;;  %v10682_v2 = vld [vmem:[#allocation35_spill] sm:$0xff] }
0x1743   :  { %v8961_v38 = vadd.f32 %v3117_v27, %v3116_v42  ;;  %v10679_v42 = vld [vmem:[#allocation25_spill] sm:$0xff]  ;;  %v10680_v27 = vld [vmem:[#allocation82_spill] sm:$0xff] }
0x1745   :  { %4307 = vtanh.f32 %v8961_v38 }
0x1752   :  { %v4308_v7 = vpop.eup %4307 }
0x1753   :  { %v3120_v21 = vmul.f32 %v4308_v7, %v3115_v50  ;;  %v10683_v50 = vld [vmem:[#allocation84_spill] sm:$0xff]  ;;  %v8997_v7 = vld [vmem:[%s9464_s2 + $0x10] sm:$0xff] }
0x1754   :  { %10684 = vst [vmem:[#allocation16_spill] sm:$0xff] %v8997_v7 }
0x1755   :  { %4073 = vmatmul.mubr.f32.vlgmr.msra.gmra.mxu1 %v3120_v21  ;;  %3270 = vmatprep.mubr.f32.mxu0 %v3120_v21 }
0x1756   :  { %3341 = vmatprep.mubr.f32.mxu1 %v3120_v21  ;;  %3278 = vmatpush1.msra.mxu1 %v8481_v30  ;;  %v10685_v21 = vld [vmem:[#allocation56_spill] sm:$0xff] }
0x1757   :  { %3279 = vmatprep.subr.mxu1 %v8487_v19 }
0x1758   :  { %3280 = vmatpush1.msra.mxu1 %v8493_v28 }
0x1759   :  { %3281 = vmatprep.subr.mxu1 %v8499_v46 }
0x175a   :  { %3282 = vmatpush1.msra.mxu1 %v8505_v5 }
0x175b   :  { %3283 = vmatprep.subr.mxu1 %v8511_v57 }
0x175c   :  { %3284 = vmatpush1.msra.mxu1 %v8517_v59 }
0x175d   :  { %3285 = vmatprep.subr.mxu1 %v8523_v3 }
0x175e   :  { %3286 = vmatpush1.msra.mxu1 %v8529_v63 }
0x175f   :  { %3287 = vmatprep.subr.mxu1 %v8535_v25 }
0x1760   :  { %3288 = vmatpush1.msra.mxu1 %v8541_v60 }
0x1761   :  { %3289 = vmatprep.subr.mxu1 %v8547_v12 }
0x1762   :  { %3290 = vmatpush1.msra.mxu1 %v10670_v45 }
0x1763   :  { %3291 = vmatprep.subr.mxu1 %v10671_v52 }
0x1764   :  { %3292 = vmatpush1.msra.mxu1 %v10672_v55 }
0x1765   :  { %3293 = vmatprep.subr.mxu1 %v10673_v13 }
0x1766   :  { %3294 = vmatpush1.msra.mxu1 %v10674_v47 }
0x1767   :  { %3295 = vmatprep.subr.mxu1 %v10675_v20 }
0x1768   :  { %3296 = vmatpush1.msra.mxu1 %v10676_v0 }
0x1769   :  { %3297 = vmatprep.subr.mxu1 %v10677_v9 }
0x176a   :  { %3298 = vmatpush1.msra.mxu1 %v10678_v22 }
0x176b   :  { %3299 = vmatprep.subr.mxu1 %v10679_v42  ;;  %v10694_v42 = vld [vmem:[#allocation72_spill] sm:$0xff] }
0x176c   :  { %3300 = vmatpush1.msra.mxu1 %v10680_v27  ;;  %v10693_v27 = vld [vmem:[#allocation71_spill] sm:$0xff] }
0x176d   :  { %3301 = vmatprep.subr.mxu1 %v10681_v58  ;;  %v10692_v58 = vld [vmem:[#allocation70_spill] sm:$0xff] }
0x176e   :  { %3302 = vmatpush1.msra.mxu1 %v10682_v2  ;;  %v10686_v2 = vld [vmem:[#allocation58_spill] sm:$0xff] }
0x176f   :  { %3303 = vmatprep.subr.mxu1 %v10683_v50  ;;  %v10687_v50 = vld [vmem:[#allocation60_spill] sm:$0xff] }
0x1770   :  { %3304 = vmatpush1.msra.mxu1 %v8637_v17  ;;  %v10688_v17 = vld [vmem:[#allocation62_spill] sm:$0xff] }
0x1771   :  { %3305 = vmatprep.subr.mxu1 %v8643_v41  ;;  %v10689_v41 = vld [vmem:[#allocation64_spill] sm:$0xff] }
0x1772   :  { %3306 = vmatpush1.msra.mxu1 %v8649_v11  ;;  %v10690_v11 = vld [vmem:[#allocation66_spill] sm:$0xff] }
0x1773   :  { %3307 = vmatprep.subr.mxu1 %v8655_v23  ;;  %v10691_v23 = vld [vmem:[#allocation68_spill] sm:$0xff] }
0x1774   :  { %3308 = vmatpush1.msra.mxu1 %v8997_v7  ;;  %v10695_v7 = vld [vmem:[#allocation73_spill] sm:$0xff] }
0x1775   :  { %3309 = vmatprep.subr.mxu1 %v10685_v21  ;;  %v10696_v21 = vld [vmem:[#allocation74_spill] sm:$0xff] }
0x1776   :  { %3310 = vmatpush2.msra.mxu1 %v10686_v2  ;;  %v10697_v2 = vld [vmem:[#allocation75_spill] sm:$0xff] }
0x1777   :  { %3311 = vmatprep.subr.mxu1 %v10687_v50  ;;  %v10698_v50 = vld [vmem:[#allocation55_spill] sm:$0xff] }
0x1778   :  { %3312 = vmatpush2.msra.mxu1 %v10688_v17  ;;  %v10699_v17 = vld [vmem:[#allocation57_spill] sm:$0xff] }
0x1779   :  { %3313 = vmatprep.subr.mxu1 %v10689_v41  ;;  %v10700_v41 = vld [vmem:[#allocation47_spill] sm:$0xff] }
0x177a   :  { %3314 = vmatpush2.msra.mxu1 %v10690_v11  ;;  %v10701_v11 = vld [vmem:[#allocation59_spill] sm:$0xff] }
0x177b   :  { %3315 = vmatprep.subr.mxu1 %v10691_v23  ;;  %v10702_v23 = vld [vmem:[#allocation61_spill] sm:$0xff] }
0x177c   :  { %3316 = vmatpush2.msra.mxu1 %v10692_v58  ;;  %v10703_v58 = vld [vmem:[#allocation65_spill] sm:$0xff] }
0x177d   :  { %3317 = vmatprep.subr.mxu1 %v10693_v27  ;;  %v10704_v27 = vld [vmem:[#allocation51_spill] sm:$0xff] }
0x177e   :  { %3318 = vmatpush2.msra.mxu1 %v10694_v42  ;;  %v10705_v42 = vld [vmem:[#allocation67_spill] sm:$0xff] }
0x177f   :  { %3319 = vmatprep.subr.mxu1 %v10695_v7  ;;  %v10706_v7 = vld [vmem:[#allocation69_spill] sm:$0xff] }
0x1780   :  { %3320 = vmatpush2.msra.mxu1 %v10696_v21  ;;  %v10707_v21 = vld [vmem:[#allocation5_spill] sm:$0xff] }
0x1781   :  { %3321 = vmatprep.subr.mxu1 %v10697_v2  ;;  %v10708_v2 = vld [vmem:[#allocation6_spill] sm:$0xff] }
0x1782   :  { %3322 = vmatpush2.msra.mxu1 %v10698_v50  ;;  %v10709_v50 = vld [vmem:[#allocation7_spill] sm:$0xff] }
0x1783   :  { %3323 = vmatprep.subr.mxu1 %v10699_v17  ;;  %v10710_v17 = vld [vmem:[#allocation18_spill] sm:$0xff] }
0x1784   :  { %3324 = vmatpush2.msra.mxu1 %v10700_v41  ;;  %v10711_v41 = vld [vmem:[#allocation8_spill] sm:$0xff] }
0x1785   :  { %3325 = vmatprep.subr.mxu1 %v10701_v11  ;;  %v10712_v11 = vld [vmem:[#allocation20_spill] sm:$0xff] }
0x1786   :  { %3326 = vmatpush2.msra.mxu1 %v10702_v23  ;;  %v10713_v23 = vld [vmem:[#allocation9_spill] sm:$0xff] }
0x1787   :  { %3327 = vmatprep.subr.mxu1 %v10703_v58  ;;  %v10714_v58 = vld [vmem:[#allocation22_spill] sm:$0xff] }
0x1788   :  { %3328 = vmatpush2.msra.mxu1 %v10704_v27  ;;  %v10715_v27 = vld [vmem:[#allocation11_spill] sm:$0xff] }
0x1789   :  { %3329 = vmatprep.subr.mxu1 %v10705_v42  ;;  %v10716_v42 = vld [vmem:[#allocation10_spill] sm:$0xff] }
0x178a   :  { %3330 = vmatpush2.msra.mxu1 %v10706_v7  ;;  %v10717_v7 = vld [vmem:[#allocation43_spill] sm:$0xff] }
0x178b   :  { %3331 = vmatprep.subr.mxu1 %v10707_v21 }
0x178c   :  { %3332 = vmatpush2.msra.mxu1 %v10708_v2 }
0x178d   :  { %3333 = vmatprep.subr.mxu1 %v10709_v50 }
0x178e   :  { %3334 = vmatpush2.msra.mxu1 %v10710_v17 }
0x178f   :  { %3335 = vmatprep.subr.mxu1 %v10711_v41 }
0x1790   :  { %3336 = vmatpush2.msra.mxu1 %v10712_v11 }
0x1791   :  { %3337 = vmatprep.subr.mxu1 %v10713_v23 }
0x1792   :  { %3338 = vmatpush2.msra.mxu1 %v10714_v58 }
0x1793   :  { %3339 = vmatprep.subr.mxu1 %v10715_v27 }
0x1794   :  { %3340 = vmatpush2.msra.mxu1 %v10716_v42 }
0x1795   :  { %3451 = vmatprep.subr.mxu1 %v10717_v7 }
0x1815   :  { %v3187_v21 = vpop.f32.mrf.mxu1 }
0x1816   :  { %v3188_v2 = vadd.f32 %v8329_v62, %v3187_v21  ;;  %v9042_v62 = vld [vmem:[%s9466_s4 + $0x78] sm:$0xff]  ;;  %v4702_v21 = vld [vmem:[%s9464_s2 + $0x368] sm:$0xff] }
0x1817   :  { %v4074_v50 = vpop.f32.mrf.mxu1 }
0x1818   :  { %v3191_v17 = vsel %vm1966_vm1, %v3188_v2, -inf  ;;  %v4704_v50 = vld [vmem:[%s9464_s2 + $0x348] sm:$0xff] }
0x1819   :  { %3192 = vmax.xlane.f32.xlu0 %v3191_v17  ;;  %v4705_v17 = vld [vmem:[%s9464_s2 + $0x340] sm:$0xff] }
0x18a2   :  { %v3193_v41 = vpop.xlane.xlu0 %3192 }
0x18a3   :  { %v3194_v22 = vsub.f32 %v3188_v2, %v3193_v41 }
0x18a5   :  { %v3195_v11 = vmul.f32 1.442695, %v3194_v22  ;;  %v4701_v22 = vld [vmem:[%s9464_s2 + $0x380] sm:$0xff] }
0x18a7   :  { %4309 = vpow2.f32 %v3195_v11  ;;  %v4707_v11 = vld [vmem:[%s9464_s2 + $0x320] sm:$0xff] }
0x18b4   :  { %v4310_v23 = vpop.eup %4309 }
0x18b5   :  { %v3197_v58 = vsel %vm1966_vm1, %v4310_v23, 0.0  ;;  %v4708_v23 = vld [vmem:[%s9464_s2 + $0x308] sm:$0xff] }
0x18b6   :  { %3198 = vadd.xlane.f32.xlu1 %v3197_v58  ;;  %v4709_v58 = vld [vmem:[%s9464_s2 + $0x300] sm:$0xff] }
0x193f   :  { %v3199_v27 = vpop.xlane.xlu1 %3198 }
0x1940   :  { %4311 = vlog2.f32 %v3199_v27  ;;  %v4710_v27 = vld [vmem:[%s9464_s2 + $0x2e8] sm:$0xff] }
0x194d   :  { %v4312_v42 = vpop.eup %4311 }
0x194e   :  { %v3201_v9 = vmul.f32 0.6931472, %v4312_v42  ;;  %v4711_v42 = vld [vmem:[%s9464_s2 + $0x2e0] sm:$0xff] }
0x1950   :  { %v3202_v7 = vadd.f32 %v3201_v9, %v3193_v41  ;;  %v9052_v9 = vld [vmem:[%s9466_s4 + $0x70] sm:$0xff]  ;;  %v4706_v41 = vld [vmem:[%s9464_s2 + $0x328] sm:$0xff] }
0x1952   :  { %v3203_v0 = vsub.f32 %v3188_v2, %v3202_v7  ;;  %v4703_v2 = vld [vmem:[%s9464_s2 + $0x360] sm:$0xff]  ;;  %v4712_v7 = vld [vmem:[%s9464_s2 + $0x2c8] sm:$0xff] }
0x1954   :  { %3726 = vst [vmem:[%s9469_s7 + $0xa] sm:$0x3] %v3203_v0  ;;  %3271 = vmatmul.mubr.f32.vlgmr.msra.gmra.mxu0 %v3203_v0  ;;  %3342 = vmatmul.mubr.f32.vlgmr.msra.gmra.mxu1 %v3203_v0  ;;  %v9061_v0 = vld [vmem:[%s9466_s4 + $0x68] sm:$0xff] }
0x1955   :  { %4076 = vmatpush3.msra.mxu0 %v9042_v62  ;;  %4107 = vmatprep.mubr.msk.f32.mxu0 %vm4777_vm0, %v10178_v6 }
0x1956   :  { %4077 = vmatprep.subr.mxu0 %v10178_v6  ;;  %3452 = vmatpush1.msra.mxu1 %v8710_v26  ;;  %v9070_v26 = vld [vmem:[%s9466_s4 + $0x60] sm:$0xff] }
0x1957   :  { %4078 = vmatpush3.msra.mxu0 %v9052_v9  ;;  %3453 = vmatprep.subr.mxu1 %v8717_v51  ;;  %v9079_v51 = vld [vmem:[%s9466_s4 + $0x58] sm:$0xff] }
0x1958   :  { %4079 = vmatprep.subr.mxu0 %v10178_v6  ;;  %3454 = vmatpush1.msra.mxu1 %v8724_v43  ;;  %v9088_v43 = vld [vmem:[%s9466_s4 + $0x50] sm:$0xff] }
0x1959   :  { %4080 = vmatpush3.msra.mxu0 %v9061_v0  ;;  %3455 = vmatprep.subr.mxu1 %v8731_v40  ;;  %v9097_v40 = vld [vmem:[%s9466_s4 + $0x48] sm:$0xff] }
0x195a   :  { %4081 = vmatprep.subr.mxu0 %v10178_v6  ;;  %3456 = vmatpush1.msra.mxu1 %v8738_v4  ;;  %v9106_v4 = vld [vmem:[%s9466_s4 + $0x40] sm:$0xff] }
0x195b   :  { %4082 = vmatpush3.msra.mxu0 %v9070_v26  ;;  %3457 = vmatprep.subr.mxu1 %v8745_v39  ;;  %v9115_v39 = vld [vmem:[%s9466_s4 + $0x38] sm:$0xff] }
0x195c   :  { %4083 = vmatprep.subr.mxu0 %v10178_v6  ;;  %3458 = vmatpush1.msra.mxu1 %v8752_v61  ;;  %v9124_v61 = vld [vmem:[%s9466_s4 + $0x30] sm:$0xff] }
0x195d   :  { %4084 = vmatpush3.msra.mxu0 %v9079_v51  ;;  %3459 = vmatprep.subr.mxu1 %v8759_v53  ;;  %v9133_v53 = vld [vmem:[%s9466_s4 + $0x28] sm:$0xff] }
0x195e   :  { %4085 = vmatprep.subr.mxu0 %v10178_v6  ;;  %3460 = vmatpush1.msra.mxu1 %v8766_v31  ;;  %v9142_v31 = vld [vmem:[%s9466_s4 + $0x20] sm:$0xff] }
0x195f   :  { %4086 = vmatpush3.msra.mxu0 %v9088_v43  ;;  %3461 = vmatprep.subr.mxu1 %v8773_v29  ;;  %v9151_v29 = vld [vmem:[%s9466_s4 + $0x18] sm:$0xff] }
0x1960   :  { %4087 = vmatprep.subr.mxu0 %v10178_v6  ;;  %3462 = vmatpush1.msra.mxu1 %v8780_v8  ;;  %v9160_v8 = vld [vmem:[%s9466_s4 + $0x10] sm:$0xff] }
0x1961   :  { %4088 = vmatpush3.msra.mxu0 %v9097_v40  ;;  %3463 = vmatprep.subr.mxu1 %v8787_v32  ;;  %v10718_v32 = vld [vmem:[#allocation45_spill] sm:$0xff] }
0x1962   :  { %4089 = vmatprep.subr.mxu0 %v10178_v6  ;;  %3464 = vmatpush1.msra.mxu1 %v8794_v36  ;;  %v9169_v36 = vld [vmem:[%s9466_s4 + $0x8] sm:$0xff] }
0x1963   :  { %4090 = vmatpush3.msra.mxu0 %v9106_v4  ;;  %3465 = vmatprep.subr.mxu1 %v8801_v33  ;;  %v10719_v33 = vld [vmem:[#allocation49_spill] sm:$0xff] }
0x1964   :  { %4091 = vmatprep.subr.mxu0 %v10178_v6  ;;  %3466 = vmatpush1.msra.mxu1 %v8808_v18  ;;  %v10720_v18 = vld [vmem:[#allocation63_spill] sm:$0xff] }
0x1965   :  { %4092 = vmatpush3.msra.mxu0 %v9115_v39  ;;  %3467 = vmatprep.subr.mxu1 %v8815_v34  ;;  %v9178_v34 = vld [vmem:[%s9466_s4] sm:$0xff] }
0x1966   :  { %4093 = vmatprep.subr.mxu0 %v10178_v6  ;;  %3468 = vmatpush1.msra.mxu1 %v8822_v49  ;;  %v10721_v49 = vld [vmem:[#allocation14_spill] sm:$0xff] }
0x1967   :  { %4094 = vmatpush3.msra.mxu0 %v9124_v61  ;;  %3469 = vmatprep.subr.mxu1 %v8829_v35  ;;  %v10722_v35 = vld [vmem:[#allocation13_spill] sm:$0xff] }
0x1968   :  { %4095 = vmatprep.subr.mxu0 %v10178_v6  ;;  %3470 = vmatpush1.msra.mxu1 %v8836_v14  ;;  %v10723_v14 = vld [vmem:[#allocation24_spill] sm:$0xff] }
0x1969   :  { %4096 = vmatpush3.msra.mxu0 %v9133_v53  ;;  %3471 = vmatprep.subr.mxu1 %v8843_v48  ;;  %v4694_v48 = vld [vmem:[%s9464_s2 + $0x3e8] sm:$0xff] }
0x196a   :  { %4097 = vmatprep.subr.mxu0 %v10178_v6  ;;  %3472 = vmatpush1.msra.mxu1 %v8850_v10  ;;  %v4695_v10 = vld [vmem:[%s9464_s2 + $0x3e0] sm:$0xff] }
0x196b   :  { %4098 = vmatpush3.msra.mxu0 %v9142_v31  ;;  %3473 = vmatprep.subr.mxu1 %v8857_v15  ;;  %v4696_v15 = vld [vmem:[%s9464_s2 + $0x3c8] sm:$0xff] }
0x196c   :  { %4099 = vmatprep.subr.mxu0 %v10178_v6  ;;  %3474 = vmatpush1.msra.mxu1 %v8864_v37  ;;  %v4697_v37 = vld [vmem:[%s9464_s2 + $0x3c0] sm:$0xff] }
0x196d   :  { %4100 = vmatpush3.msra.mxu0 %v9151_v29  ;;  %3475 = vmatprep.subr.mxu1 %v8871_v16  ;;  %v4698_v16 = vld [vmem:[%s9464_s2 + $0x3a8] sm:$0xff] }
0x196e   :  { %4101 = vmatprep.subr.mxu0 %v10178_v6  ;;  %3476 = vmatpush1.msra.mxu1 %v8878_v24  ;;  %v4699_v24 = vld [vmem:[%s9464_s2 + $0x3a0] sm:$0xff] }
0x196f   :  { %4102 = vmatpush3.msra.mxu0 %v9160_v8  ;;  %3477 = vmatprep.subr.mxu1 %v10718_v32  ;;  %v4713_v32 = vld [vmem:[%s9464_s2 + $0x2c0] sm:$0xff] }
0x1970   :  { %4103 = vmatprep.subr.mxu0 %v10178_v6  ;;  %3478 = vmatpush1.msra.mxu1 %v8892_v1  ;;  %v4700_v1 = vld [vmem:[%s9464_s2 + $0x388] sm:$0xff] }
0x1971   :  { %4104 = vmatpush3.msra.mxu0 %v9169_v36  ;;  %3479 = vmatprep.subr.mxu1 %v10719_v33  ;;  %v4714_v33 = vld [vmem:[%s9464_s2 + $0x2a8] sm:$0xff] }
0x1972   :  { %4105 = vmatprep.subr.mxu0 %v10178_v6  ;;  %3480 = vmatpush1.msra.mxu1 %v10720_v18  ;;  %v4715_v18 = vld [vmem:[%s9464_s2 + $0x2a0] sm:$0xff] }
0x1973   :  { %4106 = vmatpush3.msra.mxu0 %v9178_v34  ;;  %3481 = vmatprep.subr.mxu1 %v10721_v49  ;;  %v4716_v49 = vld [vmem:[%s9464_s2 + $0x288] sm:$0xff] }
0x1974   :  { %3522 = vmatprep.subr.mxu0 %v10722_v35  ;;  %3482 = vmatpush1.msra.mxu1 %v10723_v14  ;;  %v4717_v35 = vld [vmem:[%s9464_s2 + $0x280] sm:$0xff]  ;;  %v4718_v14 = vld [vmem:[%s9464_s2 + $0x268] sm:$0xff] }
0x1975   :  { %3483 = vmatprep.subr.mxu1 %v4694_v48  ;;  %v4719_v48 = vld [vmem:[%s9464_s2 + $0x260] sm:$0xff] }
0x1976   :  { %3484 = vmatpush2.msra.mxu1 %v4695_v10  ;;  %v10724_v10 = vld [vmem:[#allocation27_spill] sm:$0xff] }
0x1977   :  { %3485 = vmatprep.subr.mxu1 %v4696_v15  ;;  %v10725_v15 = vld [vmem:[#allocation15_spill] sm:$0xff] }
0x1978   :  { %3486 = vmatpush2.msra.mxu1 %v4697_v37  ;;  %v10726_v37 = vld [vmem:[#allocation23_spill] sm:$0xff] }
0x1979   :  { %3487 = vmatprep.subr.mxu1 %v4698_v16  ;;  %v10727_v16 = vld [vmem:[#allocation17_spill] sm:$0xff] }
0x197a   :  { %3488 = vmatpush2.msra.mxu1 %v4699_v24  ;;  %v10728_v24 = vld [vmem:[#allocation19_spill] sm:$0xff] }
0x197b   :  { %3489 = vmatprep.subr.mxu1 %v4700_v1  ;;  %v10729_v1 = vld [vmem:[#allocation21_spill] sm:$0xff] }
0x197c   :  { %3490 = vmatpush2.msra.mxu1 %v4701_v22 }
0x197d   :  { %3491 = vmatprep.subr.mxu1 %v4702_v21  ;;  %v10730_v21 = vld [vmem:[#allocation53_spill] sm:$0xff] }
0x197e   :  { %3492 = vmatpush2.msra.mxu1 %v4703_v2 }
0x197f   :  { %3493 = vmatprep.subr.mxu1 %v4704_v50 }
0x1980   :  { %3494 = vmatpush2.msra.mxu1 %v4705_v17 }
0x1981   :  { %3495 = vmatprep.subr.mxu1 %v4706_v41 }
0x1982   :  { %3496 = vmatpush2.msra.mxu1 %v4707_v11 }
0x1983   :  { %3497 = vmatprep.subr.mxu1 %v4708_v23 }
0x1984   :  { %3498 = vmatpush2.msra.mxu1 %v4709_v58 }
0x1985   :  { %3499 = vmatprep.subr.mxu1 %v4710_v27 }
0x1986   :  { %3500 = vmatpush2.msra.mxu1 %v4711_v42 }
0x1987   :  { %3501 = vmatprep.subr.mxu1 %v4712_v7 }
0x1988   :  { %3502 = vmatpush2.msra.mxu1 %v4713_v32 }
0x1989   :  { %3503 = vmatprep.subr.mxu1 %v4714_v33 }
0x198a   :  { %3504 = vmatpush2.msra.mxu1 %v4715_v18 }
0x198b   :  { %3505 = vmatprep.subr.mxu1 %v4716_v49 }
0x198c   :  { %3506 = vmatpush2.msra.mxu1 %v4717_v35 }
0x198d   :  { %3507 = vmatprep.subr.mxu1 %v4718_v14 }
0x198e   :  { %3508 = vmatpush2.msra.mxu1 %v4719_v48 }
0x198f   :  { %3509 = vmatprep.subr.mxu1 %v10724_v10 }
0x1990   :  { %3510 = vmatpush2.msra.mxu1 %v10725_v15 }
0x1991   :  { %3511 = vmatprep.subr.mxu1 %v10726_v37 }
0x1992   :  { %3512 = vmatpush2.msra.mxu1 %v10727_v16 }
0x1993   :  { %3513 = vmatprep.subr.mxu1 %v10728_v24 }
0x1994   :  { %3514 = vmatpush2.msra.mxu1 %v10729_v1 }
0x1995   :  { %4110 = vmatprep.subr.mxu1 %v10178_v6 }
0x1a14   :  { %v3272_v22 = vpop.f32.mrf.mxu0  ;;  %v3343_v11 = vpop.f32.mrf.mxu1 }
0x1a15   :  { %v3273_v2 = vadd.f32 %v3272_v22, %v10730_v21  ;;  %v3344_v58 = vadd.f32 %v3343_v11, %v6837_v56  ;;  %v4729_v11 = vld [vmem:[%s9464_s2 + $0x370] sm:$0xff] }
0x1a16   :  { %v3274_v50 = vpop.f32.mrf.mxu0  ;;  %v3345_v27 = vpop.f32.mrf.mxu1 }
0x1a17   :  { %v3348_v17 = vmul.f32 0.5, %v3273_v2  ;;  %v3275_v41 = vadd.f32 %v3274_v50, %v6834_v44  ;;  %v3346_v42 = vadd.f32 %v3345_v27, %v6842_v54  ;;  %v4726_v50 = vld [vmem:[%s9464_s2 + $0x398] sm:$0xff] }
0x1a18   :  { %v4732_v27 = vld [vmem:[%s9464_s2 + $0x338] sm:$0xff] }
0x1a19   :  { %4313 = vtanh.f32 %v3348_v17  ;;  %v3352_v23 = vmul.f32 0.5, %v3275_v41  ;;  %v3357_v7 = vmul.f32 0.5, %v3346_v42  ;;  %v4727_v17 = vld [vmem:[%s9464_s2 + $0x390] sm:$0xff]  ;;  %v4728_v41 = vld [vmem:[%s9464_s2 + $0x378] sm:$0xff] }
0x1a1a   :  { %v4733_v42 = vld [vmem:[%s9464_s2 + $0x330] sm:$0xff] }
0x1a1b   :  { %4315 = vtanh.f32 %v3352_v23  ;;  %v4730_v23 = vld [vmem:[%s9464_s2 + $0x358] sm:$0xff] }
0x1a1c   :  { %4317 = vtanh.f32 %v3344_v58  ;;  %v4731_v58 = vld [vmem:[%s9464_s2 + $0x350] sm:$0xff] }
0x1a1d   :  { %4319 = vtanh.f32 %v3357_v7  ;;  %v4734_v7 = vld [vmem:[%s9464_s2 + $0x318] sm:$0xff] }
0x1a26   :  { %v4314_v32 = vpop.eup %4313 }
0x1a27   :  { %v3350_v33 = vadd.f32 1.0, %v4314_v32  ;;  %v4735_v32 = vld [vmem:[%s9464_s2 + $0x310] sm:$0xff] }
0x1a28   :  { %v4316_v18 = vpop.eup %4315 }
0x1a29   :  { %v3351_v49 = vmul.f32 0.5, %v3350_v33  ;;  %v3354_v35 = vadd.f32 1.0, %v4316_v18  ;;  %v4318_v48 = vpop.eup %4317  ;;  %v4736_v33 = vld [vmem:[%s9464_s2 + $0x2f8] sm:$0xff]  ;;  %v4737_v18 = vld [vmem:[%s9464_s2 + $0x2f0] sm:$0xff] }
0x1a2a   :  { %v4320_v16 = vpop.eup %4319 }
0x1a2b   :  { %v3355_v14 = vmul.f32 0.5, %v3354_v35  ;;  %v3362_v15 = vmul.f32 %v4318_v48, %v3351_v49  ;;  %v3359_v24 = vadd.f32 1.0, %v4320_v16  ;;  %v4738_v49 = vld [vmem:[%s9464_s2 + $0x2d8] sm:$0xff]  ;;  %v4739_v35 = vld [vmem:[%s9464_s2 + $0x2d0] sm:$0xff] }
0x1a2c   :  { %v4741_v48 = vld [vmem:[%s9464_s2 + $0x2b0] sm:$0xff]  ;;  %v4744_v16 = vld [vmem:[%s9464_s2 + $0x278] sm:$0xff] }
0x1a2d   :  { %v3361_v10 = vmul.f32 %v3355_v14, %v8961_v38  ;;  %v3360_v1 = vmul.f32 0.5, %v3359_v24  ;;  %v10743_v38 = vld [vmem:[#allocation16_spill] sm:$0xff]  ;;  %v4745_v24 = vld [vmem:[%s9464_s2 + $0x270] sm:$0xff] }
0x1a2e   :  { %v4740_v14 = vld [vmem:[%s9464_s2 + $0x2b8] sm:$0xff] }
0x1a2f   :  { %v9274_v37 = vadd.f32 %v3362_v15, %v3361_v10  ;;  %v4742_v10 = vld [vmem:[%s9464_s2 + $0x298] sm:$0xff]  ;;  %v4743_v15 = vld [vmem:[%s9464_s2 + $0x290] sm:$0xff] }
0x1a31   :  { %4321 = vtanh.f32 %v9274_v37 }
0x1a3e   :  { %v4322_v22 = vpop.eup %4321 }
0x1a3f   :  { %v3365_v2 = vmul.f32 %v4322_v22, %v3360_v1  ;;  %v4746_v1 = vld [vmem:[%s9464_s2 + $0x258] sm:$0xff]  ;;  %v4747_v22 = vld [vmem:[%s9464_s2 + $0x250] sm:$0xff] }
0x1a41   :  { %4108 = vmatmul.mubr.f32.vlgmr.msra.gmra.mxu0 %v3365_v2  ;;  %3515 = vmatprep.mubr.f32.mxu1 %v3365_v2 }
0x1a42   :  { %3586 = vmatprep.mubr.f32.mxu0 %v3365_v2  ;;  %3523 = vmatpush1.msra.mxu0 %v8481_v30  ;;  %v10731_v30 = vld [vmem:[#allocation12_spill] sm:$0xff] }
0x1a43   :  { %3524 = vmatprep.subr.mxu0 %v8487_v19  ;;  %v10732_v19 = vld [vmem:[#allocation80_spill] sm:$0xff] }
0x1a44   :  { %3525 = vmatpush1.msra.mxu0 %v8493_v28  ;;  %v10733_v28 = vld [vmem:[#allocation81_spill] sm:$0xff]  ;;  %v4748_v2 = vld [vmem:[%s9464_s2 + $0x238] sm:$0xff] }
0x1a45   :  { %3526 = vmatprep.subr.mxu0 %v8499_v46  ;;  %v10734_v46 = vld [vmem:[#allocation25_spill] sm:$0xff] }
0x1a46   :  { %3527 = vmatpush1.msra.mxu0 %v8505_v5  ;;  %v10735_v5 = vld [vmem:[#allocation82_spill] sm:$0xff] }
0x1a47   :  { %3528 = vmatprep.subr.mxu0 %v8511_v57  ;;  %v10736_v57 = vld [vmem:[#allocation83_spill] sm:$0xff] }
0x1a48   :  { %3529 = vmatpush1.msra.mxu0 %v8517_v59  ;;  %v10737_v59 = vld [vmem:[#allocation35_spill] sm:$0xff] }
0x1a49   :  { %3530 = vmatprep.subr.mxu0 %v8523_v3  ;;  %v10738_v3 = vld [vmem:[#allocation84_spill] sm:$0xff] }
0x1a4a   :  { %3531 = vmatpush1.msra.mxu0 %v8529_v63  ;;  %v10739_v63 = vld [vmem:[#allocation85_spill] sm:$0xff] }
0x1a4b   :  { %3532 = vmatprep.subr.mxu0 %v8535_v25  ;;  %v10740_v25 = vld [vmem:[#allocation37_spill] sm:$0xff] }
0x1a4c   :  { %3533 = vmatpush1.msra.mxu0 %v8541_v60  ;;  %v10741_v60 = vld [vmem:[#allocation39_spill] sm:$0xff] }
0x1a4d   :  { %3534 = vmatprep.subr.mxu0 %v8547_v12  ;;  %v10742_v12 = vld [vmem:[#allocation41_spill] sm:$0xff] }
0x1a4e   :  { %3535 = vmatpush1.msra.mxu0 %v10670_v45  ;;  %v4720_v45 = vld [vmem:[%s9464_s2 + $0x3f8] sm:$0xff] }
0x1a4f   :  { %3536 = vmatprep.subr.mxu0 %v10671_v52  ;;  %v4721_v52 = vld [vmem:[%s9464_s2 + $0x3f0] sm:$0xff] }
0x1a50   :  { %3537 = vmatpush1.msra.mxu0 %v10672_v55  ;;  %v4722_v55 = vld [vmem:[%s9464_s2 + $0x3d8] sm:$0xff] }
0x1a51   :  { %3538 = vmatprep.subr.mxu0 %v10673_v13  ;;  %v4723_v13 = vld [vmem:[%s9464_s2 + $0x3d0] sm:$0xff] }
0x1a52   :  { %3539 = vmatpush1.msra.mxu0 %v10674_v47  ;;  %v4724_v47 = vld [vmem:[%s9464_s2 + $0x3b8] sm:$0xff] }
0x1a53   :  { %3540 = vmatprep.subr.mxu0 %v10675_v20  ;;  %v4725_v20 = vld [vmem:[%s9464_s2 + $0x3b0] sm:$0xff] }
0x1a54   :  { %3541 = vmatpush1.msra.mxu0 %v10731_v30  ;;  %v4749_v30 = vld [vmem:[%s9464_s2 + $0x230] sm:$0xff] }
0x1a55   :  { %3542 = vmatprep.subr.mxu0 %v10732_v19  ;;  %v4750_v19 = vld [vmem:[%s9464_s2 + $0x218] sm:$0xff] }
0x1a56   :  { %3543 = vmatpush1.msra.mxu0 %v10733_v28  ;;  %v4751_v28 = vld [vmem:[%s9464_s2 + $0x210] sm:$0xff] }
0x1a57   :  { %3544 = vmatprep.subr.mxu0 %v10734_v46 }
0x1a58   :  { %3545 = vmatpush1.msra.mxu0 %v10735_v5  ;;  %v9407_v5 = vld [vmem:[%s9467_s5] ss:$0 sm:$0xff] }
0x1a59   :  { %3546 = vmatprep.subr.mxu0 %v10736_v57 }
0x1a5a   :  { %3547 = vmatpush1.msra.mxu0 %v10737_v59 }
0x1a5b   :  { %3548 = vmatprep.subr.mxu0 %v10738_v3 }
0x1a5c   :  { %3549 = vmatpush1.msra.mxu0 %v10739_v63 }
0x1a5d   :  { %3550 = vmatprep.subr.mxu0 %v10740_v25 }
0x1a5e   :  { %3551 = vmatpush1.msra.mxu0 %v10741_v60 }
0x1a5f   :  { %3552 = vmatprep.subr.mxu0 %v10742_v12 }
0x1a60   :  { %3553 = vmatpush1.msra.mxu0 %v10743_v38 }
0x1a61   :  { %3554 = vmatprep.subr.mxu0 %v4720_v45 }
0x1a62   :  { %3555 = vmatpush2.msra.mxu0 %v4721_v52 }
0x1a63   :  { %3556 = vmatprep.subr.mxu0 %v4722_v55 }
0x1a64   :  { %3557 = vmatpush2.msra.mxu0 %v4723_v13 }
0x1a65   :  { %3558 = vmatprep.subr.mxu0 %v4724_v47 }
0x1a66   :  { %3559 = vmatpush2.msra.mxu0 %v4725_v20 }
0x1a67   :  { %3560 = vmatprep.subr.mxu0 %v4726_v50 }
0x1a68   :  { %3561 = vmatpush2.msra.mxu0 %v4727_v17 }
0x1a69   :  { %3562 = vmatprep.subr.mxu0 %v4728_v41 }
0x1a6a   :  { %3563 = vmatpush2.msra.mxu0 %v4729_v11 }
0x1a6b   :  { %3564 = vmatprep.subr.mxu0 %v4730_v23 }
0x1a6c   :  { %3565 = vmatpush2.msra.mxu0 %v4731_v58 }
0x1a6d   :  { %3566 = vmatprep.subr.mxu0 %v4732_v27 }
0x1a6e   :  { %3567 = vmatpush2.msra.mxu0 %v4733_v42 }
0x1a6f   :  { %3568 = vmatprep.subr.mxu0 %v4734_v7 }
0x1a70   :  { %3569 = vmatpush2.msra.mxu0 %v4735_v32 }
0x1a71   :  { %3570 = vmatprep.subr.mxu0 %v4736_v33 }
0x1a72   :  { %3571 = vmatpush2.msra.mxu0 %v4737_v18 }
0x1a73   :  { %3572 = vmatprep.subr.mxu0 %v4738_v49 }
0x1a74   :  { %3573 = vmatpush2.msra.mxu0 %v4739_v35 }
0x1a75   :  { %3574 = vmatprep.subr.mxu0 %v4740_v14 }
0x1a76   :  { %3575 = vmatpush2.msra.mxu0 %v4741_v48 }
0x1a77   :  { %3576 = vmatprep.subr.mxu0 %v4742_v10 }
0x1a78   :  { %3577 = vmatpush2.msra.mxu0 %v4743_v15 }
0x1a79   :  { %3578 = vmatprep.subr.mxu0 %v4744_v16 }
0x1a7a   :  { %3579 = vmatpush2.msra.mxu0 %v4745_v24 }
0x1a7b   :  { %3580 = vmatprep.subr.mxu0 %v4746_v1 }
0x1a7c   :  { %3581 = vmatpush2.msra.mxu0 %v4747_v22 }
0x1a7d   :  { %3582 = vmatprep.subr.mxu0 %v4748_v2 }
0x1a7e   :  { %3583 = vmatpush2.msra.mxu0 %v4749_v30 }
0x1a7f   :  { %3584 = vmatprep.subr.mxu0 %v4750_v19 }
0x1a80   :  { %3585 = vmatpush2.msra.mxu0 %v4751_v28 }
0x1b01   :  { %v3432_v46 = vpop.f32.mrf.mxu0 }
0x1b02   :  { %v3433_v57 = vadd.f32 %v9407_v5, %v3432_v46 }
0x1b03   :  { %v4109_v59 = vpop.f32.mrf.mxu0 }
0x1b04   :  { %v3436_v3 = vsel %vm1966_vm1, %v3433_v57, -inf }
0x1b05   :  { %3437 = vmax.xlane.f32.xlu0 %v3436_v3 }
0x1b8e   :  { %v3438_v63 = vpop.xlane.xlu0 %3437 }
0x1b8f   :  { %v3439_v25 = vsub.f32 %v3433_v57, %v3438_v63 }
0x1b91   :  { %v3440_v60 = vmul.f32 1.442695, %v3439_v25 }
0x1b93   :  { %4323 = vpow2.f32 %v3440_v60 }
0x1ba0   :  { %v4324_v12 = vpop.eup %4323 }
0x1ba1   :  { %v3442_v38 = vsel %vm1966_vm1, %v4324_v12, 0.0 }
0x1ba2   :  { %3443 = vadd.xlane.f32.xlu1 %v3442_v38 }
0x1c2b   :  { %v3444_v45 = vpop.xlane.xlu1 %3443 }
0x1c2c   :  { %4325 = vlog2.f32 %v3444_v45 }
0x1c39   :  { %v4326_v52 = vpop.eup %4325 }
0x1c3a   :  { %v3446_v55 = vmul.f32 0.6931472, %v4326_v52 }
0x1c3c   :  { %v3447_v13 = vadd.f32 %v3446_v55, %v3438_v63 }
0x1c3e   :  { %v3448_v47 = vsub.f32 %v3433_v57, %v3447_v13 }
0x1c40   :  { %3727 = vst [vmem:[%s9469_s7 + $0xc] sm:$0x3] %v3448_v47  ;;  %3516 = vmatmul.mubr.f32.vlgmr.msra.gmra.mxu1 %v3448_v47  ;;  %3587 = vmatmul.mubr.f32.vlgmr.msra.gmra.mxu0 %v3448_v47 }
0x1c41   :  { %4111 = vmatpush3.msra.mxu1 %v9042_v62  ;;  %4142 = vmatprep.mubr.msk.f32.mxu1 %vm4777_vm0, %v10178_v6 }
0x1c42   :  { %4112 = vmatprep.subr.mxu1 %v10178_v6 }
0x1c43   :  { %4113 = vmatpush3.msra.mxu1 %v9052_v9 }
0x1c44   :  { %4114 = vmatprep.subr.mxu1 %v10178_v6 }
0x1c45   :  { %4115 = vmatpush3.msra.mxu1 %v9061_v0 }
0x1c46   :  { %4116 = vmatprep.subr.mxu1 %v10178_v6 }
0x1c47   :  { %4117 = vmatpush3.msra.mxu1 %v9070_v26 }
0x1c48   :  { %4118 = vmatprep.subr.mxu1 %v10178_v6 }
0x1c49   :  { %4119 = vmatpush3.msra.mxu1 %v9079_v51 }
0x1c4a   :  { %4120 = vmatprep.subr.mxu1 %v10178_v6 }
0x1c4b   :  { %4121 = vmatpush3.msra.mxu1 %v9088_v43 }
0x1c4c   :  { %4122 = vmatprep.subr.mxu1 %v10178_v6 }
0x1c4d   :  { %4123 = vmatpush3.msra.mxu1 %v9097_v40 }
0x1c4e   :  { %4124 = vmatprep.subr.mxu1 %v10178_v6 }
0x1c4f   :  { %4125 = vmatpush3.msra.mxu1 %v9106_v4 }
0x1c50   :  { %4126 = vmatprep.subr.mxu1 %v10178_v6 }
0x1c51   :  { %4127 = vmatpush3.msra.mxu1 %v9115_v39 }
0x1c52   :  { %4128 = vmatprep.subr.mxu1 %v10178_v6 }
0x1c53   :  { %4129 = vmatpush3.msra.mxu1 %v9124_v61 }
0x1c54   :  { %4130 = vmatprep.subr.mxu1 %v10178_v6 }
0x1c55   :  { %4131 = vmatpush3.msra.mxu1 %v9133_v53 }
0x1c56   :  { %4132 = vmatprep.subr.mxu1 %v10178_v6 }
0x1c57   :  { %4133 = vmatpush3.msra.mxu1 %v9142_v31 }
0x1c58   :  { %4134 = vmatprep.subr.mxu1 %v10178_v6 }
0x1c59   :  { %4135 = vmatpush3.msra.mxu1 %v9151_v29 }
0x1c5a   :  { %4136 = vmatprep.subr.mxu1 %v10178_v6 }
0x1c5b   :  { %4137 = vmatpush3.msra.mxu1 %v9160_v8 }
0x1c5c   :  { %4138 = vmatprep.subr.mxu1 %v10178_v6 }
0x1c5d   :  { %4139 = vmatpush3.msra.mxu1 %v9169_v36 }
0x1c5e   :  { %4140 = vmatprep.subr.mxu1 %v10178_v6 }
0x1c5f   :  { %4141 = vmatpush3.msra.mxu1 %v9178_v34 }
0x1d00   :  { %v3517_v62 = vpop.f32.mrf.mxu1  ;;  %v3588_v43 = vpop.f32.mrf.mxu0 }
0x1d01   :  { %v3518_v9 = vadd.f32 %v3517_v62, %v10730_v21  ;;  %v3589_v4 = vadd.f32 %v3588_v43, %v6837_v56 }
0x1d02   :  { %v3519_v0 = vpop.f32.mrf.mxu1  ;;  %v3590_v39 = vpop.f32.mrf.mxu0 }
0x1d03   :  { %v3593_v26 = vmul.f32 0.5, %v3518_v9  ;;  %v3520_v51 = vadd.f32 %v3519_v0, %v6834_v44  ;;  %v3591_v61 = vadd.f32 %v3590_v39, %v6842_v54 }
0x1d05   :  { %4327 = vtanh.f32 %v3593_v26  ;;  %v3597_v40 = vmul.f32 0.5, %v3520_v51  ;;  %v3602_v6 = vmul.f32 0.5, %v3591_v61 }
0x1d07   :  { %4329 = vtanh.f32 %v3597_v40 }
0x1d08   :  { %4331 = vtanh.f32 %v3589_v4 }
0x1d09   :  { %4333 = vtanh.f32 %v3602_v6 }
0x1d12   :  { %v4328_v53 = vpop.eup %4327 }
0x1d13   :  { %v3595_v31 = vadd.f32 1.0, %v4328_v53 }
0x1d14   :  { %v4330_v29 = vpop.eup %4329 }
0x1d15   :  { %v3596_v8 = vmul.f32 0.5, %v3595_v31  ;;  %v3599_v36 = vadd.f32 1.0, %v4330_v29  ;;  %v4332_v21 = vpop.eup %4331 }
0x1d16   :  { %v4334_v56 = vpop.eup %4333 }
0x1d17   :  { %v3600_v34 = vmul.f32 0.5, %v3599_v36  ;;  %v3607_v20 = vmul.f32 %v4332_v21, %v3596_v8  ;;  %v3604_v17 = vadd.f32 1.0, %v4334_v56 }
0x1d19   :  { %v3606_v44 = vmul.f32 %v3600_v34, %v9274_v37  ;;  %v3605_v41 = vmul.f32 0.5, %v3604_v17 }
0x1d1b   :  { %v3608_v50 = vadd.f32 %v3607_v20, %v3606_v44 }
0x1d1d   :  { %4335 = vtanh.f32 %v3608_v50 }
0x1d2a   :  { %v4336_v11 = vpop.eup %4335 }
0x1d2b   :  { %v3610_v23 = vmul.f32 %v4336_v11, %v3605_v41 }
0x1d2d   :  { %4143 = vmatmul.mubr.f32.vlgmr.msra.gmra.mxu1 %v3610_v23 }
0x1ded   :  { %v3677_v54 = vpop.f32.mrf.mxu1 }
0x1dee   :  { %v3678_v58 = vadd.f32 %v9407_v5, %v3677_v54 }
0x1def   :  { %v4144_v27 = vpop.f32.mrf.mxu1 }
0x1df0   :  { %v3681_v42 = vsel %vm1966_vm1, %v3678_v58, -inf }
0x1df1   :  { %3682 = vmax.xlane.f32.xlu0 %v3681_v42 }
0x1e7a   :  { %v3683_v7 = vpop.xlane.xlu0 %3682 }
0x1e7b   :  { %v3684_v32 = vsub.f32 %v3678_v58, %v3683_v7 }
0x1e7d   :  { %v3685_v33 = vmul.f32 1.442695, %v3684_v32 }
0x1e7f   :  { %4337 = vpow2.f32 %v3685_v33 }
0x1e8c   :  { %v4338_v37 = vpop.eup %4337 }
0x1e8d   :  { %v3687_v18 = vsel %vm1966_vm1, %v4338_v37, 0.0 }
0x1e8e   :  { %3688 = vadd.xlane.f32.xlu1 %v3687_v18 }
0x1e8f   :  { %4764 = shalt.err (!%p4761_p4)
}
0x1e90   :  { %3705 = dma.vmem_to_hbm [thread:$0]  %s3703_s24, 32, %s9468_s6, [#allocation3]  }
0x1f17   :  { %v3689_v49 = vpop.xlane.xlu1 %3688 }
0x1f18   :  { %4339 = vlog2.f32 %v3689_v49 }
0x1f25   :  { %v4340_v35 = vpop.eup %4339 }
0x1f26   :  { %v3691_v14 = vmul.f32 0.6931472, %v4340_v35 }
0x1f28   :  { %v3692_v48 = vadd.f32 %v3691_v14, %v3683_v7 }
0x1f2a   :  { %v3693_v10 = vsub.f32 %v3678_v58, %v3692_v48 }
0x1f2c   :  { %3728 = vst [vmem:[%s9469_s7 + $0xe] sm:$0x3] %v3693_v10 }
0x1f2d   :  { %4773 = dma.done.wait [#allocation3], 32  }
0x1f2e   :  { %4774 = vsyncadd [#allocation3], 4294967264 }
0x1f2f   :  { %3713 = vsyncpa [#allocation3], 1 }

</bundles_post_ra>
